<compile_context>
chip_gen: v7x
topology: tpu7x:2x2x1
jax: 0.10.0
libtpu: 0.0.40
codegen_flags: <defaults>
</compile_context>

<pallas_src>
import jax
import jax.numpy as jnp
from jax.experimental import pallas as pl
from jax.experimental.pallas import tpu as pltpu

# ----------------------------- model dims -----------------------------------
EXTRA_FEATURES = 163      # module default
EXTRA_PAD = 256           # 163 zero-padded to a lane multiple
SWIN_FEATURES = 768       # num_last_layer for a SWIN-tiny style backbone
H1 = 1024
H2 = 512
H3 = 256
NUM_OUT = 6
OUT_PAD = 128             # lane-dense output; real logits are [:, :NUM_OUT]
BN_EPS = 1e-5


def _round_up(x, m):
    return (x + m - 1) // m * m


# ------------------------------ Pallas kernel --------------------------------
def _head_kernel(
    res_ref, extra_ref,
    w1_ref, b1_ref,
    wres_ref, wfused_ref, bc1_ref,
    w2_ref, b2_ref,
    w3_ref, b3_ref,
    w4_ref, b4_ref,
    out_ref,
):
    f32 = jnp.float32
    bf16 = jnp.bfloat16

    # ex = relu(fc_extra1(extra))            [dropout1 = identity in eval]
    extra = extra_ref[...].astype(bf16)
    ex = jnp.dot(extra, w1_ref[...], preferred_element_type=f32) + b1_ref[...]
    ex = jnp.maximum(ex, 0.0)

    # fc_combined1(concat(res, fc_extra2(bn1(ex))))  with bn1 + fc_extra2 folded:
    #   x = res @ Wc1_res + ex @ (diag(s1) @ We2 @ Wc1_ex) + bc1'
    res = res_ref[...].astype(bf16)
    x = (jnp.dot(res, wres_ref[...], preferred_element_type=f32)
         + jnp.dot(ex.astype(bf16), wfused_ref[...], preferred_element_type=f32)
         + bc1_ref[...])
    x = jnp.maximum(x, 0.0)                                     # relu (bn2 folded ahead)

    x = jnp.dot(x.astype(bf16), w2_ref[...], preferred_element_type=f32) + b2_ref[...]
    x = jnp.maximum(x, 0.0)                                     # relu (bn3 folded ahead)

    x = jnp.dot(x.astype(bf16), w3_ref[...], preferred_element_type=f32) + b3_ref[...]
    x = jnp.maximum(x, 0.0)                                     # relu (bn4 folded ahead)

    out = jnp.dot(x.astype(bf16), w4_ref[...], preferred_element_type=f32) + b4_ref[...]
    out_ref[...] = out.astype(out_ref.dtype)


def transfer_swin_head(res, extra_padded, pk):
    """Run the fused MLP head; batch tiled over a parallel grid axis."""
    batch = res.shape[0]
    tb = 256 if batch >= 256 else _round_up(batch, 8)     # batch tile (sublane-aligned)
    b_pad = _round_up(batch, tb)
    pad = b_pad - batch
    if pad:
        res = jnp.pad(res, ((0, pad), (0, 0)))
        extra_padded = jnp.pad(extra_padded, ((0, pad), (0, 0)))

    weights = (
        pk["w1"], pk["b1"],
        pk["w_res"], pk["w_fused"], pk["bc1"],
        pk["w2"], pk["b2"],
        pk["w3"], pk["b3"],
        pk["w4"], pk["b4"],
    )

    in_specs = [
        pl.BlockSpec((tb, SWIN_FEATURES), lambda i: (i, 0)),   # res rows
        pl.BlockSpec((tb, EXTRA_PAD), lambda i: (i, 0)),       # extra rows
    ]
    # Weights/biases: full-array blocks, constant index_map -> stay resident.
    in_specs += [pl.BlockSpec(w.shape, lambda i: (0, 0)) for w in weights]
    out_spec = pl.BlockSpec((tb, OUT_PAD), lambda i: (i, 0))

    out = pl.pallas_call(
        _head_kernel,
        out_shape=jax.ShapeDtypeStruct((b_pad, OUT_PAD), jnp.float32),
        grid=(b_pad // tb,),
        in_specs=in_specs,
        out_specs=out_spec,
        compiler_params=pltpu.CompilerParams(
            dimension_semantics=("parallel",),
            vmem_limit_bytes=32 * 1024 * 1024),
    )(res, extra_padded, *weights)
    return out[:batch, :NUM_OUT]


# ----------------------------- parameter setup --------------------------------
def _linear_params(key, fan_in, fan_out):
    kw, kb = jax.random.split(key)
    w = jax.random.normal(kw, (fan_in, fan_out), jnp.float32) * 0.02
    b = jax.random.normal(kb, (1, fan_out), jnp.float32) * 0.02
    return w, b


def _bn_eval_scale_shift(key, feat):
    """Fold eval-mode BatchNorm1d into per-feature (scale, shift)."""
    k1, k2, k3, k4 = jax.random.split(key, 4)
    gamma = 1.0 + 0.1 * jax.random.normal(k1, (1, feat), jnp.float32)
    beta = 0.1 * jax.random.normal(k2, (1, feat), jnp.float32)
    running_mean = 0.1 * jax.random.normal(k3, (1, feat), jnp.float32)
    running_var = 1.0 + 0.1 * jax.random.uniform(k4, (1, feat), jnp.float32)
    scale = gamma / jnp.sqrt(running_var + BN_EPS)
    shift = beta - running_mean * scale
    return scale, shift


def init_params(key):
    """Raw f32 parameters matching the PyTorch module layout (W stored as W.T)."""
    keys = jax.random.split(key, 11)
    p = {}
    p["we1"], p["be1"] = _linear_params(keys[0], EXTRA_FEATURES, H1)
    p["we2"], p["be2"] = _linear_params(keys[1], H1, H1)
    p["wc1"], p["bc1"] = _linear_params(keys[2], SWIN_FEATURES + H1, H1)
    p["wc2"], p["bc2"] = _linear_params(keys[3], H1, H2)
    p["wc3"], p["bc3"] = _linear_params(keys[4], H2, H3)
    p["wc4"], p["bc4"] = _linear_params(keys[5], H3, NUM_OUT)
    p["bn1_scale"], p["bn1_shift"] = _bn_eval_scale_shift(keys[6], H1)
    p["bn2_scale"], p["bn2_shift"] = _bn_eval_scale_shift(keys[7], H1)
    p["bn3_scale"], p["bn3_shift"] = _bn_eval_scale_shift(keys[8], H2)
    p["bn4_scale"], p["bn4_shift"] = _bn_eval_scale_shift(keys[9], H3)
    # frozen backbone stub: GAP over (H, W) then linear C -> SWIN_FEATURES
    p["w_stub"], p["b_stub"] = _linear_params(keys[10], 4, SWIN_FEATURES)
    return p


def pack_head_params(p):
    """One-time host-side packing: fold bn1+fc_extra2 into fc_combined1, fold
    bn2/bn3/bn4 affines into the next layer's weight/bias, pad, cast to bf16."""
    bf16 = jnp.bfloat16
    wc1_res = p["wc1"][:SWIN_FEATURES]          # (768, 1024)
    wc1_ex = p["wc1"][SWIN_FEATURES:]           # (1024, 1024)

    # --- bn1 + fc_extra2 folded into fc_combined1's ex branch (exact) --------
    we2_scaled = p["we2"] * p["bn1_scale"].reshape(H1, 1)        # diag(s1) @ We2
    w_fused = we2_scaled @ wc1_ex                                # (1024, 1024)
    bc1_fused = (p["bc1"]
                 + (p["bn1_shift"] @ p["we2"] + p["be2"]) @ wc1_ex)

    # --- bn2 folded into fc_combined2 (exact) --------------------------------
    w2 = p["wc2"] * p["bn2_scale"].reshape(H1, 1)
    b2 = p["bc2"] + p["bn2_shift"] @ p["wc2"]

    # --- bn3 folded into fc_combined3 (exact) --------------------------------
    w3 = p["wc3"] * p["bn3_scale"].reshape(H2, 1)
    b3 = p["bc3"] + p["bn3_shift"] @ p["wc3"]

    # --- bn4 folded into fc_combined4 (exact) --------------------------------
    w4 = p["wc4"] * p["bn4_scale"].reshape(H3, 1)
    b4 = p["bc4"] + p["bn4_shift"] @ p["wc4"]

    # --- padding to lane-friendly shapes --------------------------------------
    w1 = jnp.pad(p["we1"], ((0, EXTRA_PAD - EXTRA_FEATURES), (0, 0)))
    w4 = jnp.pad(w4, ((0, 0), (0, OUT_PAD - NUM_OUT)))
    b4 = jnp.pad(b4, ((0, 0), (0, OUT_PAD - NUM_OUT)))

    return {
        "w1": w1.astype(bf16), "b1": p["be1"],
        "w_res": wc1_res.astype(bf16), "w_fused": w_fused.astype(bf16),
        "bc1": bc1_fused,
        "w2": w2.astype(bf16), "b2": b2,
        "w3": w3.astype(bf16), "b3": b3,
        "w4": w4.astype(bf16), "b4": b4,
    }


def base_model_stub(img_nchw, params):
    # TODO(synk): the real SWIN transformer backbone is not reimplemented here;
    # it is approximated by a frozen global-average-pool + linear feature stub.
    feats = jnp.mean(img_nchw, axis=(2, 3))                    # (B, C)
    return feats @ params["w_stub"] + params["b_stub"]         # (B, 768)


@jax.jit
def forward(img, extra, params, packed):
    res = base_model_stub(img, params)                                   # (B, 768)
    extra_p = jnp.pad(extra, ((0, 0), (0, EXTRA_PAD - EXTRA_FEATURES)))  # (B, 256)
    return transfer_swin_head(res, extra_p, packed)                      # (B, 6)


# ----------------------------- references (pure JAX) --------------------------
def forward_ref_packed(img, extra, p, pk):
    """Exact mirror of the kernel math (folded weights, bf16 matmul inputs)."""
    f32, bf16 = jnp.float32, jnp.bfloat16

    def mm(a, w):
        return jnp.dot(a.astype(bf16), w, preferred_element_type=f32)

    res = base_model_stub(img, p)
    extra_p = jnp.pad(extra, ((0, 0), (0, EXTRA_PAD - EXTRA_FEATURES)))
    ex = jnp.maximum(mm(extra_p, pk["w1"]) + pk["b1"], 0.0)
    x = jnp.maximum(mm(res, pk["w_res"]) + mm(ex, pk["w_fused"]) + pk["bc1"], 0.0)
    x = jnp.maximum(mm(x, pk["w2"]) + pk["b2"], 0.0)
    x = jnp.maximum(mm(x, pk["w3"]) + pk["b3"], 0.0)
    return (mm(x, pk["w4"]) + pk["b4"])[:, :NUM_OUT]


def forward_ref_f32(img, extra, p):
    """Original (unfused) eval-mode module semantics, full f32."""
    res = base_model_stub(img, p)
    ex = jnp.maximum(extra @ p["we1"] + p["be1"], 0.0)
    ex = ex * p["bn1_scale"] + p["bn1_shift"]
    ex = ex @ p["we2"] + p["be2"]
    newx = jnp.concatenate([res, ex], axis=1)
    x = jnp.maximum(newx @ p["wc1"] + p["bc1"], 0.0) * p["bn2_scale"] + p["bn2_shift"]
    x = jnp.maximum(x @ p["wc2"] + p["bc2"], 0.0) * p["bn3_scale"] + p["bn3_shift"]
    x = jnp.maximum(x @ p["wc3"] + p["bc3"], 0.0) * p["bn4_scale"] + p["bn4_shift"]
    return x @ p["wc4"] + p["bc4"]


# ------------------------------------ main ------------------------------------
if __name__ == "__main__":
    key = jax.random.PRNGKey(0)
    k_img, k_extra, k_params = jax.random.split(key, 3)

    batch = 2
    img = jax.random.normal(k_img, (batch, 4, 16, 16), jnp.float32)       # NCHW
    extra = jax.random.normal(k_extra, (batch, EXTRA_FEATURES), jnp.float32)
    params = init_params(k_params)
    packed = pack_head_params(params)   # one-time host-side fold/pad/bf16-cast

    out = forward(img, extra, params, packed)
    out = jax.block_until_ready(out)
    assert out.shape == (batch, NUM_OUT), out.shape

    # Strict check against an exact mirror of the kernel math.
    ref_bf16 = forward_ref_packed(img, extra, params, packed)
    err_bf16 = float(jnp.max(jnp.abs(out - ref_bf16)))
    assert jnp.allclose(out, ref_bf16, atol=3e-3, rtol=3e-3), err_bf16

    # Loose check against the original unfused f32 semantics (bf16 weight quant).
    ref_f32 = forward_ref_f32(img, extra, params)
    err_f32 = float(jnp.max(jnp.abs(out - ref_f32)))
    assert jnp.allclose(out, ref_f32, atol=5e-2, rtol=5e-2), err_f32

    print("KERNEL_OK")
</pallas_src>

<mosaic_0001>
module attributes {stable_mosaic.version = 11 : i64} {
  func.func @_head_kernel(%arg0: i32, %arg1: memref<8x768xf32, #tpu.memory_space<vmem>>, %arg2: memref<8x256xf32, #tpu.memory_space<vmem>>, %arg3: memref<256x1024xbf16, #tpu.memory_space<vmem>>, %arg4: memref<1x1024xf32, #tpu.memory_space<vmem>>, %arg5: memref<768x1024xbf16, #tpu.memory_space<vmem>>, %arg6: memref<1024x1024xbf16, #tpu.memory_space<vmem>>, %arg7: memref<1x1024xf32, #tpu.memory_space<vmem>>, %arg8: memref<1024x512xbf16, #tpu.memory_space<vmem>>, %arg9: memref<1x512xf32, #tpu.memory_space<vmem>>, %arg10: memref<512x256xbf16, #tpu.memory_space<vmem>>, %arg11: memref<1x256xf32, #tpu.memory_space<vmem>>, %arg12: memref<256x128xbf16, #tpu.memory_space<vmem>>, %arg13: memref<1x128xf32, #tpu.memory_space<vmem>>, %arg14: memref<8x128xf32, #tpu.memory_space<vmem>>) attributes {dimension_semantics = [#tpu.dimension_semantics<parallel>], iteration_bounds = array<i64: 1>, scalar_prefetch = 0 : i64, scratch_operands = 0 : i64, tpu.core_type = #tpu.core_type<tc>, window_params = [{transform_indices = @transform_0, window_bounds = array<i64: 8, 768>}, {transform_indices = @transform_1, window_bounds = array<i64: 8, 256>}, {pipeline_mode = #tpu.pipeline_mode<synchronous>, transform_indices = @transform_2, window_bounds = array<i64: 256, 1024>}, {pipeline_mode = #tpu.pipeline_mode<synchronous>, transform_indices = @transform_3, window_bounds = array<i64: 1, 1024>}, {pipeline_mode = #tpu.pipeline_mode<synchronous>, transform_indices = @transform_4, window_bounds = array<i64: 768, 1024>}, {pipeline_mode = #tpu.pipeline_mode<synchronous>, transform_indices = @transform_5, window_bounds = array<i64: 1024, 1024>}, {pipeline_mode = #tpu.pipeline_mode<synchronous>, transform_indices = @transform_6, window_bounds = array<i64: 1, 1024>}, {pipeline_mode = #tpu.pipeline_mode<synchronous>, transform_indices = @transform_7, window_bounds = array<i64: 1024, 512>}, {pipeline_mode = #tpu.pipeline_mode<synchronous>, transform_indices = @transform_8, window_bounds = array<i64: 1, 512>}, {pipeline_mode = #tpu.pipeline_mode<synchronous>, transform_indices = @transform_9, window_bounds = array<i64: 512, 256>}, {pipeline_mode = #tpu.pipeline_mode<synchronous>, transform_indices = @transform_10, window_bounds = array<i64: 1, 256>}, {pipeline_mode = #tpu.pipeline_mode<synchronous>, transform_indices = @transform_11, window_bounds = array<i64: 256, 128>}, {pipeline_mode = #tpu.pipeline_mode<synchronous>, transform_indices = @transform_12, window_bounds = array<i64: 1, 128>}, {transform_indices = @transform_13, window_bounds = array<i64: 8, 128>}]} {
    %c0 = arith.constant 0 : index
    %c0_0 = arith.constant 0 : index
    %0 = vector.load %arg2[%c0, %c0_0] : memref<8x256xf32, #tpu.memory_space<vmem>>, vector<8x256xf32>
    %1 = arith.truncf %0 : vector<8x256xf32> to vector<8x256xbf16>
    %c0_1 = arith.constant 0 : index
    %c0_2 = arith.constant 0 : index
    %2 = vector.load %arg3[%c0_1, %c0_2] : memref<256x1024xbf16, #tpu.memory_space<vmem>>, vector<256x1024xbf16>
    %cst = arith.constant dense<0.000000e+00> : vector<8x1024xf32>
    %3 = tpu.matmul %1, %2, %cst {dimension_numbers = #tpu.dot_dimension_numbers<[1], [0], [0], [1], [0, 0, 1, 1], [], []>} : vector<8x256xbf16>, vector<256x1024xbf16>, vector<8x1024xf32> -> vector<8x1024xf32>
    %c0_3 = arith.constant 0 : index
    %c0_4 = arith.constant 0 : index
    %4 = vector.load %arg4[%c0_3, %c0_4] : memref<1x1024xf32, #tpu.memory_space<vmem>>, vector<1x1024xf32>
    %5 = vector.broadcast %4 : vector<1x1024xf32> to vector<8x1024xf32>
    %6 = arith.addf %3, %5 : vector<8x1024xf32>
    %cst_5 = arith.constant 0.000000e+00 : f32
    %7 = vector.broadcast %cst_5 : f32 to vector<8x1024xf32>
    %8 = arith.maximumf %6, %7 : vector<8x1024xf32>
    %c0_6 = arith.constant 0 : index
    %c0_7 = arith.constant 0 : index
    %9 = vector.load %arg1[%c0_6, %c0_7] : memref<8x768xf32, #tpu.memory_space<vmem>>, vector<8x768xf32>
    %10 = arith.truncf %9 : vector<8x768xf32> to vector<8x768xbf16>
    %c0_8 = arith.constant 0 : index
    %c0_9 = arith.constant 0 : index
    %11 = vector.load %arg5[%c0_8, %c0_9] : memref<768x1024xbf16, #tpu.memory_space<vmem>>, vector<768x1024xbf16>
    %cst_10 = arith.constant dense<0.000000e+00> : vector<8x1024xf32>
    %12 = tpu.matmul %10, %11, %cst_10 {dimension_numbers = #tpu.dot_dimension_numbers<[1], [0], [0], [1], [0, 0, 1, 1], [], []>} : vector<8x768xbf16>, vector<768x1024xbf16>, vector<8x1024xf32> -> vector<8x1024xf32>
    %13 = arith.truncf %8 : vector<8x1024xf32> to vector<8x1024xbf16>
    %c0_11 = arith.constant 0 : index
    %c0_12 = arith.constant 0 : index
    %14 = vector.load %arg6[%c0_11, %c0_12] : memref<1024x1024xbf16, #tpu.memory_space<vmem>>, vector<1024x1024xbf16>
    %cst_13 = arith.constant dense<0.000000e+00> : vector<8x1024xf32>
    %15 = tpu.matmul %13, %14, %cst_13 {dimension_numbers = #tpu.dot_dimension_numbers<[1], [0], [0], [1], [0, 0, 1, 1], [], []>} : vector<8x1024xbf16>, vector<1024x1024xbf16>, vector<8x1024xf32> -> vector<8x1024xf32>
    %16 = arith.addf %12, %15 : vector<8x1024xf32>
    %c0_14 = arith.constant 0 : index
    %c0_15 = arith.constant 0 : index
    %17 = vector.load %arg7[%c0_14, %c0_15] : memref<1x1024xf32, #tpu.memory_space<vmem>>, vector<1x1024xf32>
    %18 = vector.broadcast %17 : vector<1x1024xf32> to vector<8x1024xf32>
    %19 = arith.addf %16, %18 : vector<8x1024xf32>
    %cst_16 = arith.constant 0.000000e+00 : f32
    %20 = vector.broadcast %cst_16 : f32 to vector<8x1024xf32>
    %21 = arith.maximumf %19, %20 : vector<8x1024xf32>
    %22 = arith.truncf %21 : vector<8x1024xf32> to vector<8x1024xbf16>
    %c0_17 = arith.constant 0 : index
    %c0_18 = arith.constant 0 : index
    %23 = vector.load %arg8[%c0_17, %c0_18] : memref<1024x512xbf16, #tpu.memory_space<vmem>>, vector<1024x512xbf16>
    %cst_19 = arith.constant dense<0.000000e+00> : vector<8x512xf32>
    %24 = tpu.matmul %22, %23, %cst_19 {dimension_numbers = #tpu.dot_dimension_numbers<[1], [0], [0], [1], [0, 0, 1, 1], [], []>} : vector<8x1024xbf16>, vector<1024x512xbf16>, vector<8x512xf32> -> vector<8x512xf32>
    %c0_20 = arith.constant 0 : index
    %c0_21 = arith.constant 0 : index
    %25 = vector.load %arg9[%c0_20, %c0_21] : memref<1x512xf32, #tpu.memory_space<vmem>>, vector<1x512xf32>
    %26 = vector.broadcast %25 : vector<1x512xf32> to vector<8x512xf32>
    %27 = arith.addf %24, %26 : vector<8x512xf32>
    %cst_22 = arith.constant 0.000000e+00 : f32
    %28 = vector.broadcast %cst_22 : f32 to vector<8x512xf32>
    %29 = arith.maximumf %27, %28 : vector<8x512xf32>
    %30 = arith.truncf %29 : vector<8x512xf32> to vector<8x512xbf16>
    %c0_23 = arith.constant 0 : index
    %c0_24 = arith.constant 0 : index
    %31 = vector.load %arg10[%c0_23, %c0_24] : memref<512x256xbf16, #tpu.memory_space<vmem>>, vector<512x256xbf16>
    %cst_25 = arith.constant dense<0.000000e+00> : vector<8x256xf32>
    %32 = tpu.matmul %30, %31, %cst_25 {dimension_numbers = #tpu.dot_dimension_numbers<[1], [0], [0], [1], [0, 0, 1, 1], [], []>} : vector<8x512xbf16>, vector<512x256xbf16>, vector<8x256xf32> -> vector<8x256xf32>
    %c0_26 = arith.constant 0 : index
    %c0_27 = arith.constant 0 : index
    %33 = vector.load %arg11[%c0_26, %c0_27] : memref<1x256xf32, #tpu.memory_space<vmem>>, vector<1x256xf32>
    %34 = vector.broadcast %33 : vector<1x256xf32> to vector<8x256xf32>
    %35 = arith.addf %32, %34 : vector<8x256xf32>
    %cst_28 = arith.constant 0.000000e+00 : f32
    %36 = vector.broadcast %cst_28 : f32 to vector<8x256xf32>
    %37 = arith.maximumf %35, %36 : vector<8x256xf32>
    %38 = arith.truncf %37 : vector<8x256xf32> to vector<8x256xbf16>
    %c0_29 = arith.constant 0 : index
    %c0_30 = arith.constant 0 : index
    %39 = vector.load %arg12[%c0_29, %c0_30] : memref<256x128xbf16, #tpu.memory_space<vmem>>, vector<256x128xbf16>
    %cst_31 = arith.constant dense<0.000000e+00> : vector<8x128xf32>
    %40 = tpu.matmul %38, %39, %cst_31 {dimension_numbers = #tpu.dot_dimension_numbers<[1], [0], [0], [1], [0, 0, 1, 1], [], []>} : vector<8x256xbf16>, vector<256x128xbf16>, vector<8x128xf32> -> vector<8x128xf32>
    %c0_32 = arith.constant 0 : index
    %c0_33 = arith.constant 0 : index
    %41 = vector.load %arg13[%c0_32, %c0_33] : memref<1x128xf32, #tpu.memory_space<vmem>>, vector<1x128xf32>
    %42 = vector.broadcast %41 : vector<1x128xf32> to vector<8x128xf32>
    %43 = arith.addf %40, %42 : vector<8x128xf32>
    %c0_34 = arith.constant 0 : index
    %c0_35 = arith.constant 0 : index
    %44 = vector.load %arg14[%c0_34, %c0_35] : memref<8x128xf32, #tpu.memory_space<vmem>>, vector<8x128xf32>
    tpu.vector_store %arg14[%c0_34, %c0_35], %43 {strides = array<i32>} : memref<8x128xf32, #tpu.memory_space<vmem>>, vector<8x128xf32>,
    return
  }
  func.func @transform_0(%arg0: i32) -> (i32, i32) {
    %c0_i32 = arith.constant 0 : i32
    %c0_i32_0 = arith.constant 0 : i32
    return %arg0, %c0_i32 : i32, i32
  }
  func.func @transform_1(%arg0: i32) -> (i32, i32) {
    %c0_i32 = arith.constant 0 : i32
    %c0_i32_0 = arith.constant 0 : i32
    return %arg0, %c0_i32 : i32, i32
  }
  func.func @transform_2(%arg0: i32) -> (i32, i32) {
    %c0_i32 = arith.constant 0 : i32
    %c0_i32_0 = arith.constant 0 : i32
    %c0_i32_1 = arith.constant 0 : i32
    return %c0_i32, %c0_i32_0 : i32, i32
  }
  func.func @transform_3(%arg0: i32) -> (i32, i32) {
    %c0_i32 = arith.constant 0 : i32
    %c0_i32_0 = arith.constant 0 : i32
    %c0_i32_1 = arith.constant 0 : i32
    return %c0_i32, %c0_i32_0 : i32, i32
  }
  func.func @transform_4(%arg0: i32) -> (i32, i32) {
    %c0_i32 = arith.constant 0 : i32
    %c0_i32_0 = arith.constant 0 : i32
    %c0_i32_1 = arith.constant 0 : i32
    return %c0_i32, %c0_i32_0 : i32, i32
  }
  func.func @transform_5(%arg0: i32) -> (i32, i32) {
    %c0_i32 = arith.constant 0 : i32
    %c0_i32_0 = arith.constant 0 : i32
    %c0_i32_1 = arith.constant 0 : i32
    return %c0_i32, %c0_i32_0 : i32, i32
  }
  func.func @transform_6(%arg0: i32) -> (i32, i32) {
    %c0_i32 = arith.constant 0 : i32
    %c0_i32_0 = arith.constant 0 : i32
    %c0_i32_1 = arith.constant 0 : i32
    return %c0_i32, %c0_i32_0 : i32, i32
  }
  func.func @transform_7(%arg0: i32) -> (i32, i32) {
    %c0_i32 = arith.constant 0 : i32
    %c0_i32_0 = arith.constant 0 : i32
    %c0_i32_1 = arith.constant 0 : i32
    return %c0_i32, %c0_i32_0 : i32, i32
  }
  func.func @transform_8(%arg0: i32) -> (i32, i32) {
    %c0_i32 = arith.constant 0 : i32
    %c0_i32_0 = arith.constant 0 : i32
    %c0_i32_1 = arith.constant 0 : i32
    return %c0_i32, %c0_i32_0 : i32, i32
  }
  func.func @transform_9(%arg0: i32) -> (i32, i32) {
    %c0_i32 = arith.constant 0 : i32
    %c0_i32_0 = arith.constant 0 : i32
    %c0_i32_1 = arith.constant 0 : i32
    return %c0_i32, %c0_i32_0 : i32, i32
  }
  func.func @transform_10(%arg0: i32) -> (i32, i32) {
    %c0_i32 = arith.constant 0 : i32
    %c0_i32_0 = arith.constant 0 : i32
    %c0_i32_1 = arith.constant 0 : i32
    return %c0_i32, %c0_i32_0 : i32, i32
  }
  func.func @transform_11(%arg0: i32) -> (i32, i32) {
    %c0_i32 = arith.constant 0 : i32
    %c0_i32_0 = arith.constant 0 : i32
    %c0_i32_1 = arith.constant 0 : i32
    return %c0_i32, %c0_i32_0 : i32, i32
  }
  func.func @transform_12(%arg0: i32) -> (i32, i32) {
    %c0_i32 = arith.constant 0 : i32
    %c0_i32_0 = arith.constant 0 : i32
    %c0_i32_1 = arith.constant 0 : i32
    return %c0_i32, %c0_i32_0 : i32, i32
  }
  func.func @transform_13(%arg0: i32) -> (i32, i32) {
    %c0_i32 = arith.constant 0 : i32
    %c0_i32_0 = arith.constant 0 : i32
    return %arg0, %c0_i32 : i32, i32
  }
}

</mosaic_0001>

<bundles_post_ra>
// kernel: forward.1
= control target key start
LH: loop header
LB: loop body
LE: loop exit
PB: predicated region body
PF: predicated region fallthrough
CT: control target
= control target key end

     0   :  { %18 = vsyncpa [#allocation3], 0  ;;  %s13115_s0 = inlined_call_operand.vmem [shape: f32[8,768], index: 0, kind: input, shape index: {}]   ;;  %s13116_s1 = inlined_call_operand.vmem [shape: f32[8,256], index: 1, kind: input, shape index: {}]   ;;  %s13117_s2 = inlined_call_operand.hbm [shape: bf16[256,1024], index: 2, kind: input, shape index: {}]   ;;  %s13118_s3 = inlined_call_operand.hbm [shape: f32[1,1024], index: 3, kind: input, shape index: {}]   ;;  %s13119_s4 = inlined_call_operand.hbm [shape: bf16[768,1024], index: 4, kind: input, shape index: {}]   ;;  %s13120_s5 = inlined_call_operand.hbm [shape: bf16[1024,1024], index: 5, kind: input, shape index: {}]   ;;  %s13121_s6 = inlined_call_operand.hbm [shape: f32[1,1024], index: 6, kind: input, shape index: {}]   ;;  %s13122_s7 = inlined_call_operand.hbm [shape: bf16[1024,512], index: 7, kind: input, shape index: {}]   ;;  %s13123_s8 = inlined_call_operand.hbm [shape: f32[1,512], index: 8, kind: input, shape index: {}]   ;;  %s13124_s9 = inlined_call_operand.hbm [shape: bf16[512,256], index: 9, kind: input, shape index: {}]   ;;  %s13125_s10 = inlined_call_operand.hbm [shape: f32[1,256], index: 10, kind: input, shape index: {}]   ;;  %s13126_s11 = inlined_call_operand.hbm [shape: bf16[256,128], index: 11, kind: input, shape index: {}]   ;;  %s13127_s12 = inlined_call_operand.hbm [shape: f32[1,128], index: 12, kind: input, shape index: {}]   ;;  %s13128_s13 = inlined_call_operand.vmem [shape: f32[8,128], index: 13, kind: output, shape index: {}]  }
   0x1   :  { %19 = vsyncpa [#allocation5], 0 }
   0x2   :  { %20 = vsyncpa [#allocation8], 0 }
   0x3   :  { %21 = vsyncpa [#allocation11], 0 }
   0x4   :  { %22 = vsyncpa [#allocation14], 0 }
   0x5   :  { %23 = vsyncpa [#allocation17], 0  ;;  %s12529_s25 = smov [#allocation4]   ;;  %s12275_s29 = scalar_lea.hbm %s13118_s3, 128 }
   0x6   :  { %s46_s26 = sshll.u32 %s12529_s25, 4  ;;  %p12276_p0 = scmp.ne.s32.totalorder %s13118_s3, %s12275_s29  ;;  %s47_s26 = int_to_ptr.vmem [resolvable:$true] %s46_s26 }
   0x7   :  { %p12279_p1 = scmp.lt.u32.totalorder %s12275_s29, %s13118_s3 }
   0x9   :  { %p12281_p2 = pnand %p12279_p1, %p12276_p0 }
   0xb   :  { %12284 = shalt.err (!%p12281_p2)
}
   0xc   :  { %s12285_s17 = scalar_lea.vmem %s47_s26, 128  ;;  %p12290_p4 = scmp.lt.s32.totalorder %s47_s26, %s47_s26 }
   0xd   :  { %p12286_p3 = scmp.ne.s32.totalorder %s47_s26, %s12285_s17  ;;  %p12291_p5 = scmp.lt.s32.totalorder %s12285_s17, %s12285_s17 }
   0xf   :  { %p12292_p6 = por %p12291_p5, %p12290_p4 }
  0x11   :  { %p12293_p7 = pnand %p12292_p6, %p12286_p3 }
  0x13   :  { %12296 = shalt.err (!%p12293_p7)
}
  0x14   :  { %49 = dma.hbm_to_vmem [thread:$0]  %s13118_s3, 128, %s47_s26, [#allocation5]  }
  0x15   :  { %s12530_s20 = smov [#allocation7]   ;;  %s12531_s22 = smov [#allocation10]  }
  0x16   :  { %s67_s21 = sshll.u32 %s12530_s20, 4  ;;  %s89_s23 = sshll.u32 %s12531_s22, 4  ;;  %s68_s21 = int_to_ptr.vmem [resolvable:$true] %s67_s21  ;;  %s90_s23 = int_to_ptr.vmem [resolvable:$true] %s89_s23 }
  0x17   :  { %s12297_s27 = scalar_lea.hbm %s13120_s5, 65536 }
  0x18   :  { %p12298_p8 = scmp.ne.s32.totalorder %s13120_s5, %s12297_s27  ;;  %p12301_p9 = scmp.lt.u32.totalorder %s12297_s27, %s13120_s5 }
  0x1a   :  { %p12303_p10 = pnand %p12301_p9, %p12298_p8 }
  0x1c   :  { %12306 = shalt.err (!%p12303_p10)
}
  0x1d   :  { %s12307_s3 = scalar_lea.vmem %s68_s21, 65536  ;;  %p12312_p12 = scmp.lt.s32.totalorder %s68_s21, %s68_s21 }
  0x1e   :  { %p12308_p11 = scmp.ne.s32.totalorder %s68_s21, %s12307_s3  ;;  %p12313_p13 = scmp.lt.s32.totalorder %s12307_s3, %s12307_s3 }
  0x20   :  { %p12314_p0 = por %p12313_p13, %p12312_p12 }
  0x22   :  { %p12315_p1 = pnand %p12314_p0, %p12308_p11 }
  0x24   :  { %12318 = shalt.err (!%p12315_p1)
}
  0x25   :  { %s12532_s26 = smov 512   ;;  %s12533_s15 = smov 32  }
  0x26   :  { %73 = dma.hbm_to_vmem [thread:$0]  %s13120_s5, 65536, %s68_s21, [#allocation8], %s12532_s26, %s12532_s26, %s12533_s15  }
  0x27   :  { %s12319_s20 = scalar_lea.hbm %s13122_s7, 32768 }
  0x28   :  { %p12320_p2 = scmp.ne.s32.totalorder %s13122_s7, %s12319_s20  ;;  %p12323_p3 = scmp.lt.u32.totalorder %s12319_s20, %s13122_s7 }
  0x2a   :  { %p12325_p4 = pnand %p12323_p3, %p12320_p2 }
  0x2c   :  { %12328 = shalt.err (!%p12325_p4)
}
  0x2d   :  { %s12329_s28 = scalar_lea.vmem %s90_s23, 32768  ;;  %p12334_p6 = scmp.lt.s32.totalorder %s90_s23, %s90_s23 }
  0x2e   :  { %p12330_p5 = scmp.ne.s32.totalorder %s90_s23, %s12329_s28  ;;  %p12335_p7 = scmp.lt.s32.totalorder %s12329_s28, %s12329_s28 }
  0x30   :  { %p12336_p8 = por %p12335_p7, %p12334_p6 }
  0x32   :  { %p12337_p9 = pnand %p12336_p8, %p12330_p5 }
  0x34   :  { %12340 = shalt.err (!%p12337_p9)
}
  0x35   :  { %s12534_s5 = smov 256   ;;  %s12535_s21 = smov 16  }
  0x36   :  { %95 = dma.hbm_to_vmem [thread:$0]  %s13122_s7, 32768, %s90_s23, [#allocation11], %s12534_s5, %s12534_s5, %s12535_s21  }
  0x37   :  { %s12536_s14 = smov [#allocation13]   ;;  %s12341_s18 = scalar_lea.hbm %s13124_s9, 8192 }
  0x38   :  { %s111_s3 = sshll.u32 %s12536_s14, 4  ;;  %p12342_p10 = scmp.ne.s32.totalorder %s13124_s9, %s12341_s18  ;;  %s112_s3 = int_to_ptr.vmem [resolvable:$true] %s111_s3 }
  0x39   :  { %p12345_p11 = scmp.lt.u32.totalorder %s12341_s18, %s13124_s9 }
  0x3b   :  { %p12347_p12 = pnand %p12345_p11, %p12342_p10 }
  0x3d   :  { %12350 = shalt.err (!%p12347_p12)
}
  0x3e   :  { %s12351_s25 = scalar_lea.vmem %s112_s3, 8192  ;;  %p12356_p0 = scmp.lt.s32.totalorder %s112_s3, %s112_s3 }
  0x3f   :  { %p12352_p13 = scmp.ne.s32.totalorder %s112_s3, %s12351_s25  ;;  %p12357_p1 = scmp.lt.s32.totalorder %s12351_s25, %s12351_s25 }
  0x41   :  { %p12358_p2 = por %p12357_p1, %p12356_p0 }
  0x43   :  { %p12359_p3 = pnand %p12358_p2, %p12352_p13 }
  0x45   :  { %12362 = shalt.err (!%p12359_p3)
}
  0x46   :  { %s12537_s7 = smov 128   ;;  %s12538_s23 = smov 8  }
  0x47   :  { %117 = dma.hbm_to_vmem [thread:$0]  %s13124_s9, 8192, %s112_s3, [#allocation14], %s12537_s7, %s12537_s7, %s12538_s23  }
  0x48   :  { %s12539_s5 = smov [#allocation16]   ;;  %s12363_s14 = scalar_lea.hbm %s13126_s11, 2048 }
  0x49   :  { %s133_s21 = sshll.u32 %s12539_s5, 4  ;;  %p12364_p4 = scmp.ne.s32.totalorder %s13126_s11, %s12363_s14  ;;  %s134_s21 = int_to_ptr.vmem [resolvable:$true] %s133_s21 }
  0x4a   :  { %p12367_p5 = scmp.lt.u32.totalorder %s12363_s14, %s13126_s11 }
  0x4c   :  { %p12369_p6 = pnand %p12367_p5, %p12364_p4 }
  0x4e   :  { %12372 = shalt.err (!%p12369_p6)
}
  0x4f   :  { %s12373_s20 = scalar_lea.vmem %s134_s21, 2048  ;;  %p12378_p8 = scmp.lt.s32.totalorder %s134_s21, %s134_s21 }
  0x50   :  { %p12374_p7 = scmp.ne.s32.totalorder %s134_s21, %s12373_s20  ;;  %p12379_p9 = scmp.lt.s32.totalorder %s12373_s20, %s12373_s20 }
  0x52   :  { %p12380_p10 = por %p12379_p9, %p12378_p8 }
  0x54   :  { %p12381_p11 = pnand %p12380_p10, %p12374_p7 }
  0x56   :  { %12384 = shalt.err (!%p12381_p11)
}
  0x57   :  { %s12540_s9 = smov 64   ;;  %s12541_s3 = smov 4  }
  0x58   :  { %139 = dma.hbm_to_vmem [thread:$0]  %s13126_s11, 2048, %s134_s21, [#allocation17], %s12540_s9, %s12540_s9, %s12541_s3  }
  0x59   :  { %s12542_s25 = smov [#allocation2]   ;;  %s12543_s23 = smov [#allocation6]  }
  0x5a   :  { %s33_s7 = sshll.u32 %s12542_s25, 4  ;;  %s55_s27 = sshll.u32 %s12543_s23, 4  ;;  %s34_s7 = int_to_ptr.vmem [resolvable:$true] %s33_s7  ;;  %s56_s27 = int_to_ptr.vmem [resolvable:$true] %s55_s27 }
  0x5b   :  { %s12385_s29 = scalar_lea.hbm %s13117_s2, 16384 }
  0x5c   :  { %p12386_p12 = scmp.ne.s32.totalorder %s13117_s2, %s12385_s29  ;;  %p12389_p13 = scmp.lt.u32.totalorder %s12385_s29, %s13117_s2 }
  0x5e   :  { %p12391_p0 = pnand %p12389_p13, %p12386_p12 }
  0x60   :  { %12394 = shalt.err (!%p12391_p0)
}
  0x61   :  { %s12395_s11 = scalar_lea.vmem %s34_s7, 16384  ;;  %p12400_p2 = scmp.lt.s32.totalorder %s34_s7, %s34_s7 }
  0x62   :  { %p12396_p1 = scmp.ne.s32.totalorder %s34_s7, %s12395_s11  ;;  %p12401_p3 = scmp.lt.s32.totalorder %s12395_s11, %s12395_s11 }
  0x64   :  { %p12402_p4 = por %p12401_p3, %p12400_p2 }
  0x66   :  { %p12403_p5 = pnand %p12402_p4, %p12396_p1 }
  0x68   :  { %12406 = shalt.err (!%p12403_p5)
}
  0x69   :  { %39 = dma.hbm_to_vmem [thread:$0]  %s13117_s2, 16384, %s34_s7, [#allocation3], %s12532_s26, %s12532_s26, %s12533_s15  }
  0x6a   :  { %s12407_s9 = scalar_lea.hbm %s13119_s4, 49152 }
  0x6b   :  { %p12408_p6 = scmp.ne.s32.totalorder %s13119_s4, %s12407_s9  ;;  %p12411_p7 = scmp.lt.u32.totalorder %s12407_s9, %s13119_s4 }
  0x6d   :  { %p12413_p8 = pnand %p12411_p7, %p12408_p6 }
  0x6f   :  { %12416 = shalt.err (!%p12413_p8)
}
  0x70   :  { %s12417_s23 = scalar_lea.vmem %s56_s27, 49152  ;;  %p12422_p10 = scmp.lt.s32.totalorder %s56_s27, %s56_s27 }
  0x71   :  { %p12418_p9 = scmp.ne.s32.totalorder %s56_s27, %s12417_s23  ;;  %p12423_p11 = scmp.lt.s32.totalorder %s12417_s23, %s12417_s23 }
  0x73   :  { %p12424_p12 = por %p12423_p11, %p12422_p10 }
  0x75   :  { %p12425_p13 = pnand %p12424_p12, %p12418_p9 }
  0x77   :  { %12428 = shalt.err (!%p12425_p13)
}
  0x78   :  { %61 = dma.hbm_to_vmem [thread:$0]  %s13119_s4, 49152, %s56_s27, [#allocation5], %s12532_s26, %s12532_s26, %s12533_s15  }
  0x79   :  { %s12544_s28 = smov [#allocation9]   ;;  %s12545_s29 = smov [#allocation12]  }
  0x7a   :  { %s80_s5 = sshll.u32 %s12544_s28, 4  ;;  %s102_s30 = sshll.u32 %s12545_s29, 4  ;;  %s81_s5 = int_to_ptr.vmem [resolvable:$true] %s80_s5  ;;  %s103_s30 = int_to_ptr.vmem [resolvable:$true] %s102_s30 }
  0x7b   :  { %s12429_s17 = scalar_lea.hbm %s13121_s6, 128 }
  0x7c   :  { %p12430_p0 = scmp.ne.s32.totalorder %s13121_s6, %s12429_s17  ;;  %p12433_p1 = scmp.lt.u32.totalorder %s12429_s17, %s13121_s6 }
  0x7e   :  { %p12435_p2 = pnand %p12433_p1, %p12430_p0 }
  0x80   :  { %12438 = shalt.err (!%p12435_p2)
}
  0x81   :  { %s12439_s4 = scalar_lea.vmem %s81_s5, 128  ;;  %p12444_p4 = scmp.lt.s32.totalorder %s81_s5, %s81_s5 }
  0x82   :  { %p12440_p3 = scmp.ne.s32.totalorder %s81_s5, %s12439_s4  ;;  %p12445_p5 = scmp.lt.s32.totalorder %s12439_s4, %s12439_s4 }
  0x84   :  { %p12446_p6 = por %p12445_p5, %p12444_p4 }
  0x86   :  { %p12447_p7 = pnand %p12446_p6, %p12440_p3 }
  0x88   :  { %12450 = shalt.err (!%p12447_p7)
}
  0x89   :  { %83 = dma.hbm_to_vmem [thread:$0]  %s13121_s6, 128, %s81_s5, [#allocation8]  }
  0x8a   :  { %s12451_s9 = scalar_lea.hbm %s13123_s8, 64 }
  0x8b   :  { %p12452_p8 = scmp.ne.s32.totalorder %s13123_s8, %s12451_s9  ;;  %p12455_p9 = scmp.lt.u32.totalorder %s12451_s9, %s13123_s8 }
  0x8d   :  { %p12457_p10 = pnand %p12455_p9, %p12452_p8 }
  0x8f   :  { %12460 = shalt.err (!%p12457_p10)
}
  0x90   :  { %s12461_s23 = scalar_lea.vmem %s103_s30, 64  ;;  %p12466_p12 = scmp.lt.s32.totalorder %s103_s30, %s103_s30 }
  0x91   :  { %p12462_p11 = scmp.ne.s32.totalorder %s103_s30, %s12461_s23  ;;  %p12467_p13 = scmp.lt.s32.totalorder %s12461_s23, %s12461_s23 }
  0x93   :  { %p12468_p0 = por %p12467_p13, %p12466_p12 }
  0x95   :  { %p12469_p1 = pnand %p12468_p0, %p12462_p11 }
  0x97   :  { %12472 = shalt.err (!%p12469_p1)
}
  0x98   :  { %105 = dma.hbm_to_vmem [thread:$0]  %s13123_s8, 64, %s103_s30, [#allocation11]  }
  0x99   :  { %s12546_s7 = smov [#allocation15]   ;;  %s12547_s5 = smov [#allocation18]  }
  0x9a   :  { %s124_s28 = sshll.u32 %s12546_s7, 4  ;;  %s146_s29 = sshll.u32 %s12547_s5, 4  ;;  %s125_s28 = int_to_ptr.vmem [resolvable:$true] %s124_s28  ;;  %s147_s29 = int_to_ptr.vmem [resolvable:$true] %s146_s29 }
  0x9b   :  { %s12473_s17 = scalar_lea.hbm %s13125_s10, 32 }
  0x9c   :  { %p12474_p2 = scmp.ne.s32.totalorder %s13125_s10, %s12473_s17  ;;  %p12477_p3 = scmp.lt.u32.totalorder %s12473_s17, %s13125_s10 }
  0x9e   :  { %p12479_p4 = pnand %p12477_p3, %p12474_p2 }
  0xa0   :  { %12482 = shalt.err (!%p12479_p4)
}
  0xa1   :  { %s12483_s8 = scalar_lea.vmem %s125_s28, 32  ;;  %p12488_p6 = scmp.lt.s32.totalorder %s125_s28, %s125_s28 }
  0xa2   :  { %p12484_p5 = scmp.ne.s32.totalorder %s125_s28, %s12483_s8  ;;  %p12489_p7 = scmp.lt.s32.totalorder %s12483_s8, %s12483_s8 }
  0xa4   :  { %p12490_p8 = por %p12489_p7, %p12488_p6 }
  0xa6   :  { %p12491_p9 = pnand %p12490_p8, %p12484_p5 }
  0xa8   :  { %12494 = shalt.err (!%p12491_p9)
}
  0xa9   :  { %127 = dma.hbm_to_vmem [thread:$0]  %s13125_s10, 32, %s125_s28, [#allocation14]  }
  0xaa   :  { %s12495_s27 = scalar_lea.hbm %s13127_s12, 16 }
  0xab   :  { %p12496_p10 = scmp.ne.s32.totalorder %s13127_s12, %s12495_s27  ;;  %p12499_p11 = scmp.lt.u32.totalorder %s12495_s27, %s13127_s12 }
  0xad   :  { %p12501_p12 = pnand %p12499_p11, %p12496_p10 }
  0xaf   :  { %12504 = shalt.err (!%p12501_p12)
}
  0xb0   :  { %s12505_s24 = scalar_lea.vmem %s147_s29, 16  ;;  %s12509_s25 = scalar_lea.vmem %s147_s29, 32 }
  0xb1   :  { %p12506_p13 = scmp.ne.s32.totalorder %s147_s29, %s12505_s24  ;;  %p12510_p0 = scmp.lt.s32.totalorder %s147_s29, %s147_s29 }
  0xb2   :  { %p12511_p1 = scmp.lt.s32.totalorder %s12509_s25, %s12505_s24 }
  0xb4   :  { %p12512_p2 = por %p12511_p1, %p12510_p0 }
  0xb6   :  { %p12513_p3 = pnand %p12512_p2, %p12506_p13 }
  0xb8   :  { %12516 = shalt.err (!%p12513_p3)
}
  0xb9   :  { %149 = dma.hbm_to_vmem [thread:$0]  %s13127_s12, 16, %s147_s29, [#allocation17]  }
  0xba   :  { %12517 = dma.done.wait [#allocation3], 16384  }
  0xbb   :  { %12518 = vsyncadd [#allocation3], 4294950912 }
  0xbc   :  { %12519 = dma.done.wait [#allocation5], 49280  }
  0xbd   :  { %12520 = vsyncadd [#allocation5], 4294918016 }
  0xbe   :  { %12521 = dma.done.wait [#allocation8], 65664  }
  0xbf   :  { %12522 = vsyncadd [#allocation8], 4294901632 }
  0xc0   :  { %12523 = dma.done.wait [#allocation11], 32832  }
  0xc1   :  { %12524 = vsyncadd [#allocation11], 4294934464 }
  0xc2   :  { %12525 = dma.done.wait [#allocation14], 8224  }
  0xc3   :  { %12526 = vsyncadd [#allocation14], 4294959072 }
  0xc4   :  { %12527 = dma.done.wait [#allocation17], 2064  }
  0xc5   :  { %12528 = vsyncadd [#allocation17], 4294965232  ;;  %v188_v0 = vld [vmem:[#allocation2] sm:$0xff]  ;;  %v185_v17 = vld [vmem:[%s13116_s1 + $0x8] sm:$0xff] }
  0xc6   :  { %v192_v1 = vld [vmem:[#allocation2 + $0x20] sm:$0xff]  ;;  %v12762_v18 = vpack.c.bf16 %v185_v17, %v185_v17  ;;  %v190_v19 = vld [vmem:[#allocation2 + $0x10] sm:$0xff] }
  0xc7   :  { %v196_v2 = vld [vmem:[#allocation2 + $0x40] sm:$0xff]  ;;  %v10343_v3 = vcombine.high %v188_v0, %v192_v1  ;;  %v10342_v4 = vcombine.low %v188_v0, %v192_v1  ;;  %v194_v20 = vld [vmem:[#allocation2 + $0x30] sm:$0xff] }
  0xc8   :  { %v200_v5 = vld [vmem:[#allocation2 + $0x60] sm:$0xff]  ;;  %v10347_v22 = vcombine.high %v190_v19, %v194_v20  ;;  %v10346_v23 = vcombine.low %v190_v19, %v194_v20  ;;  %v198_v24 = vld [vmem:[#allocation2 + $0x50] sm:$0xff]  ;;  %1030 = vmatprep.mubr.bf16.mxu1 %v12762_v18  ;;  %1112 = vmatprep.mubr.bf16.mxu0 %v12762_v18 }
  0xc9   :  { %v10351_v6 = vcombine.high %v196_v2, %v200_v5  ;;  %v204_v7 = vld [vmem:[#allocation2 + $0x80] sm:$0xff]  ;;  %998 = vmatprep.subr.bf16.mxu1 %v10343_v3  ;;  %v10350_v9 = vcombine.low %v196_v2, %v200_v5  ;;  %v202_v27 = vld [vmem:[#allocation2 + $0x70] sm:$0xff] }
  0xca   :  { %v208_v8 = vld [vmem:[#allocation2 + $0xa0] sm:$0xff]  ;;  %999 = vmatpush1.bf16.msra.mxu1 %v10342_v4  ;;  %1080 = vmatprep.subr.bf16.mxu0 %v10347_v22  ;;  %v10355_v29 = vcombine.high %v198_v24, %v202_v27  ;;  %v206_v30 = vld [vmem:[#allocation2 + $0x90] sm:$0xff]  ;;  %v10354_v32 = vcombine.low %v198_v24, %v202_v27 }
  0xcb   :  { %1000 = vmatprep.subr.bf16.mxu1 %v10351_v6  ;;  %v10359_v10 = vcombine.high %v204_v7, %v208_v8  ;;  %v212_v11 = vld [vmem:[#allocation2 + $0xc0] sm:$0xff]  ;;  %v10358_v13 = vcombine.low %v204_v7, %v208_v8  ;;  %v210_v31 = vld [vmem:[#allocation2 + $0xb0] sm:$0xff]  ;;  %1081 = vmatpush1.bf16.msra.mxu0 %v10346_v23 }
  0xcc   :  { %v216_v12 = vld [vmem:[#allocation2 + $0xe0] sm:$0xff]  ;;  %1082 = vmatprep.subr.bf16.mxu0 %v10355_v29  ;;  %v10363_v34 = vcombine.high %v206_v30, %v210_v31  ;;  %v214_v36 = vld [vmem:[#allocation2 + $0xd0] sm:$0xff]  ;;  %v10362_v40 = vcombine.low %v206_v30, %v210_v31 }
  0xcd   :  { %v10367_v14 = vcombine.high %v212_v11, %v216_v12  ;;  %v220_v15 = vld [vmem:[#allocation2 + $0x100] sm:$0xff]  ;;  %v10366_v21 = vcombine.low %v212_v11, %v216_v12  ;;  %v218_v37 = vld [vmem:[#allocation2 + $0xf0] sm:$0xff] }
  0xce   :  { %1001 = vmatpush1.bf16.msra.mxu1 %v10350_v9  ;;  %v224_v16 = vld [vmem:[#allocation2 + $0x120] sm:$0xff]  ;;  %v10371_v42 = vcombine.high %v214_v36, %v218_v37  ;;  %v222_v44 = vld [vmem:[#allocation2 + $0x110] sm:$0xff]  ;;  %v10370_v48 = vcombine.low %v214_v36, %v218_v37 }
  0xcf   :  { %1002 = vmatprep.subr.bf16.mxu1 %v10359_v10  ;;  %v10375_v25 = vcombine.high %v220_v15, %v224_v16  ;;  %v228_v26 = vld [vmem:[#allocation2 + $0x140] sm:$0xff]  ;;  %v10374_v33 = vcombine.low %v220_v15, %v224_v16  ;;  %1083 = vmatpush1.bf16.msra.mxu0 %v10354_v32  ;;  %v226_v45 = vld [vmem:[#allocation2 + $0x130] sm:$0xff] }
  0xd0   :  { %v232_v28 = vld [vmem:[#allocation2 + $0x160] sm:$0xff]  ;;  %1084 = vmatprep.subr.bf16.mxu0 %v10363_v34  ;;  %v10379_v50 = vcombine.high %v222_v44, %v226_v45  ;;  %v230_v52 = vld [vmem:[#allocation2 + $0x150] sm:$0xff]  ;;  %v10378_v56 = vcombine.low %v222_v44, %v226_v45 }
  0xd1   :  { %v10383_v35 = vcombine.high %v228_v26, %v232_v28  ;;  %v236_v38 = vld [vmem:[#allocation2 + $0x180] sm:$0xff]  ;;  %v10382_v41 = vcombine.low %v228_v26, %v232_v28  ;;  %v234_v53 = vld [vmem:[#allocation2 + $0x170] sm:$0xff] }
  0xd2   :  { %1003 = vmatpush1.bf16.msra.mxu1 %v10358_v13  ;;  %v240_v39 = vld [vmem:[#allocation2 + $0x1a0] sm:$0xff]  ;;  %v10387_v58 = vcombine.high %v230_v52, %v234_v53  ;;  %v238_v60 = vld [vmem:[#allocation2 + $0x190] sm:$0xff]  ;;  %v10386_v0 = vcombine.low %v230_v52, %v234_v53  ;;  %v193_v52 = vld [vmem:[#allocation2 + $0x28] sm:$0xff] }
  0xd3   :  { %1004 = vmatprep.subr.bf16.mxu1 %v10367_v14  ;;  %v10391_v43 = vcombine.high %v236_v38, %v240_v39  ;;  %v244_v46 = vld [vmem:[#allocation2 + $0x1c0] sm:$0xff]  ;;  %1085 = vmatpush1.bf16.msra.mxu0 %v10362_v40  ;;  %v10390_v49 = vcombine.low %v236_v38, %v240_v39  ;;  %v242_v61 = vld [vmem:[#allocation2 + $0x1b0] sm:$0xff] }
  0xd4   :  { %v248_v47 = vld [vmem:[#allocation2 + $0x1e0] sm:$0xff]  ;;  %1086 = vmatprep.subr.bf16.mxu0 %v10371_v42  ;;  %v10395_v2 = vcombine.high %v238_v60, %v242_v61  ;;  %v246_v4 = vld [vmem:[#allocation2 + $0x1d0] sm:$0xff]  ;;  %v10394_v8 = vcombine.low %v238_v60, %v242_v61  ;;  %v197_v60 = vld [vmem:[#allocation2 + $0x48] sm:$0xff] }
  0xd5   :  { %v10399_v51 = vcombine.high %v244_v46, %v248_v47  ;;  %v252_v54 = vld [vmem:[#allocation2 + $0x200] sm:$0xff]  ;;  %v10398_v57 = vcombine.low %v244_v46, %v248_v47  ;;  %v250_v5 = vld [vmem:[#allocation2 + $0x1f0] sm:$0xff]  ;;  %v201_v61 = vld [vmem:[#allocation2 + $0x68] sm:$0xff] }
  0xd6   :  { %1005 = vmatpush1.bf16.msra.mxu1 %v10366_v21  ;;  %v256_v55 = vld [vmem:[#allocation2 + $0x220] sm:$0xff]  ;;  %v10403_v10 = vcombine.high %v246_v4, %v250_v5  ;;  %v254_v12 = vld [vmem:[#allocation2 + $0x210] sm:$0xff]  ;;  %v10402_v16 = vcombine.low %v246_v4, %v250_v5 }
  0xd7   :  { %1006 = vmatprep.subr.bf16.mxu1 %v10375_v25  ;;  %1087 = vmatpush1.bf16.msra.mxu0 %v10370_v48  ;;  %v10407_v59 = vcombine.high %v252_v54, %v256_v55  ;;  %v260_v62 = vld [vmem:[#allocation2 + $0x240] sm:$0xff]  ;;  %v10406_v1 = vcombine.low %v252_v54, %v256_v55  ;;  %v258_v13 = vld [vmem:[#allocation2 + $0x230] sm:$0xff] }
  0xd8   :  { %1088 = vmatprep.subr.bf16.mxu0 %v10379_v50  ;;  %v264_v63 = vld [vmem:[#allocation2 + $0x260] sm:$0xff]  ;;  %v10411_v21 = vcombine.high %v254_v12, %v258_v13  ;;  %v262_v22 = vld [vmem:[#allocation2 + $0x250] sm:$0xff]  ;;  %v10410_v25 = vcombine.low %v254_v12, %v258_v13  ;;  %v10352_v12 = vcombine.low %v197_v60, %v201_v61 }
  0xd9   :  { %v10415_v3 = vcombine.high %v260_v62, %v264_v63  ;;  %v268_v6 = vld [vmem:[#allocation2 + $0x280] sm:$0xff]  ;;  %v10414_v9 = vcombine.low %v260_v62, %v264_v63  ;;  %v266_v23 = vld [vmem:[#allocation2 + $0x270] sm:$0xff] }
  0xda   :  { %1007 = vmatpush1.bf16.msra.mxu1 %v10374_v33  ;;  %v272_v7 = vld [vmem:[#allocation2 + $0x2a0] sm:$0xff]  ;;  %v10419_v29 = vcombine.high %v262_v22, %v266_v23  ;;  %v270_v30 = vld [vmem:[#allocation2 + $0x290] sm:$0xff]  ;;  %v10418_v33 = vcombine.low %v262_v22, %v266_v23 }
  0xdb   :  { %1008 = vmatprep.subr.bf16.mxu1 %v10383_v35  ;;  %1089 = vmatpush1.bf16.msra.mxu0 %v10378_v56  ;;  %v10423_v11 = vcombine.high %v268_v6, %v272_v7  ;;  %v276_v14 = vld [vmem:[#allocation2 + $0x2c0] sm:$0xff]  ;;  %v10422_v17 = vcombine.low %v268_v6, %v272_v7  ;;  %v274_v31 = vld [vmem:[#allocation2 + $0x2b0] sm:$0xff]  ;;  %v205_v7 = vld [vmem:[#allocation2 + $0x88] sm:$0xff] }
  0xdc   :  { %1090 = vmatprep.subr.bf16.mxu0 %v10387_v58  ;;  %v280_v15 = vld [vmem:[#allocation2 + $0x2e0] sm:$0xff]  ;;  %v10427_v37 = vcombine.high %v270_v30, %v274_v31  ;;  %v278_v38 = vld [vmem:[#allocation2 + $0x2d0] sm:$0xff] }
  0xdd   :  { %v284_v19 = vld [vmem:[#allocation2 + $0x300] sm:$0xff]  ;;  %v10431_v24 = vcombine.high %v276_v14, %v280_v15  ;;  %v10430_v26 = vcombine.low %v276_v14, %v280_v15  ;;  %v282_v39 = vld [vmem:[#allocation2 + $0x2f0] sm:$0xff]  ;;  %v1574_v15 = vld [vmem:[#allocation7] sm:$0xff] }
  0xde   :  { %1009 = vmatpush1.bf16.msra.mxu1 %v10382_v41  ;;  %v288_v20 = vld [vmem:[#allocation2 + $0x320] sm:$0xff]  ;;  %v10426_v41 = vcombine.low %v270_v30, %v274_v31  ;;  %v10435_v45 = vcombine.high %v278_v38, %v282_v39  ;;  %v286_v46 = vld [vmem:[#allocation2 + $0x310] sm:$0xff]  ;;  %v229_v30 = vld [vmem:[#allocation2 + $0x148] sm:$0xff] }
  0xdf   :  { %1010 = vmatprep.subr.bf16.mxu1 %v10391_v43  ;;  %1091 = vmatpush1.bf16.msra.mxu0 %v10386_v0  ;;  %v292_v27 = vld [vmem:[#allocation2 + $0x340] sm:$0xff]  ;;  %v10439_v32 = vcombine.high %v284_v19, %v288_v20  ;;  %v10438_v34 = vcombine.low %v284_v19, %v288_v20  ;;  %v290_v47 = vld [vmem:[#allocation2 + $0x330] sm:$0xff]  ;;  %v217_v19 = vld [vmem:[#allocation2 + $0xe8] sm:$0xff] }
  0xe0   :  { %1092 = vmatprep.subr.bf16.mxu0 %v10395_v2  ;;  %v296_v28 = vld [vmem:[#allocation2 + $0x360] sm:$0xff]  ;;  %v10443_v53 = vcombine.high %v286_v46, %v290_v47  ;;  %v294_v54 = vld [vmem:[#allocation2 + $0x350] sm:$0xff]  ;;  %v10442_v58 = vcombine.low %v286_v46, %v290_v47  ;;  %v233_v31 = vld [vmem:[#allocation2 + $0x168] sm:$0xff] }
  0xe1   :  { %v300_v35 = vld [vmem:[#allocation2 + $0x380] sm:$0xff]  ;;  %v10447_v40 = vcombine.high %v292_v27, %v296_v28  ;;  %v10446_v42 = vcombine.low %v292_v27, %v296_v28  ;;  %v298_v55 = vld [vmem:[#allocation2 + $0x370] sm:$0xff]  ;;  %v225_v27 = vld [vmem:[#allocation2 + $0x128] sm:$0xff]  ;;  %v10384_v47 = vcombine.low %v229_v30, %v233_v31 }
  0xe2   :  { %1011 = vmatpush1.bf16.msra.mxu1 %v10390_v49  ;;  %v304_v36 = vld [vmem:[#allocation2 + $0x3a0] sm:$0xff]  ;;  %v10434_v49 = vcombine.low %v278_v38, %v282_v39  ;;  %v10451_v62 = vcombine.high %v294_v54, %v298_v55  ;;  %v302_v63 = vld [vmem:[#allocation2 + $0x390] sm:$0xff]  ;;  %v1602_v38 = vld [vmem:[#allocation7 + $0xe0] sm:$0xff] }
  0xe3   :  { %1012 = vmatprep.subr.bf16.mxu1 %v10399_v51  ;;  %1093 = vmatpush1.bf16.msra.mxu0 %v10394_v8  ;;  %v308_v43 = vld [vmem:[#allocation2 + $0x3c0] sm:$0xff]  ;;  %v10455_v48 = vcombine.high %v300_v35, %v304_v36  ;;  %v10454_v50 = vcombine.low %v300_v35, %v304_v36  ;;  %v189_v51 = vld [vmem:[#allocation2 + $0x8] sm:$0xff]  ;;  %v306_v0 = vld [vmem:[#allocation2 + $0x3b0] sm:$0xff] }
  0xe4   :  { %1094 = vmatprep.subr.bf16.mxu0 %v10403_v10  ;;  %v312_v44 = vld [vmem:[#allocation2 + $0x3e0] sm:$0xff]  ;;  %v310_v4 = vld [vmem:[#allocation2 + $0x3d0] sm:$0xff]  ;;  %v10344_v6 = vcombine.low %v189_v51, %v193_v52  ;;  %v209_v8 = vld [vmem:[#allocation2 + $0xa8] sm:$0xff]  ;;  %v10353_v10 = vcombine.high %v197_v60, %v201_v61 }
  0xe5   :  { %v10463_v56 = vcombine.high %v308_v43, %v312_v44  ;;  %v314_v5 = vld [vmem:[#allocation2 + $0x3f0] sm:$0xff]  ;;  %v10361_v14 = vcombine.high %v205_v7, %v209_v8  ;;  %v1610_v46 = vld [vmem:[#allocation7 + $0x120] sm:$0xff] }
  0xe6   :  { %1013 = vmatpush1.bf16.msra.mxu1 %v10398_v57  ;;  %v184_v57 = vld [vmem:[%s13116_s1] sm:$0xff]  ;;  %v10467_v13 = vcombine.high %v310_v4, %v314_v5  ;;  %v10466_v20 = vcombine.low %v310_v4, %v314_v5  ;;  %v1622_v61 = vld [vmem:[#allocation7 + $0x180] sm:$0xff] }
  0xe7   :  { %1014 = vmatprep.subr.bf16.mxu1 %v10407_v59  ;;  %1095 = vmatpush1.bf16.msra.mxu0 %v10402_v16  ;;  %v10462_v59 = vcombine.low %v308_v43, %v312_v44  ;;  %v12769_v2 = vpack.c.bf16 %v184_v57, %v184_v57  ;;  %v1578_v16 = vld [vmem:[#allocation7 + $0x20] sm:$0xff]  ;;  %v10385_v43 = vcombine.high %v229_v30, %v233_v31 }
  0xe8   :  { %1096 = vmatprep.subr.bf16.mxu0 %v10411_v21  ;;  %v10360_v21 = vcombine.low %v205_v7, %v209_v8  ;;  %v10471_v22 = vcombine.high %v1574_v15, %v1578_v16  ;;  %v10470_v28 = vcombine.low %v1574_v15, %v1578_v16  ;;  %v257_v57 = vld [vmem:[#allocation2 + $0x228] sm:$0xff] }
  0xe9   :  { %v1634_v7 = vld [vmem:[#allocation7 + $0x1e0] sm:$0xff] }
  0xea   :  { %1015 = vmatpush1.bf16.msra.mxu1 %v10406_v1  ;;  %v10345_v1 = vcombine.high %v189_v51, %v193_v52  ;;  %v1642_v15 = vld [vmem:[#allocation7 + $0x220] sm:$0xff] }
  0xeb   :  { %1016 = vmatprep.subr.bf16.mxu1 %v10415_v3  ;;  %1097 = vmatpush1.bf16.msra.mxu0 %v10410_v25  ;;  %v10450_v3 = vcombine.low %v294_v54, %v298_v55  ;;  %v1586_v25 = vld [vmem:[#allocation7 + $0x60] sm:$0xff] }
  0xec   :  { %1098 = vmatprep.subr.bf16.mxu0 %v10419_v29  ;;  %v1618_v54 = vld [vmem:[#allocation7 + $0x160] sm:$0xff] }
  0xed   :  { %v1654_v31 = vld [vmem:[#allocation7 + $0x280] sm:$0xff] }
  0xee   :  { %1017 = vmatpush1.bf16.msra.mxu1 %v10414_v9  ;;  %v10459_v9 = vcombine.high %v302_v63, %v306_v0 }
  0xef   :  { %1018 = vmatprep.subr.bf16.mxu1 %v10423_v11  ;;  %1099 = vmatpush1.bf16.msra.mxu0 %v10418_v33  ;;  %v10458_v11 = vcombine.low %v302_v63, %v306_v0  ;;  %v1590_v33 = vld [vmem:[#allocation7 + $0x80] sm:$0xff] }
  0xf0   :  { %1100 = vmatprep.subr.bf16.mxu0 %v10427_v37  ;;  %v1598_v37 = vld [vmem:[#allocation7 + $0xc0] sm:$0xff] }
  0xf1   :  { %v10494_v52 = vcombine.low %v1598_v37, %v1602_v38  ;;  %v261_v0 = vld [vmem:[#allocation2 + $0x248] sm:$0xff] }
  0xf2   :  { %1019 = vmatpush1.bf16.msra.mxu1 %v10422_v17  ;;  %v213_v17 = vld [vmem:[#allocation2 + $0xc8] sm:$0xff] }
  0xf3   :  { %1020 = vmatprep.subr.bf16.mxu1 %v10431_v24  ;;  %1101 = vmatpush1.bf16.msra.mxu0 %v10426_v41  ;;  %v10369_v23 = vcombine.high %v213_v17, %v217_v19  ;;  %v1582_v24 = vld [vmem:[#allocation7 + $0x40] sm:$0xff]  ;;  %v10368_v29 = vcombine.low %v213_v17, %v217_v19 }
  0xf4   :  { %1102 = vmatprep.subr.bf16.mxu0 %v10435_v45  ;;  %v10478_v36 = vcombine.low %v1582_v24, %v1586_v25  ;;  %v241_v41 = vld [vmem:[#allocation2 + $0x1a8] sm:$0xff] }
  0xf5   :  { %v1606_v45 = vld [vmem:[#allocation7 + $0x100] sm:$0xff] }
  0xf6   :  { %1021 = vmatpush1.bf16.msra.mxu1 %v10430_v26  ;;  %v221_v26 = vld [vmem:[#allocation2 + $0x108] sm:$0xff]  ;;  %v10502_v60 = vcombine.low %v1606_v45, %v1610_v46 }
  0xf7   :  { %1022 = vmatprep.subr.bf16.mxu1 %v10439_v32  ;;  %1103 = vmatpush1.bf16.msra.mxu0 %v10434_v49  ;;  %v10479_v32 = vcombine.high %v1582_v24, %v1586_v25  ;;  %v10377_v35 = vcombine.high %v221_v26, %v225_v27  ;;  %v10376_v39 = vcombine.low %v221_v26, %v225_v27  ;;  %v249_v49 = vld [vmem:[#allocation2 + $0x1e8] sm:$0xff] }
  0xf8   :  { %1104 = vmatprep.subr.bf16.mxu0 %v10443_v53  ;;  %v1614_v53 = vld [vmem:[#allocation7 + $0x140] sm:$0xff] }
  0xf9   :  { %v10510_v5 = vcombine.low %v1614_v53, %v1618_v54  ;;  %v277_v17 = vld [vmem:[#allocation2 + $0x2c8] sm:$0xff] }
  0xfa   :  { %1023 = vmatpush1.bf16.msra.mxu1 %v10438_v34  ;;  %v1594_v34 = vld [vmem:[#allocation7 + $0xa0] sm:$0xff] }
  0xfb   :  { %1024 = vmatprep.subr.bf16.mxu1 %v10447_v40  ;;  %1105 = vmatpush1.bf16.msra.mxu0 %v10442_v58  ;;  %v237_v40 = vld [vmem:[#allocation2 + $0x188] sm:$0xff]  ;;  %v10486_v44 = vcombine.low %v1590_v33, %v1594_v34  ;;  %v10503_v58 = vcombine.high %v1606_v45, %v1610_v46 }
  0xfc   :  { %1106 = vmatprep.subr.bf16.mxu0 %v10451_v62  ;;  %v10393_v51 = vcombine.high %v237_v40, %v241_v41  ;;  %v10392_v55 = vcombine.low %v237_v40, %v241_v41  ;;  %v1626_v62 = vld [vmem:[#allocation7 + $0x1a0] sm:$0xff] }
  0xfd   :  { %v281_v19 = vld [vmem:[#allocation2 + $0x2e8] sm:$0xff] }
  0xfe   :  { %1025 = vmatpush1.bf16.msra.mxu1 %v10446_v42  ;;  %v10487_v42 = vcombine.high %v1590_v33, %v1594_v34  ;;  %v1650_v24 = vld [vmem:[#allocation7 + $0x260] sm:$0xff]  ;;  %v10432_v33 = vcombine.low %v277_v17, %v281_v19 }
  0xff   :  { %1026 = vmatprep.subr.bf16.mxu1 %v10455_v48  ;;  %1107 = vmatpush1.bf16.msra.mxu0 %v10450_v3  ;;  %v245_v48 = vld [vmem:[#allocation2 + $0x1c8] sm:$0xff]  ;;  %v10511_v3 = vcombine.high %v1614_v53, %v1618_v54 }
 0x100   :  { %1108 = vmatprep.subr.bf16.mxu0 %v10459_v9  ;;  %v10400_v63 = vcombine.low %v245_v48, %v249_v49  ;;  %v269_v9 = vld [vmem:[#allocation2 + $0x288] sm:$0xff] }
 0x101   :  { %v285_v26 = vld [vmem:[#allocation2 + $0x308] sm:$0xff] }
 0x102   :  { %1027 = vmatpush1.bf16.msra.mxu1 %v10454_v50  ;;  %v10495_v50 = vcombine.high %v1598_v37, %v1602_v38  ;;  %v289_v27 = vld [vmem:[#allocation2 + $0x328] sm:$0xff] }
 0x103   :  { %1028 = vmatprep.subr.bf16.mxu1 %v10463_v56  ;;  %1109 = vmatpush1.bf16.msra.mxu0 %v10458_v11  ;;  %v253_v56 = vld [vmem:[#allocation2 + $0x208] sm:$0xff]  ;;  %v10519_v11 = vcombine.high %v1622_v61, %v1626_v62  ;;  %v10441_v37 = vcombine.high %v285_v26, %v289_v27  ;;  %v10440_v41 = vcombine.low %v285_v26, %v289_v27 }
 0x104   :  { %1110 = vmatprep.subr.bf16.mxu0 %v10467_v13  ;;  %v10409_v4 = vcombine.high %v253_v56, %v257_v57  ;;  %v10408_v8 = vcombine.low %v253_v56, %v257_v57  ;;  %v10518_v13 = vcombine.low %v1622_v61, %v1626_v62  ;;  %v293_v34 = vld [vmem:[#allocation2 + $0x348] sm:$0xff] }
 0x105   :  { %v1666_v40 = vld [vmem:[#allocation7 + $0x2e0] sm:$0xff] }
 0x106   :  { %1029 = vmatpush1.bf16.msra.mxu1 %v10462_v59  ;;  %v10401_v59 = vcombine.high %v245_v48, %v249_v49  ;;  %v1674_v48 = vld [vmem:[#allocation7 + $0x320] sm:$0xff] }
 0x107   :  { %1039 = vmatprep.subr.bf16.mxu1 %v10345_v1  ;;  %1111 = vmatpush1.bf16.msra.mxu0 %v10466_v20  ;;  %v265_v1 = vld [vmem:[#allocation2 + $0x268] sm:$0xff] }
 0x108   :  { %4646 = vmatprep.subr.bf16.mxu0 %v10471_v22  ;;  %v10416_v16 = vcombine.low %v261_v0, %v265_v1  ;;  %v1682_v56 = vld [vmem:[#allocation7 + $0x360] sm:$0xff] }
 0x109   :  { %1031 = vmatmul.mubr.bf16.vlgmr.msra.gmra.mrb[0].mxu1 %v12769_v2  ;;  %v1686_v26 = vld [vmem:[#allocation7 + $0x380] sm:$0xff] }
 0x10a   :  { %1040 = vmatpush1.bf16.msra.mxu1 %v10344_v6  ;;  %1071 = vmatprep.mubr.bf16.mxu1 %v12762_v18  ;;  %v1630_v6 = vld [vmem:[#allocation7 + $0x1c0] sm:$0xff] }
 0x10b   :  { %1041 = vmatprep.subr.bf16.mxu1 %v10353_v10  ;;  %1113 = vmatmul.mubr.bf16.vlgmr.msra.gmra.mrb[0].mxu0 %v12769_v2  ;;  %v273_v10 = vld [vmem:[#allocation2 + $0x2a8] sm:$0xff]  ;;  %v10527_v20 = vcombine.high %v1630_v6, %v1634_v7  ;;  %v10526_v22 = vcombine.low %v1630_v6, %v1634_v7  ;;  %v207_v7 = vld [vmem:[#allocation2 + $0x98] sm:$0xff] }
 0x10c   :  { %4647 = vmatpush1.bf16.msra.mxu0 %v10470_v28  ;;  %v10424_v25 = vcombine.low %v269_v9, %v273_v10  ;;  %v1690_v27 = vld [vmem:[#allocation7 + $0x3a0] sm:$0xff] }
 0x10d   :  { %4648 = vmatprep.subr.bf16.mxu0 %v10479_v32  ;;  %v1658_v32 = vld [vmem:[#allocation7 + $0x2a0] sm:$0xff] }
 0x10e   :  { %1042 = vmatpush1.bf16.msra.mxu1 %v10352_v12  ;;  %v10417_v12 = vcombine.high %v261_v0, %v265_v1  ;;  %v10550_v46 = vcombine.low %v1654_v31, %v1658_v32  ;;  %v199_v0 = vld [vmem:[#allocation2 + $0x58] sm:$0xff] }
 0x10f   :  { %1043 = vmatprep.subr.bf16.mxu1 %v10361_v14  ;;  %v1638_v14 = vld [vmem:[#allocation7 + $0x200] sm:$0xff]  ;;  %v203_v1 = vld [vmem:[#allocation2 + $0x78] sm:$0xff] }
 0x110   :  { %4649 = vmatpush1.bf16.msra.mxu0 %v10478_v36  ;;  %v10535_v28 = vcombine.high %v1638_v14, %v1642_v15  ;;  %v10534_v30 = vcombine.low %v1638_v14, %v1642_v15  ;;  %v223_v15 = vld [vmem:[#allocation2 + $0x118] sm:$0xff] }
 0x111   :  { %4650 = vmatprep.subr.bf16.mxu0 %v10487_v42  ;;  %v301_v42 = vld [vmem:[#allocation2 + $0x388] sm:$0xff] }
 0x112   :  { %1044 = vmatpush1.bf16.msra.mxu1 %v10360_v21  ;;  %v10425_v21 = vcombine.high %v269_v9, %v273_v10  ;;  %v10357_v9 = vcombine.high %v199_v0, %v203_v1  ;;  %v10356_v10 = vcombine.low %v199_v0, %v203_v1  ;;  %v299_v1 = vld [vmem:[#allocation2 + $0x378] sm:$0xff] }
 0x113   :  { %1045 = vmatprep.subr.bf16.mxu1 %v10369_v23  ;;  %v1646_v23 = vld [vmem:[#allocation7 + $0x240] sm:$0xff] }
 0x114   :  { %4651 = vmatpush1.bf16.msra.mxu0 %v10486_v44  ;;  %v10543_v36 = vcombine.high %v1646_v23, %v1650_v24  ;;  %v10542_v38 = vcombine.low %v1646_v23, %v1650_v24  ;;  %v10551_v44 = vcombine.high %v1654_v31, %v1658_v32  ;;  %v239_v24 = vld [vmem:[#allocation2 + $0x198] sm:$0xff]  ;;  %v10583_v31 = vcombine.high %v1686_v26, %v1690_v27 }
 0x115   :  { %4652 = vmatprep.subr.bf16.mxu0 %v10495_v50  ;;  %v309_v50 = vld [vmem:[#allocation2 + $0x3c8] sm:$0xff] }
 0x116   :  { %1046 = vmatpush1.bf16.msra.mxu1 %v10368_v29  ;;  %v10433_v29 = vcombine.high %v277_v17, %v281_v19 }
 0x117   :  { %1047 = vmatprep.subr.bf16.mxu1 %v10377_v35  ;;  %v297_v35 = vld [vmem:[#allocation2 + $0x368] sm:$0xff] }
 0x118   :  { %4653 = vmatpush1.bf16.msra.mxu0 %v10494_v52  ;;  %v10449_v45 = vcombine.high %v293_v34, %v297_v35  ;;  %v10448_v49 = vcombine.low %v293_v34, %v297_v35  ;;  %v1694_v34 = vld [vmem:[#allocation7 + $0x3c0] sm:$0xff] }
 0x119   :  { %4654 = vmatprep.subr.bf16.mxu0 %v10503_v58  ;;  %v191_v58 = vld [vmem:[#allocation2 + $0x18] sm:$0xff]  ;;  %v1698_v35 = vld [vmem:[#allocation7 + $0x3e0] sm:$0xff] }
 0x11a   :  { %1048 = vmatpush1.bf16.msra.mxu1 %v10376_v39  ;;  %v1662_v39 = vld [vmem:[#allocation7 + $0x2c0] sm:$0xff] }
 0x11b   :  { %1049 = vmatprep.subr.bf16.mxu1 %v10385_v43  ;;  %v305_v43 = vld [vmem:[#allocation2 + $0x3a8] sm:$0xff]  ;;  %v10559_v52 = vcombine.high %v1662_v39, %v1666_v40  ;;  %v10558_v54 = vcombine.low %v1662_v39, %v1666_v40  ;;  %v10591_v39 = vcombine.high %v1694_v34, %v1698_v35 }
 0x11c   :  { %4655 = vmatpush1.bf16.msra.mxu0 %v10502_v60  ;;  %v10457_v53 = vcombine.high %v301_v42, %v305_v43  ;;  %v10456_v57 = vcombine.low %v301_v42, %v305_v43  ;;  %v12776_v42 = vld [vmem:[#allocation7 + $0x800] sm:$0xff] }
 0x11d   :  { %4656 = vmatprep.subr.bf16.mxu0 %v10511_v3 }
 0x11e   :  { %1050 = vmatpush1.bf16.msra.mxu1 %v10384_v47  ;;  %v1670_v47 = vld [vmem:[#allocation7 + $0x300] sm:$0xff] }
 0x11f   :  { %1051 = vmatprep.subr.bf16.mxu1 %v10393_v51  ;;  %v313_v51 = vld [vmem:[#allocation2 + $0x3e8] sm:$0xff]  ;;  %v10567_v60 = vcombine.high %v1670_v47, %v1674_v48  ;;  %v10566_v62 = vcombine.low %v1670_v47, %v1674_v48 }
 0x120   :  { %4657 = vmatpush1.bf16.msra.mxu0 %v10510_v5  ;;  %v10465_v61 = vcombine.high %v309_v50, %v313_v51 }
 0x121   :  { %4658 = vmatprep.subr.bf16.mxu0 %v10519_v11  ;;  %v215_v11 = vld [vmem:[#allocation2 + $0xd8] sm:$0xff] }
 0x122   :  { %1052 = vmatpush1.bf16.msra.mxu1 %v10392_v55  ;;  %v1678_v55 = vld [vmem:[#allocation7 + $0x340] sm:$0xff] }
 0x123   :  { %1053 = vmatprep.subr.bf16.mxu1 %v10401_v59  ;;  %v195_v59 = vld [vmem:[#allocation2 + $0x38] sm:$0xff]  ;;  %v10575_v3 = vcombine.high %v1678_v55, %v1682_v56  ;;  %v10574_v5 = vcombine.low %v1678_v55, %v1682_v56 }
 0x124   :  { %4659 = vmatpush1.bf16.msra.mxu0 %v10518_v13  ;;  %v10348_v6 = vcombine.low %v191_v58, %v195_v59  ;;  %v279_v55 = vld [vmem:[#allocation2 + $0x2d8] sm:$0xff] }
 0x125   :  { %4660 = vmatprep.subr.bf16.mxu0 %v10527_v20  ;;  %v231_v20 = vld [vmem:[#allocation2 + $0x158] sm:$0xff] }
 0x126   :  { %1054 = vmatpush1.bf16.msra.mxu1 %v10400_v63  ;;  %v10464_v63 = vcombine.low %v309_v50, %v313_v51  ;;  %v271_v51 = vld [vmem:[#allocation2 + $0x298] sm:$0xff] }
 0x127   :  { %1055 = vmatprep.subr.bf16.mxu1 %v10409_v4  ;;  %v10349_v4 = vcombine.high %v191_v58, %v195_v59  ;;  %v287_v59 = vld [vmem:[#allocation2 + $0x318] sm:$0xff] }
 0x128   :  { %4661 = vmatpush1.bf16.msra.mxu0 %v10526_v22 }
 0x129   :  { %4662 = vmatprep.subr.bf16.mxu0 %v10535_v28 }
 0x12a   :  { %1056 = vmatpush1.bf16.msra.mxu1 %v10408_v8  ;;  %v211_v8 = vld [vmem:[#allocation2 + $0xb8] sm:$0xff] }
 0x12b   :  { %1057 = vmatprep.subr.bf16.mxu1 %v10417_v12  ;;  %v219_v12 = vld [vmem:[#allocation2 + $0xf8] sm:$0xff]  ;;  %v10365_v13 = vcombine.high %v207_v7, %v211_v8  ;;  %v10364_v14 = vcombine.low %v207_v7, %v211_v8 }
 0x12c   :  { %4663 = vmatpush1.bf16.msra.mxu0 %v10534_v30  ;;  %v10373_v17 = vcombine.high %v215_v11, %v219_v12  ;;  %v10372_v19 = vcombine.low %v215_v11, %v219_v12  ;;  %v251_v30 = vld [vmem:[#allocation2 + $0x1f8] sm:$0xff] }
 0x12d   :  { %4664 = vmatprep.subr.bf16.mxu0 %v10543_v36 }
 0x12e   :  { %1058 = vmatpush1.bf16.msra.mxu1 %v10416_v16  ;;  %v227_v16 = vld [vmem:[#allocation2 + $0x138] sm:$0xff] }
 0x12f   :  { %1059 = vmatprep.subr.bf16.mxu1 %v10425_v21  ;;  %v235_v21 = vld [vmem:[#allocation2 + $0x178] sm:$0xff]  ;;  %v10381_v22 = vcombine.high %v223_v15, %v227_v16  ;;  %v10380_v23 = vcombine.low %v223_v15, %v227_v16 }
 0x130   :  { %4665 = vmatpush1.bf16.msra.mxu0 %v10542_v38  ;;  %v10388_v28 = vcombine.low %v231_v20, %v235_v21  ;;  %v259_v38 = vld [vmem:[#allocation2 + $0x238] sm:$0xff] }
 0x131   :  { %4666 = vmatprep.subr.bf16.mxu0 %v10551_v44  ;;  %v263_v44 = vld [vmem:[#allocation2 + $0x258] sm:$0xff] }
 0x132   :  { %1060 = vmatpush1.bf16.msra.mxu1 %v10424_v25  ;;  %v243_v25 = vld [vmem:[#allocation2 + $0x1b8] sm:$0xff] }
 0x133   :  { %1061 = vmatprep.subr.bf16.mxu1 %v10433_v29  ;;  %v247_v29 = vld [vmem:[#allocation2 + $0x1d8] sm:$0xff]  ;;  %v10397_v32 = vcombine.high %v239_v24, %v243_v25  ;;  %v10396_v36 = vcombine.low %v239_v24, %v243_v25 }
 0x134   :  { %4667 = vmatpush1.bf16.msra.mxu0 %v10550_v46  ;;  %v10405_v40 = vcombine.high %v247_v29, %v251_v30  ;;  %v10404_v43 = vcombine.low %v247_v29, %v251_v30  ;;  %v12778_v46 = vld [vmem:[#allocation7 + $0x820] sm:$0xff] }
 0x135   :  { %4668 = vmatprep.subr.bf16.mxu0 %v10559_v52  ;;  %v10726_v48 = vcombine.low %v12776_v42, %v12778_v46  ;;  %v1734_v29 = vld [vmem:[#allocation7 + $0x500] sm:$0xff] }
 0x136   :  { %1062 = vmatpush1.bf16.msra.mxu1 %v10432_v33  ;;  %v10582_v33 = vcombine.low %v1686_v26, %v1690_v27  ;;  %v1730_v26 = vld [vmem:[#allocation7 + $0x4e0] sm:$0xff] }
 0x137   :  { %1063 = vmatprep.subr.bf16.mxu1 %v10441_v37  ;;  %v255_v37 = vld [vmem:[#allocation2 + $0x218] sm:$0xff]  ;;  %v1738_v30 = vld [vmem:[#allocation7 + $0x520] sm:$0xff] }
 0x138   :  { %4669 = vmatpush1.bf16.msra.mxu0 %v10558_v54  ;;  %v10413_v47 = vcombine.high %v255_v37, %v259_v38  ;;  %v10412_v50 = vcombine.low %v255_v37, %v259_v38  ;;  %v1754_v37 = vld [vmem:[#allocation7 + $0x5a0] sm:$0xff] }
 0x139   :  { %4670 = vmatprep.subr.bf16.mxu0 %v10567_v60 }
 0x13a   :  { %1064 = vmatpush1.bf16.msra.mxu1 %v10440_v41  ;;  %v10590_v41 = vcombine.low %v1694_v34, %v1698_v35  ;;  %v1746_v34 = vld [vmem:[#allocation7 + $0x560] sm:$0xff] }
 0x13b   :  { %1065 = vmatprep.subr.bf16.mxu1 %v10449_v45  ;;  %v267_v45 = vld [vmem:[#allocation2 + $0x278] sm:$0xff] }
 0x13c   :  { %4671 = vmatpush1.bf16.msra.mxu0 %v10566_v62  ;;  %v10421_v52 = vcombine.high %v263_v44, %v267_v45  ;;  %v10420_v54 = vcombine.low %v263_v44, %v267_v45  ;;  %v1766_v45 = vld [vmem:[#allocation7 + $0x600] sm:$0xff] }
 0x13d   :  { %4672 = vmatprep.subr.bf16.mxu0 %v10575_v3 }
 0x13e   :  { %1066 = vmatpush1.bf16.msra.mxu1 %v10448_v49  ;;  %v10727_v49 = vcombine.high %v12776_v42, %v12778_v46 }
 0x13f   :  { %1067 = vmatprep.subr.bf16.mxu1 %v10457_v53  ;;  %v275_v53 = vld [vmem:[#allocation2 + $0x2b8] sm:$0xff] }
 0x140   :  { %4673 = vmatpush1.bf16.msra.mxu0 %v10574_v5  ;;  %v10429_v56 = vcombine.high %v271_v51, %v275_v53  ;;  %v10428_v58 = vcombine.low %v271_v51, %v275_v53  ;;  %v12787_v51 = vld [vmem:[#allocation7 + $0xc20] sm:$0xff] }
 0x141   :  { %4674 = vmatprep.subr.bf16.mxu0 %v10583_v31  ;;  %v1774_v53 = vld [vmem:[#allocation7 + $0x640] sm:$0xff] }
 0x142   :  { %1068 = vmatpush1.bf16.msra.mxu1 %v10456_v57  ;;  %v283_v57 = vld [vmem:[#allocation2 + $0x2f8] sm:$0xff] }
 0x143   :  { %1069 = vmatprep.subr.bf16.mxu1 %v10465_v61  ;;  %v10437_v60 = vcombine.high %v279_v55, %v283_v57  ;;  %v291_v61 = vld [vmem:[#allocation2 + $0x338] sm:$0xff]  ;;  %v10436_v62 = vcombine.low %v279_v55, %v283_v57 }
 0x144   :  { %4675 = vmatpush1.bf16.msra.mxu0 %v10582_v33  ;;  %v10445_v0 = vcombine.high %v287_v59, %v291_v61  ;;  %v10444_v3 = vcombine.low %v287_v59, %v291_v61  ;;  %v1742_v33 = vld [vmem:[#allocation7 + $0x540] sm:$0xff] }
 0x145   :  { %4676 = vmatprep.subr.bf16.mxu0 %v10591_v39  ;;  %v10639_v35 = vcombine.high %v1742_v33, %v1746_v34  ;;  %v10638_v38 = vcombine.low %v1742_v33, %v1746_v34  ;;  %v1786_v59 = vld [vmem:[#allocation7 + $0x6a0] sm:$0xff] }
 0x146   :  { %1070 = vmatpush1.bf16.msra.mxu1 %v10464_v63  ;;  %v295_v63 = vld [vmem:[#allocation2 + $0x358] sm:$0xff] }
 0x147   :  { %1121 = vmatprep.subr.bf16.mxu1 %v10349_v4  ;;  %v303_v4 = vld [vmem:[#allocation2 + $0x398] sm:$0xff]  ;;  %v10453_v5 = vcombine.high %v295_v63, %v299_v1  ;;  %v10452_v7 = vcombine.low %v295_v63, %v299_v1  ;;  %v1794_v63 = vld [vmem:[#allocation7 + $0x6e0] sm:$0xff] }
 0x148   :  { %4677 = vmatpush1.bf16.msra.mxu0 %v10590_v41  ;;  %v1762_v41 = vld [vmem:[#allocation7 + $0x5e0] sm:$0xff] }
 0x149   :  { %1072 = vmatmul.mubr.bf16.vlgmr.msra.gmra.mrb[4].mxu1 %v12769_v2  ;;  %4728 = vmatprep.subr.bf16.mxu0 %v10727_v49 }
 0x14a   :  { %1122 = vmatpush1.bf16.msra.mxu1 %v10348_v6  ;;  %1153 = vmatprep.mubr.bf16.mxu1 %v12762_v18  ;;  %v10389_v18 = vcombine.high %v231_v20, %v235_v21  ;;  %v307_v6 = vld [vmem:[#allocation2 + $0x3b8] sm:$0xff] }
 0x14b   :  { %1123 = vmatprep.subr.bf16.mxu1 %v10357_v9  ;;  %v10461_v8 = vcombine.high %v303_v4, %v307_v6  ;;  %v311_v9 = vld [vmem:[#allocation2 + $0x3d8] sm:$0xff]  ;;  %v10460_v11 = vcombine.low %v303_v4, %v307_v6  ;;  %v1802_v4 = vld [vmem:[#allocation7 + $0x720] sm:$0xff] }
 0x14e   :  { %1124 = vmatpush1.bf16.msra.mxu1 %v10356_v10  ;;  %v315_v10 = vld [vmem:[#allocation2 + $0x3f8] sm:$0xff] }
 0x14f   :  { %1125 = vmatprep.subr.bf16.mxu1 %v10365_v13  ;;  %v10469_v12 = vcombine.high %v311_v9, %v315_v10  ;;  %v1702_v13 = vld [vmem:[#allocation7 + $0x400] sm:$0xff]  ;;  %v10468_v15 = vcombine.low %v311_v9, %v315_v10 }
 0x152   :  { %1126 = vmatpush1.bf16.msra.mxu1 %v10364_v14  ;;  %v1706_v14 = vld [vmem:[#allocation7 + $0x420] sm:$0xff] }
 0x153   :  { %1127 = vmatprep.subr.bf16.mxu1 %v10373_v17  ;;  %v10599_v16 = vcombine.high %v1702_v13, %v1706_v14  ;;  %v1710_v17 = vld [vmem:[#allocation7 + $0x440] sm:$0xff]  ;;  %v10598_v20 = vcombine.low %v1702_v13, %v1706_v14 }
 0x156   :  { %1128 = vmatpush1.bf16.msra.mxu1 %v10372_v19  ;;  %v1714_v19 = vld [vmem:[#allocation7 + $0x460] sm:$0xff] }
 0x157   :  { %1129 = vmatprep.subr.bf16.mxu1 %v10381_v22  ;;  %v10607_v21 = vcombine.high %v1710_v17, %v1714_v19  ;;  %v1718_v22 = vld [vmem:[#allocation7 + $0x480] sm:$0xff]  ;;  %v10606_v24 = vcombine.low %v1710_v17, %v1714_v19 }
 0x15a   :  { %1130 = vmatpush1.bf16.msra.mxu1 %v10380_v23  ;;  %v1722_v23 = vld [vmem:[#allocation7 + $0x4a0] sm:$0xff] }
 0x15b   :  { %1131 = vmatprep.subr.bf16.mxu1 %v10389_v18  ;;  %v10615_v25 = vcombine.high %v1718_v22, %v1722_v23  ;;  %v1726_v18 = vld [vmem:[#allocation7 + $0x4c0] sm:$0xff]  ;;  %v10614_v27 = vcombine.low %v1718_v22, %v1722_v23  ;;  %v318_v22 = vlaneseq }
 0x15c   :  { %v10622_v31 = vcombine.low %v1726_v18, %v1730_v26 }
 0x15d   :  { %v12793_v23 = vshrl.u32 %v318_v22, 7  ;;  %v1910_v22 = vld [vmem:[#allocation7 + $0xa80] sm:$0xff] }
 0x15e   :  { %1132 = vmatpush1.bf16.msra.mxu1 %v10388_v28  ;;  %v10623_v28 = vcombine.high %v1726_v18, %v1730_v26 }
 0x15f   :  { %1133 = vmatprep.subr.bf16.mxu1 %v10397_v32  ;;  %v10631_v32 = vcombine.high %v1734_v29, %v1738_v30  ;;  %v12801_v18 = vsub.s32 1, %v12793_v23 }
 0x162   :  { %1134 = vmatpush1.bf16.msra.mxu1 %v10396_v36  ;;  %v1750_v36 = vld [vmem:[#allocation7 + $0x580] sm:$0xff] }
 0x163   :  { %1135 = vmatprep.subr.bf16.mxu1 %v10405_v40  ;;  %v10647_v39 = vcombine.high %v1750_v36, %v1754_v37  ;;  %v1758_v40 = vld [vmem:[#allocation7 + $0x5c0] sm:$0xff] }
 0x164   :  { %v10655_v44 = vcombine.high %v1758_v40, %v1762_v41  ;;  %v10654_v49 = vcombine.low %v1758_v40, %v1762_v41  ;;  %v1846_v41 = vld [vmem:[#allocation7 + $0x880] sm:$0xff] }
 0x166   :  { %1136 = vmatpush1.bf16.msra.mxu1 %v10404_v43  ;;  %v10646_v43 = vcombine.low %v1750_v36, %v1754_v37  ;;  %v1842_v36 = vld [vmem:[#allocation7 + $0x860] sm:$0xff] }
 0x167   :  { %1137 = vmatprep.subr.bf16.mxu1 %v10413_v47  ;;  %v1770_v47 = vld [vmem:[#allocation7 + $0x620] sm:$0xff] }
 0x16a   :  { %1138 = vmatpush1.bf16.msra.mxu1 %v10412_v50  ;;  %v12785_v50 = vld [vmem:[#allocation7 + $0xc00] sm:$0xff] }
 0x16b   :  { %1139 = vmatprep.subr.bf16.mxu1 %v10421_v52  ;;  %v10663_v52 = vcombine.high %v1766_v45, %v1770_v47  ;;  %v10854_v55 = vcombine.low %v12785_v50, %v12787_v51 }
 0x16e   :  { %1140 = vmatpush1.bf16.msra.mxu1 %v10420_v54  ;;  %v1778_v54 = vld [vmem:[#allocation7 + $0x660] sm:$0xff] }
 0x16f   :  { %1141 = vmatprep.subr.bf16.mxu1 %v10429_v56  ;;  %v10662_v56 = vcombine.low %v1766_v45, %v1770_v47  ;;  %v10671_v57 = vcombine.high %v1774_v53, %v1778_v54 }
 0x172   :  { %1142 = vmatpush1.bf16.msra.mxu1 %v10428_v58  ;;  %v1782_v58 = vld [vmem:[#allocation7 + $0x680] sm:$0xff] }
 0x173   :  { %1143 = vmatprep.subr.bf16.mxu1 %v10437_v60  ;;  %v10670_v60 = vcombine.low %v1774_v53, %v1778_v54  ;;  %v10679_v61 = vcombine.high %v1782_v58, %v1786_v59  ;;  %v1858_v53 = vld [vmem:[#allocation7 + $0x8e0] sm:$0xff] }
 0x176   :  { %1144 = vmatpush1.bf16.msra.mxu1 %v10436_v62  ;;  %v1790_v62 = vld [vmem:[#allocation7 + $0x6c0] sm:$0xff] }
 0x177   :  { %1145 = vmatprep.subr.bf16.mxu1 %v10445_v0  ;;  %v10678_v0 = vcombine.low %v1782_v58, %v1786_v59  ;;  %v10687_v1 = vcombine.high %v1790_v62, %v1794_v63 }
 0x17a   :  { %1146 = vmatpush1.bf16.msra.mxu1 %v10444_v3  ;;  %v1798_v3 = vld [vmem:[#allocation7 + $0x700] sm:$0xff] }
 0x17b   :  { %1147 = vmatprep.subr.bf16.mxu1 %v10453_v5  ;;  %v10686_v5 = vcombine.low %v1790_v62, %v1794_v63  ;;  %v10695_v6 = vcombine.high %v1798_v3, %v1802_v4  ;;  %v10694_v9 = vcombine.low %v1798_v3, %v1802_v4  ;;  %v1862_v62 = vld [vmem:[#allocation7 + $0x900] sm:$0xff] }
 0x17c   :  { %v1866_v63 = vld [vmem:[#allocation7 + $0x920] sm:$0xff] }
 0x17d   :  { %v10758_v3 = vcombine.low %v1862_v62, %v1866_v63 }
 0x17e   :  { %1148 = vmatpush1.bf16.msra.mxu1 %v10452_v7  ;;  %v1806_v7 = vld [vmem:[#allocation7 + $0x740] sm:$0xff] }
 0x17f   :  { %1149 = vmatprep.subr.bf16.mxu1 %v10461_v8  ;;  %v1810_v8 = vld [vmem:[#allocation7 + $0x760] sm:$0xff] }
 0x180   :  { %v10703_v10 = vcombine.high %v1806_v7, %v1810_v8  ;;  %v10702_v13 = vcombine.low %v1806_v7, %v1810_v8 }
 0x182   :  { %1150 = vmatpush1.bf16.msra.mxu1 %v10460_v11  ;;  %v1814_v11 = vld [vmem:[#allocation7 + $0x780] sm:$0xff] }
 0x183   :  { %1151 = vmatprep.subr.bf16.mxu1 %v10469_v12  ;;  %v1818_v12 = vld [vmem:[#allocation7 + $0x7a0] sm:$0xff] }
 0x184   :  { %v10711_v14 = vcombine.high %v1814_v11, %v1818_v12  ;;  %v10710_v17 = vcombine.low %v1814_v11, %v1818_v12 }
 0x186   :  { %1152 = vmatpush1.bf16.msra.mxu1 %v10468_v15  ;;  %v1822_v15 = vld [vmem:[#allocation7 + $0x7c0] sm:$0xff] }
 0x187   :  { %4687 = vmatprep.subr.bf16.mxu1 %v10599_v16  ;;  %v1826_v16 = vld [vmem:[#allocation7 + $0x7e0] sm:$0xff] }
 0x188   :  { %v10719_v19 = vcombine.high %v1822_v15, %v1826_v16 }
 0x189   :  { %1154 = vmatmul.mubr.bf16.vlgmr.msra.gmra.mrb[8].mxu1 %v12769_v2  ;;  %v10630_v2 = vcombine.low %v1734_v29, %v1738_v30 }
 0x18a   :  { %4688 = vmatpush1.bf16.msra.mxu1 %v10598_v20  ;;  %v10718_v20 = vcombine.low %v1822_v15, %v1826_v16 }
 0x18b   :  { %4689 = vmatprep.subr.bf16.mxu1 %v10607_v21  ;;  %v10855_v21 = vcombine.high %v12785_v50, %v12787_v51 }
 0x18e   :  { %4690 = vmatpush1.bf16.msra.mxu1 %v10606_v24  ;;  %v12796_v24 = vsub.s32 0, %v12793_v23 }
 0x18f   :  { %4691 = vmatprep.subr.bf16.mxu1 %v10615_v25  ;;  %v12798_v25 = vld [vmem:[#allocation4] sm:$0xff] }
 0x190   :  { %v321_v26 = vrot.slane %v12798_v25, %v12796_v24 }
 0x192   :  { %4692 = vmatpush1.bf16.msra.mxu1 %v10614_v27  ;;  %v325_v27 = vrot.slane %v12798_v25, %v12801_v18 }
 0x193   :  { %4693 = vmatprep.subr.bf16.mxu1 %v10623_v28 }
 0x196   :  { %4694 = vmatpush1.bf16.msra.mxu1 %v10622_v31 }
 0x197   :  { %4695 = vmatprep.subr.bf16.mxu1 %v10631_v32 }
 0x19a   :  { %4696 = vmatpush1.bf16.msra.mxu1 %v10630_v2 }
 0x19b   :  { %4697 = vmatprep.subr.bf16.mxu1 %v10639_v35  ;;  %v1838_v35 = vld [vmem:[#allocation7 + $0x840] sm:$0xff] }
 0x19c   :  { %v10735_v40 = vcombine.high %v1838_v35, %v1842_v36  ;;  %v10734_v45 = vcombine.low %v1838_v35, %v1842_v36  ;;  %v1934_v36 = vld [vmem:[#allocation7 + $0xb40] sm:$0xff] }
 0x19e   :  { %4698 = vmatpush1.bf16.msra.mxu1 %v10638_v38  ;;  %v340_v38 = vsub.s32 5, %v12793_v23 }
 0x19f   :  { %4699 = vmatprep.subr.bf16.mxu1 %v10647_v39 }
 0x1a2   :  { %4700 = vmatpush1.bf16.msra.mxu1 %v10646_v43  ;;  %v1850_v43 = vld [vmem:[#allocation7 + $0x8a0] sm:$0xff] }
 0x1a3   :  { %4701 = vmatprep.subr.bf16.mxu1 %v10655_v44  ;;  %v341_v44 = vrot.slane %v12798_v25, %v340_v38  ;;  %v10743_v47 = vcombine.high %v1846_v41, %v1850_v43  ;;  %v10742_v58 = vcombine.low %v1846_v41, %v1850_v43  ;;  %v336_v41 = vsub.s32 4, %v12793_v23 }
 0x1a6   :  { %4702 = vmatpush1.bf16.msra.mxu1 %v10654_v49 }
 0x1a7   :  { %4703 = vmatprep.subr.bf16.mxu1 %v10663_v52  ;;  %v1854_v52 = vld [vmem:[#allocation7 + $0x8c0] sm:$0xff] }
 0x1a8   :  { %v10750_v46 = vcombine.low %v1854_v52, %v1858_v53 }
 0x1aa   :  { %4704 = vmatpush1.bf16.msra.mxu1 %v10662_v56 }
 0x1ab   :  { %4705 = vmatprep.subr.bf16.mxu1 %v10671_v57 }
 0x1ae   :  { %4706 = vmatpush1.bf16.msra.mxu1 %v10670_v60  ;;  %v10751_v60 = vcombine.high %v1854_v52, %v1858_v53  ;;  %v337_v52 = vrot.slane %v12798_v25, %v336_v41  ;;  %v12830_v53 = vsub.s32 2, %v12793_v23 }
 0x1af   :  { %4707 = vmatprep.subr.bf16.mxu1 %v10679_v61 }
 0x1b2   :  { %4708 = vmatpush1.bf16.msra.mxu1 %v10678_v0  ;;  %v1870_v0 = vld [vmem:[#allocation7 + $0x940] sm:$0xff] }
 0x1b3   :  { %4709 = vmatprep.subr.bf16.mxu1 %v10687_v1  ;;  %v1874_v1 = vld [vmem:[#allocation7 + $0x960] sm:$0xff] }
 0x1b4   :  { %v10767_v4 = vcombine.high %v1870_v0, %v1874_v1  ;;  %v10766_v7 = vcombine.low %v1870_v0, %v1874_v1  ;;  %v1575_v0 = vld [vmem:[#allocation7 + $0x8] sm:$0xff] }
 0x1b5   :  { %v1579_v1 = vld [vmem:[#allocation7 + $0x28] sm:$0xff] }
 0x1b6   :  { %4710 = vmatpush1.bf16.msra.mxu1 %v10686_v5  ;;  %v1878_v5 = vld [vmem:[#allocation7 + $0x980] sm:$0xff] }
 0x1b7   :  { %4711 = vmatprep.subr.bf16.mxu1 %v10695_v6  ;;  %v1882_v6 = vld [vmem:[#allocation7 + $0x9a0] sm:$0xff] }
 0x1b8   :  { %v10775_v8 = vcombine.high %v1878_v5, %v1882_v6  ;;  %v10774_v11 = vcombine.low %v1878_v5, %v1882_v6 }
 0x1ba   :  { %4712 = vmatpush1.bf16.msra.mxu1 %v10694_v9  ;;  %v1886_v9 = vld [vmem:[#allocation7 + $0x9c0] sm:$0xff] }
 0x1bb   :  { %4713 = vmatprep.subr.bf16.mxu1 %v10703_v10  ;;  %v1890_v10 = vld [vmem:[#allocation7 + $0x9e0] sm:$0xff] }
 0x1bc   :  { %v10783_v12 = vcombine.high %v1886_v9, %v1890_v10  ;;  %v10782_v15 = vcombine.low %v1886_v9, %v1890_v10  ;;  %v10473_v10 = vcombine.high %v1575_v0, %v1579_v1 }
 0x1be   :  { %4714 = vmatpush1.bf16.msra.mxu1 %v10702_v13  ;;  %v1894_v13 = vld [vmem:[#allocation7 + $0xa00] sm:$0xff] }
 0x1bf   :  { %4715 = vmatprep.subr.bf16.mxu1 %v10711_v14  ;;  %v1898_v14 = vld [vmem:[#allocation7 + $0xa20] sm:$0xff] }
 0x1c0   :  { %v10791_v16 = vcombine.high %v1894_v13, %v1898_v14 }
 0x1c2   :  { %4716 = vmatpush1.bf16.msra.mxu1 %v10710_v17  ;;  %v1902_v17 = vld [vmem:[#allocation7 + $0xa40] sm:$0xff] }
 0x1c3   :  { %4717 = vmatprep.subr.bf16.mxu1 %v10719_v19  ;;  %v1906_v19 = vld [vmem:[#allocation7 + $0xa60] sm:$0xff] }
 0x1c6   :  { %4718 = vmatpush1.bf16.msra.mxu1 %v10718_v20  ;;  %v10790_v20 = vcombine.low %v1894_v13, %v1898_v14  ;;  %v1970_v13 = vld [vmem:[#allocation7 + $0xc60] sm:$0xff] }
 0x1c7   :  { %4769 = vmatprep.subr.bf16.mxu1 %v10855_v21  ;;  %v10799_v21 = vcombine.high %v1902_v17, %v1906_v19 }
 0x1dc   :  { %v1032_v28 = vpop.f32.mrb[0].mxu1 }
 0x1dd   :  { %v1033_v29 = vadd.f32 %v1032_v28, %v321_v26  ;;  %v1034_v30 = vpop.f32.mrb[1].mxu1  ;;  %v1914_v26 = vld [vmem:[#allocation7 + $0xaa0] sm:$0xff] }
 0x1de   :  { %v1035_v31 = vadd.f32 %v1034_v30, %v325_v27  ;;  %v1036_v32 = vpop.f32.mrb[2].mxu1  ;;  %v12820_v49 = vpop.f32.mrb[0].mxu0  ;;  %v10798_v27 = vcombine.low %v1902_v17, %v1906_v19  ;;  %v10807_v28 = vcombine.high %v1910_v22, %v1914_v26  ;;  %v1922_v30 = vld [vmem:[#allocation7 + $0xae0] sm:$0xff]  ;;  %v10472_v19 = vcombine.low %v1575_v0, %v1579_v1 }
 0x1df   :  { %v1162_v33 = vmax.f32 %v1033_v29, 0.0  ;;  %v1037_v34 = vpop.f32.mrb[3].mxu1  ;;  %v1116_v54 = vpop.f32.mrb[1].mxu0  ;;  %v1918_v29 = vld [vmem:[#allocation7 + $0xac0] sm:$0xff] }
 0x1e0   :  { %v1163_v2 = vmax.f32 %v1035_v31, 0.0  ;;  %v1117_v56 = vadd.f32 %v1116_v54, %v341_v44  ;;  %v1118_v57 = vpop.f32.mrb[2].mxu0  ;;  %v10806_v31 = vcombine.low %v1910_v22, %v1914_v26  ;;  %v10815_v32 = vcombine.high %v1918_v29, %v1922_v30  ;;  %v1930_v34 = vld [vmem:[#allocation7 + $0xb20] sm:$0xff] }
 0x1e1   :  { %v12807_v37 = vpack.c.bf16 %v1162_v33, %v1162_v33  ;;  %v1119_v59 = vpop.f32.mrb[3].mxu0  ;;  %v1926_v33 = vld [vmem:[#allocation7 + $0xb00] sm:$0xff] }
 0x1e2   :  { %v12810_v39 = vpack.c.bf16 %v1163_v2, %v1163_v2  ;;  %v1167_v61 = vmax.f32 %v1117_v56, 0.0  ;;  %v10814_v2 = vcombine.low %v1918_v29, %v1922_v30  ;;  %v10823_v35 = vcombine.high %v1926_v33, %v1930_v34  ;;  %v1954_v59 = vld [vmem:[#allocation7 + $0xbe0] sm:$0xff]  ;;  %v1595_v29 = vld [vmem:[#allocation7 + $0xa8] sm:$0xff] }
 0x1e3   :  { %v10822_v43 = vcombine.low %v1926_v33, %v1930_v34  ;;  %v12833_v56 = vsub.s32 3, %v12793_v23  ;;  %v1974_v22 = vld [vmem:[#allocation7 + $0xc80] sm:$0xff] }
 0x1e4   :  { %4678 = vmatprep.mubr.bf16.mxu0 %v12810_v39  ;;  %v12822_v42 = vpack.c.bf16 %v1167_v61, %v1167_v61  ;;  %v329_v61 = vrot.slane %v12798_v25, %v12830_v53  ;;  %v1982_v34 = vld [vmem:[#allocation7 + $0xcc0] sm:$0xff] }
 0x1e5   :  { %4679 = vmatmul.mubr.bf16.vlgmr.msra.gmra.mrb[4].mxu0 %v12807_v37  ;;  %v2006_v1 = vld [vmem:[#allocation7 + $0xd80] sm:$0xff] }
 0x1e6   :  { %4729 = vmatpush1.bf16.msra.mxu0 %v10726_v48  ;;  %v10759_v48 = vcombine.high %v1862_v62, %v1866_v63  ;;  %4760 = vmatprep.mubr.bf16.mxu0 %v12822_v42  ;;  %v333_v63 = vrot.slane %v12798_v25, %v12833_v56 }
 0x1e7   :  { %4730 = vmatprep.subr.bf16.mxu0 %v10735_v40  ;;  %v1938_v40 = vld [vmem:[#allocation7 + $0xb60] sm:$0xff] }
 0x1e8   :  { %v10831_v44 = vcombine.high %v1934_v36, %v1938_v40  ;;  %v10830_v54 = vcombine.low %v1934_v36, %v1938_v40  ;;  %v1603_v36 = vld [vmem:[#allocation7 + $0xe8] sm:$0xff] }
 0x1ea   :  { %4731 = vmatpush1.bf16.msra.mxu0 %v10734_v45  ;;  %v1942_v45 = vld [vmem:[#allocation7 + $0xb80] sm:$0xff] }
 0x1eb   :  { %4732 = vmatprep.subr.bf16.mxu0 %v10743_v47  ;;  %v1946_v47 = vld [vmem:[#allocation7 + $0xba0] sm:$0xff] }
 0x1ec   :  { %v10839_v57 = vcombine.high %v1942_v45, %v1946_v47  ;;  %v10838_v62 = vcombine.low %v1942_v45, %v1946_v47  ;;  %v1607_v45 = vld [vmem:[#allocation7 + $0x108] sm:$0xff] }
 0x1ed   :  { %v1611_v47 = vld [vmem:[#allocation7 + $0x128] sm:$0xff] }
 0x1ee   :  { %4733 = vmatpush1.bf16.msra.mxu0 %v10742_v58  ;;  %v1950_v58 = vld [vmem:[#allocation7 + $0xbc0] sm:$0xff] }
 0x1ef   :  { %4734 = vmatprep.subr.bf16.mxu0 %v10751_v60  ;;  %v1115_v60 = vadd.f32 %v12820_v49, %v337_v52  ;;  %v10846_v49 = vcombine.low %v1950_v58, %v1954_v59 }
 0x1f2   :  { %4735 = vmatpush1.bf16.msra.mxu0 %v10750_v46  ;;  %v10847_v46 = vcombine.high %v1950_v58, %v1954_v59  ;;  %v10505_v58 = vcombine.high %v1607_v45, %v1611_v47  ;;  %v1998_v59 = vld [vmem:[#allocation7 + $0xd40] sm:$0xff] }
 0x1f3   :  { %4736 = vmatprep.subr.bf16.mxu0 %v10759_v48 }
 0x1f6   :  { %4737 = vmatpush1.bf16.msra.mxu0 %v10758_v3  ;;  %v1166_v3 = vmax.f32 %v1115_v60, 0.0  ;;  %v2002_v60 = vld [vmem:[#allocation7 + $0xd60] sm:$0xff] }
 0x1f7   :  { %4738 = vmatprep.subr.bf16.mxu0 %v10767_v4 }
 0x1f8   :  { %v12840_v14 = vpack.c.bf16 %v1166_v3, %v1166_v3  ;;  %v2010_v3 = vld [vmem:[#allocation7 + $0xda0] sm:$0xff] }
 0x1fa   :  { %4739 = vmatpush1.bf16.msra.mxu0 %v10766_v7 }
 0x1fb   :  { %4740 = vmatprep.subr.bf16.mxu0 %v10775_v8 }
 0x1fe   :  { %4741 = vmatpush1.bf16.msra.mxu0 %v10774_v11 }
 0x1ff   :  { %4742 = vmatprep.subr.bf16.mxu0 %v10783_v12  ;;  %v1966_v12 = vld [vmem:[#allocation7 + $0xc40] sm:$0xff] }
 0x200   :  { %v10862_v30 = vcombine.low %v1966_v12, %v1970_v13 }
 0x202   :  { %4743 = vmatpush1.bf16.msra.mxu0 %v10782_v15  ;;  %v1583_v15 = vld [vmem:[#allocation7 + $0x48] sm:$0xff] }
 0x203   :  { %4744 = vmatprep.subr.bf16.mxu0 %v10791_v16  ;;  %v1587_v16 = vld [vmem:[#allocation7 + $0x68] sm:$0xff] }
 0x204   :  { %v10481_v26 = vcombine.high %v1583_v15, %v1587_v16 }
 0x206   :  { %4745 = vmatpush1.bf16.msra.mxu0 %v10790_v20 }
 0x207   :  { %4746 = vmatprep.subr.bf16.mxu0 %v10799_v21  ;;  %v10863_v21 = vcombine.high %v1966_v12, %v1970_v13  ;;  %v1635_v12 = vld [vmem:[#allocation7 + $0x1e8] sm:$0xff]  ;;  %v10902_v13 = vcombine.low %v2006_v1, %v2010_v3 }
 0x20a   :  { %4747 = vmatpush1.bf16.msra.mxu0 %v10798_v27  ;;  %v1978_v27 = vld [vmem:[#allocation7 + $0xca0] sm:$0xff] }
 0x20b   :  { %4748 = vmatprep.subr.bf16.mxu0 %v10807_v28  ;;  %v1591_v28 = vld [vmem:[#allocation7 + $0x88] sm:$0xff]  ;;  %v10870_v40 = vcombine.low %v1974_v22, %v1978_v27 }
 0x20c   :  { %v10489_v33 = vcombine.high %v1591_v28, %v1595_v29 }
 0x20e   :  { %4749 = vmatpush1.bf16.msra.mxu0 %v10806_v31  ;;  %v10480_v31 = vcombine.low %v1583_v15, %v1587_v16 }
 0x20f   :  { %4750 = vmatprep.subr.bf16.mxu0 %v10815_v32  ;;  %v10871_v32 = vcombine.high %v1974_v22, %v1978_v27  ;;  %v2026_v22 = vld [vmem:[#allocation7 + $0xe20] sm:$0xff]  ;;  %v1643_v27 = vld [vmem:[#allocation7 + $0x228] sm:$0xff] }
 0x212   :  { %4751 = vmatpush1.bf16.msra.mxu0 %v10814_v2  ;;  %v1986_v2 = vld [vmem:[#allocation7 + $0xce0] sm:$0xff] }
 0x213   :  { %4752 = vmatprep.subr.bf16.mxu0 %v10823_v35  ;;  %v1599_v35 = vld [vmem:[#allocation7 + $0xc8] sm:$0xff]  ;;  %v10879_v50 = vcombine.high %v1982_v34, %v1986_v2  ;;  %v10878_v52 = vcombine.low %v1982_v34, %v1986_v2 }
 0x214   :  { %v10497_v51 = vcombine.high %v1599_v35, %v1603_v36  ;;  %v1647_v34 = vld [vmem:[#allocation7 + $0x248] sm:$0xff] }
 0x215   :  { %v1651_v2 = vld [vmem:[#allocation7 + $0x268] sm:$0xff] }
 0x216   :  { %4753 = vmatpush1.bf16.msra.mxu0 %v10822_v43  ;;  %v10488_v43 = vcombine.low %v1591_v28, %v1595_v29 }
 0x217   :  { %4754 = vmatprep.subr.bf16.mxu0 %v10831_v44  ;;  %v1994_v44 = vld [vmem:[#allocation7 + $0xd20] sm:$0xff] }
 0x21a   :  { %4755 = vmatpush1.bf16.msra.mxu0 %v10830_v54  ;;  %v10496_v54 = vcombine.low %v1599_v35, %v1603_v36 }
 0x21b   :  { %4756 = vmatprep.subr.bf16.mxu0 %v10839_v57 }
 0x21c   :  { %v1073_v48 = vpop.f32.mrb[4].mxu1 }
 0x21d   :  { %v1074_v4 = vadd.f32 %v1073_v48, %v329_v61  ;;  %v1075_v5 = vpop.f32.mrb[5].mxu1  ;;  %v1615_v61 = vld [vmem:[#allocation7 + $0x148] sm:$0xff]  ;;  %v10895_v48 = vcombine.high %v1998_v59, %v2002_v60 }
 0x21e   :  { %v1076_v6 = vadd.f32 %v1075_v5, %v333_v63  ;;  %4757 = vmatpush1.bf16.msra.mxu0 %v10838_v62  ;;  %v1077_v7 = vpop.f32.mrb[6].mxu1  ;;  %v1619_v62 = vld [vmem:[#allocation7 + $0x168] sm:$0xff] }
 0x21f   :  { %v1164_v8 = vmax.f32 %v1074_v4, 0.0  ;;  %v1078_v9 = vpop.f32.mrb[7].mxu1  ;;  %4758 = vmatprep.subr.bf16.mxu0 %v10847_v46  ;;  %v10504_v46 = vcombine.low %v1607_v45, %v1611_v47  ;;  %v10513_v0 = vcombine.high %v1615_v61, %v1619_v62  ;;  %v1623_v4 = vld [vmem:[#allocation7 + $0x188] sm:$0xff]  ;;  %v10512_v7 = vcombine.low %v1615_v61, %v1619_v62 }
 0x220   :  { %v1165_v11 = vmax.f32 %v1076_v6, 0.0  ;;  %v1627_v5 = vld [vmem:[#allocation7 + $0x1a8] sm:$0xff]  ;;  %v10894_v6 = vcombine.low %v1998_v59, %v2002_v60  ;;  %v2014_v9 = vld [vmem:[#allocation7 + $0xdc0] sm:$0xff]  ;;  %v10544_v47 = vcombine.low %v1647_v34, %v1651_v2 }
 0x221   :  { %v12844_v20 = vpack.c.bf16 %v1164_v8, %v1164_v8  ;;  %v10521_v8 = vcombine.high %v1623_v4, %v1627_v5  ;;  %v10520_v15 = vcombine.low %v1623_v4, %v1627_v5  ;;  %v1663_v59 = vld [vmem:[#allocation7 + $0x2c8] sm:$0xff] }
 0x222   :  { %v12842_v17 = vpack.c.bf16 %v1165_v11, %v1165_v11  ;;  %4759 = vmatpush1.bf16.msra.mxu0 %v10846_v49  ;;  %v10903_v49 = vcombine.high %v2006_v1, %v2010_v3  ;;  %v1631_v11 = vld [vmem:[#allocation7 + $0x1c8] sm:$0xff] }
 0x223   :  { %4810 = vmatprep.subr.bf16.mxu0 %v10473_v10  ;;  %v2018_v10 = vld [vmem:[#allocation7 + $0xde0] sm:$0xff]  ;;  %v10528_v29 = vcombine.low %v1631_v11, %v1635_v12  ;;  %v1667_v60 = vld [vmem:[#allocation7 + $0x2e8] sm:$0xff] }
 0x224   :  { %4719 = vmatprep.mubr.bf16.mxu1 %v12842_v17  ;;  %v10911_v16 = vcombine.high %v2014_v9, %v2018_v10  ;;  %v10910_v28 = vcombine.low %v2014_v9, %v2018_v10  ;;  %v1671_v1 = vld [vmem:[#allocation7 + $0x308] sm:$0xff]  ;;  %v10560_v5 = vcombine.low %v1663_v59, %v1667_v60 }
 0x225   :  { %4761 = vmatmul.mubr.bf16.vlgmr.msra.gmra.mrb[8].mxu0 %v12840_v14  ;;  %4720 = vmatmul.mubr.bf16.vlgmr.msra.gmra.mrb[12].mxu1 %v12844_v20  ;;  %v1675_v3 = vld [vmem:[#allocation7 + $0x328] sm:$0xff] }
 0x226   :  { %4770 = vmatpush1.bf16.msra.mxu1 %v10854_v55  ;;  %4811 = vmatpush1.bf16.msra.mxu0 %v10472_v19  ;;  %v1990_v55 = vld [vmem:[#allocation7 + $0xd00] sm:$0xff]  ;;  %v10529_v19 = vcombine.high %v1631_v11, %v1635_v12  ;;  %v1679_v9 = vld [vmem:[#allocation7 + $0x348] sm:$0xff]  ;;  %v10568_v12 = vcombine.low %v1671_v1, %v1675_v3 }
 0x227   :  { %4842 = vmatprep.mubr.bf16.mxu0 %v12810_v39  ;;  %4771 = vmatprep.subr.bf16.mxu1 %v10863_v21  ;;  %v10887_v57 = vcombine.high %v1990_v55, %v1994_v44  ;;  %v10886_v63 = vcombine.low %v1990_v55, %v1994_v44  ;;  %v2022_v21 = vld [vmem:[#allocation7 + $0xe00] sm:$0xff]  ;;  %v1655_v55 = vld [vmem:[#allocation7 + $0x288] sm:$0xff] }
 0x228   :  { %4812 = vmatprep.subr.bf16.mxu0 %v10481_v26  ;;  %v1639_v26 = vld [vmem:[#allocation7 + $0x208] sm:$0xff]  ;;  %v10918_v35 = vcombine.low %v2022_v21, %v2026_v22 }
 0x229   :  { %v10536_v36 = vcombine.low %v1639_v26, %v1643_v27  ;;  %v1659_v44 = vld [vmem:[#allocation7 + $0x2a8] sm:$0xff] }
 0x22a   :  { %4772 = vmatpush1.bf16.msra.mxu1 %v10862_v30  ;;  %4813 = vmatpush1.bf16.msra.mxu0 %v10480_v31  ;;  %v10919_v30 = vcombine.high %v2022_v21, %v2026_v22  ;;  %v10537_v31 = vcombine.high %v1639_v26, %v1643_v27  ;;  %v10552_v62 = vcombine.low %v1655_v55, %v1659_v44  ;;  %v1683_v10 = vld [vmem:[#allocation7 + $0x368] sm:$0xff]  ;;  %v344_v26 = vsub.s32 6, %v12793_v23 }
 0x22b   :  { %4773 = vmatprep.subr.bf16.mxu1 %v10871_v32  ;;  %4814 = vmatprep.subr.bf16.mxu0 %v10489_v33  ;;  %v2030_v32 = vld [vmem:[#allocation7 + $0xe40] sm:$0xff]  ;;  %v1687_v21 = vld [vmem:[#allocation7 + $0x388] sm:$0xff] }
 0x22c   :  { %v2034_v33 = vld [vmem:[#allocation7 + $0xe60] sm:$0xff]  ;;  %v1691_v22 = vld [vmem:[#allocation7 + $0x3a8] sm:$0xff] }
 0x22d   :  { %v10926_v45 = vcombine.low %v2030_v32, %v2034_v33 }
 0x22e   :  { %4774 = vmatpush1.bf16.msra.mxu1 %v10870_v40  ;;  %4815 = vmatpush1.bf16.msra.mxu0 %v10488_v43  ;;  %v10927_v40 = vcombine.high %v2030_v32, %v2034_v33  ;;  %v10545_v43 = vcombine.high %v1647_v34, %v1651_v2  ;;  %v2078_v32 = vld [vmem:[#allocation7 + $0xfc0] sm:$0xff]  ;;  %v1695_v34 = vld [vmem:[#allocation7 + $0x3c8] sm:$0xff] }
 0x22f   :  { %4775 = vmatprep.subr.bf16.mxu1 %v10879_v50  ;;  %4816 = vmatprep.subr.bf16.mxu0 %v10497_v51  ;;  %v2038_v50 = vld [vmem:[#allocation7 + $0xe80] sm:$0xff]  ;;  %v1699_v2 = vld [vmem:[#allocation7 + $0x3e8] sm:$0xff] }
 0x230   :  { %v2042_v51 = vld [vmem:[#allocation7 + $0xea0] sm:$0xff] }
 0x231   :  { %v10934_v61 = vcombine.low %v2038_v50, %v2042_v51  ;;  %v2082_v33 = vld [vmem:[#allocation7 + $0xfe0] sm:$0xff] }
 0x232   :  { %4776 = vmatpush1.bf16.msra.mxu1 %v10878_v52  ;;  %4817 = vmatpush1.bf16.msra.mxu0 %v10496_v54  ;;  %v10935_v52 = vcombine.high %v2038_v50, %v2042_v51  ;;  %v10553_v54 = vcombine.high %v1655_v55, %v1659_v44  ;;  %v10975_v50 = vcombine.high %v2078_v32, %v2082_v33  ;;  %v1703_v55 = vld [vmem:[#allocation7 + $0x408] sm:$0xff] }
 0x233   :  { %4777 = vmatprep.subr.bf16.mxu1 %v10887_v57  ;;  %4818 = vmatprep.subr.bf16.mxu0 %v10505_v58  ;;  %v2046_v57 = vld [vmem:[#allocation7 + $0xec0] sm:$0xff]  ;;  %v10593_v51 = vcombine.high %v1695_v34, %v1699_v2 }
 0x234   :  { %v2050_v58 = vld [vmem:[#allocation7 + $0xee0] sm:$0xff] }
 0x235   :  { %v10942_v4 = vcombine.low %v2046_v57, %v2050_v58 }
 0x236   :  { %4778 = vmatpush1.bf16.msra.mxu1 %v10886_v63  ;;  %4819 = vmatpush1.bf16.msra.mxu0 %v10504_v46  ;;  %v10943_v63 = vcombine.high %v2046_v57, %v2050_v58  ;;  %v10561_v46 = vcombine.high %v1663_v59, %v1667_v60  ;;  %v10974_v60 = vcombine.low %v2078_v32, %v2082_v33 }
 0x237   :  { %4779 = vmatprep.subr.bf16.mxu1 %v10895_v48  ;;  %4820 = vmatprep.subr.bf16.mxu0 %v10513_v0  ;;  %v2054_v48 = vld [vmem:[#allocation7 + $0xf00] sm:$0xff] }
 0x238   :  { %v2058_v0 = vld [vmem:[#allocation7 + $0xf20] sm:$0xff] }
 0x239   :  { %v10950_v11 = vcombine.low %v2054_v48, %v2058_v0 }
 0x23a   :  { %4780 = vmatpush1.bf16.msra.mxu1 %v10894_v6  ;;  %4821 = vmatpush1.bf16.msra.mxu0 %v10512_v7  ;;  %v10951_v6 = vcombine.high %v2054_v48, %v2058_v0  ;;  %v10569_v7 = vcombine.high %v1671_v1, %v1675_v3  ;;  %v1711_v0 = vld [vmem:[#allocation7 + $0x448] sm:$0xff] }
 0x23b   :  { %4781 = vmatprep.subr.bf16.mxu1 %v10903_v49  ;;  %4822 = vmatprep.subr.bf16.mxu0 %v10521_v8  ;;  %v2062_v49 = vld [vmem:[#allocation7 + $0xf40] sm:$0xff]  ;;  %v1715_v1 = vld [vmem:[#allocation7 + $0x468] sm:$0xff] }
 0x23c   :  { %v2066_v8 = vld [vmem:[#allocation7 + $0xf60] sm:$0xff]  ;;  %v1839_v3 = vld [vmem:[#allocation7 + $0x848] sm:$0xff] }
 0x23d   :  { %v10958_v27 = vcombine.low %v2062_v49, %v2066_v8 }
 0x23e   :  { %4782 = vmatpush1.bf16.msra.mxu1 %v10902_v13  ;;  %4823 = vmatpush1.bf16.msra.mxu0 %v10520_v15  ;;  %v10959_v13 = vcombine.high %v2062_v49, %v2066_v8  ;;  %v10577_v15 = vcombine.high %v1679_v9, %v1683_v10  ;;  %v1719_v8 = vld [vmem:[#allocation7 + $0x488] sm:$0xff] }
 0x23f   :  { %4783 = vmatprep.subr.bf16.mxu1 %v10911_v16  ;;  %4824 = vmatprep.subr.bf16.mxu0 %v10529_v19  ;;  %v2070_v16 = vld [vmem:[#allocation7 + $0xf80] sm:$0xff] }
 0x240   :  { %v2074_v19 = vld [vmem:[#allocation7 + $0xfa0] sm:$0xff] }
 0x242   :  { %4784 = vmatpush1.bf16.msra.mxu1 %v10910_v28  ;;  %4825 = vmatpush1.bf16.msra.mxu0 %v10528_v29  ;;  %v10576_v28 = vcombine.low %v1679_v9, %v1683_v10  ;;  %v348_v29 = vsub.s32 7, %v12793_v23  ;;  %v10609_v9 = vcombine.high %v1711_v0, %v1715_v1 }
 0x243   :  { %4785 = vmatprep.subr.bf16.mxu1 %v10919_v30  ;;  %4826 = vmatprep.subr.bf16.mxu0 %v10537_v31  ;;  %v10967_v30 = vcombine.high %v2070_v16, %v2074_v19  ;;  %v10585_v31 = vcombine.high %v1687_v21, %v1691_v22 }
 0x246   :  { %4786 = vmatpush1.bf16.msra.mxu1 %v10918_v35  ;;  %4827 = vmatpush1.bf16.msra.mxu0 %v10536_v36  ;;  %v345_v35 = vrot.slane %v12798_v25, %v344_v26  ;;  %v10966_v36 = vcombine.low %v2070_v16, %v2074_v19 }
 0x247   :  { %4787 = vmatprep.subr.bf16.mxu1 %v10927_v40  ;;  %4828 = vmatprep.subr.bf16.mxu0 %v10545_v43  ;;  %v10584_v40 = vcombine.low %v1687_v21, %v1691_v22  ;;  %v349_v43 = vrot.slane %v12798_v25, %v348_v29  ;;  %v1727_v22 = vld [vmem:[#allocation7 + $0x4c8] sm:$0xff] }
 0x24a   :  { %4788 = vmatpush1.bf16.msra.mxu1 %v10926_v45  ;;  %4829 = vmatpush1.bf16.msra.mxu0 %v10544_v47  ;;  %v1707_v45 = vld [vmem:[#allocation7 + $0x428] sm:$0xff] }
 0x24b   :  { %4789 = vmatprep.subr.bf16.mxu1 %v10935_v52  ;;  %4830 = vmatprep.subr.bf16.mxu0 %v10553_v54  ;;  %v1831_v47 = vld [vmem:[#allocation7 + $0x808] sm:$0xff]  ;;  %v10601_v25 = vcombine.high %v1703_v55, %v1707_v45 }
 0x24c   :  { %v1835_v52 = vld [vmem:[#allocation7 + $0x828] sm:$0xff] }
 0x24e   :  { %4790 = vmatpush1.bf16.msra.mxu1 %v10934_v61  ;;  %4831 = vmatpush1.bf16.msra.mxu0 %v10552_v62  ;;  %v10592_v61 = vcombine.low %v1695_v34, %v1699_v2  ;;  %v1735_v2 = vld [vmem:[#allocation7 + $0x508] sm:$0xff] }
 0x24f   :  { %4791 = vmatprep.subr.bf16.mxu1 %v10943_v63  ;;  %4832 = vmatprep.subr.bf16.mxu0 %v10561_v46  ;;  %v10729_v46 = vcombine.high %v1831_v47, %v1835_v52 }
 0x252   :  { %4792 = vmatpush1.bf16.msra.mxu1 %v10942_v4  ;;  %4833 = vmatpush1.bf16.msra.mxu0 %v10560_v5  ;;  %v1843_v4 = vld [vmem:[#allocation7 + $0x868] sm:$0xff] }
 0x253   :  { %4793 = vmatprep.subr.bf16.mxu1 %v10951_v6  ;;  %4834 = vmatprep.subr.bf16.mxu0 %v10569_v7  ;;  %v10600_v6 = vcombine.low %v1703_v55, %v1707_v45  ;;  %v10728_v7 = vcombine.low %v1831_v47, %v1835_v52  ;;  %v10737_v10 = vcombine.high %v1839_v3, %v1843_v4  ;;  %v1747_v45 = vld [vmem:[#allocation7 + $0x568] sm:$0xff] }
 0x254   :  { %v10736_v16 = vcombine.low %v1839_v3, %v1843_v4  ;;  %v1871_v47 = vld [vmem:[#allocation7 + $0x948] sm:$0xff] }
 0x255   :  { %v1875_v52 = vld [vmem:[#allocation7 + $0x968] sm:$0xff] }
 0x256   :  { %4794 = vmatpush1.bf16.msra.mxu1 %v10950_v11  ;;  %4835 = vmatpush1.bf16.msra.mxu0 %v10568_v12  ;;  %v1723_v11 = vld [vmem:[#allocation7 + $0x4a8] sm:$0xff] }
 0x257   :  { %4795 = vmatprep.subr.bf16.mxu1 %v10959_v13  ;;  %4836 = vmatprep.subr.bf16.mxu0 %v10577_v15  ;;  %v1847_v12 = vld [vmem:[#allocation7 + $0x888] sm:$0xff]  ;;  %v10608_v15 = vcombine.low %v1711_v0, %v1715_v1  ;;  %v10617_v19 = vcombine.high %v1719_v8, %v1723_v11 }
 0x258   :  { %v1851_v13 = vld [vmem:[#allocation7 + $0x8a8] sm:$0xff] }
 0x259   :  { %v10745_v21 = vcombine.high %v1847_v12, %v1851_v13  ;;  %v10744_v32 = vcombine.low %v1847_v12, %v1851_v13  ;;  %v1759_v1 = vld [vmem:[#allocation7 + $0x5c8] sm:$0xff] }
 0x25a   :  { %4796 = vmatpush1.bf16.msra.mxu1 %v10958_v27  ;;  %4837 = vmatpush1.bf16.msra.mxu0 %v10576_v28  ;;  %v1731_v27 = vld [vmem:[#allocation7 + $0x4e8] sm:$0xff] }
 0x25b   :  { %4797 = vmatprep.subr.bf16.mxu1 %v10967_v30  ;;  %4838 = vmatprep.subr.bf16.mxu0 %v10585_v31  ;;  %v1855_v28 = vld [vmem:[#allocation7 + $0x8c8] sm:$0xff]  ;;  %v10616_v31 = vcombine.low %v1719_v8, %v1723_v11  ;;  %v10625_v33 = vcombine.high %v1727_v22, %v1731_v27 }
 0x25c   :  { %v1155_v44 = vpop.f32.mrb[8].mxu1  ;;  %v1859_v30 = vld [vmem:[#allocation7 + $0x8e8] sm:$0xff] }
 0x25d   :  { %v1156_v54 = vadd.f32 %v1155_v44, %v345_v35  ;;  %v1157_v57 = vpop.f32.mrb[9].mxu1  ;;  %v10753_v34 = vcombine.high %v1855_v28, %v1859_v30  ;;  %v1739_v35 = vld [vmem:[#allocation7 + $0x528] sm:$0xff] }
 0x25e   :  { %v1158_v58 = vadd.f32 %v1157_v57, %v349_v43  ;;  %4798 = vmatpush1.bf16.msra.mxu1 %v10966_v36  ;;  %4839 = vmatpush1.bf16.msra.mxu0 %v10584_v40  ;;  %v1159_v59 = vpop.f32.mrb[10].mxu1  ;;  %v1863_v36 = vld [vmem:[#allocation7 + $0x908] sm:$0xff]  ;;  %v10624_v43 = vcombine.low %v1727_v22, %v1731_v27 }
 0x25f   :  { %v1168_v62 = vmax.f32 %v1156_v54, 0.0  ;;  %v1160_v63 = vpop.f32.mrb[11].mxu1  ;;  %4799 = vmatprep.subr.bf16.mxu1 %v10975_v50  ;;  %4840 = vmatprep.subr.bf16.mxu0 %v10593_v51  ;;  %v1867_v40 = vld [vmem:[#allocation7 + $0x928] sm:$0xff]  ;;  %v10752_v50 = vcombine.low %v1855_v28, %v1859_v30  ;;  %v10633_v51 = vcombine.high %v1735_v2, %v1739_v35  ;;  %v10632_v54 = vcombine.low %v1735_v2, %v1739_v35 }
 0x260   :  { %v1169_v48 = vmax.f32 %v1158_v58, 0.0  ;;  %v10761_v55 = vcombine.high %v1863_v36, %v1867_v40  ;;  %v1743_v44 = vld [vmem:[#allocation7 + $0x548] sm:$0xff]  ;;  %v10760_v57 = vcombine.low %v1863_v36, %v1867_v40  ;;  %v10769_v59 = vcombine.high %v1871_v47, %v1875_v52 }
 0x261   :  { %v12863_v49 = vpack.c.bf16 %v1168_v62, %v1168_v62  ;;  %v10641_v58 = vcombine.high %v1743_v44, %v1747_v45  ;;  %v1879_v62 = vld [vmem:[#allocation7 + $0x988] sm:$0xff] }
 0x262   :  { %v12861_v5 = vpack.c.bf16 %v1169_v48, %v1169_v48  ;;  %4800 = vmatpush1.bf16.msra.mxu1 %v10974_v60  ;;  %4841 = vmatpush1.bf16.msra.mxu0 %v10592_v61  ;;  %v1751_v60 = vld [vmem:[#allocation7 + $0x588] sm:$0xff] }
 0x263   :  { %4851 = vmatprep.subr.bf16.mxu1 %v10601_v25  ;;  %4892 = vmatprep.subr.bf16.mxu0 %v10729_v46  ;;  %v1755_v61 = vld [vmem:[#allocation7 + $0x5a8] sm:$0xff]  ;;  %v10640_v25 = vcombine.low %v1743_v44, %v1747_v45  ;;  %v10768_v46 = vcombine.low %v1871_v47, %v1875_v52 }
 0x264   :  { %4801 = vmatprep.mubr.bf16.mxu1 %v12861_v5  ;;  %v1883_v63 = vld [vmem:[#allocation7 + $0x9a8] sm:$0xff]  ;;  %v10649_v48 = vcombine.high %v1751_v60, %v1755_v61 }
 0x265   :  { %4843 = vmatmul.mubr.bf16.vlgmr.msra.gmra.mrb[12].mxu0 %v12807_v37  ;;  %4802 = vmatmul.mubr.bf16.vlgmr.msra.gmra.mrb[16].mxu1 %v12863_v49  ;;  %v10777_v0 = vcombine.high %v1879_v62, %v1883_v63  ;;  %v1763_v3 = vld [vmem:[#allocation7 + $0x5e8] sm:$0xff]  ;;  %v10776_v8 = vcombine.low %v1879_v62, %v1883_v63 }
 0x266   :  { %4852 = vmatpush1.bf16.msra.mxu1 %v10600_v6  ;;  %4893 = vmatpush1.bf16.msra.mxu0 %v10728_v7  ;;  %v1887_v4 = vld [vmem:[#allocation7 + $0x9c8] sm:$0xff]  ;;  %v10648_v7 = vcombine.low %v1751_v60, %v1755_v61 }
 0x267   :  { %4924 = vmatprep.mubr.bf16.mxu0 %v12822_v42  ;;  %4883 = vmatprep.mubr.bf16.mxu1 %v12842_v17  ;;  %v1891_v6 = vld [vmem:[#allocation7 + $0x9e8] sm:$0xff] }
 0x268   :  { %4853 = vmatprep.subr.bf16.mxu1 %v10609_v9  ;;  %4894 = vmatprep.subr.bf16.mxu0 %v10737_v10  ;;  %v10657_v9 = vcombine.high %v1759_v1, %v1763_v3  ;;  %v10785_v10 = vcombine.high %v1887_v4, %v1891_v6  ;;  %v1767_v11 = vld [vmem:[#allocation7 + $0x608] sm:$0xff] }
 0x269   :  { %v1771_v12 = vld [vmem:[#allocation7 + $0x628] sm:$0xff] }
 0x26a   :  { %4854 = vmatpush1.bf16.msra.mxu1 %v10608_v15  ;;  %4895 = vmatpush1.bf16.msra.mxu0 %v10736_v16  ;;  %v1895_v13 = vld [vmem:[#allocation7 + $0xa08] sm:$0xff]  ;;  %v10656_v16 = vcombine.low %v1759_v1, %v1763_v3 }
 0x26b   :  { %4855 = vmatprep.subr.bf16.mxu1 %v10617_v19  ;;  %4896 = vmatprep.subr.bf16.mxu0 %v10745_v21  ;;  %v1899_v15 = vld [vmem:[#allocation7 + $0xa28] sm:$0xff]  ;;  %v10784_v19 = vcombine.low %v1887_v4, %v1891_v6  ;;  %v10665_v21 = vcombine.high %v1767_v11, %v1771_v12 }
 0x26c   :  { %v10793_v22 = vcombine.high %v1895_v13, %v1899_v15  ;;  %v1775_v27 = vld [vmem:[#allocation7 + $0x648] sm:$0xff] }
 0x26d   :  { %v1779_v28 = vld [vmem:[#allocation7 + $0x668] sm:$0xff] }
 0x26e   :  { %4856 = vmatpush1.bf16.msra.mxu1 %v10616_v31  ;;  %4897 = vmatpush1.bf16.msra.mxu0 %v10744_v32  ;;  %v1903_v30 = vld [vmem:[#allocation7 + $0xa48] sm:$0xff]  ;;  %v10664_v32 = vcombine.low %v1767_v11, %v1771_v12 }
 0x26f   :  { %4857 = vmatprep.subr.bf16.mxu1 %v10625_v33  ;;  %4898 = vmatprep.subr.bf16.mxu0 %v10753_v34  ;;  %v1907_v31 = vld [vmem:[#allocation7 + $0xa68] sm:$0xff]  ;;  %v10792_v33 = vcombine.low %v1895_v13, %v1899_v15  ;;  %v10673_v34 = vcombine.high %v1775_v27, %v1779_v28 }
 0x270   :  { %v10801_v2 = vcombine.high %v1903_v30, %v1907_v31  ;;  %v1783_v35 = vld [vmem:[#allocation7 + $0x688] sm:$0xff] }
 0x271   :  { %v1787_v36 = vld [vmem:[#allocation7 + $0x6a8] sm:$0xff] }
 0x272   :  { %4858 = vmatpush1.bf16.msra.mxu1 %v10624_v43  ;;  %4899 = vmatpush1.bf16.msra.mxu0 %v10752_v50  ;;  %v1911_v40 = vld [vmem:[#allocation7 + $0xa88] sm:$0xff]  ;;  %v10672_v50 = vcombine.low %v1775_v27, %v1779_v28 }
 0x273   :  { %4859 = vmatprep.subr.bf16.mxu1 %v10633_v51  ;;  %4900 = vmatprep.subr.bf16.mxu0 %v10761_v55  ;;  %v1915_v43 = vld [vmem:[#allocation7 + $0xaa8] sm:$0xff]  ;;  %v10800_v51 = vcombine.low %v1903_v30, %v1907_v31  ;;  %v10681_v55 = vcombine.high %v1783_v35, %v1787_v36 }
 0x274   :  { %v10809_v44 = vcombine.high %v1911_v40, %v1915_v43  ;;  %v1791_v45 = vld [vmem:[#allocation7 + $0x6c8] sm:$0xff] }
 0x275   :  { %v1795_v47 = vld [vmem:[#allocation7 + $0x6e8] sm:$0xff] }
 0x276   :  { %4860 = vmatpush1.bf16.msra.mxu1 %v10632_v54  ;;  %4901 = vmatpush1.bf16.msra.mxu0 %v10760_v57  ;;  %v1919_v52 = vld [vmem:[#allocation7 + $0xac8] sm:$0xff]  ;;  %v10680_v57 = vcombine.low %v1783_v35, %v1787_v36 }
 0x277   :  { %4861 = vmatprep.subr.bf16.mxu1 %v10641_v58  ;;  %4902 = vmatprep.subr.bf16.mxu0 %v10769_v59  ;;  %v1923_v54 = vld [vmem:[#allocation7 + $0xae8] sm:$0xff]  ;;  %v10808_v58 = vcombine.low %v1911_v40, %v1915_v43  ;;  %v10689_v59 = vcombine.high %v1791_v45, %v1795_v47  ;;  %v1576_v43 = vld [vmem:[#allocation7 + $0x10] sm:$0xff] }
 0x278   :  { %v10817_v60 = vcombine.high %v1919_v52, %v1923_v54  ;;  %v1799_v61 = vld [vmem:[#allocation7 + $0x708] sm:$0xff] }
 0x279   :  { %v1803_v62 = vld [vmem:[#allocation7 + $0x728] sm:$0xff] }
 0x27a   :  { %4862 = vmatpush1.bf16.msra.mxu1 %v10640_v25  ;;  %4903 = vmatpush1.bf16.msra.mxu0 %v10768_v46  ;;  %v1927_v63 = vld [vmem:[#allocation7 + $0xb08] sm:$0xff]  ;;  %v10688_v46 = vcombine.low %v1791_v45, %v1795_v47 }
 0x27b   :  { %4863 = vmatprep.subr.bf16.mxu1 %v10649_v48  ;;  %4904 = vmatprep.subr.bf16.mxu0 %v10777_v0  ;;  %v1931_v25 = vld [vmem:[#allocation7 + $0xb28] sm:$0xff]  ;;  %v10816_v48 = vcombine.low %v1919_v52, %v1923_v54  ;;  %v10697_v0 = vcombine.high %v1799_v61, %v1803_v62  ;;  %v1584_v54 = vld [vmem:[#allocation7 + $0x50] sm:$0xff] }
 0x27c   :  { %v10825_v1 = vcombine.high %v1927_v63, %v1931_v25  ;;  %v1807_v3 = vld [vmem:[#allocation7 + $0x748] sm:$0xff] }
 0x27d   :  { %v1811_v4 = vld [vmem:[#allocation7 + $0x768] sm:$0xff] }
 0x27e   :  { %4864 = vmatpush1.bf16.msra.mxu1 %v10648_v7  ;;  %4905 = vmatpush1.bf16.msra.mxu0 %v10776_v8  ;;  %v1935_v6 = vld [vmem:[#allocation7 + $0xb48] sm:$0xff]  ;;  %v10696_v8 = vcombine.low %v1799_v61, %v1803_v62 }
 0x27f   :  { %4865 = vmatprep.subr.bf16.mxu1 %v10657_v9  ;;  %4906 = vmatprep.subr.bf16.mxu0 %v10785_v10  ;;  %v1939_v7 = vld [vmem:[#allocation7 + $0xb68] sm:$0xff]  ;;  %v10824_v9 = vcombine.low %v1927_v63, %v1931_v25  ;;  %v10705_v10 = vcombine.high %v1807_v3, %v1811_v4  ;;  %v1592_v25 = vld [vmem:[#allocation7 + $0x90] sm:$0xff] }
 0x280   :  { %v10833_v11 = vcombine.high %v1935_v6, %v1939_v7  ;;  %v1815_v12 = vld [vmem:[#allocation7 + $0x788] sm:$0xff] }
 0x281   :  { %v1819_v13 = vld [vmem:[#allocation7 + $0x7a8] sm:$0xff] }
 0x282   :  { %4866 = vmatpush1.bf16.msra.mxu1 %v10656_v16  ;;  %4907 = vmatpush1.bf16.msra.mxu0 %v10784_v19  ;;  %v1943_v15 = vld [vmem:[#allocation7 + $0xb88] sm:$0xff]  ;;  %v10704_v19 = vcombine.low %v1807_v3, %v1811_v4 }
 0x283   :  { %4867 = vmatprep.subr.bf16.mxu1 %v10665_v21  ;;  %4908 = vmatprep.subr.bf16.mxu0 %v10793_v22  ;;  %v1947_v16 = vld [vmem:[#allocation7 + $0xba8] sm:$0xff]  ;;  %v10832_v21 = vcombine.low %v1935_v6, %v1939_v7  ;;  %v10713_v22 = vcombine.high %v1815_v12, %v1819_v13  ;;  %v1600_v7 = vld [vmem:[#allocation7 + $0xd0] sm:$0xff] }
 0x284   :  { %v10841_v27 = vcombine.high %v1943_v15, %v1947_v16  ;;  %v1823_v28 = vld [vmem:[#allocation7 + $0x7c8] sm:$0xff] }
 0x285   :  { %v1827_v30 = vld [vmem:[#allocation7 + $0x7e8] sm:$0xff] }
 0x286   :  { %4868 = vmatpush1.bf16.msra.mxu1 %v10664_v32  ;;  %4909 = vmatpush1.bf16.msra.mxu0 %v10792_v33  ;;  %v1951_v31 = vld [vmem:[#allocation7 + $0xbc8] sm:$0xff]  ;;  %v10712_v33 = vcombine.low %v1815_v12, %v1819_v13 }
 0x287   :  { %4869 = vmatprep.subr.bf16.mxu1 %v10673_v34  ;;  %4910 = vmatprep.subr.bf16.mxu0 %v10801_v2  ;;  %v1955_v32 = vld [vmem:[#allocation7 + $0xbe8] sm:$0xff]  ;;  %v10840_v34 = vcombine.low %v1943_v15, %v1947_v16  ;;  %v10721_v2 = vcombine.high %v1823_v28, %v1827_v30  ;;  %v1608_v16 = vld [vmem:[#allocation7 + $0x110] sm:$0xff] }
 0x288   :  { %v10849_v35 = vcombine.high %v1951_v31, %v1955_v32  ;;  %v1959_v36 = vld [vmem:[#allocation7 + $0xc08] sm:$0xff] }
 0x289   :  { %v1963_v40 = vld [vmem:[#allocation7 + $0xc28] sm:$0xff] }
 0x28a   :  { %4870 = vmatpush1.bf16.msra.mxu1 %v10672_v50  ;;  %4911 = vmatpush1.bf16.msra.mxu0 %v10800_v51  ;;  %v1580_v50 = vld [vmem:[#allocation7 + $0x30] sm:$0xff]  ;;  %v10720_v51 = vcombine.low %v1823_v28, %v1827_v30  ;;  %v1967_v47 = vld [vmem:[#allocation7 + $0xc48] sm:$0xff] }
 0x28b   :  { %4871 = vmatprep.subr.bf16.mxu1 %v10681_v55  ;;  %4912 = vmatprep.subr.bf16.mxu0 %v10809_v44  ;;  %v10848_v55 = vcombine.low %v1951_v31, %v1955_v32  ;;  %v10857_v44 = vcombine.high %v1959_v36, %v1963_v40  ;;  %v10475_v45 = vcombine.high %v1576_v43, %v1580_v50  ;;  %v1971_v52 = vld [vmem:[#allocation7 + $0xc68] sm:$0xff]  ;;  %v1616_v32 = vld [vmem:[#allocation7 + $0x150] sm:$0xff] }
 0x28c   :  { %v1975_v62 = vld [vmem:[#allocation7 + $0xc88] sm:$0xff] }
 0x28d   :  { %v1979_v63 = vld [vmem:[#allocation7 + $0xca8] sm:$0xff] }
 0x28e   :  { %4872 = vmatpush1.bf16.msra.mxu1 %v10680_v57  ;;  %4913 = vmatpush1.bf16.msra.mxu0 %v10808_v58  ;;  %v1588_v57 = vld [vmem:[#allocation7 + $0x70] sm:$0xff]  ;;  %v10856_v58 = vcombine.low %v1959_v36, %v1963_v40  ;;  %v1983_v4 = vld [vmem:[#allocation7 + $0xcc8] sm:$0xff] }
 0x28f   :  { %4873 = vmatprep.subr.bf16.mxu1 %v10689_v59  ;;  %4914 = vmatprep.subr.bf16.mxu0 %v10817_v60  ;;  %v10474_v59 = vcombine.low %v1576_v43, %v1580_v50  ;;  %v10865_v60 = vcombine.high %v1967_v47, %v1971_v52  ;;  %v10483_v61 = vcombine.high %v1584_v54, %v1588_v57  ;;  %v1987_v6 = vld [vmem:[#allocation7 + $0xce8] sm:$0xff]  ;;  %v1624_v50 = vld [vmem:[#allocation7 + $0x190] sm:$0xff] }
 0x290   :  { %v1991_v13 = vld [vmem:[#allocation7 + $0xd08] sm:$0xff] }
 0x291   :  { %v1995_v15 = vld [vmem:[#allocation7 + $0xd28] sm:$0xff] }
 0x292   :  { %4874 = vmatpush1.bf16.msra.mxu1 %v10688_v46  ;;  %4915 = vmatpush1.bf16.msra.mxu0 %v10816_v48  ;;  %v1596_v46 = vld [vmem:[#allocation7 + $0xb0] sm:$0xff]  ;;  %v10864_v48 = vcombine.low %v1967_v47, %v1971_v52  ;;  %v1999_v30 = vld [vmem:[#allocation7 + $0xd48] sm:$0xff] }
 0x293   :  { %4875 = vmatprep.subr.bf16.mxu1 %v10697_v0  ;;  %4916 = vmatprep.subr.bf16.mxu0 %v10825_v1  ;;  %v10482_v0 = vcombine.low %v1584_v54, %v1588_v57  ;;  %v10873_v1 = vcombine.high %v1975_v62, %v1979_v63  ;;  %v10491_v3 = vcombine.high %v1592_v25, %v1596_v46  ;;  %v2003_v31 = vld [vmem:[#allocation7 + $0xd68] sm:$0xff] }
 0x294   :  { %v2007_v40 = vld [vmem:[#allocation7 + $0xd88] sm:$0xff] }
 0x295   :  { %v2011_v43 = vld [vmem:[#allocation7 + $0xda8] sm:$0xff] }
 0x296   :  { %4876 = vmatpush1.bf16.msra.mxu1 %v10696_v8  ;;  %4917 = vmatpush1.bf16.msra.mxu0 %v10824_v9  ;;  %v1604_v8 = vld [vmem:[#allocation7 + $0xf0] sm:$0xff]  ;;  %v10872_v9 = vcombine.low %v1975_v62, %v1979_v63  ;;  %v2015_v54 = vld [vmem:[#allocation7 + $0xdc8] sm:$0xff]  ;;  %v10904_v62 = vcombine.low %v2007_v40, %v2011_v43 }
 0x297   :  { %4877 = vmatprep.subr.bf16.mxu1 %v10705_v10  ;;  %4918 = vmatprep.subr.bf16.mxu0 %v10833_v11  ;;  %v10490_v10 = vcombine.low %v1592_v25, %v1596_v46  ;;  %v10881_v11 = vcombine.high %v1983_v4, %v1987_v6  ;;  %v10499_v12 = vcombine.high %v1600_v7, %v1604_v8  ;;  %v2019_v57 = vld [vmem:[#allocation7 + $0xde8] sm:$0xff] }
 0x298   :  { %v10913_v46 = vcombine.high %v2015_v54, %v2019_v57 }
 0x29a   :  { %4878 = vmatpush1.bf16.msra.mxu1 %v10704_v19  ;;  %4919 = vmatpush1.bf16.msra.mxu0 %v10832_v21  ;;  %v1612_v19 = vld [vmem:[#allocation7 + $0x130] sm:$0xff]  ;;  %v10880_v21 = vcombine.low %v1983_v4, %v1987_v6  ;;  %v10912_v6 = vcombine.low %v2015_v54, %v2019_v57 }
 0x29b   :  { %4879 = vmatprep.subr.bf16.mxu1 %v10713_v22  ;;  %4920 = vmatprep.subr.bf16.mxu0 %v10841_v27  ;;  %v10498_v22 = vcombine.low %v1600_v7, %v1604_v8  ;;  %v10889_v27 = vcombine.high %v1991_v13, %v1995_v15  ;;  %v10507_v28 = vcombine.high %v1608_v16, %v1612_v19  ;;  %v1644_v4 = vld [vmem:[#allocation7 + $0x230] sm:$0xff] }
 0x29c   :  { %v1676_v54 = vld [vmem:[#allocation7 + $0x330] sm:$0xff] }
 0x29e   :  { %4880 = vmatpush1.bf16.msra.mxu1 %v10712_v33  ;;  %4921 = vmatpush1.bf16.msra.mxu0 %v10840_v34  ;;  %v1620_v33 = vld [vmem:[#allocation7 + $0x170] sm:$0xff]  ;;  %v10888_v34 = vcombine.low %v1991_v13, %v1995_v15 }
 0x29f   :  { %4881 = vmatprep.subr.bf16.mxu1 %v10721_v2  ;;  %4922 = vmatprep.subr.bf16.mxu0 %v10849_v35  ;;  %v10506_v2 = vcombine.low %v1608_v16, %v1612_v19  ;;  %v10897_v35 = vcombine.high %v1999_v30, %v2003_v31  ;;  %v10515_v36 = vcombine.high %v1616_v32, %v1620_v33  ;;  %v1652_v13 = vld [vmem:[#allocation7 + $0x270] sm:$0xff] }
 0x2a2   :  { %4882 = vmatpush1.bf16.msra.mxu1 %v10720_v51  ;;  %4923 = vmatpush1.bf16.msra.mxu0 %v10848_v55  ;;  %v1628_v51 = vld [vmem:[#allocation7 + $0x1b0] sm:$0xff]  ;;  %v10896_v55 = vcombine.low %v1999_v30, %v2003_v31 }
 0x2a3   :  { %4933 = vmatprep.subr.bf16.mxu1 %v10857_v44  ;;  %4974 = vmatprep.subr.bf16.mxu0 %v10475_v45  ;;  %v10514_v44 = vcombine.low %v1616_v32, %v1620_v33  ;;  %v10905_v45 = vcombine.high %v2007_v40, %v2011_v43  ;;  %v10523_v52 = vcombine.high %v1624_v50, %v1628_v51  ;;  %v1660_v30 = vld [vmem:[#allocation7 + $0x2b0] sm:$0xff] }
 0x2a4   :  { %v10522_v25 = vcombine.low %v1624_v50, %v1628_v51  ;;  %v1668_v40 = vld [vmem:[#allocation7 + $0x2f0] sm:$0xff] }
 0x2a5   :  { %4884 = vmatmul.mubr.bf16.vlgmr.msra.gmra.mrb[20].mxu1 %v12844_v20  ;;  %4925 = vmatmul.mubr.bf16.vlgmr.msra.gmra.mrb[16].mxu0 %v12840_v14 }
 0x2a6   :  { %4934 = vmatpush1.bf16.msra.mxu1 %v10856_v58  ;;  %4965 = vmatprep.mubr.bf16.mxu1 %v12861_v5 }
 0x2a7   :  { %4975 = vmatpush1.bf16.msra.mxu0 %v10474_v59  ;;  %5006 = vmatprep.mubr.bf16.mxu0 %v12810_v39  ;;  %v1632_v59 = vld [vmem:[#allocation7 + $0x1d0] sm:$0xff] }
 0x2a8   :  { %4935 = vmatprep.subr.bf16.mxu1 %v10865_v60  ;;  %4976 = vmatprep.subr.bf16.mxu0 %v10483_v61  ;;  %v1636_v60 = vld [vmem:[#allocation7 + $0x1f0] sm:$0xff] }
 0x2a9   :  { %v10530_v7 = vcombine.low %v1632_v59, %v1636_v60 }
 0x2aa   :  { %4936 = vmatpush1.bf16.msra.mxu1 %v10864_v48  ;;  %v10531_v48 = vcombine.high %v1632_v59, %v1636_v60 }
 0x2ab   :  { %4977 = vmatpush1.bf16.msra.mxu0 %v10482_v0  ;;  %4937 = vmatprep.subr.bf16.mxu1 %v10873_v1  ;;  %v2023_v0 = vld [vmem:[#allocation7 + $0xe08] sm:$0xff] }
 0x2ac   :  { %4978 = vmatprep.subr.bf16.mxu0 %v10491_v3  ;;  %v2027_v1 = vld [vmem:[#allocation7 + $0xe28] sm:$0xff]  ;;  %v1640_v3 = vld [vmem:[#allocation7 + $0x210] sm:$0xff] }
 0x2ad   :  { %v10921_v8 = vcombine.high %v2023_v0, %v2027_v1  ;;  %v10920_v15 = vcombine.low %v2023_v0, %v2027_v1  ;;  %v10538_v16 = vcombine.low %v1640_v3, %v1644_v4 }
 0x2ae   :  { %4938 = vmatpush1.bf16.msra.mxu1 %v10872_v9  ;;  %v10539_v9 = vcombine.high %v1640_v3, %v1644_v4  ;;  %v2071_v4 = vld [vmem:[#allocation7 + $0xf88] sm:$0xff] }
 0x2af   :  { %4979 = vmatpush1.bf16.msra.mxu0 %v10490_v10  ;;  %4939 = vmatprep.subr.bf16.mxu1 %v10881_v11  ;;  %v2031_v10 = vld [vmem:[#allocation7 + $0xe48] sm:$0xff] }
 0x2b0   :  { %4980 = vmatprep.subr.bf16.mxu0 %v10499_v12  ;;  %v2035_v11 = vld [vmem:[#allocation7 + $0xe68] sm:$0xff]  ;;  %v1648_v12 = vld [vmem:[#allocation7 + $0x250] sm:$0xff] }
 0x2b1   :  { %v10929_v19 = vcombine.high %v2031_v10, %v2035_v11  ;;  %v10928_v31 = vcombine.low %v2031_v10, %v2035_v11  ;;  %v10546_v32 = vcombine.low %v1648_v12, %v1652_v13 }
 0x2b2   :  { %4940 = vmatpush1.bf16.msra.mxu1 %v10880_v21  ;;  %v10547_v21 = vcombine.high %v1648_v12, %v1652_v13  ;;  %v2079_v13 = vld [vmem:[#allocation7 + $0xfc8] sm:$0xff] }
 0x2b3   :  { %4981 = vmatpush1.bf16.msra.mxu0 %v10498_v22  ;;  %4941 = vmatprep.subr.bf16.mxu1 %v10889_v27  ;;  %v2039_v22 = vld [vmem:[#allocation7 + $0xe88] sm:$0xff] }
 0x2b4   :  { %4982 = vmatprep.subr.bf16.mxu0 %v10507_v28  ;;  %v2043_v27 = vld [vmem:[#allocation7 + $0xea8] sm:$0xff]  ;;  %v1656_v28 = vld [vmem:[#allocation7 + $0x290] sm:$0xff] }
 0x2b5   :  { %v10937_v33 = vcombine.high %v2039_v22, %v2043_v27  ;;  %v10936_v43 = vcombine.low %v2039_v22, %v2043_v27  ;;  %v10554_v50 = vcombine.low %v1656_v28, %v1660_v30 }
 0x2b6   :  { %4942 = vmatpush1.bf16.msra.mxu1 %v10888_v34  ;;  %v10555_v34 = vcombine.high %v1656_v28, %v1660_v30  ;;  %v1704_v30 = vld [vmem:[#allocation7 + $0x410] sm:$0xff] }
 0x2b7   :  { %4983 = vmatpush1.bf16.msra.mxu0 %v10506_v2  ;;  %4943 = vmatprep.subr.bf16.mxu1 %v10897_v35  ;;  %v2047_v2 = vld [vmem:[#allocation7 + $0xec8] sm:$0xff] }
 0x2b8   :  { %v12874_v47 = vpop.f32.mrb[4].mxu0  ;;  %4984 = vmatprep.subr.bf16.mxu0 %v10515_v36  ;;  %v2051_v35 = vld [vmem:[#allocation7 + $0xee8] sm:$0xff]  ;;  %v1664_v36 = vld [vmem:[#allocation7 + $0x2d0] sm:$0xff] }
 0x2b9   :  { %v12876_v58 = vpop.f32.mrb[5].mxu0  ;;  %v10945_v51 = vcombine.high %v2047_v2, %v2051_v35  ;;  %v10944_v57 = vcombine.low %v2047_v2, %v2051_v35  ;;  %v10562_v59 = vcombine.low %v1664_v36, %v1668_v40 }
 0x2ba   :  { %4944 = vmatpush1.bf16.msra.mxu1 %v10896_v55  ;;  %v4684_v61 = vpop.f32.mrb[6].mxu0  ;;  %v10563_v55 = vcombine.high %v1664_v36, %v1668_v40  ;;  %v1712_v40 = vld [vmem:[#allocation7 + $0x450] sm:$0xff] }
 0x2bb   :  { %4985 = vmatpush1.bf16.msra.mxu0 %v10514_v44  ;;  %v4685_v63 = vpop.f32.mrb[7].mxu0  ;;  %4945 = vmatprep.subr.bf16.mxu1 %v10905_v45  ;;  %v2055_v44 = vld [vmem:[#allocation7 + $0xf08] sm:$0xff] }
 0x2bc   :  { %4986 = vmatprep.subr.bf16.mxu0 %v10523_v52  ;;  %v2059_v45 = vld [vmem:[#allocation7 + $0xf28] sm:$0xff]  ;;  %v1672_v52 = vld [vmem:[#allocation7 + $0x310] sm:$0xff] }
 0x2bd   :  { %v10953_v60 = vcombine.high %v2055_v44, %v2059_v45  ;;  %v10571_v61 = vcombine.high %v1672_v52, %v1676_v54  ;;  %v2067_v63 = vld [vmem:[#allocation7 + $0xf68] sm:$0xff]  ;;  %v10570_v0 = vcombine.low %v1672_v52, %v1676_v54  ;;  %v1720_v52 = vld [vmem:[#allocation7 + $0x490] sm:$0xff] }
 0x2be   :  { %4946 = vmatpush1.bf16.msra.mxu1 %v10904_v62  ;;  %v2063_v62 = vld [vmem:[#allocation7 + $0xf48] sm:$0xff]  ;;  %v1724_v54 = vld [vmem:[#allocation7 + $0x4b0] sm:$0xff] }
 0x2bf   :  { %4987 = vmatpush1.bf16.msra.mxu0 %v10522_v25  ;;  %4947 = vmatprep.subr.bf16.mxu1 %v10913_v46  ;;  %v1680_v25 = vld [vmem:[#allocation7 + $0x350] sm:$0xff]  ;;  %v10961_v1 = vcombine.high %v2063_v62, %v2067_v63 }
 0x2c0   :  { %4988 = vmatprep.subr.bf16.mxu0 %v10531_v48  ;;  %v1684_v46 = vld [vmem:[#allocation7 + $0x370] sm:$0xff]  ;;  %v10952_v48 = vcombine.low %v2055_v44, %v2059_v45 }
 0x2c1   :  { %v10579_v3 = vcombine.high %v1680_v25, %v1684_v46  ;;  %v10578_v10 = vcombine.low %v1680_v25, %v1684_v46  ;;  %v1728_v46 = vld [vmem:[#allocation7 + $0x4d0] sm:$0xff] }
 0x2c2   :  { %4948 = vmatpush1.bf16.msra.mxu1 %v10912_v6  ;;  %v2075_v6 = vld [vmem:[#allocation7 + $0xfa8] sm:$0xff] }
 0x2c3   :  { %4989 = vmatpush1.bf16.msra.mxu0 %v10530_v7  ;;  %4949 = vmatprep.subr.bf16.mxu1 %v10921_v8  ;;  %v1688_v7 = vld [vmem:[#allocation7 + $0x390] sm:$0xff]  ;;  %v10969_v11 = vcombine.high %v2071_v4, %v2075_v6 }
 0x2c4   :  { %4990 = vmatprep.subr.bf16.mxu0 %v10539_v9  ;;  %v1692_v8 = vld [vmem:[#allocation7 + $0x3b0] sm:$0xff]  ;;  %v10960_v9 = vcombine.low %v2063_v62, %v2067_v63  ;;  %v10619_v63 = vcombine.high %v1720_v52, %v1724_v54 }
 0x2c5   :  { %v10587_v12 = vcombine.high %v1688_v7, %v1692_v8  ;;  %v10586_v22 = vcombine.low %v1688_v7, %v1692_v8  ;;  %v1736_v8 = vld [vmem:[#allocation7 + $0x510] sm:$0xff] }
 0x2c6   :  { %4950 = vmatpush1.bf16.msra.mxu1 %v10920_v15  ;;  %v2083_v15 = vld [vmem:[#allocation7 + $0xfe8] sm:$0xff] }
 0x2c7   :  { %4991 = vmatpush1.bf16.msra.mxu0 %v10538_v16  ;;  %4951 = vmatprep.subr.bf16.mxu1 %v10929_v19  ;;  %v1696_v16 = vld [vmem:[#allocation7 + $0x3d0] sm:$0xff]  ;;  %v10977_v27 = vcombine.high %v2079_v13, %v2083_v15 }
 0x2c8   :  { %4992 = vmatprep.subr.bf16.mxu0 %v10547_v21  ;;  %v1700_v19 = vld [vmem:[#allocation7 + $0x3f0] sm:$0xff]  ;;  %v10968_v21 = vcombine.low %v2071_v4, %v2075_v6 }
 0x2c9   :  { %v10595_v28 = vcombine.high %v1696_v16, %v1700_v19  ;;  %v10594_v2 = vcombine.low %v1696_v16, %v1700_v19  ;;  %v1744_v19 = vld [vmem:[#allocation7 + $0x550] sm:$0xff] }
 0x2ca   :  { %4952 = vmatpush1.bf16.msra.mxu1 %v10928_v31  ;;  %v1708_v31 = vld [vmem:[#allocation7 + $0x430] sm:$0xff] }
 0x2cb   :  { %4993 = vmatpush1.bf16.msra.mxu0 %v10546_v32  ;;  %4953 = vmatprep.subr.bf16.mxu1 %v10937_v33  ;;  %v1832_v32 = vld [vmem:[#allocation7 + $0x810] sm:$0xff]  ;;  %v10603_v35 = vcombine.high %v1704_v30, %v1708_v31 }
 0x2cc   :  { %4994 = vmatprep.subr.bf16.mxu0 %v10555_v34  ;;  %v1836_v33 = vld [vmem:[#allocation7 + $0x830] sm:$0xff]  ;;  %v10976_v34 = vcombine.low %v2079_v13, %v2083_v15 }
 0x2cd   :  { %v10731_v36 = vcombine.high %v1832_v32, %v1836_v33  ;;  %v10730_v44 = vcombine.low %v1832_v32, %v1836_v33  ;;  %v1752_v33 = vld [vmem:[#allocation7 + $0x590] sm:$0xff] }
 0x2ce   :  { %4954 = vmatpush1.bf16.msra.mxu1 %v10936_v43  ;;  %v1716_v43 = vld [vmem:[#allocation7 + $0x470] sm:$0xff] }
 0x2cf   :  { %4995 = vmatpush1.bf16.msra.mxu0 %v10554_v50  ;;  %4955 = vmatprep.subr.bf16.mxu1 %v10945_v51  ;;  %v10602_v50 = vcombine.low %v1704_v30, %v1708_v31  ;;  %v1840_v51 = vld [vmem:[#allocation7 + $0x850] sm:$0xff]  ;;  %v10611_v45 = vcombine.high %v1712_v40, %v1716_v43 }
 0x2d0   :  { %4996 = vmatprep.subr.bf16.mxu0 %v10563_v55  ;;  %v1844_v55 = vld [vmem:[#allocation7 + $0x870] sm:$0xff] }
 0x2d1   :  { %v10738_v62 = vcombine.low %v1840_v51, %v1844_v55 }
 0x2d2   :  { %4956 = vmatpush1.bf16.msra.mxu1 %v10944_v57  ;;  %v10739_v57 = vcombine.high %v1840_v51, %v1844_v55 }
 0x2d3   :  { %4997 = vmatpush1.bf16.msra.mxu0 %v10562_v59  ;;  %4957 = vmatprep.subr.bf16.mxu1 %v10953_v60  ;;  %v1848_v59 = vld [vmem:[#allocation7 + $0x890] sm:$0xff] }
 0x2d4   :  { %4998 = vmatprep.subr.bf16.mxu0 %v10571_v61  ;;  %v1852_v60 = vld [vmem:[#allocation7 + $0x8b0] sm:$0xff]  ;;  %v10610_v61 = vcombine.low %v1712_v40, %v1716_v43 }
 0x2d5   :  { %v10747_v25 = vcombine.high %v1848_v59, %v1852_v60  ;;  %v10746_v4 = vcombine.low %v1848_v59, %v1852_v60  ;;  %v1888_v59 = vld [vmem:[#allocation7 + $0x9d0] sm:$0xff] }
 0x2d6   :  { %4958 = vmatpush1.bf16.msra.mxu1 %v10952_v48  ;;  %v1732_v48 = vld [vmem:[#allocation7 + $0x4f0] sm:$0xff] }
 0x2d7   :  { %4999 = vmatpush1.bf16.msra.mxu0 %v10570_v0  ;;  %4959 = vmatprep.subr.bf16.mxu1 %v10961_v1  ;;  %v1856_v0 = vld [vmem:[#allocation7 + $0x8d0] sm:$0xff]  ;;  %v10627_v6 = vcombine.high %v1728_v46, %v1732_v48 }
 0x2d8   :  { %5000 = vmatprep.subr.bf16.mxu0 %v10579_v3  ;;  %v1860_v1 = vld [vmem:[#allocation7 + $0x8f0] sm:$0xff]  ;;  %v10618_v3 = vcombine.low %v1720_v52, %v1724_v54 }
 0x2d9   :  { %v10755_v7 = vcombine.high %v1856_v0, %v1860_v1  ;;  %v10754_v13 = vcombine.low %v1856_v0, %v1860_v1  ;;  %v1892_v60 = vld [vmem:[#allocation7 + $0x9f0] sm:$0xff] }
 0x2da   :  { %4960 = vmatpush1.bf16.msra.mxu1 %v10960_v9  ;;  %v1740_v9 = vld [vmem:[#allocation7 + $0x530] sm:$0xff] }
 0x2db   :  { %5001 = vmatpush1.bf16.msra.mxu0 %v10578_v10  ;;  %4961 = vmatprep.subr.bf16.mxu1 %v10969_v11  ;;  %v1864_v10 = vld [vmem:[#allocation7 + $0x910] sm:$0xff]  ;;  %v10635_v15 = vcombine.high %v1736_v8, %v1740_v9 }
 0x2dc   :  { %5002 = vmatprep.subr.bf16.mxu0 %v10587_v12  ;;  %v1868_v11 = vld [vmem:[#allocation7 + $0x930] sm:$0xff]  ;;  %v10626_v12 = vcombine.low %v1728_v46, %v1732_v48 }
 0x2dd   :  { %v10763_v16 = vcombine.high %v1864_v10, %v1868_v11  ;;  %v10762_v30 = vcombine.low %v1864_v10, %v1868_v11  ;;  %v10786_v10 = vcombine.low %v1888_v59, %v1892_v60 }
 0x2de   :  { %4962 = vmatpush1.bf16.msra.mxu1 %v10968_v21  ;;  %v1748_v21 = vld [vmem:[#allocation7 + $0x570] sm:$0xff] }
 0x2df   :  { %5003 = vmatpush1.bf16.msra.mxu0 %v10586_v22  ;;  %4963 = vmatprep.subr.bf16.mxu1 %v10977_v27  ;;  %v1872_v22 = vld [vmem:[#allocation7 + $0x950] sm:$0xff]  ;;  %v10643_v31 = vcombine.high %v1744_v19, %v1748_v21 }
 0x2e0   :  { %5004 = vmatprep.subr.bf16.mxu0 %v10595_v28  ;;  %v1876_v27 = vld [vmem:[#allocation7 + $0x970] sm:$0xff]  ;;  %v10634_v28 = vcombine.low %v1736_v8, %v1740_v9 }
 0x2e1   :  { %v10771_v32 = vcombine.high %v1872_v22, %v1876_v27  ;;  %v10770_v40 = vcombine.low %v1872_v22, %v1876_v27  ;;  %v1896_v8 = vld [vmem:[#allocation7 + $0xa10] sm:$0xff] }
 0x2e2   :  { %4964 = vmatpush1.bf16.msra.mxu1 %v10976_v34  ;;  %v1756_v34 = vld [vmem:[#allocation7 + $0x5b0] sm:$0xff] }
 0x2e3   :  { %5005 = vmatpush1.bf16.msra.mxu0 %v10594_v2  ;;  %5015 = vmatprep.subr.bf16.mxu1 %v10603_v35  ;;  %v1880_v2 = vld [vmem:[#allocation7 + $0x990] sm:$0xff]  ;;  %v10651_v43 = vcombine.high %v1752_v33, %v1756_v34 }
 0x2e4   :  { %5056 = vmatprep.subr.bf16.mxu0 %v10731_v36  ;;  %v1884_v35 = vld [vmem:[#allocation7 + $0x9b0] sm:$0xff]  ;;  %v10642_v36 = vcombine.low %v1744_v19, %v1748_v21 }
 0x2e5   :  { %4966 = vmatmul.mubr.bf16.vlgmr.msra.gmra.mrb[24].mxu1 %v12863_v49  ;;  %v10779_v55 = vcombine.high %v1880_v2, %v1884_v35  ;;  %v10778_v0 = vcombine.low %v1880_v2, %v1884_v35  ;;  %v1908_v19 = vld [vmem:[#allocation7 + $0xa70] sm:$0xff] }
 0x2e6   :  { %5007 = vmatmul.mubr.bf16.vlgmr.msra.gmra.mrb[20].mxu0 %v12807_v37  ;;  %5016 = vmatpush1.bf16.msra.mxu1 %v10602_v50 }
 0x2e7   :  { %5047 = vmatprep.mubr.bf16.mxu1 %v12842_v17  ;;  %5057 = vmatpush1.bf16.msra.mxu0 %v10730_v44  ;;  %v1760_v44 = vld [vmem:[#allocation7 + $0x5d0] sm:$0xff] }
 0x2e8   :  { %5088 = vmatprep.mubr.bf16.mxu0 %v12822_v42  ;;  %5017 = vmatprep.subr.bf16.mxu1 %v10611_v45  ;;  %v1764_v45 = vld [vmem:[#allocation7 + $0x5f0] sm:$0xff] }
 0x2e9   :  { %5058 = vmatprep.subr.bf16.mxu0 %v10739_v57  ;;  %v10659_v1 = vcombine.high %v1760_v44, %v1764_v45  ;;  %v10658_v9 = vcombine.low %v1760_v44, %v1764_v45 }
 0x2ea   :  { %5018 = vmatpush1.bf16.msra.mxu1 %v10610_v61 }
 0x2eb   :  { %5059 = vmatpush1.bf16.msra.mxu0 %v10738_v62  ;;  %5019 = vmatprep.subr.bf16.mxu1 %v10619_v63  ;;  %v10650_v63 = vcombine.low %v1752_v33, %v1756_v34  ;;  %v1916_v33 = vld [vmem:[#allocation7 + $0xab0] sm:$0xff] }
 0x2ec   :  { %5060 = vmatprep.subr.bf16.mxu0 %v10747_v25 }
 0x2ee   :  { %5020 = vmatpush1.bf16.msra.mxu1 %v10618_v3 }
 0x2ef   :  { %5061 = vmatpush1.bf16.msra.mxu0 %v10746_v4  ;;  %5021 = vmatprep.subr.bf16.mxu1 %v10627_v6  ;;  %v1768_v6 = vld [vmem:[#allocation7 + $0x610] sm:$0xff] }
 0x2f0   :  { %5062 = vmatprep.subr.bf16.mxu0 %v10755_v7  ;;  %v1772_v7 = vld [vmem:[#allocation7 + $0x630] sm:$0xff] }
 0x2f1   :  { %v10667_v11 = vcombine.high %v1768_v6, %v1772_v7  ;;  %v10666_v21 = vcombine.low %v1768_v6, %v1772_v7 }
 0x2f2   :  { %5022 = vmatpush1.bf16.msra.mxu1 %v10626_v12 }
 0x2f3   :  { %5063 = vmatpush1.bf16.msra.mxu0 %v10754_v13  ;;  %5023 = vmatprep.subr.bf16.mxu1 %v10635_v15  ;;  %v1776_v13 = vld [vmem:[#allocation7 + $0x650] sm:$0xff] }
 0x2f4   :  { %5064 = vmatprep.subr.bf16.mxu0 %v10763_v16  ;;  %v1780_v15 = vld [vmem:[#allocation7 + $0x670] sm:$0xff] }
 0x2f5   :  { %v1904_v16 = vld [vmem:[#allocation7 + $0xa50] sm:$0xff]  ;;  %v10675_v27 = vcombine.high %v1776_v13, %v1780_v15  ;;  %v10674_v34 = vcombine.low %v1776_v13, %v1780_v15 }
 0x2f6   :  { %5024 = vmatpush1.bf16.msra.mxu1 %v10634_v28  ;;  %v10803_v28 = vcombine.high %v1904_v16, %v1908_v19  ;;  %v10802_v2 = vcombine.low %v1904_v16, %v1908_v19  ;;  %v1824_v19 = vld [vmem:[#allocation7 + $0x7d0] sm:$0xff] }
 0x2f7   :  { %5065 = vmatpush1.bf16.msra.mxu0 %v10762_v30  ;;  %5025 = vmatprep.subr.bf16.mxu1 %v10643_v31  ;;  %v1784_v30 = vld [vmem:[#allocation7 + $0x690] sm:$0xff] }
 0x2f8   :  { %v4721_v50 = vpop.f32.mrb[12].mxu1  ;;  %5066 = vmatprep.subr.bf16.mxu0 %v10771_v32  ;;  %v4762_v51 = vpop.f32.mrb[8].mxu0  ;;  %v1788_v31 = vld [vmem:[#allocation7 + $0x6b0] sm:$0xff] }
 0x2f9   :  { %v4722_v52 = vadd.f32 %v4721_v50, %v12874_v47  ;;  %v4723_v54 = vpop.f32.mrb[13].mxu1  ;;  %v4764_v57 = vpop.f32.mrb[9].mxu0  ;;  %v10787_v47 = vcombine.high %v1888_v59, %v1892_v60  ;;  %v1912_v32 = vld [vmem:[#allocation7 + $0xa90] sm:$0xff]  ;;  %v10683_v35 = vcombine.high %v1784_v30, %v1788_v31 }
 0x2fa   :  { %v4724_v61 = vadd.f32 %v4723_v54, %v12876_v58  ;;  %5026 = vmatpush1.bf16.msra.mxu1 %v10642_v36  ;;  %v4725_v62 = vpop.f32.mrb[14].mxu1  ;;  %v4766_v25 = vpop.f32.mrb[10].mxu0  ;;  %v1900_v58 = vld [vmem:[#allocation7 + $0xa30] sm:$0xff]  ;;  %v10811_v36 = vcombine.high %v1912_v32, %v1916_v33  ;;  %v10810_v44 = vcombine.low %v1912_v32, %v1916_v33 }
 0x2fb   :  { %5067 = vmatpush1.bf16.msra.mxu0 %v10770_v40  ;;  %v12884_v46 = vadd.f32 %v4762_v51, %v4722_v52  ;;  %v4726_v48 = vpop.f32.mrb[15].mxu1  ;;  %5027 = vmatprep.subr.bf16.mxu1 %v10651_v43  ;;  %v4767_v3 = vpop.f32.mrb[11].mxu0  ;;  %v10795_v12 = vcombine.high %v1896_v8, %v1900_v58  ;;  %v10794_v22 = vcombine.low %v1896_v8, %v1900_v58  ;;  %v1792_v40 = vld [vmem:[#allocation7 + $0x6d0] sm:$0xff] }
 0x2fc   :  { %v12886_v4 = vadd.f32 %v4764_v57, %v4724_v61  ;;  %5068 = vmatprep.subr.bf16.mxu0 %v10779_v55  ;;  %v1796_v43 = vld [vmem:[#allocation7 + $0x6f0] sm:$0xff]  ;;  %v10682_v55 = vcombine.low %v1784_v30, %v1788_v31 }
 0x2fd   :  { %v1920_v50 = vld [vmem:[#allocation7 + $0xad0] sm:$0xff]  ;;  %v10691_v45 = vcombine.high %v1792_v40, %v1796_v43  ;;  %v10690_v61 = vcombine.low %v1792_v40, %v1796_v43 }
 0x2fe   :  { %5028 = vmatpush1.bf16.msra.mxu1 %v10650_v63  ;;  %v1924_v51 = vld [vmem:[#allocation7 + $0xaf0] sm:$0xff] }
 0x2ff   :  { %5069 = vmatpush1.bf16.msra.mxu0 %v10778_v0  ;;  %5029 = vmatprep.subr.bf16.mxu1 %v10659_v1  ;;  %v10819_v52 = vcombine.high %v1920_v50, %v1924_v51  ;;  %v1800_v54 = vld [vmem:[#allocation7 + $0x710] sm:$0xff]  ;;  %v10818_v62 = vcombine.low %v1920_v50, %v1924_v51 }
 0x300   :  { %5070 = vmatprep.subr.bf16.mxu0 %v10787_v47  ;;  %v1804_v57 = vld [vmem:[#allocation7 + $0x730] sm:$0xff] }
 0x301   :  { %v1928_v59 = vld [vmem:[#allocation7 + $0xb10] sm:$0xff]  ;;  %v10699_v63 = vcombine.high %v1800_v54, %v1804_v57  ;;  %v10698_v47 = vcombine.low %v1800_v54, %v1804_v57 }
 0x302   :  { %5030 = vmatpush1.bf16.msra.mxu1 %v10658_v9  ;;  %v1932_v60 = vld [vmem:[#allocation7 + $0xb30] sm:$0xff] }
 0x303   :  { %5071 = vmatpush1.bf16.msra.mxu0 %v10786_v10  ;;  %5031 = vmatprep.subr.bf16.mxu1 %v10667_v11  ;;  %v10827_v25 = vcombine.high %v1928_v59, %v1932_v60  ;;  %v1808_v48 = vld [vmem:[#allocation7 + $0x750] sm:$0xff]  ;;  %v10826_v6 = vcombine.low %v1928_v59, %v1932_v60 }
 0x304   :  { %5072 = vmatprep.subr.bf16.mxu0 %v10795_v12  ;;  %v1812_v0 = vld [vmem:[#allocation7 + $0x770] sm:$0xff] }
 0x305   :  { %v1936_v1 = vld [vmem:[#allocation7 + $0xb50] sm:$0xff]  ;;  %v10707_v7 = vcombine.high %v1808_v48, %v1812_v0  ;;  %v10706_v12 = vcombine.low %v1808_v48, %v1812_v0 }
 0x306   :  { %5032 = vmatpush1.bf16.msra.mxu1 %v10666_v21  ;;  %v1940_v3 = vld [vmem:[#allocation7 + $0xb70] sm:$0xff] }
 0x307   :  { %5073 = vmatpush1.bf16.msra.mxu0 %v10794_v22  ;;  %5033 = vmatprep.subr.bf16.mxu1 %v10675_v27  ;;  %v10835_v8 = vcombine.high %v1936_v1, %v1940_v3  ;;  %v1816_v58 = vld [vmem:[#allocation7 + $0x790] sm:$0xff]  ;;  %v10834_v13 = vcombine.low %v1936_v1, %v1940_v3 }
 0x308   :  { %5074 = vmatprep.subr.bf16.mxu0 %v10803_v28  ;;  %v1820_v9 = vld [vmem:[#allocation7 + $0x7b0] sm:$0xff] }
 0x309   :  { %v1944_v10 = vld [vmem:[#allocation7 + $0xb90] sm:$0xff]  ;;  %v10715_v15 = vcombine.high %v1816_v58, %v1820_v9  ;;  %v10714_v28 = vcombine.low %v1816_v58, %v1820_v9 }
 0x30a   :  { %5034 = vmatpush1.bf16.msra.mxu1 %v10674_v34  ;;  %v1948_v11 = vld [vmem:[#allocation7 + $0xbb0] sm:$0xff] }
 0x30b   :  { %5075 = vmatpush1.bf16.msra.mxu0 %v10802_v2  ;;  %5035 = vmatprep.subr.bf16.mxu1 %v10683_v35  ;;  %v10843_v16 = vcombine.high %v1944_v10, %v1948_v11  ;;  %v1828_v21 = vld [vmem:[#allocation7 + $0x7f0] sm:$0xff]  ;;  %v10842_v30 = vcombine.low %v1944_v10, %v1948_v11  ;;  %v1577_v2 = vld [vmem:[#allocation7 + $0x18] sm:$0xff] }
 0x30c   :  { %5076 = vmatprep.subr.bf16.mxu0 %v10811_v36  ;;  %v1952_v22 = vld [vmem:[#allocation7 + $0xbd0] sm:$0xff]  ;;  %v10723_v31 = vcombine.high %v1824_v19, %v1828_v21  ;;  %v1581_v35 = vld [vmem:[#allocation7 + $0x38] sm:$0xff]  ;;  %v10722_v36 = vcombine.low %v1824_v19, %v1828_v21 }
 0x30d   :  { %v1956_v27 = vld [vmem:[#allocation7 + $0xbf0] sm:$0xff]  ;;  %v10477_v50 = vcombine.high %v1577_v2, %v1581_v35  ;;  %v10476_v54 = vcombine.low %v1577_v2, %v1581_v35 }
 0x30e   :  { %5036 = vmatpush1.bf16.msra.mxu1 %v10682_v55  ;;  %v10851_v32 = vcombine.high %v1952_v22, %v1956_v27  ;;  %v1960_v33 = vld [vmem:[#allocation7 + $0xc10] sm:$0xff]  ;;  %v10850_v40 = vcombine.low %v1952_v22, %v1956_v27 }
 0x30f   :  { %5077 = vmatpush1.bf16.msra.mxu0 %v10810_v44  ;;  %5037 = vmatprep.subr.bf16.mxu1 %v10691_v45  ;;  %v1964_v34 = vld [vmem:[#allocation7 + $0xc30] sm:$0xff]  ;;  %v1585_v45 = vld [vmem:[#allocation7 + $0x58] sm:$0xff] }
 0x310   :  { %5078 = vmatprep.subr.bf16.mxu0 %v10819_v52  ;;  %v10859_v43 = vcombine.high %v1960_v33, %v1964_v34  ;;  %v1968_v51 = vld [vmem:[#allocation7 + $0xc50] sm:$0xff]  ;;  %v10858_v44 = vcombine.low %v1960_v33, %v1964_v34  ;;  %v1589_v52 = vld [vmem:[#allocation7 + $0x78] sm:$0xff] }
 0x311   :  { %v1972_v55 = vld [vmem:[#allocation7 + $0xc70] sm:$0xff]  ;;  %v10484_v48 = vcombine.low %v1585_v45, %v1589_v52 }
 0x312   :  { %5038 = vmatpush1.bf16.msra.mxu1 %v10690_v61  ;;  %v10867_v57 = vcombine.high %v1968_v51, %v1972_v55  ;;  %v1976_v59 = vld [vmem:[#allocation7 + $0xc90] sm:$0xff]  ;;  %v10485_v61 = vcombine.high %v1585_v45, %v1589_v52 }
 0x313   :  { %5079 = vmatpush1.bf16.msra.mxu0 %v10818_v62  ;;  %5039 = vmatprep.subr.bf16.mxu1 %v10699_v63  ;;  %v1980_v60 = vld [vmem:[#allocation7 + $0xcb0] sm:$0xff]  ;;  %v1593_v62 = vld [vmem:[#allocation7 + $0x98] sm:$0xff] }
 0x314   :  { %5080 = vmatprep.subr.bf16.mxu0 %v10827_v25  ;;  %v1597_v63 = vld [vmem:[#allocation7 + $0xb8] sm:$0xff]  ;;  %v10866_v25 = vcombine.low %v1968_v51, %v1972_v55  ;;  %v10875_v0 = vcombine.high %v1976_v59, %v1980_v60  ;;  %v1984_v3 = vld [vmem:[#allocation7 + $0xcd0] sm:$0xff] }
 0x315   :  { %v10493_v1 = vcombine.high %v1593_v62, %v1597_v63  ;;  %v10492_v58 = vcombine.low %v1593_v62, %v1597_v63  ;;  %v1992_v11 = vld [vmem:[#allocation7 + $0xd10] sm:$0xff]  ;;  %v1637_v62 = vld [vmem:[#allocation7 + $0x1f8] sm:$0xff] }
 0x316   :  { %5040 = vmatpush1.bf16.msra.mxu1 %v10698_v47  ;;  %v1988_v47 = vld [vmem:[#allocation7 + $0xcf0] sm:$0xff] }
 0x317   :  { %5081 = vmatpush1.bf16.msra.mxu0 %v10826_v6  ;;  %5041 = vmatprep.subr.bf16.mxu1 %v10707_v7  ;;  %v1601_v6 = vld [vmem:[#allocation7 + $0xd8] sm:$0xff]  ;;  %v10883_v9 = vcombine.high %v1984_v3, %v1988_v47  ;;  %v2000_v22 = vld [vmem:[#allocation7 + $0xd50] sm:$0xff] }
 0x318   :  { %5082 = vmatprep.subr.bf16.mxu0 %v10835_v8  ;;  %v1605_v7 = vld [vmem:[#allocation7 + $0xf8] sm:$0xff]  ;;  %v10874_v8 = vcombine.low %v1976_v59, %v1980_v60  ;;  %v2004_v27 = vld [vmem:[#allocation7 + $0xd70] sm:$0xff] }
 0x319   :  { %v10501_v10 = vcombine.high %v1601_v6, %v1605_v7  ;;  %v10899_v33 = vcombine.high %v2000_v22, %v2004_v27  ;;  %v2008_v2 = vld [vmem:[#allocation7 + $0xd90] sm:$0xff] }
 0x31a   :  { %5042 = vmatpush1.bf16.msra.mxu1 %v10706_v12  ;;  %v1996_v12 = vld [vmem:[#allocation7 + $0xd30] sm:$0xff] }
 0x31b   :  { %5083 = vmatpush1.bf16.msra.mxu0 %v10834_v13  ;;  %5043 = vmatprep.subr.bf16.mxu1 %v10715_v15  ;;  %v1609_v13 = vld [vmem:[#allocation7 + $0x118] sm:$0xff]  ;;  %v10891_v19 = vcombine.high %v1992_v11, %v1996_v12  ;;  %v2012_v35 = vld [vmem:[#allocation7 + $0xdb0] sm:$0xff] }
 0x31c   :  { %5084 = vmatprep.subr.bf16.mxu0 %v10843_v16  ;;  %v1613_v15 = vld [vmem:[#allocation7 + $0x138] sm:$0xff]  ;;  %v10500_v16 = vcombine.low %v1601_v6, %v1605_v7  ;;  %v10907_v51 = vcombine.high %v2008_v2, %v2012_v35  ;;  %v2016_v52 = vld [vmem:[#allocation7 + $0xdd0] sm:$0xff] }
 0x31d   :  { %v10509_v21 = vcombine.high %v1609_v13, %v1613_v15  ;;  %v2024_v7 = vld [vmem:[#allocation7 + $0xe10] sm:$0xff] }
 0x31e   :  { %5044 = vmatpush1.bf16.msra.mxu1 %v10714_v28  ;;  %v1617_v28 = vld [vmem:[#allocation7 + $0x158] sm:$0xff] }
 0x31f   :  { %5085 = vmatpush1.bf16.msra.mxu0 %v10842_v30  ;;  %5045 = vmatprep.subr.bf16.mxu1 %v10723_v31  ;;  %v1621_v30 = vld [vmem:[#allocation7 + $0x178] sm:$0xff]  ;;  %v10890_v31 = vcombine.low %v1992_v11, %v1996_v12 }
 0x320   :  { %5086 = vmatprep.subr.bf16.mxu0 %v10851_v32  ;;  %v10508_v32 = vcombine.low %v1609_v13, %v1613_v15  ;;  %v10517_v34 = vcombine.high %v1617_v28, %v1621_v30  ;;  %v2032_v13 = vld [vmem:[#allocation7 + $0xe50] sm:$0xff] }
 0x321   :  { %v2036_v15 = vld [vmem:[#allocation7 + $0xe70] sm:$0xff] }
 0x322   :  { %5046 = vmatpush1.bf16.msra.mxu1 %v10722_v36  ;;  %v1625_v36 = vld [vmem:[#allocation7 + $0x198] sm:$0xff] }
 0x323   :  { %5087 = vmatpush1.bf16.msra.mxu0 %v10850_v40  ;;  %5097 = vmatprep.subr.bf16.mxu1 %v10859_v43  ;;  %v1629_v40 = vld [vmem:[#allocation7 + $0x1b8] sm:$0xff]  ;;  %v10898_v43 = vcombine.low %v2000_v22, %v2004_v27  ;;  %v10931_v22 = vcombine.high %v2032_v13, %v2036_v15 }
 0x324   :  { %5138 = vmatprep.subr.bf16.mxu0 %v10477_v50  ;;  %v10516_v50 = vcombine.low %v1617_v28, %v1621_v30  ;;  %v10525_v45 = vcombine.high %v1625_v36, %v1629_v40  ;;  %v2040_v28 = vld [vmem:[#allocation7 + $0xe90] sm:$0xff] }
 0x325   :  { %5048 = vmatmul.mubr.bf16.vlgmr.msra.gmra.mrb[28].mxu1 %v12844_v20  ;;  %v2044_v30 = vld [vmem:[#allocation7 + $0xeb0] sm:$0xff] }
 0x326   :  { %5089 = vmatmul.mubr.bf16.vlgmr.msra.gmra.mrb[24].mxu0 %v12840_v14  ;;  %5098 = vmatpush1.bf16.msra.mxu1 %v10858_v44 }
 0x327   :  { %5129 = vmatprep.mubr.bf16.mxu1 %v12861_v5  ;;  %5139 = vmatpush1.bf16.msra.mxu0 %v10476_v54  ;;  %v2020_v54 = vld [vmem:[#allocation7 + $0xdf0] sm:$0xff] }
 0x328   :  { %5170 = vmatprep.mubr.bf16.mxu0 %v12810_v39  ;;  %5099 = vmatprep.subr.bf16.mxu1 %v10867_v57  ;;  %v10882_v39 = vcombine.low %v1984_v3, %v1988_v47  ;;  %v10524_v47 = vcombine.low %v1625_v36, %v1629_v40  ;;  %v10915_v6 = vcombine.high %v2016_v52, %v2020_v54  ;;  %v2048_v36 = vld [vmem:[#allocation7 + $0xed0] sm:$0xff] }
 0x329   :  { %5140 = vmatprep.subr.bf16.mxu0 %v10485_v61  ;;  %v1633_v61 = vld [vmem:[#allocation7 + $0x1d8] sm:$0xff]  ;;  %v2052_v40 = vld [vmem:[#allocation7 + $0xef0] sm:$0xff] }
 0x32a   :  { %5100 = vmatpush1.bf16.msra.mxu1 %v10866_v25 }
 0x32b   :  { %5141 = vmatpush1.bf16.msra.mxu0 %v10484_v48  ;;  %5101 = vmatprep.subr.bf16.mxu1 %v10875_v0  ;;  %v10906_v0 = vcombine.low %v2008_v2, %v2012_v35  ;;  %v10939_v2 = vcombine.high %v2040_v28, %v2044_v30 }
 0x32c   :  { %5142 = vmatprep.subr.bf16.mxu0 %v10493_v1 }
 0x32e   :  { %5102 = vmatpush1.bf16.msra.mxu1 %v10874_v8  ;;  %v2028_v8 = vld [vmem:[#allocation7 + $0xe30] sm:$0xff] }
 0x32f   :  { %5143 = vmatpush1.bf16.msra.mxu0 %v10492_v58  ;;  %5103 = vmatprep.subr.bf16.mxu1 %v10883_v9  ;;  %v1641_v58 = vld [vmem:[#allocation7 + $0x218] sm:$0xff]  ;;  %v10923_v11 = vcombine.high %v2024_v7, %v2028_v8 }
 0x330   :  { %5144 = vmatprep.subr.bf16.mxu0 %v10501_v10  ;;  %v1645_v9 = vld [vmem:[#allocation7 + $0x238] sm:$0xff]  ;;  %v10914_v10 = vcombine.low %v2016_v52, %v2020_v54  ;;  %v2056_v54 = vld [vmem:[#allocation7 + $0xf10] sm:$0xff] }
 0x331   :  { %v10541_v12 = vcombine.high %v1641_v58, %v1645_v9 }
 0x332   :  { %5104 = vmatpush1.bf16.msra.mxu1 %v10882_v39  ;;  %v1649_v39 = vld [vmem:[#allocation7 + $0x258] sm:$0xff] }
 0x333   :  { %5145 = vmatpush1.bf16.msra.mxu0 %v10500_v16  ;;  %5105 = vmatprep.subr.bf16.mxu1 %v10891_v19  ;;  %v1653_v16 = vld [vmem:[#allocation7 + $0x278] sm:$0xff]  ;;  %v10922_v19 = vcombine.low %v2024_v7, %v2028_v8 }
 0x334   :  { %5146 = vmatprep.subr.bf16.mxu0 %v10509_v21  ;;  %v10540_v21 = vcombine.low %v1641_v58, %v1645_v9  ;;  %v10549_v27 = vcombine.high %v1649_v39, %v1653_v16 }
 0x336   :  { %5106 = vmatpush1.bf16.msra.mxu1 %v10890_v31  ;;  %v1657_v31 = vld [vmem:[#allocation7 + $0x298] sm:$0xff] }
 0x337   :  { %5147 = vmatpush1.bf16.msra.mxu0 %v10508_v32  ;;  %5107 = vmatprep.subr.bf16.mxu1 %v10899_v33  ;;  %v1661_v32 = vld [vmem:[#allocation7 + $0x2b8] sm:$0xff]  ;;  %v10930_v33 = vcombine.low %v2032_v13, %v2036_v15 }
 0x338   :  { %v12892_v55 = vpop.f32.mrb[12].mxu0  ;;  %v4803_v44 = vpop.f32.mrb[16].mxu1  ;;  %5148 = vmatprep.subr.bf16.mxu0 %v10517_v34  ;;  %v10548_v34 = vcombine.low %v1649_v39, %v1653_v16  ;;  %v10557_v35 = vcombine.high %v1657_v31, %v1661_v32 }
 0x339   :  { %v12895_v57 = vadd.f32 %v4803_v44, %v12884_v46  ;;  %v12897_v59 = vpop.f32.mrb[13].mxu0  ;;  %v4805_v60 = vpop.f32.mrb[17].mxu1  ;;  %v10533_v46 = vcombine.high %v1633_v61, %v1637_v62  ;;  %v10556_v44 = vcombine.low %v1657_v31, %v1661_v32 }
 0x33a   :  { %v12900_v63 = vadd.f32 %v4805_v60, %v12886_v4  ;;  %v4848_v25 = vpop.f32.mrb[14].mxu0  ;;  %5108 = vmatpush1.bf16.msra.mxu1 %v10898_v43  ;;  %v4807_v48 = vpop.f32.mrb[18].mxu1  ;;  %v10532_v4 = vcombine.low %v1633_v61, %v1637_v62  ;;  %v1665_v43 = vld [vmem:[#allocation7 + $0x2d8] sm:$0xff]  ;;  %v2060_v60 = vld [vmem:[#allocation7 + $0xf30] sm:$0xff] }
 0x33b   :  { %5149 = vmatpush1.bf16.msra.mxu0 %v10516_v50  ;;  %v4849_v1 = vpop.f32.mrb[15].mxu0  ;;  %v4808_v3 = vpop.f32.mrb[19].mxu1  ;;  %5109 = vmatprep.subr.bf16.mxu1 %v10907_v51  ;;  %v1669_v50 = vld [vmem:[#allocation7 + $0x2f8] sm:$0xff]  ;;  %v10938_v51 = vcombine.low %v2040_v28, %v2044_v30  ;;  %v10946_v25 = vcombine.low %v2048_v36, %v2052_v40  ;;  %v10954_v7 = vcombine.low %v2056_v54, %v2060_v60 }
 0x33c   :  { %5150 = vmatprep.subr.bf16.mxu0 %v10525_v45  ;;  %v10947_v45 = vcombine.high %v2048_v36, %v2052_v40  ;;  %v10565_v52 = vcombine.high %v1665_v43, %v1669_v50  ;;  %v1673_v61 = vld [vmem:[#allocation7 + $0x318] sm:$0xff]  ;;  %v10564_v48 = vcombine.low %v1665_v43, %v1669_v50  ;;  %v2064_v3 = vld [vmem:[#allocation7 + $0xf50] sm:$0xff] }
 0x33d   :  { %v1677_v62 = vld [vmem:[#allocation7 + $0x338] sm:$0xff] }
 0x33e   :  { %5110 = vmatpush1.bf16.msra.mxu1 %v10906_v0  ;;  %v10955_v0 = vcombine.high %v2056_v54, %v2060_v60  ;;  %v10573_v1 = vcombine.high %v1673_v61, %v1677_v62  ;;  %v10572_v8 = vcombine.low %v1673_v61, %v1677_v62  ;;  %v1845_v54 = vld [vmem:[#allocation7 + $0x878] sm:$0xff] }
 0x33f   :  { %5151 = vmatpush1.bf16.msra.mxu0 %v10524_v47  ;;  %5111 = vmatprep.subr.bf16.mxu1 %v10915_v6  ;;  %v2068_v47 = vld [vmem:[#allocation7 + $0xf70] sm:$0xff]  ;;  %v1681_v6 = vld [vmem:[#allocation7 + $0x358] sm:$0xff] }
 0x340   :  { %5152 = vmatprep.subr.bf16.mxu0 %v10533_v46  ;;  %v1685_v46 = vld [vmem:[#allocation7 + $0x378] sm:$0xff]  ;;  %v10963_v58 = vcombine.high %v2064_v3, %v2068_v47  ;;  %v10962_v13 = vcombine.low %v2064_v3, %v2068_v47 }
 0x341   :  { %v10581_v9 = vcombine.high %v1681_v6, %v1685_v46  ;;  %v10580_v15 = vcombine.low %v1681_v6, %v1685_v46  ;;  %v1721_v62 = vld [vmem:[#allocation7 + $0x498] sm:$0xff] }
 0x342   :  { %5112 = vmatpush1.bf16.msra.mxu1 %v10914_v10  ;;  %v2072_v10 = vld [vmem:[#allocation7 + $0xf90] sm:$0xff] }
 0x343   :  { %5153 = vmatpush1.bf16.msra.mxu0 %v10532_v4  ;;  %5113 = vmatprep.subr.bf16.mxu1 %v10923_v11  ;;  %v2076_v4 = vld [vmem:[#allocation7 + $0xfb0] sm:$0xff]  ;;  %v1689_v11 = vld [vmem:[#allocation7 + $0x398] sm:$0xff] }
 0x344   :  { %5154 = vmatprep.subr.bf16.mxu0 %v10541_v12  ;;  %v1693_v12 = vld [vmem:[#allocation7 + $0x3b8] sm:$0xff]  ;;  %v10971_v39 = vcombine.high %v2072_v10, %v2076_v4  ;;  %v10970_v28 = vcombine.low %v2072_v10, %v2076_v4 }
 0x345   :  { %v10589_v16 = vcombine.high %v1689_v11, %v1693_v12  ;;  %v10588_v30 = vcombine.low %v1689_v11, %v1693_v12  ;;  %v1737_v11 = vld [vmem:[#allocation7 + $0x518] sm:$0xff] }
 0x346   :  { %5114 = vmatpush1.bf16.msra.mxu1 %v10922_v19  ;;  %v2080_v19 = vld [vmem:[#allocation7 + $0xfd0] sm:$0xff]  ;;  %v1741_v12 = vld [vmem:[#allocation7 + $0x538] sm:$0xff] }
 0x347   :  { %5155 = vmatpush1.bf16.msra.mxu0 %v10540_v21  ;;  %5115 = vmatprep.subr.bf16.mxu1 %v10931_v22  ;;  %v2084_v21 = vld [vmem:[#allocation7 + $0xff0] sm:$0xff]  ;;  %v1697_v22 = vld [vmem:[#allocation7 + $0x3d8] sm:$0xff] }
 0x348   :  { %5156 = vmatprep.subr.bf16.mxu0 %v10549_v27  ;;  %v1701_v27 = vld [vmem:[#allocation7 + $0x3f8] sm:$0xff]  ;;  %v10979_v31 = vcombine.high %v2080_v19, %v2084_v21  ;;  %v10978_v36 = vcombine.low %v2080_v19, %v2084_v21 }
 0x349   :  { %v10597_v32 = vcombine.high %v1697_v22, %v1701_v27  ;;  %v10596_v40 = vcombine.low %v1697_v22, %v1701_v27  ;;  %v1745_v21 = vld [vmem:[#allocation7 + $0x558] sm:$0xff] }
 0x34a   :  { %5116 = vmatpush1.bf16.msra.mxu1 %v10930_v33  ;;  %v1705_v33 = vld [vmem:[#allocation7 + $0x418] sm:$0xff] }
 0x34b   :  { %5157 = vmatpush1.bf16.msra.mxu0 %v10548_v34  ;;  %5117 = vmatprep.subr.bf16.mxu1 %v10939_v2  ;;  %v1709_v34 = vld [vmem:[#allocation7 + $0x438] sm:$0xff] }
 0x34c   :  { %5158 = vmatprep.subr.bf16.mxu0 %v10557_v35  ;;  %v1833_v2 = vld [vmem:[#allocation7 + $0x818] sm:$0xff]  ;;  %v10605_v43 = vcombine.high %v1705_v33, %v1709_v34 }
 0x34d   :  { %v1837_v35 = vld [vmem:[#allocation7 + $0x838] sm:$0xff] }
 0x34e   :  { %5118 = vmatpush1.bf16.msra.mxu1 %v10938_v51  ;;  %v10733_v50 = vcombine.high %v1833_v2, %v1837_v35  ;;  %v1713_v51 = vld [vmem:[#allocation7 + $0x458] sm:$0xff]  ;;  %v10732_v60 = vcombine.low %v1833_v2, %v1837_v35 }
 0x34f   :  { %5159 = vmatpush1.bf16.msra.mxu0 %v10556_v44  ;;  %5119 = vmatprep.subr.bf16.mxu1 %v10947_v45  ;;  %v1717_v44 = vld [vmem:[#allocation7 + $0x478] sm:$0xff]  ;;  %v10604_v45 = vcombine.low %v1705_v33, %v1709_v34 }
 0x350   :  { %5160 = vmatprep.subr.bf16.mxu0 %v10565_v52  ;;  %v1841_v52 = vld [vmem:[#allocation7 + $0x858] sm:$0xff]  ;;  %v10613_v61 = vcombine.high %v1713_v51, %v1717_v44  ;;  %v10612_v3 = vcombine.low %v1713_v51, %v1717_v44 }
 0x351   :  { %v10740_v47 = vcombine.low %v1841_v52, %v1845_v54  ;;  %v1749_v22 = vld [vmem:[#allocation7 + $0x578] sm:$0xff] }
 0x352   :  { %5120 = vmatpush1.bf16.msra.mxu1 %v10946_v25  ;;  %v1725_v25 = vld [vmem:[#allocation7 + $0x4b8] sm:$0xff] }
 0x353   :  { %5161 = vmatpush1.bf16.msra.mxu0 %v10564_v48  ;;  %5121 = vmatprep.subr.bf16.mxu1 %v10955_v0  ;;  %v10741_v48 = vcombine.high %v1841_v52, %v1845_v54  ;;  %v1849_v0 = vld [vmem:[#allocation7 + $0x898] sm:$0xff]  ;;  %v10621_v6 = vcombine.high %v1721_v62, %v1725_v25  ;;  %v10620_v10 = vcombine.low %v1721_v62, %v1725_v25 }
 0x354   :  { %5162 = vmatprep.subr.bf16.mxu0 %v10573_v1  ;;  %v1853_v1 = vld [vmem:[#allocation7 + $0x8b8] sm:$0xff] }
 0x355   :  { %v10749_v46 = vcombine.high %v1849_v0, %v1853_v1  ;;  %v1873_v27 = vld [vmem:[#allocation7 + $0x958] sm:$0xff] }
 0x356   :  { %5122 = vmatpush1.bf16.msra.mxu1 %v10954_v7  ;;  %v1729_v7 = vld [vmem:[#allocation7 + $0x4d8] sm:$0xff] }
 0x357   :  { %5163 = vmatpush1.bf16.msra.mxu0 %v10572_v8  ;;  %5123 = vmatprep.subr.bf16.mxu1 %v10963_v58  ;;  %v1733_v8 = vld [vmem:[#allocation7 + $0x4f8] sm:$0xff] }
 0x358   :  { %5164 = vmatprep.subr.bf16.mxu0 %v10581_v9  ;;  %v1857_v58 = vld [vmem:[#allocation7 + $0x8d8] sm:$0xff]  ;;  %v10629_v4 = vcombine.high %v1729_v7, %v1733_v8 }
 0x359   :  { %v1861_v9 = vld [vmem:[#allocation7 + $0x8f8] sm:$0xff] }
 0x35a   :  { %5124 = vmatpush1.bf16.msra.mxu1 %v10962_v13  ;;  %v1865_v13 = vld [vmem:[#allocation7 + $0x918] sm:$0xff] }
 0x35b   :  { %5165 = vmatpush1.bf16.msra.mxu0 %v10580_v15  ;;  %5125 = vmatprep.subr.bf16.mxu1 %v10971_v39  ;;  %v1869_v15 = vld [vmem:[#allocation7 + $0x938] sm:$0xff]  ;;  %v10756_v39 = vcombine.low %v1857_v58, %v1861_v9 }
 0x35c   :  { %5166 = vmatprep.subr.bf16.mxu0 %v10589_v16  ;;  %v10637_v16 = vcombine.high %v1737_v11, %v1741_v12  ;;  %v10765_v19 = vcombine.high %v1865_v13, %v1869_v15  ;;  %v1753_v34 = vld [vmem:[#allocation7 + $0x598] sm:$0xff] }
 0x35d   :  { %v1757_v2 = vld [vmem:[#allocation7 + $0x5b8] sm:$0xff] }
 0x35e   :  { %5126 = vmatpush1.bf16.msra.mxu1 %v10970_v28  ;;  %v1877_v28 = vld [vmem:[#allocation7 + $0x978] sm:$0xff] }
 0x35f   :  { %5167 = vmatpush1.bf16.msra.mxu0 %v10588_v30  ;;  %5127 = vmatprep.subr.bf16.mxu1 %v10979_v31  ;;  %v10636_v30 = vcombine.low %v1737_v11, %v1741_v12  ;;  %v10764_v31 = vcombine.low %v1865_v13, %v1869_v15  ;;  %v10773_v33 = vcombine.high %v1873_v27, %v1877_v28  ;;  %v1881_v35 = vld [vmem:[#allocation7 + $0x998] sm:$0xff] }
 0x360   :  { %5168 = vmatprep.subr.bf16.mxu0 %v10597_v32  ;;  %v10645_v32 = vcombine.high %v1745_v21, %v1749_v22  ;;  %v1761_v52 = vld [vmem:[#allocation7 + $0x5d8] sm:$0xff] }
 0x361   :  { %v1765_v54 = vld [vmem:[#allocation7 + $0x5f8] sm:$0xff] }
 0x362   :  { %5128 = vmatpush1.bf16.msra.mxu1 %v10978_v36  ;;  %v1885_v36 = vld [vmem:[#allocation7 + $0x9b8] sm:$0xff] }
 0x363   :  { %5169 = vmatpush1.bf16.msra.mxu0 %v10596_v40  ;;  %5179 = vmatprep.subr.bf16.mxu1 %v10605_v43  ;;  %v10644_v40 = vcombine.low %v1745_v21, %v1749_v22  ;;  %v10772_v43 = vcombine.low %v1873_v27, %v1877_v28  ;;  %v1889_v25 = vld [vmem:[#allocation7 + $0x9d8] sm:$0xff] }
 0x364   :  { %5220 = vmatprep.subr.bf16.mxu0 %v10733_v50  ;;  %v10653_v50 = vcombine.high %v1753_v34, %v1757_v2  ;;  %v1777_v15 = vld [vmem:[#allocation7 + $0x658] sm:$0xff] }
 0x365   :  { %5130 = vmatmul.mubr.bf16.vlgmr.msra.gmra.mrb[32].mxu1 %v12863_v49  ;;  %v1785_v28 = vld [vmem:[#allocation7 + $0x698] sm:$0xff] }
 0x366   :  { %5171 = vmatmul.mubr.bf16.vlgmr.msra.gmra.mrb[28].mxu0 %v12807_v37  ;;  %5180 = vmatpush1.bf16.msra.mxu1 %v10604_v45  ;;  %v10748_v37 = vcombine.low %v1849_v0, %v1853_v1  ;;  %v10781_v45 = vcombine.high %v1881_v35, %v1885_v36 }
 0x367   :  { %5211 = vmatprep.mubr.bf16.mxu1 %v12842_v17  ;;  %5221 = vmatpush1.bf16.msra.mxu0 %v10732_v60  ;;  %v10757_v17 = vcombine.high %v1857_v58, %v1861_v9  ;;  %v10661_v58 = vcombine.high %v1761_v52, %v1765_v54 }
 0x368   :  { %5252 = vmatprep.mubr.bf16.mxu0 %v12822_v42  ;;  %5181 = vmatprep.subr.bf16.mxu1 %v10613_v61  ;;  %v10628_v42 = vcombine.low %v1729_v7, %v1733_v8  ;;  %v10780_v8 = vcombine.low %v1881_v35, %v1885_v36  ;;  %v1793_v36 = vld [vmem:[#allocation7 + $0x6d8] sm:$0xff] }
 0x369   :  { %5222 = vmatprep.subr.bf16.mxu0 %v10741_v48  ;;  %v1893_v48 = vld [vmem:[#allocation7 + $0x9f8] sm:$0xff] }
 0x36a   :  { %5182 = vmatpush1.bf16.msra.mxu1 %v10612_v3  ;;  %v10788_v11 = vcombine.low %v1889_v25, %v1893_v48 }
 0x36b   :  { %5223 = vmatpush1.bf16.msra.mxu0 %v10740_v47  ;;  %5183 = vmatprep.subr.bf16.mxu1 %v10621_v6  ;;  %v10652_v47 = vcombine.low %v1753_v34, %v1757_v2 }
 0x36c   :  { %5224 = vmatprep.subr.bf16.mxu0 %v10749_v46 }
 0x36e   :  { %5184 = vmatpush1.bf16.msra.mxu1 %v10620_v10  ;;  %v1769_v10 = vld [vmem:[#allocation7 + $0x618] sm:$0xff] }
 0x36f   :  { %5225 = vmatpush1.bf16.msra.mxu0 %v10748_v37  ;;  %5185 = vmatprep.subr.bf16.mxu1 %v10629_v4  ;;  %v1773_v37 = vld [vmem:[#allocation7 + $0x638] sm:$0xff] }
 0x370   :  { %5226 = vmatprep.subr.bf16.mxu0 %v10757_v17  ;;  %v1897_v4 = vld [vmem:[#allocation7 + $0xa18] sm:$0xff]  ;;  %v10660_v17 = vcombine.low %v1761_v52, %v1765_v54  ;;  %v10669_v12 = vcombine.high %v1769_v10, %v1773_v37 }
 0x371   :  { %v1801_v54 = vld [vmem:[#allocation7 + $0x718] sm:$0xff] }
 0x372   :  { %5186 = vmatpush1.bf16.msra.mxu1 %v10628_v42  ;;  %v1781_v42 = vld [vmem:[#allocation7 + $0x678] sm:$0xff] }
 0x373   :  { %5227 = vmatpush1.bf16.msra.mxu0 %v10756_v39  ;;  %5187 = vmatprep.subr.bf16.mxu1 %v10637_v16  ;;  %v1905_v39 = vld [vmem:[#allocation7 + $0xa58] sm:$0xff]  ;;  %v10677_v22 = vcombine.high %v1777_v15, %v1781_v42 }
 0x374   :  { %5228 = vmatprep.subr.bf16.mxu0 %v10765_v19  ;;  %v1909_v16 = vld [vmem:[#allocation7 + $0xa78] sm:$0xff]  ;;  %v10668_v19 = vcombine.low %v1769_v10, %v1773_v37 }
 0x375   :  { %v10805_v27 = vcombine.high %v1905_v39, %v1909_v16  ;;  %v10804_v34 = vcombine.low %v1905_v39, %v1909_v16  ;;  %v1817_v37 = vld [vmem:[#allocation7 + $0x798] sm:$0xff] }
 0x376   :  { %5188 = vmatpush1.bf16.msra.mxu1 %v10636_v30  ;;  %v1789_v30 = vld [vmem:[#allocation7 + $0x6b8] sm:$0xff] }
 0x377   :  { %5229 = vmatpush1.bf16.msra.mxu0 %v10764_v31  ;;  %5189 = vmatprep.subr.bf16.mxu1 %v10645_v32  ;;  %v1913_v31 = vld [vmem:[#allocation7 + $0xa98] sm:$0xff]  ;;  %v10685_v2 = vcombine.high %v1785_v28, %v1789_v30 }
 0x378   :  { %v4885_v51 = vpop.f32.mrb[20].mxu1  ;;  %v4926_v44 = vpop.f32.mrb[16].mxu0  ;;  %5230 = vmatprep.subr.bf16.mxu0 %v10773_v33  ;;  %v1917_v32 = vld [vmem:[#allocation7 + $0xab8] sm:$0xff]  ;;  %v10676_v33 = vcombine.low %v1777_v15, %v1781_v42 }
 0x379   :  { %v4886_v60 = vadd.f32 %v4885_v51, %v12892_v55  ;;  %v4887_v61 = vpop.f32.mrb[21].mxu1  ;;  %v4928_v62 = vpop.f32.mrb[17].mxu0  ;;  %v10789_v55 = vcombine.high %v1889_v25, %v1893_v48  ;;  %v10813_v35 = vcombine.high %v1913_v31, %v1917_v32  ;;  %v10684_v51 = vcombine.low %v1785_v28, %v1789_v30  ;;  %v1825_v42 = vld [vmem:[#allocation7 + $0x7d8] sm:$0xff] }
 0x37a   :  { %v4888_v0 = vadd.f32 %v4887_v61, %v12897_v59  ;;  %v4889_v1 = vpop.f32.mrb[22].mxu1  ;;  %v4930_v3 = vpop.f32.mrb[18].mxu0  ;;  %5190 = vmatpush1.bf16.msra.mxu1 %v10644_v40  ;;  %v1901_v59 = vld [vmem:[#allocation7 + $0xa38] sm:$0xff] }
 0x37b   :  { %v12908_v6 = vadd.f32 %v4926_v44, %v4886_v60  ;;  %5231 = vmatpush1.bf16.msra.mxu0 %v10772_v43  ;;  %v4890_v46 = vpop.f32.mrb[23].mxu1  ;;  %v4931_v7 = vpop.f32.mrb[19].mxu0  ;;  %5191 = vmatprep.subr.bf16.mxu1 %v10653_v50  ;;  %v10797_v13 = vcombine.high %v1897_v4, %v1901_v59  ;;  %v10796_v21 = vcombine.low %v1897_v4, %v1901_v59  ;;  %v1797_v40 = vld [vmem:[#allocation7 + $0x6f8] sm:$0xff] }
 0x37c   :  { %v12910_v9 = vadd.f32 %v4928_v62, %v4888_v0  ;;  %5232 = vmatprep.subr.bf16.mxu0 %v10781_v45  ;;  %v1921_v43 = vld [vmem:[#allocation7 + $0xad8] sm:$0xff]  ;;  %v10812_v44 = vcombine.low %v1913_v31, %v1917_v32  ;;  %v10693_v45 = vcombine.high %v1793_v36, %v1797_v40  ;;  %v10692_v25 = vcombine.low %v1793_v36, %v1797_v40  ;;  %v1182_v32 = vld [vmem:[#allocation6] sm:$0xff] }
 0x37d   :  { %v1925_v50 = vld [vmem:[#allocation7 + $0xaf8] sm:$0xff] }
 0x37e   :  { %5192 = vmatpush1.bf16.msra.mxu1 %v10652_v47  ;;  %v10821_v52 = vcombine.high %v1921_v43, %v1925_v50  ;;  %v1805_v60 = vld [vmem:[#allocation7 + $0x738] sm:$0xff]  ;;  %v10820_v48 = vcombine.low %v1921_v43, %v1925_v50  ;;  %v1190_v50 = vld [vmem:[#allocation6 + $0x40] sm:$0xff] }
 0x37f   :  { %5233 = vmatpush1.bf16.msra.mxu0 %v10780_v8  ;;  %5193 = vmatprep.subr.bf16.mxu1 %v10661_v58  ;;  %v1929_v61 = vld [vmem:[#allocation7 + $0xb18] sm:$0xff]  ;;  %v10701_v0 = vcombine.high %v1801_v54, %v1805_v60  ;;  %v10700_v8 = vcombine.low %v1801_v54, %v1805_v60 }
 0x380   :  { %5234 = vmatprep.subr.bf16.mxu0 %v10789_v55  ;;  %v1933_v62 = vld [vmem:[#allocation7 + $0xb38] sm:$0xff] }
 0x381   :  { %v10829_v1 = vcombine.high %v1929_v61, %v1933_v62  ;;  %v1809_v3 = vld [vmem:[#allocation7 + $0x758] sm:$0xff]  ;;  %v10828_v58 = vcombine.low %v1929_v61, %v1933_v62 }
 0x382   :  { %5194 = vmatpush1.bf16.msra.mxu1 %v10660_v17  ;;  %v1813_v47 = vld [vmem:[#allocation7 + $0x778] sm:$0xff] }
 0x383   :  { %5235 = vmatpush1.bf16.msra.mxu0 %v10788_v11  ;;  %5195 = vmatprep.subr.bf16.mxu1 %v10669_v12  ;;  %v1937_v46 = vld [vmem:[#allocation7 + $0xb58] sm:$0xff]  ;;  %v10709_v55 = vcombine.high %v1809_v3, %v1813_v47  ;;  %v10708_v11 = vcombine.low %v1809_v3, %v1813_v47 }
 0x384   :  { %5236 = vmatprep.subr.bf16.mxu0 %v10797_v13  ;;  %v1941_v7 = vld [vmem:[#allocation7 + $0xb78] sm:$0xff] }
 0x385   :  { %v10837_v10 = vcombine.high %v1937_v46, %v1941_v7  ;;  %v1821_v4 = vld [vmem:[#allocation7 + $0x7b8] sm:$0xff]  ;;  %v10836_v12 = vcombine.low %v1937_v46, %v1941_v7 }
 0x386   :  { %5196 = vmatpush1.bf16.msra.mxu1 %v10668_v19  ;;  %v1945_v59 = vld [vmem:[#allocation7 + $0xb98] sm:$0xff]  ;;  %v10717_v13 = vcombine.high %v1817_v37, %v1821_v4 }
 0x387   :  { %5237 = vmatpush1.bf16.msra.mxu0 %v10796_v21  ;;  %5197 = vmatprep.subr.bf16.mxu1 %v10677_v22  ;;  %v1949_v17 = vld [vmem:[#allocation7 + $0xbb8] sm:$0xff]  ;;  %v10716_v21 = vcombine.low %v1817_v37, %v1821_v4 }
 0x388   :  { %5238 = vmatprep.subr.bf16.mxu0 %v10805_v27  ;;  %v10845_v15 = vcombine.high %v1945_v59, %v1949_v17  ;;  %v1829_v39 = vld [vmem:[#allocation7 + $0x7f8] sm:$0xff]  ;;  %v10844_v22 = vcombine.low %v1945_v59, %v1949_v17  ;;  %v1214_v59 = vld [vmem:[#allocation6 + $0x100] sm:$0xff] }
 0x389   :  { %v1953_v16 = vld [vmem:[#allocation7 + $0xbd8] sm:$0xff]  ;;  %v10725_v27 = vcombine.high %v1825_v42, %v1829_v39  ;;  %v1218_v17 = vld [vmem:[#allocation6 + $0x120] sm:$0xff] }
 0x38a   :  { %5198 = vmatpush1.bf16.msra.mxu1 %v10676_v33  ;;  %v1957_v19 = vld [vmem:[#allocation7 + $0xbf8] sm:$0xff]  ;;  %v1186_v33 = vld [vmem:[#allocation6 + $0x20] sm:$0xff] }
 0x38b   :  { %5239 = vmatpush1.bf16.msra.mxu0 %v10804_v34  ;;  %5199 = vmatprep.subr.bf16.mxu1 %v10685_v2  ;;  %v10853_v28 = vcombine.high %v1953_v16, %v1957_v19  ;;  %v1961_v30 = vld [vmem:[#allocation7 + $0xc18] sm:$0xff]  ;;  %v10724_v34 = vcombine.low %v1825_v42, %v1829_v39  ;;  %v10852_v2 = vcombine.low %v1953_v16, %v1957_v19  ;;  %v1222_v16 = vld [vmem:[#allocation6 + $0x140] sm:$0xff] }
 0x38c   :  { %5240 = vmatprep.subr.bf16.mxu0 %v10813_v35  ;;  %v1965_v31 = vld [vmem:[#allocation7 + $0xc38] sm:$0xff]  ;;  %v10983_v36 = vcombine.high %v1182_v32, %v1186_v33  ;;  %v1226_v19 = vld [vmem:[#allocation6 + $0x160] sm:$0xff] }
 0x38d   :  { %v10861_v35 = vcombine.high %v1961_v30, %v1965_v31  ;;  %v1969_v40 = vld [vmem:[#allocation7 + $0xc58] sm:$0xff] }
 0x38e   :  { %5200 = vmatpush1.bf16.msra.mxu1 %v10684_v51  ;;  %v1973_v43 = vld [vmem:[#allocation7 + $0xc78] sm:$0xff]  ;;  %v1194_v51 = vld [vmem:[#allocation6 + $0x60] sm:$0xff] }
 0x38f   :  { %5241 = vmatpush1.bf16.msra.mxu0 %v10812_v44  ;;  %5201 = vmatprep.subr.bf16.mxu1 %v10693_v45  ;;  %v10860_v44 = vcombine.low %v1961_v30, %v1965_v31  ;;  %v1171_v45 = vld [vmem:[%s13115_s0 + $0x8] sm:$0xff]  ;;  %v10869_v54 = vcombine.high %v1969_v40, %v1973_v43  ;;  %v10991_v60 = vcombine.high %v1190_v50, %v1194_v51  ;;  %v1977_v61 = vld [vmem:[#allocation7 + $0xc98] sm:$0xff] }
 0x390   :  { %5242 = vmatprep.subr.bf16.mxu0 %v10821_v52  ;;  %v10982_v52 = vcombine.low %v1182_v32, %v1186_v33  ;;  %v1981_v62 = vld [vmem:[#allocation7 + $0xcb8] sm:$0xff]  ;;  %v10990_v3 = vcombine.low %v1190_v50, %v1194_v51  ;;  %v1230_v32 = vld [vmem:[#allocation6 + $0x180] sm:$0xff] }
 0x391   :  { %v10877_v47 = vcombine.high %v1977_v61, %v1981_v62  ;;  %v1985_v7 = vld [vmem:[#allocation7 + $0xcd8] sm:$0xff]  ;;  %v1234_v33 = vld [vmem:[#allocation6 + $0x1a0] sm:$0xff] }
 0x392   :  { %5202 = vmatpush1.bf16.msra.mxu1 %v10692_v25  ;;  %v1198_v25 = vld [vmem:[#allocation6 + $0x80] sm:$0xff]  ;;  %v1993_v37 = vld [vmem:[#allocation7 + $0xd18] sm:$0xff] }
 0x393   :  { %5243 = vmatpush1.bf16.msra.mxu0 %v10820_v48  ;;  %5203 = vmatprep.subr.bf16.mxu1 %v10701_v0  ;;  %v1202_v48 = vld [vmem:[#allocation6 + $0xa0] sm:$0xff]  ;;  %v12916_v0 = vpack.c.bf16 %v1171_v45, %v1171_v45  ;;  %v1997_v4 = vld [vmem:[#allocation7 + $0xd38] sm:$0xff] }
 0x394   :  { %5244 = vmatprep.subr.bf16.mxu0 %v10829_v1  ;;  %v10868_v1 = vcombine.low %v1969_v40, %v1973_v43  ;;  %v10999_v46 = vcombine.high %v1198_v25, %v1202_v48  ;;  %v2001_v42 = vld [vmem:[#allocation7 + $0xd58] sm:$0xff]  ;;  %v11031_v40 = vcombine.high %v1230_v32, %v1234_v33 }
 0x395   :  { %v2005_v39 = vld [vmem:[#allocation7 + $0xd78] sm:$0xff] }
 0x396   :  { %5204 = vmatpush1.bf16.msra.mxu1 %v10700_v8  ;;  %v1989_v8 = vld [vmem:[#allocation7 + $0xcf8] sm:$0xff] }
 0x397   :  { %5245 = vmatpush1.bf16.msra.mxu0 %v10828_v58  ;;  %5205 = vmatprep.subr.bf16.mxu1 %v10709_v55  ;;  %v1206_v58 = vld [vmem:[#allocation6 + $0xc0] sm:$0xff]  ;;  %v10876_v55 = vcombine.low %v1977_v61, %v1981_v62  ;;  %v2009_v30 = vld [vmem:[#allocation7 + $0xd98] sm:$0xff] }
 0x398   :  { %5246 = vmatprep.subr.bf16.mxu0 %v10837_v10  ;;  %v10885_v10 = vcombine.high %v1985_v7, %v1989_v8  ;;  %v2013_v31 = vld [vmem:[#allocation7 + $0xdb8] sm:$0xff] }
 0x399   :  { %v2017_v43 = vld [vmem:[#allocation7 + $0xdd8] sm:$0xff] }
 0x39a   :  { %5206 = vmatpush1.bf16.msra.mxu1 %v10708_v11  ;;  %v10884_v11 = vcombine.low %v1985_v7, %v1989_v8  ;;  %v2021_v50 = vld [vmem:[#allocation7 + $0xdf8] sm:$0xff] }
 0x39b   :  { %5247 = vmatpush1.bf16.msra.mxu0 %v10836_v12  ;;  %5207 = vmatprep.subr.bf16.mxu1 %v10717_v13  ;;  %v10893_v13 = vcombine.high %v1993_v37, %v1997_v4  ;;  %v2025_v7 = vld [vmem:[#allocation7 + $0xe18] sm:$0xff] }
 0x39c   :  { %5248 = vmatprep.subr.bf16.mxu0 %v10845_v15  ;;  %v11015_v15 = vcombine.high %v1214_v59, %v1218_v17  ;;  %v2029_v8 = vld [vmem:[#allocation7 + $0xe38] sm:$0xff] }
 0x39e   :  { %5208 = vmatpush1.bf16.msra.mxu1 %v10716_v21  ;;  %v10892_v21 = vcombine.low %v1993_v37, %v1997_v4  ;;  %v2037_v37 = vld [vmem:[#allocation7 + $0xe78] sm:$0xff]  ;;  %v1254_v4 = vld [vmem:[#allocation6 + $0x240] sm:$0xff] }
 0x39f   :  { %5249 = vmatpush1.bf16.msra.mxu0 %v10844_v22  ;;  %5209 = vmatprep.subr.bf16.mxu1 %v10725_v27  ;;  %v11014_v22 = vcombine.low %v1214_v59, %v1218_v17  ;;  %v10901_v27 = vcombine.high %v2001_v42, %v2005_v39  ;;  %v1258_v59 = vld [vmem:[#allocation6 + $0x260] sm:$0xff]  ;;  %v10924_v17 = vcombine.low %v2025_v7, %v2029_v8 }
 0x3a0   :  { %5250 = vmatprep.subr.bf16.mxu0 %v10853_v28  ;;  %v11023_v28 = vcombine.high %v1222_v16, %v1226_v19 }
 0x3a2   :  { %5210 = vmatpush1.bf16.msra.mxu1 %v10724_v34  ;;  %v10900_v34 = vcombine.low %v2001_v42, %v2005_v39  ;;  %v2045_v42 = vld [vmem:[#allocation7 + $0xeb8] sm:$0xff]  ;;  %v1262_v39 = vld [vmem:[#allocation6 + $0x280] sm:$0xff] }
 0x3a3   :  { %5251 = vmatpush1.bf16.msra.mxu0 %v10852_v2  ;;  %5261 = vmatprep.subr.bf16.mxu1 %v10861_v35  ;;  %v11022_v2 = vcombine.low %v1222_v16, %v1226_v19  ;;  %v10909_v35 = vcombine.high %v2009_v30, %v2013_v31  ;;  %v1266_v16 = vld [vmem:[#allocation6 + $0x2a0] sm:$0xff] }
 0x3a4   :  { %7222 = vmatprep.subr.bf16.mxu0 %v10983_v36 }
 0x3a5   :  { %5212 = vmatmul.mubr.bf16.vlgmr.msra.gmra.mrb[36].mxu1 %v12844_v20  ;;  %v1210_v20 = vld [vmem:[#allocation6 + $0xe0] sm:$0xff] }
 0x3a6   :  { %5253 = vmatmul.mubr.bf16.vlgmr.msra.gmra.mrb[32].mxu0 %v12840_v14  ;;  %5262 = vmatpush1.bf16.msra.mxu1 %v10860_v44  ;;  %v10998_v14 = vcombine.low %v1198_v25, %v1202_v48  ;;  %v11006_v12 = vcombine.low %v1206_v58, %v1210_v20  ;;  %v10908_v25 = vcombine.low %v2009_v30, %v2013_v31  ;;  %v2053_v30 = vld [vmem:[#allocation7 + $0xef8] sm:$0xff]  ;;  %v1270_v31 = vld [vmem:[#allocation6 + $0x2c0] sm:$0xff] }
 0x3a7   :  { %5293 = vmatprep.mubr.bf16.mxu1 %v12861_v5  ;;  %7223 = vmatpush1.bf16.msra.mxu0 %v10982_v52  ;;  %v11007_v5 = vcombine.high %v1206_v58, %v1210_v20  ;;  %v1238_v52 = vld [vmem:[#allocation6 + $0x1c0] sm:$0xff] }
 0x3a8   :  { %5263 = vmatprep.subr.bf16.mxu1 %v10869_v54  ;;  %7224 = vmatprep.subr.bf16.mxu0 %v10991_v60  ;;  %v1242_v54 = vld [vmem:[#allocation6 + $0x1e0] sm:$0xff] }
 0x3a9   :  { %7254 = vmatprep.mubr.bf16.mxu0 %v12916_v0  ;;  %v1246_v58 = vld [vmem:[#allocation6 + $0x200] sm:$0xff] }
 0x3aa   :  { %5264 = vmatpush1.bf16.msra.mxu1 %v10868_v1  ;;  %v1250_v20 = vld [vmem:[#allocation6 + $0x220] sm:$0xff] }
 0x3ab   :  { %7225 = vmatpush1.bf16.msra.mxu0 %v10990_v3  ;;  %5265 = vmatprep.subr.bf16.mxu1 %v10877_v47  ;;  %v11030_v3 = vcombine.low %v1230_v32, %v1234_v33  ;;  %v1274_v32 = vld [vmem:[#allocation6 + $0x2e0] sm:$0xff] }
 0x3ac   :  { %7226 = vmatprep.subr.bf16.mxu0 %v10999_v46  ;;  %v11039_v46 = vcombine.high %v1238_v52, %v1242_v54 }
 0x3ae   :  { %5266 = vmatpush1.bf16.msra.mxu1 %v10876_v55  ;;  %v11038_v55 = vcombine.low %v1238_v52, %v1242_v54  ;;  %v11070_v52 = vcombine.low %v1270_v31, %v1274_v32 }
 0x3af   :  { %7227 = vmatpush1.bf16.msra.mxu0 %v10998_v14  ;;  %5267 = vmatprep.subr.bf16.mxu1 %v10885_v10  ;;  %v10925_v14 = vcombine.high %v2025_v7, %v2029_v8  ;;  %v11047_v10 = vcombine.high %v1246_v58, %v1250_v20  ;;  %v2073_v8 = vld [vmem:[#allocation7 + $0xf98] sm:$0xff] }
 0x3b0   :  { %7228 = vmatprep.subr.bf16.mxu0 %v11007_v5  ;;  %v2033_v5 = vld [vmem:[#allocation7 + $0xe58] sm:$0xff] }
 0x3b1   :  { %v10932_v19 = vcombine.low %v2033_v5, %v2037_v37 }
 0x3b2   :  { %5268 = vmatpush1.bf16.msra.mxu1 %v10884_v11  ;;  %v11046_v11 = vcombine.low %v1246_v58, %v1250_v20  ;;  %v2077_v58 = vld [vmem:[#allocation7 + $0xfb8] sm:$0xff]  ;;  %v1294_v20 = vld [vmem:[#allocation6 + $0x380] sm:$0xff] }
 0x3b3   :  { %7229 = vmatpush1.bf16.msra.mxu0 %v11006_v12  ;;  %5269 = vmatprep.subr.bf16.mxu1 %v10893_v13  ;;  %v10933_v12 = vcombine.high %v2033_v5, %v2037_v37  ;;  %v11055_v13 = vcombine.high %v1254_v4, %v1258_v59  ;;  %v2081_v37 = vld [vmem:[#allocation7 + $0xfd8] sm:$0xff] }
 0x3b4   :  { %7230 = vmatprep.subr.bf16.mxu0 %v11015_v15  ;;  %v2041_v15 = vld [vmem:[#allocation7 + $0xe98] sm:$0xff] }
 0x3b5   :  { %v10940_v33 = vcombine.low %v2041_v15, %v2045_v42 }
 0x3b6   :  { %5270 = vmatpush1.bf16.msra.mxu1 %v10892_v21  ;;  %v11054_v21 = vcombine.low %v1254_v4, %v1258_v59  ;;  %v2085_v4 = vld [vmem:[#allocation7 + $0xff8] sm:$0xff]  ;;  %v1302_v59 = vld [vmem:[#allocation6 + $0x3c0] sm:$0xff] }
 0x3b7   :  { %7231 = vmatpush1.bf16.msra.mxu0 %v11014_v22  ;;  %5271 = vmatprep.subr.bf16.mxu1 %v10901_v27  ;;  %v10941_v22 = vcombine.high %v2041_v15, %v2045_v42  ;;  %v11063_v27 = vcombine.high %v1262_v39, %v1266_v16  ;;  %v1310_v42 = vld [vmem:[#allocation6 + $0x400] sm:$0xff] }
 0x3b8   :  { %v4967_v36 = vpop.f32.mrb[24].mxu1  ;;  %7232 = vmatprep.subr.bf16.mxu0 %v11023_v28  ;;  %v2049_v28 = vld [vmem:[#allocation7 + $0xed8] sm:$0xff] }
 0x3b9   :  { %v12922_v51 = vadd.f32 %v4967_v36, %v12908_v6  ;;  %v12924_v44 = vpop.f32.mrb[20].mxu0  ;;  %v4969_v45 = vpop.f32.mrb[25].mxu1  ;;  %v10917_v6 = vcombine.high %v2017_v43, %v2021_v50  ;;  %v2057_v36 = vld [vmem:[#allocation7 + $0xf18] sm:$0xff] }
 0x3ba   :  { %v12927_v60 = vadd.f32 %v4969_v45, %v12910_v9  ;;  %v12929_v61 = vpop.f32.mrb[21].mxu0  ;;  %v4971_v62 = vpop.f32.mrb[26].mxu1  ;;  %5272 = vmatpush1.bf16.msra.mxu1 %v10900_v34  ;;  %v10916_v9 = vcombine.low %v2017_v43, %v2021_v50  ;;  %v11062_v34 = vcombine.low %v1262_v39, %v1266_v16  ;;  %v1278_v43 = vld [vmem:[#allocation6 + $0x300] sm:$0xff]  ;;  %v10948_v45 = vcombine.low %v2049_v28, %v2053_v30 }
 0x3bb   :  { %v5012_v48 = vpop.f32.mrb[22].mxu0  ;;  %7233 = vmatpush1.bf16.msra.mxu0 %v11022_v2  ;;  %v4972_v1 = vpop.f32.mrb[27].mxu1  ;;  %5273 = vmatprep.subr.bf16.mxu1 %v10909_v35  ;;  %v10949_v2 = vcombine.high %v2049_v28, %v2053_v30  ;;  %v11071_v35 = vcombine.high %v1270_v31, %v1274_v32  ;;  %v1282_v50 = vld [vmem:[#allocation6 + $0x320] sm:$0xff] }
 0x3bc   :  { %v5013_v47 = vpop.f32.mrb[23].mxu0  ;;  %7234 = vmatprep.subr.bf16.mxu0 %v11031_v40  ;;  %v2061_v40 = vld [vmem:[#allocation7 + $0xf38] sm:$0xff]  ;;  %v11079_v62 = vcombine.high %v1278_v43, %v1282_v50  ;;  %v1286_v1 = vld [vmem:[#allocation6 + $0x340] sm:$0xff] }
 0x3bd   :  { %v10957_v54 = vcombine.high %v2057_v36, %v2061_v40  ;;  %v2069_v48 = vld [vmem:[#allocation7 + $0xf78] sm:$0xff]  ;;  %v11078_v47 = vcombine.low %v1278_v43, %v1282_v50  ;;  %v1314_v39 = vld [vmem:[#allocation6 + $0x420] sm:$0xff] }
 0x3be   :  { %5274 = vmatpush1.bf16.msra.mxu1 %v10908_v25  ;;  %v2065_v25 = vld [vmem:[#allocation7 + $0xf58] sm:$0xff]  ;;  %v1438_v16 = vld [vmem:[#allocation6 + $0x800] sm:$0xff]  ;;  %v11111_v28 = vcombine.high %v1310_v42, %v1314_v39 }
 0x3bf   :  { %7235 = vmatpush1.bf16.msra.mxu0 %v11030_v3  ;;  %5275 = vmatprep.subr.bf16.mxu1 %v10917_v6  ;;  %v1290_v3 = vld [vmem:[#allocation6 + $0x360] sm:$0xff]  ;;  %v10956_v6 = vcombine.low %v2057_v36, %v2061_v40  ;;  %v11110_v36 = vcombine.low %v1310_v42, %v1314_v39 }
 0x3c0   :  { %7236 = vmatprep.subr.bf16.mxu0 %v11039_v46  ;;  %v10965_v46 = vcombine.high %v2065_v25, %v2069_v48  ;;  %v11087_v7 = vcombine.high %v1286_v1, %v1290_v3  ;;  %v1318_v31 = vld [vmem:[#allocation6 + $0x440] sm:$0xff] }
 0x3c1   :  { %v1322_v32 = vld [vmem:[#allocation6 + $0x460] sm:$0xff] }
 0x3c2   :  { %5276 = vmatpush1.bf16.msra.mxu1 %v10916_v9  ;;  %v1298_v9 = vld [vmem:[#allocation6 + $0x3a0] sm:$0xff]  ;;  %v11119_v50 = vcombine.high %v1318_v31, %v1322_v32 }
 0x3c3   :  { %7237 = vmatpush1.bf16.msra.mxu0 %v11038_v55  ;;  %5277 = vmatprep.subr.bf16.mxu1 %v10925_v14  ;;  %v10964_v55 = vcombine.low %v2065_v25, %v2069_v48  ;;  %v11086_v14 = vcombine.low %v1286_v1, %v1290_v3  ;;  %v11095_v5 = vcombine.high %v1294_v20, %v1298_v9  ;;  %v1175_v40 = vld [vmem:[%s13115_s0 + $0x28] sm:$0xff] }
 0x3c4   :  { %7238 = vmatprep.subr.bf16.mxu0 %v11047_v10  ;;  %v10973_v10 = vcombine.high %v2073_v8, %v2077_v58  ;;  %v1454_v25 = vld [vmem:[#allocation6 + $0x880] sm:$0xff]  ;;  %v12945_v1 = vpack.c.bf16 %v1175_v40, %v1175_v40  ;;  %v11118_v3 = vcombine.low %v1318_v31, %v1322_v32 }
 0x3c5   :  { %v1458_v48 = vld [vmem:[#allocation6 + $0x8a0] sm:$0xff] }
 0x3c6   :  { %5278 = vmatpush1.bf16.msra.mxu1 %v10924_v17  ;;  %v1306_v17 = vld [vmem:[#allocation6 + $0x3e0] sm:$0xff] }
 0x3c7   :  { %7239 = vmatpush1.bf16.msra.mxu0 %v11046_v11  ;;  %5279 = vmatprep.subr.bf16.mxu1 %v10933_v12  ;;  %v10972_v11 = vcombine.low %v2073_v8, %v2077_v58  ;;  %v11094_v12 = vcombine.low %v1294_v20, %v1298_v9  ;;  %v11103_v15 = vcombine.high %v1302_v59, %v1306_v17  ;;  %v1338_v8 = vld [vmem:[#allocation6 + $0x4e0] sm:$0xff] }
 0x3c8   :  { %7240 = vmatprep.subr.bf16.mxu0 %v11055_v13  ;;  %v10981_v13 = vcombine.high %v2081_v37, %v2085_v4  ;;  %v1462_v58 = vld [vmem:[#allocation6 + $0x8c0] sm:$0xff]  ;;  %v11254_v9 = vcombine.low %v1454_v25, %v1458_v48 }
 0x3c9   :  { %v1478_v42 = vld [vmem:[#allocation6 + $0x940] sm:$0xff] }
 0x3ca   :  { %5280 = vmatpush1.bf16.msra.mxu1 %v10932_v19  ;;  %v1442_v19 = vld [vmem:[#allocation6 + $0x820] sm:$0xff] }
 0x3cb   :  { %7241 = vmatpush1.bf16.msra.mxu0 %v11054_v21  ;;  %5281 = vmatprep.subr.bf16.mxu1 %v10941_v22  ;;  %v10980_v21 = vcombine.low %v2081_v37, %v2085_v4  ;;  %v11102_v22 = vcombine.low %v1302_v59, %v1306_v17  ;;  %v11239_v30 = vcombine.high %v1438_v16, %v1442_v19  ;;  %v1470_v37 = vld [vmem:[#allocation6 + $0x900] sm:$0xff] }
 0x3cc   :  { %7242 = vmatprep.subr.bf16.mxu0 %v11063_v27  ;;  %v1170_v27 = vld [vmem:[%s13115_s0] sm:$0xff]  ;;  %v11238_v43 = vcombine.low %v1438_v16, %v1442_v19  ;;  %v1474_v4 = vld [vmem:[#allocation6 + $0x920] sm:$0xff] }
 0x3cd   :  { %v1482_v39 = vld [vmem:[#allocation6 + $0x960] sm:$0xff]  ;;  %v11270_v19 = vcombine.low %v1470_v37, %v1474_v4 }
 0x3ce   :  { %5282 = vmatpush1.bf16.msra.mxu1 %v10940_v33  ;;  %v1446_v33 = vld [vmem:[#allocation6 + $0x840] sm:$0xff] }
 0x3cf   :  { %7243 = vmatpush1.bf16.msra.mxu0 %v11062_v34  ;;  %5283 = vmatprep.subr.bf16.mxu1 %v10949_v2  ;;  %v1450_v34 = vld [vmem:[#allocation6 + $0x860] sm:$0xff]  ;;  %v1173_v2 = vld [vmem:[%s13115_s0 + $0x18] sm:$0xff] }
 0x3d0   :  { %7244 = vmatprep.subr.bf16.mxu0 %v11071_v35  ;;  %v12937_v35 = vpack.c.bf16 %v1170_v27, %v1170_v27  ;;  %v1358_v27 = vld [vmem:[#allocation6 + $0x580] sm:$0xff] }
 0x3d1   :  { %v1490_v31 = vld [vmem:[#allocation6 + $0x9a0] sm:$0xff] }
 0x3d2   :  { %5284 = vmatpush1.bf16.msra.mxu1 %v10948_v45  ;;  %v11247_v45 = vcombine.high %v1446_v33, %v1450_v34  ;;  %v1366_v40 = vld [vmem:[#allocation6 + $0x5c0] sm:$0xff] }
 0x3d3   :  { %7245 = vmatpush1.bf16.msra.mxu0 %v11070_v52  ;;  %5285 = vmatprep.subr.bf16.mxu1 %v10957_v54  ;;  %v1326_v52 = vld [vmem:[#allocation6 + $0x480] sm:$0xff] }
 0x3d4   :  { %7246 = vmatprep.subr.bf16.mxu0 %v11079_v62  ;;  %v1330_v54 = vld [vmem:[#allocation6 + $0x4a0] sm:$0xff]  ;;  %v12942_v62 = vpack.c.bf16 %v1173_v2, %v1173_v2 }
 0x3d5   :  { %v11126_v20 = vcombine.low %v1326_v52, %v1330_v54 }
 0x3d6   :  { %5286 = vmatpush1.bf16.msra.mxu1 %v10956_v6  ;;  %v11246_v6 = vcombine.low %v1446_v33, %v1450_v34  ;;  %v11278_v33 = vcombine.low %v1478_v42, %v1482_v39 }
 0x3d7   :  { %7247 = vmatpush1.bf16.msra.mxu0 %v11078_v47  ;;  %5287 = vmatprep.subr.bf16.mxu1 %v10965_v46  ;;  %v11127_v47 = vcombine.high %v1326_v52, %v1330_v54  ;;  %v11255_v46 = vcombine.high %v1454_v25, %v1458_v48  ;;  %v1494_v54 = vld [vmem:[#allocation6 + $0x9c0] sm:$0xff] }
 0x3d8   :  { %7248 = vmatprep.subr.bf16.mxu0 %v11087_v7  ;;  %v1334_v7 = vld [vmem:[#allocation6 + $0x4c0] sm:$0xff] }
 0x3d9   :  { %v11134_v59 = vcombine.low %v1334_v7, %v1338_v8  ;;  %v1498_v25 = vld [vmem:[#allocation6 + $0x9e0] sm:$0xff] }
 0x3da   :  { %5288 = vmatpush1.bf16.msra.mxu1 %v10964_v55  ;;  %v11135_v55 = vcombine.high %v1334_v7, %v1338_v8 }
 0x3db   :  { %7249 = vmatpush1.bf16.msra.mxu0 %v11086_v14  ;;  %5289 = vmatprep.subr.bf16.mxu1 %v10973_v10  ;;  %v1342_v10 = vld [vmem:[#allocation6 + $0x500] sm:$0xff] }
 0x3dc   :  { %7250 = vmatprep.subr.bf16.mxu0 %v11095_v5  ;;  %v1346_v5 = vld [vmem:[#allocation6 + $0x520] sm:$0xff] }
 0x3dd   :  { %v11142_v16 = vcombine.low %v1342_v10, %v1346_v5 }
 0x3de   :  { %5290 = vmatpush1.bf16.msra.mxu1 %v10972_v11  ;;  %v11143_v11 = vcombine.high %v1342_v10, %v1346_v5  ;;  %v1506_v10 = vld [vmem:[#allocation6 + $0xa20] sm:$0xff] }
 0x3df   :  { %7251 = vmatpush1.bf16.msra.mxu0 %v11094_v12  ;;  %5291 = vmatprep.subr.bf16.mxu1 %v10981_v13  ;;  %v11271_v12 = vcombine.high %v1470_v37, %v1474_v4  ;;  %v1350_v13 = vld [vmem:[#allocation6 + $0x540] sm:$0xff]  ;;  %v11294_v37 = vcombine.low %v1494_v54, %v1498_v25 }
 0x3e0   :  { %7252 = vmatprep.subr.bf16.mxu0 %v11103_v15  ;;  %v1354_v15 = vld [vmem:[#allocation6 + $0x560] sm:$0xff] }
 0x3e1   :  { %v11150_v32 = vcombine.low %v1350_v13, %v1354_v15 }
 0x3e2   :  { %5292 = vmatpush1.bf16.msra.mxu1 %v10980_v21  ;;  %v11151_v21 = vcombine.high %v1350_v13, %v1354_v15  ;;  %v1514_v13 = vld [vmem:[#allocation6 + $0xa60] sm:$0xff] }
 0x3e3   :  { %7253 = vmatpush1.bf16.msra.mxu0 %v11102_v22  ;;  %7263 = vmatprep.subr.bf16.mxu1 %v11111_v28  ;;  %v11279_v22 = vcombine.high %v1478_v42, %v1482_v39  ;;  %v1362_v28 = vld [vmem:[#allocation6 + $0x5a0] sm:$0xff] }
 0x3e4   :  { %7304 = vmatprep.subr.bf16.mxu0 %v11239_v30  ;;  %v1486_v30 = vld [vmem:[#allocation6 + $0x980] sm:$0xff]  ;;  %v11159_v34 = vcombine.high %v1358_v27, %v1362_v28 }
 0x3e5   :  { %5294 = vmatmul.mubr.bf16.vlgmr.msra.gmra.mrb[40].mxu1 %v12863_v49  ;;  %v1466_v49 = vld [vmem:[#allocation6 + $0x8e0] sm:$0xff] }
 0x3e6   :  { %7255 = vmatmul.mubr.bf16.vlgmr.msra.gmra.mrb[36].mxu0 %v12937_v35  ;;  %7264 = vmatpush1.bf16.msra.mxu1 %v11110_v36  ;;  %v11263_v14 = vcombine.high %v1462_v58, %v1466_v49  ;;  %v11262_v17 = vcombine.low %v1462_v58, %v1466_v49  ;;  %v11287_v36 = vcombine.high %v1486_v30, %v1490_v31 }
 0x3e7   :  { %7305 = vmatpush1.bf16.msra.mxu0 %v11238_v43  ;;  %7265 = vmatprep.subr.bf16.mxu1 %v11119_v50  ;;  %v1370_v43 = vld [vmem:[#allocation6 + $0x5e0] sm:$0xff]  ;;  %v11286_v58 = vcombine.low %v1486_v30, %v1490_v31 }
 0x3e8   :  { %7306 = vmatprep.subr.bf16.mxu0 %v11247_v45  ;;  %7295 = vmatprep.mubr.bf16.mxu1 %v12942_v62  ;;  %v11167_v49 = vcombine.high %v1366_v40, %v1370_v43  ;;  %v11166_v5 = vcombine.low %v1366_v40, %v1370_v43 }
 0x3e9   :  { %7336 = vmatprep.mubr.bf16.mxu0 %v12945_v1 }
 0x3ea   :  { %7266 = vmatpush1.bf16.msra.mxu1 %v11118_v3 }
 0x3eb   :  { %7307 = vmatpush1.bf16.msra.mxu0 %v11246_v6  ;;  %7267 = vmatprep.subr.bf16.mxu1 %v11127_v47  ;;  %v11158_v47 = vcombine.low %v1358_v27, %v1362_v28  ;;  %v1522_v27 = vld [vmem:[#allocation6 + $0xaa0] sm:$0xff] }
 0x3ec   :  { %7308 = vmatprep.subr.bf16.mxu0 %v11255_v46 }
 0x3ee   :  { %7268 = vmatpush1.bf16.msra.mxu1 %v11126_v20 }
 0x3ef   :  { %7309 = vmatpush1.bf16.msra.mxu0 %v11254_v9  ;;  %7269 = vmatprep.subr.bf16.mxu1 %v11135_v55  ;;  %v11295_v9 = vcombine.high %v1494_v54, %v1498_v25  ;;  %v1374_v55 = vld [vmem:[#allocation6 + $0x600] sm:$0xff] }
 0x3f0   :  { %7310 = vmatprep.subr.bf16.mxu0 %v11263_v14  ;;  %v1378_v14 = vld [vmem:[#allocation6 + $0x620] sm:$0xff] }
 0x3f1   :  { %v11175_v4 = vcombine.high %v1374_v55, %v1378_v14  ;;  %v11174_v15 = vcombine.low %v1374_v55, %v1378_v14  ;;  %v1410_v54 = vld [vmem:[#allocation6 + $0x720] sm:$0xff] }
 0x3f2   :  { %7270 = vmatpush1.bf16.msra.mxu1 %v11134_v59  ;;  %v1534_v25 = vld [vmem:[#allocation6 + $0xb00] sm:$0xff] }
 0x3f3   :  { %7311 = vmatpush1.bf16.msra.mxu0 %v11262_v17  ;;  %7271 = vmatprep.subr.bf16.mxu1 %v11143_v11  ;;  %v1382_v17 = vld [vmem:[#allocation6 + $0x640] sm:$0xff] }
 0x3f4   :  { %7312 = vmatprep.subr.bf16.mxu0 %v11271_v12  ;;  %v1386_v11 = vld [vmem:[#allocation6 + $0x660] sm:$0xff] }
 0x3f5   :  { %v1510_v12 = vld [vmem:[#allocation6 + $0xa40] sm:$0xff]  ;;  %v11183_v39 = vcombine.high %v1382_v17, %v1386_v11  ;;  %v11182_v28 = vcombine.low %v1382_v17, %v1386_v11 }
 0x3f6   :  { %7272 = vmatpush1.bf16.msra.mxu1 %v11142_v16  ;;  %v11311_v16 = vcombine.high %v1510_v12, %v1514_v13  ;;  %v11310_v30 = vcombine.low %v1510_v12, %v1514_v13  ;;  %v1430_v13 = vld [vmem:[#allocation6 + $0x7c0] sm:$0xff] }
 0x3f7   :  { %7313 = vmatpush1.bf16.msra.mxu0 %v11270_v19  ;;  %7273 = vmatprep.subr.bf16.mxu1 %v11151_v21  ;;  %v1390_v19 = vld [vmem:[#allocation6 + $0x680] sm:$0xff] }
 0x3f8   :  { %v5049_v2 = vpop.f32.mrb[28].mxu1  ;;  %7314 = vmatprep.subr.bf16.mxu0 %v11279_v22  ;;  %v1394_v21 = vld [vmem:[#allocation6 + $0x6a0] sm:$0xff] }
 0x3f9   :  { %v5050_v50 = vadd.f32 %v5049_v2, %v12924_v44  ;;  %v5090_v45 = vpop.f32.mrb[24].mxu0  ;;  %v5051_v52 = vpop.f32.mrb[29].mxu1  ;;  %v1518_v22 = vld [vmem:[#allocation6 + $0xa80] sm:$0xff]  ;;  %v11191_v31 = vcombine.high %v1390_v19, %v1394_v21  ;;  %v11190_v40 = vcombine.low %v1390_v19, %v1394_v21 }
 0x3fa   :  { %v5052_v48 = vadd.f32 %v5051_v52, %v12929_v61  ;;  %v5092_v3 = vpop.f32.mrb[25].mxu0  ;;  %v5053_v6 = vpop.f32.mrb[30].mxu1  ;;  %7274 = vmatpush1.bf16.msra.mxu1 %v11150_v32  ;;  %v1502_v61 = vld [vmem:[#allocation6 + $0xa00] sm:$0xff]  ;;  %v11319_v32 = vcombine.high %v1518_v22, %v1522_v27  ;;  %v11318_v43 = vcombine.low %v1518_v22, %v1522_v27  ;;  %v1183_v27 = vld [vmem:[#allocation6 + $0x8] sm:$0xff] }
 0x3fb   :  { %v12952_v46 = vadd.f32 %v5090_v45, %v5050_v50  ;;  %v5094_v7 = vpop.f32.mrb[26].mxu0  ;;  %7315 = vmatpush1.bf16.msra.mxu0 %v11278_v33  ;;  %v5054_v8 = vpop.f32.mrb[31].mxu1  ;;  %7275 = vmatprep.subr.bf16.mxu1 %v11159_v34  ;;  %v11303_v59 = vcombine.high %v1502_v61, %v1506_v10  ;;  %v11302_v42 = vcombine.low %v1502_v61, %v1506_v10  ;;  %v1398_v33 = vld [vmem:[#allocation6 + $0x6c0] sm:$0xff] }
 0x3fc   :  { %v12954_v20 = vadd.f32 %v5092_v3, %v5052_v48  ;;  %v5095_v44 = vpop.f32.mrb[27].mxu0  ;;  %7316 = vmatprep.subr.bf16.mxu0 %v11287_v36  ;;  %v1402_v34 = vld [vmem:[#allocation6 + $0x6e0] sm:$0xff] }
 0x3fd   :  { %v1526_v2 = vld [vmem:[#allocation6 + $0xac0] sm:$0xff]  ;;  %v11199_v50 = vcombine.high %v1398_v33, %v1402_v34  ;;  %v11198_v3 = vcombine.low %v1398_v33, %v1402_v34  ;;  %v1172_v33 = vld [vmem:[%s13115_s0 + $0x10] sm:$0xff] }
 0x3fe   :  { %7276 = vmatpush1.bf16.msra.mxu1 %v11158_v47  ;;  %v1530_v36 = vld [vmem:[#allocation6 + $0xae0] sm:$0xff] }
 0x3ff   :  { %7317 = vmatpush1.bf16.msra.mxu0 %v11286_v58  ;;  %7277 = vmatprep.subr.bf16.mxu1 %v11167_v49  ;;  %v11327_v45 = vcombine.high %v1526_v2, %v1530_v36  ;;  %v1406_v52 = vld [vmem:[#allocation6 + $0x700] sm:$0xff]  ;;  %v11326_v6 = vcombine.low %v1526_v2, %v1530_v36  ;;  %v1174_v36 = vld [vmem:[%s13115_s0 + $0x20] sm:$0xff] }
 0x400   :  { %7318 = vmatprep.subr.bf16.mxu0 %v11295_v9  ;;  %v1538_v48 = vld [vmem:[#allocation6 + $0xb20] sm:$0xff]  ;;  %v11207_v47 = vcombine.high %v1406_v52, %v1410_v54  ;;  %v11206_v9 = vcombine.low %v1406_v52, %v1410_v54  ;;  %v1319_v52 = vld [vmem:[#allocation6 + $0x448] sm:$0xff] }
 0x401   :  { %v11335_v7 = vcombine.high %v1534_v25, %v1538_v48  ;;  %v1414_v8 = vld [vmem:[#allocation6 + $0x740] sm:$0xff]  ;;  %v11334_v55 = vcombine.low %v1534_v25, %v1538_v48  ;;  %v1323_v54 = vld [vmem:[#allocation6 + $0x468] sm:$0xff]  ;;  %v12964_v48 = vpack.c.bf16 %v1174_v36, %v1174_v36 }
 0x402   :  { %7278 = vmatpush1.bf16.msra.mxu1 %v11166_v5  ;;  %v1418_v58 = vld [vmem:[#allocation6 + $0x760] sm:$0xff]  ;;  %v1235_v36 = vld [vmem:[#allocation6 + $0x1a8] sm:$0xff] }
 0x403   :  { %7319 = vmatpush1.bf16.msra.mxu0 %v11294_v37  ;;  %7279 = vmatprep.subr.bf16.mxu1 %v11175_v4  ;;  %v1542_v49 = vld [vmem:[#allocation6 + $0xb40] sm:$0xff]  ;;  %v11215_v14 = vcombine.high %v1414_v8, %v1418_v58 }
 0x404   :  { %7320 = vmatprep.subr.bf16.mxu0 %v11303_v59  ;;  %v1546_v44 = vld [vmem:[#allocation6 + $0xb60] sm:$0xff]  ;;  %v11214_v59 = vcombine.low %v1414_v8, %v1418_v58  ;;  %v1203_v8 = vld [vmem:[#allocation6 + $0xa8] sm:$0xff] }
 0x405   :  { %v11343_v61 = vcombine.high %v1542_v49, %v1546_v44  ;;  %v1422_v10 = vld [vmem:[#allocation6 + $0x780] sm:$0xff]  ;;  %v11342_v17 = vcombine.low %v1542_v49, %v1546_v44  ;;  %v1327_v58 = vld [vmem:[#allocation6 + $0x488] sm:$0xff] }
 0x406   :  { %7280 = vmatpush1.bf16.msra.mxu1 %v11174_v15  ;;  %v1426_v5 = vld [vmem:[#allocation6 + $0x7a0] sm:$0xff]  ;;  %v1331_v49 = vld [vmem:[#allocation6 + $0x4a8] sm:$0xff] }
 0x407   :  { %7321 = vmatpush1.bf16.msra.mxu0 %v11302_v42  ;;  %7281 = vmatprep.subr.bf16.mxu1 %v11183_v39  ;;  %v1550_v37 = vld [vmem:[#allocation6 + $0xb80] sm:$0xff]  ;;  %v11223_v11 = vcombine.high %v1422_v10, %v1426_v5 }
 0x408   :  { %7322 = vmatprep.subr.bf16.mxu0 %v11311_v16  ;;  %v1554_v4 = vld [vmem:[#allocation6 + $0xba0] sm:$0xff]  ;;  %v11222_v16 = vcombine.low %v1422_v10, %v1426_v5  ;;  %v1211_v10 = vld [vmem:[#allocation6 + $0xe8] sm:$0xff] }
 0x409   :  { %v11351_v12 = vcombine.high %v1550_v37, %v1554_v4  ;;  %v1434_v15 = vld [vmem:[#allocation6 + $0x7e0] sm:$0xff]  ;;  %v11350_v19 = vcombine.low %v1550_v37, %v1554_v4  ;;  %v1335_v5 = vld [vmem:[#allocation6 + $0x4c8] sm:$0xff] }
 0x40a   :  { %7282 = vmatpush1.bf16.msra.mxu1 %v11182_v28  ;;  %v1558_v42 = vld [vmem:[#allocation6 + $0xbc0] sm:$0xff]  ;;  %v11231_v21 = vcombine.high %v1430_v13, %v1434_v15  ;;  %v1187_v28 = vld [vmem:[#allocation6 + $0x28] sm:$0xff] }
 0x40b   :  { %7323 = vmatpush1.bf16.msra.mxu0 %v11310_v30  ;;  %7283 = vmatprep.subr.bf16.mxu1 %v11191_v31  ;;  %v1562_v39 = vld [vmem:[#allocation6 + $0xbe0] sm:$0xff]  ;;  %v1311_v30 = vld [vmem:[#allocation6 + $0x408] sm:$0xff]  ;;  %v10985_v2 = vcombine.high %v1183_v27, %v1187_v28  ;;  %v10984_v25 = vcombine.low %v1183_v27, %v1187_v28 }
 0x40c   :  { %7324 = vmatprep.subr.bf16.mxu0 %v11319_v32  ;;  %v11359_v22 = vcombine.high %v1558_v42, %v1562_v39  ;;  %v1315_v31 = vld [vmem:[#allocation6 + $0x428] sm:$0xff]  ;;  %v11230_v32 = vcombine.low %v1430_v13, %v1434_v15  ;;  %v11358_v34 = vcombine.low %v1558_v42, %v1562_v39 }
 0x40d   :  { %v1339_v37 = vld [vmem:[#allocation6 + $0x4e8] sm:$0xff] }
 0x40e   :  { %7284 = vmatpush1.bf16.msra.mxu1 %v11190_v40  ;;  %v11113_v40 = vcombine.high %v1311_v30, %v1315_v31  ;;  %v1219_v13 = vld [vmem:[#allocation6 + $0x128] sm:$0xff] }
 0x40f   :  { %7325 = vmatpush1.bf16.msra.mxu0 %v11318_v43  ;;  %7285 = vmatprep.subr.bf16.mxu1 %v11199_v50  ;;  %v1191_v43 = vld [vmem:[#allocation6 + $0x48] sm:$0xff] }
 0x410   :  { %7326 = vmatprep.subr.bf16.mxu0 %v11327_v45  ;;  %v1195_v50 = vld [vmem:[#allocation6 + $0x68] sm:$0xff]  ;;  %v12962_v45 = vpack.c.bf16 %v1172_v33, %v1172_v33 }
 0x411   :  { %v10992_v44 = vcombine.low %v1191_v43, %v1195_v50  ;;  %v1343_v15 = vld [vmem:[#allocation6 + $0x508] sm:$0xff] }
 0x412   :  { %7286 = vmatpush1.bf16.msra.mxu1 %v11198_v3  ;;  %v11112_v3 = vcombine.low %v1311_v30, %v1315_v31  ;;  %v1347_v42 = vld [vmem:[#allocation6 + $0x528] sm:$0xff] }
 0x413   :  { %7327 = vmatpush1.bf16.msra.mxu0 %v11326_v6  ;;  %7287 = vmatprep.subr.bf16.mxu1 %v11207_v47  ;;  %v10993_v6 = vcombine.high %v1191_v43, %v1195_v50  ;;  %v11121_v47 = vcombine.high %v1319_v52, %v1323_v54  ;;  %v1227_v27 = vld [vmem:[#allocation6 + $0x168] sm:$0xff] }
 0x414   :  { %7328 = vmatprep.subr.bf16.mxu0 %v11335_v7  ;;  %v1199_v7 = vld [vmem:[#allocation6 + $0x88] sm:$0xff] }
 0x415   :  { %v11000_v4 = vcombine.low %v1199_v7, %v1203_v8  ;;  %v1351_v28 = vld [vmem:[#allocation6 + $0x548] sm:$0xff] }
 0x416   :  { %7288 = vmatpush1.bf16.msra.mxu1 %v11206_v9  ;;  %v11120_v9 = vcombine.low %v1319_v52, %v1323_v54  ;;  %v1355_v30 = vld [vmem:[#allocation6 + $0x568] sm:$0xff] }
 0x417   :  { %7329 = vmatpush1.bf16.msra.mxu0 %v11334_v55  ;;  %7289 = vmatprep.subr.bf16.mxu1 %v11215_v14  ;;  %v11001_v55 = vcombine.high %v1199_v7, %v1203_v8  ;;  %v11129_v14 = vcombine.high %v1327_v58, %v1331_v49  ;;  %v1363_v43 = vld [vmem:[#allocation6 + $0x5a8] sm:$0xff]  ;;  %v11152_v52 = vcombine.low %v1351_v28, %v1355_v30 }
 0x418   :  { %7330 = vmatprep.subr.bf16.mxu0 %v11343_v61  ;;  %v1207_v61 = vld [vmem:[#allocation6 + $0xc8] sm:$0xff] }
 0x419   :  { %v11008_v39 = vcombine.low %v1207_v61, %v1211_v10 }
 0x41a   :  { %7290 = vmatpush1.bf16.msra.mxu1 %v11214_v59  ;;  %v11128_v59 = vcombine.low %v1327_v58, %v1331_v49  ;;  %v1367_v49 = vld [vmem:[#allocation6 + $0x5c8] sm:$0xff] }
 0x41b   :  { %7331 = vmatpush1.bf16.msra.mxu0 %v11342_v17  ;;  %7291 = vmatprep.subr.bf16.mxu1 %v11223_v11  ;;  %v11009_v17 = vcombine.high %v1207_v61, %v1211_v10  ;;  %v11137_v11 = vcombine.high %v1335_v5, %v1339_v37 }
 0x41c   :  { %7332 = vmatprep.subr.bf16.mxu0 %v11351_v12  ;;  %v1215_v12 = vld [vmem:[#allocation6 + $0x108] sm:$0xff] }
 0x41d   :  { %v11016_v31 = vcombine.low %v1215_v12, %v1219_v13 }
 0x41e   :  { %7292 = vmatpush1.bf16.msra.mxu1 %v11222_v16  ;;  %v11136_v16 = vcombine.low %v1335_v5, %v1339_v37 }
 0x41f   :  { %7333 = vmatpush1.bf16.msra.mxu0 %v11350_v19  ;;  %7293 = vmatprep.subr.bf16.mxu1 %v11231_v21  ;;  %v11017_v19 = vcombine.high %v1215_v12, %v1219_v13  ;;  %v11145_v21 = vcombine.high %v1343_v15, %v1347_v42  ;;  %v1375_v12 = vld [vmem:[#allocation6 + $0x608] sm:$0xff] }
 0x420   :  { %7334 = vmatprep.subr.bf16.mxu0 %v11359_v22  ;;  %v1223_v22 = vld [vmem:[#allocation6 + $0x148] sm:$0xff] }
 0x421   :  { %v11025_v33 = vcombine.high %v1223_v22, %v1227_v27  ;;  %v11024_v50 = vcombine.low %v1223_v22, %v1227_v27  ;;  %v1379_v13 = vld [vmem:[#allocation6 + $0x628] sm:$0xff] }
 0x422   :  { %7294 = vmatpush1.bf16.msra.mxu1 %v11230_v32  ;;  %v11144_v32 = vcombine.low %v1343_v15, %v1347_v42  ;;  %v1387_v22 = vld [vmem:[#allocation6 + $0x668] sm:$0xff] }
 0x423   :  { %7335 = vmatpush1.bf16.msra.mxu0 %v11358_v34  ;;  %7345 = vmatprep.subr.bf16.mxu1 %v10985_v2  ;;  %v11153_v34 = vcombine.high %v1351_v28, %v1355_v30  ;;  %v1231_v2 = vld [vmem:[#allocation6 + $0x188] sm:$0xff]  ;;  %v11176_v28 = vcombine.low %v1375_v12, %v1379_v13 }
 0x424   :  { %7386 = vmatprep.subr.bf16.mxu0 %v11113_v40  ;;  %v1359_v40 = vld [vmem:[#allocation6 + $0x588] sm:$0xff]  ;;  %v11033_v54 = vcombine.high %v1231_v2, %v1235_v36  ;;  %v11032_v61 = vcombine.low %v1231_v2, %v1235_v36 }
 0x425   :  { %7296 = vmatmul.mubr.bf16.vlgmr.msra.gmra.mrb[44].mxu1 %v12962_v45  ;;  %v11160_v37 = vcombine.low %v1359_v40, %v1363_v43  ;;  %v1395_v2 = vld [vmem:[#allocation6 + $0x6a8] sm:$0xff] }
 0x426   :  { %7337 = vmatmul.mubr.bf16.vlgmr.msra.gmra.mrb[40].mxu0 %v12964_v48  ;;  %7346 = vmatpush1.bf16.msra.mxu1 %v10984_v25 }
 0x427   :  { %7387 = vmatpush1.bf16.msra.mxu0 %v11112_v3  ;;  %7347 = vmatprep.subr.bf16.mxu1 %v10993_v6  ;;  %v11161_v3 = vcombine.high %v1359_v40, %v1363_v43  ;;  %v1239_v6 = vld [vmem:[#allocation6 + $0x1c8] sm:$0xff] }
 0x428   :  { %7388 = vmatprep.subr.bf16.mxu0 %v11121_v47  ;;  %7377 = vmatprep.mubr.bf16.mxu1 %v12916_v0  ;;  %v1243_v47 = vld [vmem:[#allocation6 + $0x1e8] sm:$0xff] }
 0x429   :  { %7418 = vmatprep.mubr.bf16.mxu0 %v12942_v62 }
 0x42a   :  { %7348 = vmatpush1.bf16.msra.mxu1 %v10992_v44  ;;  %v1371_v44 = vld [vmem:[#allocation6 + $0x5e8] sm:$0xff] }
 0x42b   :  { %7389 = vmatpush1.bf16.msra.mxu0 %v11120_v9  ;;  %7349 = vmatprep.subr.bf16.mxu1 %v11001_v55  ;;  %v11168_v15 = vcombine.low %v1367_v49, %v1371_v44 }
 0x42c   :  { %7390 = vmatprep.subr.bf16.mxu0 %v11129_v14 }
 0x42e   :  { %7350 = vmatpush1.bf16.msra.mxu1 %v11000_v4 }
 0x42f   :  { %7391 = vmatpush1.bf16.msra.mxu0 %v11128_v59  ;;  %7351 = vmatprep.subr.bf16.mxu1 %v11009_v17  ;;  %v11169_v59 = vcombine.high %v1367_v49, %v1371_v44  ;;  %v1247_v17 = vld [vmem:[#allocation6 + $0x208] sm:$0xff] }
 0x430   :  { %7392 = vmatprep.subr.bf16.mxu0 %v11137_v11  ;;  %v1251_v11 = vld [vmem:[#allocation6 + $0x228] sm:$0xff] }
 0x431   :  { %v11049_v42 = vcombine.high %v1247_v17, %v1251_v11  ;;  %v11048_v27 = vcombine.low %v1247_v17, %v1251_v11  ;;  %v1279_v44 = vld [vmem:[#allocation6 + $0x308] sm:$0xff] }
 0x432   :  { %7352 = vmatpush1.bf16.msra.mxu1 %v11008_v39  ;;  %v11177_v39 = vcombine.high %v1375_v12, %v1379_v13  ;;  %v1291_v17 = vld [vmem:[#allocation6 + $0x368] sm:$0xff] }
 0x433   :  { %7393 = vmatpush1.bf16.msra.mxu0 %v11136_v16  ;;  %7353 = vmatprep.subr.bf16.mxu1 %v11017_v19  ;;  %v1255_v16 = vld [vmem:[#allocation6 + $0x248] sm:$0xff] }
 0x434   :  { %7394 = vmatprep.subr.bf16.mxu0 %v11145_v21  ;;  %v1259_v19 = vld [vmem:[#allocation6 + $0x268] sm:$0xff] }
 0x435   :  { %v1383_v21 = vld [vmem:[#allocation6 + $0x648] sm:$0xff]  ;;  %v11057_v30 = vcombine.high %v1255_v16, %v1259_v19  ;;  %v11056_v36 = vcombine.low %v1255_v16, %v1259_v19 }
 0x436   :  { %7354 = vmatpush1.bf16.msra.mxu1 %v11016_v31  ;;  %v11185_v31 = vcombine.high %v1383_v21, %v1387_v22  ;;  %v11184_v40 = vcombine.low %v1383_v21, %v1387_v22  ;;  %v1415_v11 = vld [vmem:[#allocation6 + $0x748] sm:$0xff] }
 0x437   :  { %7395 = vmatpush1.bf16.msra.mxu0 %v11144_v32  ;;  %7355 = vmatprep.subr.bf16.mxu1 %v11025_v33  ;;  %v1263_v32 = vld [vmem:[#allocation6 + $0x288] sm:$0xff] }
 0x438   :  { %v5131_v25 = vpop.f32.mrb[32].mxu1  ;;  %7396 = vmatprep.subr.bf16.mxu0 %v11153_v34  ;;  %v1267_v33 = vld [vmem:[#allocation6 + $0x2a8] sm:$0xff] }
 0x439   :  { %v12971_v7 = vadd.f32 %v5131_v25, %v12952_v46  ;;  %v12973_v8 = vpop.f32.mrb[28].mxu0  ;;  %v5133_v58 = vpop.f32.mrb[33].mxu1  ;;  %v11041_v46 = vcombine.high %v1239_v6, %v1243_v47  ;;  %v1391_v34 = vld [vmem:[#allocation6 + $0x688] sm:$0xff]  ;;  %v11065_v43 = vcombine.high %v1263_v32, %v1267_v33 }
 0x43a   :  { %v12976_v9 = vadd.f32 %v5133_v58, %v12954_v20  ;;  %v12978_v55 = vpop.f32.mrb[29].mxu0  ;;  %v5135_v14 = vpop.f32.mrb[34].mxu1  ;;  %7356 = vmatpush1.bf16.msra.mxu1 %v11024_v50  ;;  %v11040_v20 = vcombine.low %v1239_v6, %v1243_v47  ;;  %v11193_v50 = vcombine.high %v1391_v34, %v1395_v2  ;;  %v1399_v25 = vld [vmem:[#allocation6 + $0x6c8] sm:$0xff]  ;;  %v11064_v6 = vcombine.low %v1263_v32, %v1267_v33 }
 0x43b   :  { %v5176_v10 = vpop.f32.mrb[30].mxu0  ;;  %7397 = vmatpush1.bf16.msra.mxu0 %v11152_v52  ;;  %v5136_v5 = vpop.f32.mrb[35].mxu1  ;;  %7357 = vmatprep.subr.bf16.mxu1 %v11033_v54  ;;  %v1271_v52 = vld [vmem:[#allocation6 + $0x2c8] sm:$0xff]  ;;  %v11192_v47 = vcombine.low %v1391_v34, %v1395_v2 }
 0x43c   :  { %v5177_v4 = vpop.f32.mrb[31].mxu0  ;;  %7398 = vmatprep.subr.bf16.mxu0 %v11161_v3  ;;  %v1275_v54 = vld [vmem:[#allocation6 + $0x2e8] sm:$0xff] }
 0x43d   :  { %v1403_v3 = vld [vmem:[#allocation6 + $0x6e8] sm:$0xff]  ;;  %v11073_v58 = vcombine.high %v1271_v52, %v1275_v54  ;;  %v11072_v5 = vcombine.low %v1271_v52, %v1275_v54  ;;  %v1184_v54 = vld [vmem:[#allocation6 + $0x10] sm:$0xff] }
 0x43e   :  { %7358 = vmatpush1.bf16.msra.mxu1 %v11032_v61  ;;  %v11201_v49 = vcombine.high %v1399_v25, %v1403_v3  ;;  %v1283_v14 = vld [vmem:[#allocation6 + $0x328] sm:$0xff] }
 0x43f   :  { %7399 = vmatpush1.bf16.msra.mxu0 %v11160_v37  ;;  %7359 = vmatprep.subr.bf16.mxu1 %v11041_v46  ;;  %v1407_v61 = vld [vmem:[#allocation6 + $0x708] sm:$0xff]  ;;  %v11200_v37 = vcombine.low %v1399_v25, %v1403_v3  ;;  %v11081_v46 = vcombine.high %v1279_v44, %v1283_v14  ;;  %v11080_v13 = vcombine.low %v1279_v44, %v1283_v14  ;;  %v1188_v25 = vld [vmem:[#allocation6 + $0x30] sm:$0xff] }
 0x440   :  { %7400 = vmatprep.subr.bf16.mxu0 %v11169_v59  ;;  %v1411_v10 = vld [vmem:[#allocation6 + $0x728] sm:$0xff]  ;;  %v1192_v14 = vld [vmem:[#allocation6 + $0x50] sm:$0xff] }
 0x441   :  { %v11209_v4 = vcombine.high %v1407_v61, %v1411_v10  ;;  %v1287_v59 = vld [vmem:[#allocation6 + $0x348] sm:$0xff] }
 0x442   :  { %7360 = vmatpush1.bf16.msra.mxu1 %v11040_v20  ;;  %v1419_v12 = vld [vmem:[#allocation6 + $0x768] sm:$0xff]  ;;  %v11208_v20 = vcombine.low %v1407_v61, %v1411_v10  ;;  %v11088_v22 = vcombine.low %v1287_v59, %v1291_v17  ;;  %v1196_v61 = vld [vmem:[#allocation6 + $0x70] sm:$0xff] }
 0x443   :  { %7401 = vmatpush1.bf16.msra.mxu0 %v11168_v15  ;;  %7361 = vmatprep.subr.bf16.mxu1 %v11049_v42  ;;  %v11089_v15 = vcombine.high %v1287_v59, %v1291_v17  ;;  %v11217_v42 = vcombine.high %v1415_v11, %v1419_v12  ;;  %v1299_v16 = vld [vmem:[#allocation6 + $0x3a8] sm:$0xff]  ;;  %v1200_v17 = vld [vmem:[#allocation6 + $0x90] sm:$0xff] }
 0x444   :  { %7402 = vmatprep.subr.bf16.mxu0 %v11177_v39  ;;  %v1295_v39 = vld [vmem:[#allocation6 + $0x388] sm:$0xff] }
 0x445   :  { %v1423_v19 = vld [vmem:[#allocation6 + $0x788] sm:$0xff]  ;;  %v11096_v2 = vcombine.low %v1295_v39, %v1299_v16 }
 0x446   :  { %7362 = vmatpush1.bf16.msra.mxu1 %v11048_v27  ;;  %v1427_v21 = vld [vmem:[#allocation6 + $0x7a8] sm:$0xff]  ;;  %v11216_v27 = vcombine.low %v1415_v11, %v1419_v12  ;;  %v1204_v11 = vld [vmem:[#allocation6 + $0xb0] sm:$0xff] }
 0x447   :  { %7403 = vmatpush1.bf16.msra.mxu0 %v11176_v28  ;;  %7363 = vmatprep.subr.bf16.mxu1 %v11057_v30  ;;  %v11097_v28 = vcombine.high %v1295_v39, %v1299_v16  ;;  %v11225_v30 = vcombine.high %v1423_v19, %v1427_v21  ;;  %v1307_v32 = vld [vmem:[#allocation6 + $0x3e8] sm:$0xff]  ;;  %v1208_v16 = vld [vmem:[#allocation6 + $0xd0] sm:$0xff] }
 0x448   :  { %7404 = vmatprep.subr.bf16.mxu0 %v11185_v31  ;;  %v1303_v31 = vld [vmem:[#allocation6 + $0x3c8] sm:$0xff] }
 0x449   :  { %v1431_v33 = vld [vmem:[#allocation6 + $0x7c8] sm:$0xff]  ;;  %v11104_v3 = vcombine.low %v1303_v31, %v1307_v32 }
 0x44a   :  { %7364 = vmatpush1.bf16.msra.mxu1 %v11056_v36  ;;  %v1435_v34 = vld [vmem:[#allocation6 + $0x7e8] sm:$0xff]  ;;  %v11224_v36 = vcombine.low %v1423_v19, %v1427_v21  ;;  %v1212_v19 = vld [vmem:[#allocation6 + $0xf0] sm:$0xff] }
 0x44b   :  { %7405 = vmatpush1.bf16.msra.mxu0 %v11184_v40  ;;  %7365 = vmatprep.subr.bf16.mxu1 %v11065_v43  ;;  %v11105_v40 = vcombine.high %v1303_v31, %v1307_v32  ;;  %v11233_v43 = vcombine.high %v1431_v33, %v1435_v34  ;;  %v1443_v52 = vld [vmem:[#allocation6 + $0x828] sm:$0xff]  ;;  %v1216_v32 = vld [vmem:[#allocation6 + $0x110] sm:$0xff] }
 0x44c   :  { %7406 = vmatprep.subr.bf16.mxu0 %v11193_v50  ;;  %v1439_v50 = vld [vmem:[#allocation6 + $0x808] sm:$0xff] }
 0x44d   :  { %v1451_v44 = vld [vmem:[#allocation6 + $0x868] sm:$0xff]  ;;  %v11240_v10 = vcombine.low %v1439_v50, %v1443_v52 }
 0x44e   :  { %7366 = vmatpush1.bf16.msra.mxu1 %v11064_v6  ;;  %v11232_v6 = vcombine.low %v1431_v33, %v1435_v34  ;;  %v1459_v59 = vld [vmem:[#allocation6 + $0x8a8] sm:$0xff]  ;;  %v1220_v33 = vld [vmem:[#allocation6 + $0x130] sm:$0xff] }
 0x44f   :  { %7407 = vmatpush1.bf16.msra.mxu0 %v11192_v47  ;;  %7367 = vmatprep.subr.bf16.mxu1 %v11073_v58  ;;  %v11241_v47 = vcombine.high %v1439_v50, %v1443_v52  ;;  %v10987_v58 = vcombine.high %v1184_v54, %v1188_v25  ;;  %v1467_v39 = vld [vmem:[#allocation6 + $0x8e8] sm:$0xff]  ;;  %v1224_v52 = vld [vmem:[#allocation6 + $0x150] sm:$0xff] }
 0x450   :  { %7408 = vmatprep.subr.bf16.mxu0 %v11201_v49  ;;  %v1447_v49 = vld [vmem:[#allocation6 + $0x848] sm:$0xff] }
 0x451   :  { %v11248_v12 = vcombine.low %v1447_v49, %v1451_v44  ;;  %v1475_v31 = vld [vmem:[#allocation6 + $0x928] sm:$0xff] }
 0x452   :  { %7368 = vmatpush1.bf16.msra.mxu1 %v11072_v5  ;;  %v10986_v5 = vcombine.low %v1184_v54, %v1188_v25  ;;  %v1483_v50 = vld [vmem:[#allocation6 + $0x968] sm:$0xff]  ;;  %v1228_v54 = vld [vmem:[#allocation6 + $0x170] sm:$0xff] }
 0x453   :  { %7409 = vmatpush1.bf16.msra.mxu0 %v11200_v37  ;;  %7369 = vmatprep.subr.bf16.mxu1 %v11081_v46  ;;  %v11249_v37 = vcombine.high %v1447_v49, %v1451_v44  ;;  %v10995_v46 = vcombine.high %v1192_v14, %v1196_v61  ;;  %v1491_v49 = vld [vmem:[#allocation6 + $0x9a8] sm:$0xff]  ;;  %v1232_v44 = vld [vmem:[#allocation6 + $0x190] sm:$0xff] }
 0x454   :  { %7410 = vmatprep.subr.bf16.mxu0 %v11209_v4  ;;  %v1455_v4 = vld [vmem:[#allocation6 + $0x888] sm:$0xff] }
 0x455   :  { %v11256_v21 = vcombine.low %v1455_v4, %v1459_v59 }
 0x456   :  { %7370 = vmatpush1.bf16.msra.mxu1 %v11080_v13  ;;  %v10994_v13 = vcombine.low %v1192_v14, %v1196_v61  ;;  %v1236_v14 = vld [vmem:[#allocation6 + $0x1b0] sm:$0xff] }
 0x457   :  { %7411 = vmatpush1.bf16.msra.mxu0 %v11208_v20  ;;  %7371 = vmatprep.subr.bf16.mxu1 %v11089_v15  ;;  %v11257_v20 = vcombine.high %v1455_v4, %v1459_v59  ;;  %v11003_v15 = vcombine.high %v1200_v17, %v1204_v11  ;;  %v1495_v4 = vld [vmem:[#allocation6 + $0x9c8] sm:$0xff] }
 0x458   :  { %7412 = vmatprep.subr.bf16.mxu0 %v11217_v42  ;;  %v1463_v42 = vld [vmem:[#allocation6 + $0x8c8] sm:$0xff] }
 0x459   :  { %v11264_v34 = vcombine.low %v1463_v42, %v1467_v39  ;;  %v1499_v59 = vld [vmem:[#allocation6 + $0x9e8] sm:$0xff] }
 0x45a   :  { %7372 = vmatpush1.bf16.msra.mxu1 %v11088_v22  ;;  %v11002_v22 = vcombine.low %v1200_v17, %v1204_v11 }
 0x45b   :  { %7413 = vmatpush1.bf16.msra.mxu0 %v11216_v27  ;;  %7373 = vmatprep.subr.bf16.mxu1 %v11097_v28  ;;  %v11265_v27 = vcombine.high %v1463_v42, %v1467_v39  ;;  %v11011_v28 = vcombine.high %v1208_v16, %v1212_v19 }
 0x45c   :  { %7414 = vmatprep.subr.bf16.mxu0 %v11225_v30  ;;  %v1471_v30 = vld [vmem:[#allocation6 + $0x908] sm:$0xff] }
 0x45d   :  { %v11272_v25 = vcombine.low %v1471_v30, %v1475_v31 }
 0x45e   :  { %7374 = vmatpush1.bf16.msra.mxu1 %v11096_v2  ;;  %v11010_v2 = vcombine.low %v1208_v16, %v1212_v19 }
 0x45f   :  { %7415 = vmatpush1.bf16.msra.mxu0 %v11224_v36  ;;  %7375 = vmatprep.subr.bf16.mxu1 %v11105_v40  ;;  %v11273_v36 = vcombine.high %v1471_v30, %v1475_v31  ;;  %v11019_v40 = vcombine.high %v1216_v32, %v1220_v33 }
 0x460   :  { %7416 = vmatprep.subr.bf16.mxu0 %v11233_v43  ;;  %v1479_v43 = vld [vmem:[#allocation6 + $0x948] sm:$0xff] }
 0x461   :  { %v11280_v61 = vcombine.low %v1479_v43, %v1483_v50 }
 0x462   :  { %7376 = vmatpush1.bf16.msra.mxu1 %v11104_v3  ;;  %v11018_v3 = vcombine.low %v1216_v32, %v1220_v33  ;;  %v1503_v32 = vld [vmem:[#allocation6 + $0xa08] sm:$0xff] }
 0x463   :  { %7417 = vmatpush1.bf16.msra.mxu0 %v11232_v6  ;;  %7427 = vmatprep.subr.bf16.mxu1 %v11241_v47  ;;  %v11281_v6 = vcombine.high %v1479_v43, %v1483_v50  ;;  %v11027_v47 = vcombine.high %v1224_v52, %v1228_v54  ;;  %v1507_v33 = vld [vmem:[#allocation6 + $0xa28] sm:$0xff] }
 0x464   :  { %7468 = vmatprep.subr.bf16.mxu0 %v10987_v58  ;;  %v1487_v58 = vld [vmem:[#allocation6 + $0x988] sm:$0xff] }
 0x465   :  { %7378 = vmatmul.mubr.bf16.vlgmr.msra.gmra.mrb[48].mxu1 %v12937_v35  ;;  %v11288_v16 = vcombine.low %v1487_v58, %v1491_v49  ;;  %v1511_v50 = vld [vmem:[#allocation6 + $0xa48] sm:$0xff] }
 0x466   :  { %7419 = vmatmul.mubr.bf16.vlgmr.msra.gmra.mrb[44].mxu0 %v12962_v45  ;;  %7428 = vmatpush1.bf16.msra.mxu1 %v11240_v10  ;;  %v11026_v10 = vcombine.low %v1224_v52, %v1228_v54  ;;  %v1515_v52 = vld [vmem:[#allocation6 + $0xa68] sm:$0xff]  ;;  %v1256_v54 = vld [vmem:[#allocation6 + $0x250] sm:$0xff] }
 0x467   :  { %7469 = vmatpush1.bf16.msra.mxu0 %v10986_v5  ;;  %7429 = vmatprep.subr.bf16.mxu1 %v11249_v37  ;;  %v11289_v5 = vcombine.high %v1487_v58, %v1491_v49  ;;  %v1519_v49 = vld [vmem:[#allocation6 + $0xa88] sm:$0xff] }
 0x468   :  { %7470 = vmatprep.subr.bf16.mxu0 %v10995_v46  ;;  %7459 = vmatprep.mubr.bf16.mxu1 %v12945_v1  ;;  %v11035_v46 = vcombine.high %v1232_v44, %v1236_v14 }
 0x469   :  { %7500 = vmatprep.mubr.bf16.mxu0 %v12916_v0 }
 0x46a   :  { %7430 = vmatpush1.bf16.msra.mxu1 %v11248_v12 }
 0x46b   :  { %7471 = vmatpush1.bf16.msra.mxu0 %v10994_v13  ;;  %7431 = vmatprep.subr.bf16.mxu1 %v11257_v20  ;;  %v1240_v13 = vld [vmem:[#allocation6 + $0x1d0] sm:$0xff] }
 0x46c   :  { %7472 = vmatprep.subr.bf16.mxu0 %v11003_v15  ;;  %v1244_v20 = vld [vmem:[#allocation6 + $0x1f0] sm:$0xff] }
 0x46d   :  { %v11043_v31 = vcombine.high %v1240_v13, %v1244_v20 }
 0x46e   :  { %7432 = vmatpush1.bf16.msra.mxu1 %v11256_v21 }
 0x46f   :  { %7473 = vmatpush1.bf16.msra.mxu0 %v11002_v22  ;;  %7433 = vmatprep.subr.bf16.mxu1 %v11265_v27  ;;  %v11034_v27 = vcombine.low %v1232_v44, %v1236_v14  ;;  %v1523_v44 = vld [vmem:[#allocation6 + $0xaa8] sm:$0xff]  ;;  %v1264_v14 = vld [vmem:[#allocation6 + $0x290] sm:$0xff] }
 0x470   :  { %7474 = vmatprep.subr.bf16.mxu0 %v11011_v28  ;;  %v11297_v28 = vcombine.high %v1495_v4, %v1499_v59 }
 0x472   :  { %7434 = vmatpush1.bf16.msra.mxu1 %v11264_v34  ;;  %v1252_v34 = vld [vmem:[#allocation6 + $0x230] sm:$0xff] }
 0x473   :  { %7475 = vmatpush1.bf16.msra.mxu0 %v11010_v2  ;;  %7435 = vmatprep.subr.bf16.mxu1 %v11273_v36  ;;  %v11296_v2 = vcombine.low %v1495_v4, %v1499_v59  ;;  %v11042_v36 = vcombine.low %v1240_v13, %v1244_v20  ;;  %v1527_v4 = vld [vmem:[#allocation6 + $0xac8] sm:$0xff] }
 0x474   :  { %7476 = vmatprep.subr.bf16.mxu0 %v11019_v40  ;;  %v11305_v40 = vcombine.high %v1503_v32, %v1507_v33  ;;  %v1531_v59 = vld [vmem:[#allocation6 + $0xae8] sm:$0xff] }
 0x475   :  { %v11329_v20 = vcombine.high %v1527_v4, %v1531_v59 }
 0x476   :  { %7436 = vmatpush1.bf16.msra.mxu1 %v11272_v25  ;;  %v1260_v25 = vld [vmem:[#allocation6 + $0x270] sm:$0xff] }
 0x477   :  { %7477 = vmatpush1.bf16.msra.mxu0 %v11018_v3  ;;  %7437 = vmatprep.subr.bf16.mxu1 %v11281_v6  ;;  %v11304_v3 = vcombine.low %v1503_v32, %v1507_v33  ;;  %v11059_v58 = vcombine.high %v1256_v54, %v1260_v25  ;;  %v1547_v32 = vld [vmem:[#allocation6 + $0xb68] sm:$0xff]  ;;  %v1288_v33 = vld [vmem:[#allocation6 + $0x350] sm:$0xff] }
 0x478   :  { %v5213_v37 = vpop.f32.mrb[36].mxu1  ;;  %7478 = vmatprep.subr.bf16.mxu0 %v11027_v47  ;;  %v11313_v47 = vcombine.high %v1511_v50, %v1515_v52 }
 0x479   :  { %v5214_v17 = vadd.f32 %v5213_v37, %v12973_v8  ;;  %v5254_v11 = vpop.f32.mrb[32].mxu0  ;;  %v5215_v12 = vpop.f32.mrb[37].mxu1  ;;  %v11321_v37 = vcombine.high %v1519_v49, %v1523_v44 }
 0x47a   :  { %v5216_v15 = vadd.f32 %v5215_v12, %v12978_v55  ;;  %v5256_v42 = vpop.f32.mrb[33].mxu0  ;;  %v5217_v39 = vpop.f32.mrb[38].mxu1  ;;  %7438 = vmatpush1.bf16.msra.mxu1 %v11280_v61  ;;  %v1248_v55 = vld [vmem:[#allocation6 + $0x210] sm:$0xff]  ;;  %v11320_v12 = vcombine.low %v1519_v49, %v1523_v44  ;;  %v1563_v49 = vld [vmem:[#allocation6 + $0xbe8] sm:$0xff] }
 0x47b   :  { %v12986_v19 = vadd.f32 %v5254_v11, %v5214_v17  ;;  %v5258_v21 = vpop.f32.mrb[34].mxu0  ;;  %7479 = vmatpush1.bf16.msra.mxu0 %v11026_v10  ;;  %v5218_v22 = vpop.f32.mrb[39].mxu1  ;;  %7439 = vmatprep.subr.bf16.mxu1 %v11289_v5  ;;  %v11051_v43 = vcombine.high %v1248_v55, %v1252_v34  ;;  %v11050_v6 = vcombine.low %v1248_v55, %v1252_v34  ;;  %v1268_v61 = vld [vmem:[#allocation6 + $0x2b0] sm:$0xff]  ;;  %v1539_v39 = vld [vmem:[#allocation6 + $0xb28] sm:$0xff] }
 0x47c   :  { %v12988_v30 = vadd.f32 %v5256_v42, %v5216_v15  ;;  %v5259_v8 = vpop.f32.mrb[35].mxu0  ;;  %7480 = vmatprep.subr.bf16.mxu0 %v11035_v46  ;;  %v11312_v10 = vcombine.low %v1511_v50, %v1515_v52  ;;  %v11058_v5 = vcombine.low %v1256_v54, %v1260_v25  ;;  %v11067_v46 = vcombine.high %v1264_v14, %v1268_v61  ;;  %v1272_v17 = vld [vmem:[#allocation6 + $0x2d0] sm:$0xff]  ;;  %v1535_v42 = vld [vmem:[#allocation6 + $0xb08] sm:$0xff] }
 0x47d   :  { %v1276_v11 = vld [vmem:[#allocation6 + $0x2f0] sm:$0xff]  ;;  %v11066_v13 = vcombine.low %v1264_v14, %v1268_v61  ;;  %v11328_v22 = vcombine.low %v1527_v4, %v1531_v59  ;;  %v11336_v34 = vcombine.low %v1535_v42, %v1539_v39  ;;  %v1555_v50 = vld [vmem:[#allocation6 + $0xba8] sm:$0xff] }
 0x47e   :  { %7440 = vmatpush1.bf16.msra.mxu1 %v11288_v16  ;;  %v11075_v15 = vcombine.high %v1272_v17, %v1276_v11  ;;  %v1280_v16 = vld [vmem:[#allocation6 + $0x310] sm:$0xff] }
 0x47f   :  { %7481 = vmatpush1.bf16.msra.mxu0 %v11034_v27  ;;  %7441 = vmatprep.subr.bf16.mxu1 %v11297_v28  ;;  %v1284_v21 = vld [vmem:[#allocation6 + $0x330] sm:$0xff]  ;;  %v11074_v27 = vcombine.low %v1272_v17, %v1276_v11  ;;  %v11337_v28 = vcombine.high %v1535_v42, %v1539_v39 }
 0x480   :  { %7482 = vmatprep.subr.bf16.mxu0 %v11043_v31  ;;  %v11083_v8 = vcombine.high %v1280_v16, %v1284_v21  ;;  %v1543_v31 = vld [vmem:[#allocation6 + $0xb48] sm:$0xff]  ;;  %v1292_v55 = vld [vmem:[#allocation6 + $0x370] sm:$0xff] }
 0x481   :  { %v1296_v52 = vld [vmem:[#allocation6 + $0x390] sm:$0xff]  ;;  %v11344_v25 = vcombine.low %v1543_v31, %v1547_v32 }
 0x482   :  { %7442 = vmatpush1.bf16.msra.mxu1 %v11296_v2  ;;  %v11082_v2 = vcombine.low %v1280_v16, %v1284_v21  ;;  %v1300_v54 = vld [vmem:[#allocation6 + $0x3b0] sm:$0xff] }
 0x483   :  { %7483 = vmatpush1.bf16.msra.mxu0 %v11042_v36  ;;  %7443 = vmatprep.subr.bf16.mxu1 %v11305_v40  ;;  %v11345_v36 = vcombine.high %v1543_v31, %v1547_v32  ;;  %v11091_v40 = vcombine.high %v1288_v33, %v1292_v55  ;;  %v1304_v44 = vld [vmem:[#allocation6 + $0x3d0] sm:$0xff] }
 0x484   :  { %7484 = vmatprep.subr.bf16.mxu0 %v11051_v43  ;;  %v1551_v43 = vld [vmem:[#allocation6 + $0xb88] sm:$0xff]  ;;  %v1308_v14 = vld [vmem:[#allocation6 + $0x3f0] sm:$0xff] }
 0x485   :  { %v11352_v61 = vcombine.low %v1551_v43, %v1555_v50  ;;  %v1316_v4 = vld [vmem:[#allocation6 + $0x430] sm:$0xff] }
 0x486   :  { %7444 = vmatpush1.bf16.msra.mxu1 %v11304_v3  ;;  %v11090_v3 = vcombine.low %v1288_v33, %v1292_v55  ;;  %v1440_v59 = vld [vmem:[#allocation6 + $0x810] sm:$0xff] }
 0x487   :  { %7485 = vmatpush1.bf16.msra.mxu0 %v11050_v6  ;;  %7445 = vmatprep.subr.bf16.mxu1 %v11313_v47  ;;  %v11353_v6 = vcombine.high %v1551_v43, %v1555_v50  ;;  %v11099_v47 = vcombine.high %v1296_v52, %v1300_v54  ;;  %v1444_v17 = vld [vmem:[#allocation6 + $0x830] sm:$0xff] }
 0x488   :  { %7486 = vmatprep.subr.bf16.mxu0 %v11059_v58  ;;  %v1559_v58 = vld [vmem:[#allocation6 + $0xbc8] sm:$0xff]  ;;  %v1324_v42 = vld [vmem:[#allocation6 + $0x470] sm:$0xff] }
 0x489   :  { %v11360_v11 = vcombine.low %v1559_v58, %v1563_v49  ;;  %v1448_v39 = vld [vmem:[#allocation6 + $0x850] sm:$0xff] }
 0x48a   :  { %7446 = vmatpush1.bf16.msra.mxu1 %v11312_v10  ;;  %v11098_v10 = vcombine.low %v1296_v52, %v1300_v54  ;;  %v1452_v16 = vld [vmem:[#allocation6 + $0x870] sm:$0xff] }
 0x48b   :  { %7487 = vmatpush1.bf16.msra.mxu0 %v11058_v5  ;;  %7447 = vmatprep.subr.bf16.mxu1 %v11321_v37  ;;  %v11361_v5 = vcombine.high %v1559_v58, %v1563_v49  ;;  %v11107_v37 = vcombine.high %v1304_v44, %v1308_v14  ;;  %v1332_v31 = vld [vmem:[#allocation6 + $0x4b0] sm:$0xff] }
 0x48c   :  { %7488 = vmatprep.subr.bf16.mxu0 %v11067_v46  ;;  %v1312_v46 = vld [vmem:[#allocation6 + $0x410] sm:$0xff] }
 0x48d   :  { %v11114_v21 = vcombine.low %v1312_v46, %v1316_v4  ;;  %v1456_v32 = vld [vmem:[#allocation6 + $0x890] sm:$0xff] }
 0x48e   :  { %7448 = vmatpush1.bf16.msra.mxu1 %v11320_v12  ;;  %v11106_v12 = vcombine.low %v1304_v44, %v1308_v14  ;;  %v1460_v33 = vld [vmem:[#allocation6 + $0x8b0] sm:$0xff] }
 0x48f   :  { %7489 = vmatpush1.bf16.msra.mxu0 %v11066_v13  ;;  %7449 = vmatprep.subr.bf16.mxu1 %v11329_v20  ;;  %v11115_v13 = vcombine.high %v1312_v46, %v1316_v4  ;;  %v11243_v20 = vcombine.high %v1440_v59, %v1444_v17  ;;  %v1340_v43 = vld [vmem:[#allocation6 + $0x4f0] sm:$0xff] }
 0x490   :  { %7490 = vmatprep.subr.bf16.mxu0 %v11075_v15  ;;  %v1320_v15 = vld [vmem:[#allocation6 + $0x450] sm:$0xff] }
 0x491   :  { %v11122_v55 = vcombine.low %v1320_v15, %v1324_v42  ;;  %v1464_v50 = vld [vmem:[#allocation6 + $0x8d0] sm:$0xff] }
 0x492   :  { %7450 = vmatpush1.bf16.msra.mxu1 %v11328_v22  ;;  %v11242_v22 = vcombine.low %v1440_v59, %v1444_v17  ;;  %v1468_v52 = vld [vmem:[#allocation6 + $0x8f0] sm:$0xff] }
 0x493   :  { %7491 = vmatpush1.bf16.msra.mxu0 %v11074_v27  ;;  %7451 = vmatprep.subr.bf16.mxu1 %v11337_v28  ;;  %v11123_v27 = vcombine.high %v1320_v15, %v1324_v42  ;;  %v11251_v28 = vcombine.high %v1448_v39, %v1452_v16  ;;  %v1348_v58 = vld [vmem:[#allocation6 + $0x530] sm:$0xff] }
 0x494   :  { %7492 = vmatprep.subr.bf16.mxu0 %v11083_v8  ;;  %v1328_v8 = vld [vmem:[#allocation6 + $0x490] sm:$0xff] }
 0x495   :  { %v11130_v54 = vcombine.low %v1328_v8, %v1332_v31  ;;  %v1472_v49 = vld [vmem:[#allocation6 + $0x910] sm:$0xff] }
 0x496   :  { %7452 = vmatpush1.bf16.msra.mxu1 %v11336_v34  ;;  %v11250_v34 = vcombine.low %v1448_v39, %v1452_v16  ;;  %v1476_v44 = vld [vmem:[#allocation6 + $0x930] sm:$0xff] }
 0x497   :  { %7493 = vmatpush1.bf16.msra.mxu0 %v11082_v2  ;;  %7453 = vmatprep.subr.bf16.mxu1 %v11345_v36  ;;  %v11131_v2 = vcombine.high %v1328_v8, %v1332_v31  ;;  %v11259_v36 = vcombine.high %v1456_v32, %v1460_v33  ;;  %v1356_v46 = vld [vmem:[#allocation6 + $0x570] sm:$0xff] }
 0x498   :  { %7494 = vmatprep.subr.bf16.mxu0 %v11091_v40  ;;  %v1336_v40 = vld [vmem:[#allocation6 + $0x4d0] sm:$0xff] }
 0x499   :  { %v11138_v14 = vcombine.low %v1336_v40, %v1340_v43  ;;  %v1480_v4 = vld [vmem:[#allocation6 + $0x950] sm:$0xff] }
 0x49a   :  { %7454 = vmatpush1.bf16.msra.mxu1 %v11344_v25  ;;  %v11258_v25 = vcombine.low %v1456_v32, %v1460_v33  ;;  %v1484_v59 = vld [vmem:[#allocation6 + $0x970] sm:$0xff] }
 0x49b   :  { %7495 = vmatpush1.bf16.msra.mxu0 %v11090_v3  ;;  %7455 = vmatprep.subr.bf16.mxu1 %v11353_v6  ;;  %v11139_v3 = vcombine.high %v1336_v40, %v1340_v43  ;;  %v11267_v6 = vcombine.high %v1464_v50, %v1468_v52  ;;  %v1364_v15 = vld [vmem:[#allocation6 + $0x5b0] sm:$0xff] }
 0x49c   :  { %7496 = vmatprep.subr.bf16.mxu0 %v11099_v47  ;;  %v1344_v47 = vld [vmem:[#allocation6 + $0x510] sm:$0xff] }
 0x49d   :  { %v11146_v17 = vcombine.low %v1344_v47, %v1348_v58  ;;  %v1488_v42 = vld [vmem:[#allocation6 + $0x990] sm:$0xff] }
 0x49e   :  { %7456 = vmatpush1.bf16.msra.mxu1 %v11352_v61  ;;  %v11266_v61 = vcombine.low %v1464_v50, %v1468_v52  ;;  %v1492_v39 = vld [vmem:[#allocation6 + $0x9b0] sm:$0xff] }
 0x49f   :  { %7497 = vmatpush1.bf16.msra.mxu0 %v11098_v10  ;;  %7457 = vmatprep.subr.bf16.mxu1 %v11361_v5  ;;  %v11147_v10 = vcombine.high %v1344_v47, %v1348_v58  ;;  %v11275_v5 = vcombine.high %v1472_v49, %v1476_v44  ;;  %v1368_v8 = vld [vmem:[#allocation6 + $0x5d0] sm:$0xff] }
 0x4a0   :  { %7498 = vmatprep.subr.bf16.mxu0 %v11107_v37  ;;  %v1352_v37 = vld [vmem:[#allocation6 + $0x550] sm:$0xff] }
 0x4a1   :  { %v11154_v16 = vcombine.low %v1352_v37, %v1356_v46  ;;  %v1372_v31 = vld [vmem:[#allocation6 + $0x5f0] sm:$0xff] }
 0x4a2   :  { %7458 = vmatpush1.bf16.msra.mxu1 %v11360_v11  ;;  %v11274_v11 = vcombine.low %v1472_v49, %v1476_v44  ;;  %v1380_v58 = vld [vmem:[#allocation6 + $0x630] sm:$0xff] }
 0x4a3   :  { %7499 = vmatpush1.bf16.msra.mxu0 %v11106_v12  ;;  %7509 = vmatprep.subr.bf16.mxu1 %v11115_v13  ;;  %v11155_v12 = vcombine.high %v1352_v37, %v1356_v46  ;;  %v11283_v13 = vcombine.high %v1480_v4, %v1484_v59  ;;  %v1508_v44 = vld [vmem:[#allocation6 + $0xa30] sm:$0xff] }
 0x4a4   :  { %7550 = vmatprep.subr.bf16.mxu0 %v11243_v20  ;;  %v1360_v20 = vld [vmem:[#allocation6 + $0x590] sm:$0xff] }
 0x4a5   :  { %7460 = vmatmul.mubr.bf16.vlgmr.msra.gmra.mrb[52].mxu1 %v12964_v48  ;;  %v11162_v52 = vcombine.low %v1360_v20, %v1364_v15  ;;  %v1388_v37 = vld [vmem:[#allocation6 + $0x670] sm:$0xff] }
 0x4a6   :  { %7501 = vmatmul.mubr.bf16.vlgmr.msra.gmra.mrb[48].mxu0 %v12937_v35  ;;  %7510 = vmatpush1.bf16.msra.mxu1 %v11114_v21  ;;  %v11282_v21 = vcombine.low %v1480_v4, %v1484_v59  ;;  %v1512_v46 = vld [vmem:[#allocation6 + $0xa50] sm:$0xff] }
 0x4a7   :  { %7551 = vmatpush1.bf16.msra.mxu0 %v11242_v22  ;;  %7511 = vmatprep.subr.bf16.mxu1 %v11123_v27  ;;  %v11163_v22 = vcombine.high %v1360_v20, %v1364_v15  ;;  %v1516_v4 = vld [vmem:[#allocation6 + $0xa70] sm:$0xff] }
 0x4a8   :  { %7552 = vmatprep.subr.bf16.mxu0 %v11251_v28  ;;  %7541 = vmatprep.mubr.bf16.mxu1 %v12942_v62  ;;  %v11291_v28 = vcombine.high %v1488_v42, %v1492_v39  ;;  %v1396_v20 = vld [vmem:[#allocation6 + $0x6b0] sm:$0xff] }
 0x4a9   :  { %7582 = vmatprep.mubr.bf16.mxu0 %v12945_v1  ;;  %v1520_v15 = vld [vmem:[#allocation6 + $0xa90] sm:$0xff] }
 0x4aa   :  { %7512 = vmatpush1.bf16.msra.mxu1 %v11122_v55 }
 0x4ab   :  { %7553 = vmatpush1.bf16.msra.mxu0 %v11250_v34  ;;  %7513 = vmatprep.subr.bf16.mxu1 %v11131_v2  ;;  %v1496_v34 = vld [vmem:[#allocation6 + $0x9d0] sm:$0xff] }
 0x4ac   :  { %7554 = vmatprep.subr.bf16.mxu0 %v11259_v36  ;;  %v1500_v2 = vld [vmem:[#allocation6 + $0x9f0] sm:$0xff] }
 0x4ad   :  { %v11299_v47 = vcombine.high %v1496_v34, %v1500_v2 }
 0x4ae   :  { %7514 = vmatpush1.bf16.msra.mxu1 %v11130_v54 }
 0x4af   :  { %7555 = vmatpush1.bf16.msra.mxu0 %v11258_v25  ;;  %7515 = vmatprep.subr.bf16.mxu1 %v11139_v3  ;;  %v11290_v25 = vcombine.low %v1488_v42, %v1492_v39  ;;  %v11171_v3 = vcombine.high %v1368_v8, %v1372_v31  ;;  %v1524_v42 = vld [vmem:[#allocation6 + $0xab0] sm:$0xff] }
 0x4b0   :  { %7556 = vmatprep.subr.bf16.mxu0 %v11267_v6 }
 0x4b2   :  { %7516 = vmatpush1.bf16.msra.mxu1 %v11138_v14  ;;  %v11170_v14 = vcombine.low %v1368_v8, %v1372_v31  ;;  %v1528_v8 = vld [vmem:[#allocation6 + $0xad0] sm:$0xff] }
 0x4b3   :  { %7557 = vmatpush1.bf16.msra.mxu0 %v11266_v61  ;;  %7517 = vmatprep.subr.bf16.mxu1 %v11147_v10  ;;  %v11298_v61 = vcombine.low %v1496_v34, %v1500_v2  ;;  %v1532_v31 = vld [vmem:[#allocation6 + $0xaf0] sm:$0xff] }
 0x4b4   :  { %7558 = vmatprep.subr.bf16.mxu0 %v11275_v5  ;;  %v1384_v5 = vld [vmem:[#allocation6 + $0x650] sm:$0xff]  ;;  %v11331_v2 = vcombine.high %v1528_v8, %v1532_v31 }
 0x4b5   :  { %v11186_v39 = vcombine.low %v1384_v5, %v1388_v37 }
 0x4b6   :  { %7518 = vmatpush1.bf16.msra.mxu1 %v11146_v17 }
 0x4b7   :  { %7559 = vmatpush1.bf16.msra.mxu0 %v11274_v11  ;;  %7519 = vmatprep.subr.bf16.mxu1 %v11155_v12  ;;  %v11187_v11 = vcombine.high %v1384_v5, %v1388_v37  ;;  %v11315_v12 = vcombine.high %v1512_v46, %v1516_v4  ;;  %v1428_v5 = vld [vmem:[#allocation6 + $0x7b0] sm:$0xff] }
 0x4b8   :  { %v5295_v27 = vpop.f32.mrb[40].mxu1  ;;  %7560 = vmatprep.subr.bf16.mxu0 %v11283_v13  ;;  %v1392_v13 = vld [vmem:[#allocation6 + $0x690] sm:$0xff] }
 0x4b9   :  { %v12995_v32 = vadd.f32 %v5295_v27, %v12986_v19  ;;  %v7256_v33 = vpop.f32.mrb[36].mxu0  ;;  %v5297_v55 = vpop.f32.mrb[41].mxu1  ;;  %v1400_v27 = vld [vmem:[#allocation6 + $0x6d0] sm:$0xff] }
 0x4ba   :  { %v12998_v36 = vadd.f32 %v7256_v33, %v12895_v57  ;;  %v13001_v40 = vadd.f32 %v5297_v55, %v12988_v30  ;;  %v7258_v43 = vpop.f32.mrb[37].mxu0  ;;  %v5299_v50 = vpop.f32.mrb[42].mxu1  ;;  %7520 = vmatpush1.bf16.msra.mxu1 %v11154_v16  ;;  %v1376_v57 = vld [vmem:[#allocation6 + $0x610] sm:$0xff]  ;;  %v11314_v16 = vcombine.low %v1512_v46, %v1516_v4  ;;  %v11194_v33 = vcombine.low %v1392_v13, %v1396_v20 }
 0x4bb   :  { %v13004_v54 = vadd.f32 %v7258_v43, %v12900_v63  ;;  %7561 = vmatpush1.bf16.msra.mxu0 %v11282_v21  ;;  %v5300_v19 = vpop.f32.mrb[43].mxu1  ;;  %7521 = vmatprep.subr.bf16.mxu1 %v11163_v22  ;;  %v7260_v6 = vpop.f32.mrb[38].mxu0  ;;  %v1504_v30 = vld [vmem:[#allocation6 + $0xa10] sm:$0xff]  ;;  %v11179_v63 = vcombine.high %v1376_v57, %v1380_v58  ;;  %v11178_v59 = vcombine.low %v1376_v57, %v1380_v58 }
 0x4bc   :  { %7562 = vmatprep.subr.bf16.mxu0 %v11291_v28  ;;  %v7261_v49 = vpop.f32.mrb[39].mxu0  ;;  %v11307_v10 = vcombine.high %v1504_v30, %v1508_v44  ;;  %v11306_v17 = vcombine.low %v1504_v30, %v1508_v44  ;;  %v11195_v21 = vcombine.high %v1392_v13, %v1396_v20  ;;  %v11323_v22 = vcombine.high %v1520_v15, %v1524_v42  ;;  %v1404_v28 = vld [vmem:[#allocation6 + $0x6f0] sm:$0xff] }
 0x4bd   :  { %v11322_v55 = vcombine.low %v1520_v15, %v1524_v42  ;;  %v11203_v34 = vcombine.high %v1400_v27, %v1404_v28  ;;  %v1408_v43 = vld [vmem:[#allocation6 + $0x710] sm:$0xff] }
 0x4be   :  { %7522 = vmatpush1.bf16.msra.mxu1 %v11162_v52  ;;  %v1412_v50 = vld [vmem:[#allocation6 + $0x730] sm:$0xff] }
 0x4bf   :  { %7563 = vmatpush1.bf16.msra.mxu0 %v11290_v25  ;;  %7523 = vmatprep.subr.bf16.mxu1 %v11171_v3  ;;  %v1536_v52 = vld [vmem:[#allocation6 + $0xb10] sm:$0xff]  ;;  %v11202_v25 = vcombine.low %v1400_v27, %v1404_v28  ;;  %v11330_v3 = vcombine.low %v1528_v8, %v1532_v31  ;;  %v11211_v6 = vcombine.high %v1408_v43, %v1412_v50  ;;  %v1189_v27 = vld [vmem:[#allocation6 + $0x38] sm:$0xff] }
 0x4c0   :  { %7564 = vmatprep.subr.bf16.mxu0 %v11299_v47  ;;  %v1540_v19 = vld [vmem:[#allocation6 + $0xb30] sm:$0xff]  ;;  %v11210_v44 = vcombine.low %v1408_v43, %v1412_v50  ;;  %v1313_v28 = vld [vmem:[#allocation6 + $0x418] sm:$0xff] }
 0x4c1   :  { %v11339_v47 = vcombine.high %v1536_v52, %v1540_v19  ;;  %v1416_v57 = vld [vmem:[#allocation6 + $0x750] sm:$0xff]  ;;  %v1317_v8 = vld [vmem:[#allocation6 + $0x438] sm:$0xff] }
 0x4c2   :  { %7524 = vmatpush1.bf16.msra.mxu1 %v11170_v14  ;;  %v1420_v58 = vld [vmem:[#allocation6 + $0x770] sm:$0xff]  ;;  %v11338_v14 = vcombine.low %v1536_v52, %v1540_v19  ;;  %v1197_v43 = vld [vmem:[#allocation6 + $0x78] sm:$0xff] }
 0x4c3   :  { %7565 = vmatpush1.bf16.msra.mxu0 %v11298_v61  ;;  %7525 = vmatprep.subr.bf16.mxu1 %v11179_v63  ;;  %v1544_v49 = vld [vmem:[#allocation6 + $0xb50] sm:$0xff]  ;;  %v11219_v61 = vcombine.high %v1416_v57, %v1420_v58  ;;  %v11218_v4 = vcombine.low %v1416_v57, %v1420_v58  ;;  %v1321_v50 = vld [vmem:[#allocation6 + $0x458] sm:$0xff] }
 0x4c4   :  { %7566 = vmatprep.subr.bf16.mxu0 %v11307_v10  ;;  %v1548_v30 = vld [vmem:[#allocation6 + $0xb70] sm:$0xff]  ;;  %v1325_v52 = vld [vmem:[#allocation6 + $0x478] sm:$0xff] }
 0x4c5   :  { %v11347_v63 = vcombine.high %v1544_v49, %v1548_v30  ;;  %v1424_v10 = vld [vmem:[#allocation6 + $0x790] sm:$0xff]  ;;  %v1205_v57 = vld [vmem:[#allocation6 + $0xb8] sm:$0xff] }
 0x4c6   :  { %7526 = vmatpush1.bf16.msra.mxu1 %v11178_v59  ;;  %v1552_v37 = vld [vmem:[#allocation6 + $0xb90] sm:$0xff]  ;;  %v11346_v59 = vcombine.low %v1544_v49, %v1548_v30  ;;  %v11226_v42 = vcombine.low %v1424_v10, %v1428_v5  ;;  %v1329_v58 = vld [vmem:[#allocation6 + $0x498] sm:$0xff] }
 0x4c7   :  { %7567 = vmatpush1.bf16.msra.mxu0 %v11306_v17  ;;  %7527 = vmatprep.subr.bf16.mxu1 %v11187_v11  ;;  %v1556_v46 = vld [vmem:[#allocation6 + $0xbb0] sm:$0xff]  ;;  %v11227_v17 = vcombine.high %v1424_v10, %v1428_v5  ;;  %v1333_v49 = vld [vmem:[#allocation6 + $0x4b8] sm:$0xff] }
 0x4c8   :  { %7568 = vmatprep.subr.bf16.mxu0 %v11315_v12  ;;  %v11355_v11 = vcombine.high %v1552_v37, %v1556_v46  ;;  %v1432_v12 = vld [vmem:[#allocation6 + $0x7d0] sm:$0xff]  ;;  %v1213_v10 = vld [vmem:[#allocation6 + $0xf8] sm:$0xff] }
 0x4c9   :  { %v1436_v13 = vld [vmem:[#allocation6 + $0x7f0] sm:$0xff]  ;;  %v1337_v5 = vld [vmem:[#allocation6 + $0x4d8] sm:$0xff] }
 0x4ca   :  { %7528 = vmatpush1.bf16.msra.mxu1 %v11186_v39  ;;  %v1560_v20 = vld [vmem:[#allocation6 + $0xbd0] sm:$0xff]  ;;  %v11354_v39 = vcombine.low %v1552_v37, %v1556_v46  ;;  %v11234_v31 = vcombine.low %v1432_v12, %v1436_v13  ;;  %v1341_v37 = vld [vmem:[#allocation6 + $0x4f8] sm:$0xff] }
 0x4cb   :  { %7569 = vmatpush1.bf16.msra.mxu0 %v11314_v16  ;;  %7529 = vmatprep.subr.bf16.mxu1 %v11195_v21  ;;  %v1564_v15 = vld [vmem:[#allocation6 + $0xbf0] sm:$0xff]  ;;  %v11235_v16 = vcombine.high %v1432_v12, %v1436_v13  ;;  %v1221_v12 = vld [vmem:[#allocation6 + $0x138] sm:$0xff] }
 0x4cc   :  { %7570 = vmatprep.subr.bf16.mxu0 %v11323_v22  ;;  %v11363_v21 = vcombine.high %v1560_v20, %v1564_v15  ;;  %v1185_v22 = vld [vmem:[#allocation6 + $0x18] sm:$0xff] }
 0x4cd   :  { %v10988_v19 = vcombine.low %v1185_v22, %v1189_v27  ;;  %v1345_v13 = vld [vmem:[#allocation6 + $0x518] sm:$0xff] }
 0x4ce   :  { %7530 = vmatpush1.bf16.msra.mxu1 %v11194_v33  ;;  %v11362_v33 = vcombine.low %v1560_v20, %v1564_v15  ;;  %v1349_v20 = vld [vmem:[#allocation6 + $0x538] sm:$0xff] }
 0x4cf   :  { %7571 = vmatpush1.bf16.msra.mxu0 %v11322_v55  ;;  %7531 = vmatprep.subr.bf16.mxu1 %v11203_v34  ;;  %v10989_v55 = vcombine.high %v1185_v22, %v1189_v27  ;;  %v11117_v34 = vcombine.high %v1313_v28, %v1317_v8  ;;  %v1357_v22 = vld [vmem:[#allocation6 + $0x578] sm:$0xff] }
 0x4d0   :  { %7572 = vmatprep.subr.bf16.mxu0 %v11331_v2  ;;  %v1193_v2 = vld [vmem:[#allocation6 + $0x58] sm:$0xff] }
 0x4d1   :  { %v10996_v30 = vcombine.low %v1193_v2, %v1197_v43 }
 0x4d2   :  { %7532 = vmatpush1.bf16.msra.mxu1 %v11202_v25  ;;  %v11116_v25 = vcombine.low %v1313_v28, %v1317_v8  ;;  %v11148_v28 = vcombine.low %v1345_v13, %v1349_v20 }
 0x4d3   :  { %7573 = vmatpush1.bf16.msra.mxu0 %v11330_v3  ;;  %7533 = vmatprep.subr.bf16.mxu1 %v11211_v6  ;;  %v10997_v3 = vcombine.high %v1193_v2, %v1197_v43  ;;  %v11125_v6 = vcombine.high %v1321_v50, %v1325_v52  ;;  %v1365_v2 = vld [vmem:[#allocation6 + $0x5b8] sm:$0xff] }
 0x4d4   :  { %7574 = vmatprep.subr.bf16.mxu0 %v11339_v47  ;;  %v1201_v47 = vld [vmem:[#allocation6 + $0x98] sm:$0xff] }
 0x4d5   :  { %v11004_v46 = vcombine.low %v1201_v47, %v1205_v57 }
 0x4d6   :  { %7534 = vmatpush1.bf16.msra.mxu1 %v11210_v44  ;;  %v11124_v44 = vcombine.low %v1321_v50, %v1325_v52 }
 0x4d7   :  { %7575 = vmatpush1.bf16.msra.mxu0 %v11338_v14  ;;  %7535 = vmatprep.subr.bf16.mxu1 %v11219_v61  ;;  %v11005_v14 = vcombine.high %v1201_v47, %v1205_v57  ;;  %v11133_v61 = vcombine.high %v1329_v58, %v1333_v49 }
 0x4d8   :  { %7576 = vmatprep.subr.bf16.mxu0 %v11347_v63  ;;  %v1209_v63 = vld [vmem:[#allocation6 + $0xd8] sm:$0xff] }
 0x4d9   :  { %v11012_v15 = vcombine.low %v1209_v63, %v1213_v10 }
 0x4da   :  { %7536 = vmatpush1.bf16.msra.mxu1 %v11218_v4  ;;  %v11132_v4 = vcombine.low %v1329_v58, %v1333_v49  ;;  %v1369_v49 = vld [vmem:[#allocation6 + $0x5d8] sm:$0xff] }
 0x4db   :  { %7577 = vmatpush1.bf16.msra.mxu0 %v11346_v59  ;;  %7537 = vmatprep.subr.bf16.mxu1 %v11227_v17  ;;  %v11013_v59 = vcombine.high %v1209_v63, %v1213_v10  ;;  %v11141_v17 = vcombine.high %v1337_v5, %v1341_v37 }
 0x4dc   :  { %7578 = vmatprep.subr.bf16.mxu0 %v11355_v11  ;;  %v1217_v11 = vld [vmem:[#allocation6 + $0x118] sm:$0xff] }
 0x4dd   :  { %v11020_v27 = vcombine.low %v1217_v11, %v1221_v12 }
 0x4de   :  { %7538 = vmatpush1.bf16.msra.mxu1 %v11226_v42  ;;  %v11021_v42 = vcombine.high %v1217_v11, %v1221_v12  ;;  %v1253_v11 = vld [vmem:[#allocation6 + $0x238] sm:$0xff] }
 0x4df   :  { %7579 = vmatpush1.bf16.msra.mxu0 %v11354_v39  ;;  %7539 = vmatprep.subr.bf16.mxu1 %v11235_v16  ;;  %v1225_v39 = vld [vmem:[#allocation6 + $0x158] sm:$0xff] }
 0x4e0   :  { %7580 = vmatprep.subr.bf16.mxu0 %v11363_v21  ;;  %v1229_v16 = vld [vmem:[#allocation6 + $0x178] sm:$0xff] }
 0x4e1   :  { %v1353_v21 = vld [vmem:[#allocation6 + $0x558] sm:$0xff]  ;;  %v11029_v8 = vcombine.high %v1225_v39, %v1229_v16  ;;  %v11028_v43 = vcombine.low %v1225_v39, %v1229_v16 }
 0x4e2   :  { %7540 = vmatpush1.bf16.msra.mxu1 %v11234_v31  ;;  %v11157_v31 = vcombine.high %v1353_v21, %v1357_v22  ;;  %v11156_v50 = vcombine.low %v1353_v21, %v1357_v22  ;;  %v1261_v39 = vld [vmem:[#allocation6 + $0x278] sm:$0xff] }
 0x4e3   :  { %7581 = vmatpush1.bf16.msra.mxu0 %v11362_v33  ;;  %7591 = vmatprep.subr.bf16.mxu1 %v10989_v55  ;;  %v1233_v33 = vld [vmem:[#allocation6 + $0x198] sm:$0xff] }
 0x4e4   :  { %7632 = vmatprep.subr.bf16.mxu0 %v11117_v34  ;;  %v1237_v55 = vld [vmem:[#allocation6 + $0x1b8] sm:$0xff] }
 0x4e5   :  { %7542 = vmatmul.mubr.bf16.vlgmr.msra.gmra.mrb[56].mxu1 %v12962_v45  ;;  %v1361_v34 = vld [vmem:[#allocation6 + $0x598] sm:$0xff]  ;;  %v11037_v52 = vcombine.high %v1233_v33, %v1237_v55  ;;  %v11036_v63 = vcombine.low %v1233_v33, %v1237_v55 }
 0x4e6   :  { %7583 = vmatmul.mubr.bf16.vlgmr.msra.gmra.mrb[52].mxu0 %v12964_v48  ;;  %7592 = vmatpush1.bf16.msra.mxu1 %v10988_v19  ;;  %v1385_v16 = vld [vmem:[#allocation6 + $0x658] sm:$0xff] }
 0x4e7   :  { %7633 = vmatpush1.bf16.msra.mxu0 %v11116_v25  ;;  %7593 = vmatprep.subr.bf16.mxu1 %v10997_v3  ;;  %v11165_v25 = vcombine.high %v1361_v34, %v1365_v2  ;;  %v1241_v3 = vld [vmem:[#allocation6 + $0x1d8] sm:$0xff] }
 0x4e8   :  { %7634 = vmatprep.subr.bf16.mxu0 %v11125_v6  ;;  %7623 = vmatprep.mubr.bf16.mxu1 %v12916_v0  ;;  %v11140_v0 = vcombine.low %v1337_v5, %v1341_v37  ;;  %v1245_v6 = vld [vmem:[#allocation6 + $0x1f8] sm:$0xff]  ;;  %v11164_v37 = vcombine.low %v1361_v34, %v1365_v2 }
 0x4e9   :  { %7664 = vmatprep.mubr.bf16.mxu0 %v12942_v62  ;;  %v11149_v62 = vcombine.high %v1345_v13, %v1349_v20  ;;  %v1381_v13 = vld [vmem:[#allocation6 + $0x638] sm:$0xff]  ;;  %v11044_v20 = vcombine.low %v1241_v3, %v1245_v6 }
 0x4ea   :  { %7594 = vmatpush1.bf16.msra.mxu1 %v10996_v30  ;;  %v1373_v30 = vld [vmem:[#allocation6 + $0x5f8] sm:$0xff] }
 0x4eb   :  { %7635 = vmatpush1.bf16.msra.mxu0 %v11124_v44  ;;  %7595 = vmatprep.subr.bf16.mxu1 %v11005_v14  ;;  %v1389_v21 = vld [vmem:[#allocation6 + $0x678] sm:$0xff] }
 0x4ec   :  { %7636 = vmatprep.subr.bf16.mxu0 %v11133_v61  ;;  %v1269_v33 = vld [vmem:[#allocation6 + $0x2b8] sm:$0xff] }
 0x4ed   :  { %v1393_v55 = vld [vmem:[#allocation6 + $0x698] sm:$0xff] }
 0x4ee   :  { %7596 = vmatpush1.bf16.msra.mxu1 %v11004_v46  ;;  %v11045_v46 = vcombine.high %v1241_v3, %v1245_v6  ;;  %v1397_v34 = vld [vmem:[#allocation6 + $0x6b8] sm:$0xff] }
 0x4ef   :  { %7637 = vmatpush1.bf16.msra.mxu0 %v11132_v4  ;;  %7597 = vmatprep.subr.bf16.mxu1 %v11013_v59  ;;  %v1401_v3 = vld [vmem:[#allocation6 + $0x6d8] sm:$0xff] }
 0x4f0   :  { %7638 = vmatprep.subr.bf16.mxu0 %v11141_v17  ;;  %v1249_v17 = vld [vmem:[#allocation6 + $0x218] sm:$0xff] }
 0x4f1   :  { %v11052_v22 = vcombine.low %v1249_v17, %v1253_v11  ;;  %v1405_v6 = vld [vmem:[#allocation6 + $0x6f8] sm:$0xff] }
 0x4f2   :  { %7598 = vmatpush1.bf16.msra.mxu1 %v11012_v15  ;;  %v11172_v15 = vcombine.low %v1369_v49, %v1373_v30 }
 0x4f3   :  { %7639 = vmatpush1.bf16.msra.mxu0 %v11140_v0  ;;  %7599 = vmatprep.subr.bf16.mxu1 %v11021_v42  ;;  %v11053_v0 = vcombine.high %v1249_v17, %v1253_v11  ;;  %v1417_v17 = vld [vmem:[#allocation6 + $0x758] sm:$0xff] }
 0x4f4   :  { %7640 = vmatprep.subr.bf16.mxu0 %v11149_v62  ;;  %v1257_v62 = vld [vmem:[#allocation6 + $0x258] sm:$0xff] }
 0x4f5   :  { %v11060_v2 = vcombine.low %v1257_v62, %v1261_v39  ;;  %v1421_v11 = vld [vmem:[#allocation6 + $0x778] sm:$0xff] }
 0x4f6   :  { %7600 = vmatpush1.bf16.msra.mxu1 %v11020_v27 }
 0x4f7   :  { %7641 = vmatpush1.bf16.msra.mxu0 %v11148_v28  ;;  %7601 = vmatprep.subr.bf16.mxu1 %v11029_v8  ;;  %v11061_v28 = vcombine.high %v1257_v62, %v1261_v39  ;;  %v11189_v8 = vcombine.high %v1385_v16, %v1389_v21  ;;  %v1429_v62 = vld [vmem:[#allocation6 + $0x7b8] sm:$0xff]  ;;  %v13016_v39 = vld [vmem:[#allocation9] sm:$0xff] }
 0x4f8   :  { %v7297_v19 = vpop.f32.mrb[44].mxu1  ;;  %7642 = vmatprep.subr.bf16.mxu0 %v11157_v31  ;;  %v1265_v31 = vld [vmem:[#allocation6 + $0x298] sm:$0xff] }
 0x4f9   :  { %v7298_v47 = vadd.f32 %v7297_v19, %v12998_v36  ;;  %v7299_v57 = vpop.f32.mrb[45].mxu1  ;;  %v7338_v58 = vpop.f32.mrb[40].mxu0  ;;  %v11173_v36 = vcombine.high %v1369_v49, %v1373_v30  ;;  %v1273_v19 = vld [vmem:[#allocation6 + $0x2d8] sm:$0xff]  ;;  %v11205_v49 = vcombine.high %v1401_v3, %v1405_v6 }
 0x4fa   :  { %v7300_v44 = vadd.f32 %v7299_v57, %v13004_v54  ;;  %v7301_v14 = vpop.f32.mrb[46].mxu1  ;;  %7602 = vmatpush1.bf16.msra.mxu1 %v11028_v43  ;;  %v7340_v61 = vpop.f32.mrb[41].mxu0  ;;  %v1377_v54 = vld [vmem:[#allocation6 + $0x618] sm:$0xff]  ;;  %v11188_v43 = vcombine.low %v1385_v16, %v1389_v21  ;;  %v11196_v57 = vcombine.low %v1393_v55, %v1397_v34  ;;  %v11220_v21 = vcombine.low %v1417_v17, %v1421_v11 }
 0x4fb   :  { %v13012_v10 = vadd.f32 %v7338_v58, %v7298_v47  ;;  %7643 = vmatpush1.bf16.msra.mxu0 %v11156_v50  ;;  %v7302_v5 = vpop.f32.mrb[47].mxu1  ;;  %7603 = vmatprep.subr.bf16.mxu1 %v11037_v52  ;;  %v7342_v4 = vpop.f32.mrb[42].mxu0  ;;  %v11181_v42 = vcombine.high %v1377_v54, %v1381_v13  ;;  %v11180_v27 = vcombine.low %v1377_v54, %v1381_v13  ;;  %v1281_v30 = vld [vmem:[#allocation6 + $0x318] sm:$0xff] }
 0x4fc   :  { %v13014_v59 = vadd.f32 %v7340_v61, %v7300_v44  ;;  %7644 = vmatprep.subr.bf16.mxu0 %v11165_v25  ;;  %v7343_v12 = vpop.f32.mrb[43].mxu0  ;;  %v11069_v50 = vcombine.high %v1265_v31, %v1269_v33  ;;  %v11197_v52 = vcombine.high %v1393_v55, %v1397_v34  ;;  %v1277_v25 = vld [vmem:[#allocation6 + $0x2f8] sm:$0xff]  ;;  %v11068_v47 = vcombine.low %v1265_v31, %v1269_v33 }
 0x4fd   :  { %v11077_v58 = vcombine.high %v1273_v19, %v1277_v25  ;;  %v1285_v44 = vld [vmem:[#allocation6 + $0x338] sm:$0xff]  ;;  %v11204_v5 = vcombine.low %v1401_v3, %v1405_v6  ;;  %v7723_v31 = vrot.slane %v13016_v39, %v12801_v18 }
 0x4fe   :  { %7604 = vmatpush1.bf16.msra.mxu1 %v11036_v63  ;;  %v1409_v14 = vld [vmem:[#allocation6 + $0x718] sm:$0xff]  ;;  %v11076_v63 = vcombine.low %v1273_v19, %v1277_v25  ;;  %v11084_v12 = vcombine.low %v1281_v30, %v1285_v44 }
 0x4ff   :  { %7645 = vmatpush1.bf16.msra.mxu0 %v11164_v37  ;;  %7605 = vmatprep.subr.bf16.mxu1 %v11045_v46  ;;  %v1413_v61 = vld [vmem:[#allocation6 + $0x738] sm:$0xff]  ;;  %v11085_v37 = vcombine.high %v1281_v30, %v1285_v44  ;;  %v7757_v25 = vadd.f32 %v7723_v31, %v13014_v59 }
 0x500   :  { %7646 = vmatprep.subr.bf16.mxu0 %v11173_v36  ;;  %v11213_v46 = vcombine.high %v1409_v14, %v1413_v61  ;;  %v1289_v4 = vld [vmem:[#allocation6 + $0x358] sm:$0xff]  ;;  %v11212_v54 = vcombine.low %v1409_v14, %v1413_v61 }
 0x501   :  { %v1293_v36 = vld [vmem:[#allocation6 + $0x378] sm:$0xff] }
 0x502   :  { %7606 = vmatpush1.bf16.msra.mxu1 %v11044_v20  ;;  %v11093_v13 = vcombine.high %v1289_v4, %v1293_v36  ;;  %v11221_v20 = vcombine.high %v1417_v17, %v1421_v11  ;;  %v11092_v16 = vcombine.low %v1289_v4, %v1293_v36  ;;  %v1433_v33 = vld [vmem:[#allocation6 + $0x7d8] sm:$0xff] }
 0x503   :  { %7647 = vmatpush1.bf16.msra.mxu0 %v11172_v15  ;;  %7607 = vmatprep.subr.bf16.mxu1 %v11053_v0  ;;  %v1297_v15 = vld [vmem:[#allocation6 + $0x398] sm:$0xff] }
 0x504   :  { %7648 = vmatprep.subr.bf16.mxu0 %v11181_v42  ;;  %v1301_v0 = vld [vmem:[#allocation6 + $0x3b8] sm:$0xff] }
 0x505   :  { %v1425_v42 = vld [vmem:[#allocation6 + $0x798] sm:$0xff]  ;;  %v11100_v34 = vcombine.low %v1297_v15, %v1301_v0 }
 0x506   :  { %7608 = vmatpush1.bf16.msra.mxu1 %v11052_v22  ;;  %v11101_v22 = vcombine.high %v1297_v15, %v1301_v0  ;;  %v1437_v55 = vld [vmem:[#allocation6 + $0x7f8] sm:$0xff] }
 0x507   :  { %7649 = vmatpush1.bf16.msra.mxu0 %v11180_v27  ;;  %7609 = vmatprep.subr.bf16.mxu1 %v11061_v28  ;;  %v11229_v27 = vcombine.high %v1425_v42, %v1429_v62  ;;  %v1305_v28 = vld [vmem:[#allocation6 + $0x3d8] sm:$0xff]  ;;  %v11236_v6 = vcombine.low %v1433_v33, %v1437_v55 }
 0x508   :  { %7650 = vmatprep.subr.bf16.mxu0 %v11189_v8  ;;  %v1309_v8 = vld [vmem:[#allocation6 + $0x3f8] sm:$0xff] }
 0x509   :  { %v1445_v19 = vld [vmem:[#allocation6 + $0x838] sm:$0xff]  ;;  %v11108_v3 = vcombine.low %v1305_v28, %v1309_v8 }
 0x50a   :  { %7610 = vmatpush1.bf16.msra.mxu1 %v11060_v2  ;;  %v11228_v2 = vcombine.low %v1425_v42, %v1429_v62  ;;  %v1453_v30 = vld [vmem:[#allocation6 + $0x878] sm:$0xff] }
 0x50b   :  { %7651 = vmatpush1.bf16.msra.mxu0 %v11188_v43  ;;  %7611 = vmatprep.subr.bf16.mxu1 %v11069_v50  ;;  %v11109_v43 = vcombine.high %v1305_v28, %v1309_v8  ;;  %v11237_v50 = vcombine.high %v1433_v33, %v1437_v55  ;;  %v11778_v14 = vld [vmem:[#allocation10] ss:$16 sps:$4 sm:$0xff]   ;;  %v11786_v17 = vld [vmem:[#allocation10 + $0x44] ss:$16 sps:$4 sm:$0xff]  }
 0x50c   :  { %7652 = vmatprep.subr.bf16.mxu0 %v11197_v52  ;;  %v1441_v52 = vld [vmem:[#allocation6 + $0x818] sm:$0xff] }
 0x50d   :  { %v11244_v44 = vcombine.low %v1441_v52, %v1445_v19  ;;  %v1457_v59 = vld [vmem:[#allocation6 + $0x898] sm:$0xff] }
 0x50e   :  { %7612 = vmatpush1.bf16.msra.mxu1 %v11068_v47  ;;  %v11245_v47 = vcombine.high %v1441_v52, %v1445_v19  ;;  %v11781_v4 = vld [vmem:[#allocation10 + $0x20] ss:$16 sps:$4 sm:$0xff]   ;;  %v11795_v8 = vld [vmem:[#allocation10 + $0xa4] ss:$16 sps:$4 sm:$0xff]  }
 0x50f   :  { %7653 = vmatpush1.bf16.msra.mxu0 %v11196_v57  ;;  %7613 = vmatprep.subr.bf16.mxu1 %v11077_v58  ;;  %v11780_v57 = vld [vmem:[#allocation10 + $0x4] ss:$16 sps:$4 sm:$0xff]   ;;  %v7765_v58 = vmax.f32 %v7757_v25, 0.0  ;;  %v11787_v42 = vld [vmem:[#allocation10 + $0x60] ss:$16 sps:$4 sm:$0xff]  }
 0x510   :  { %7654 = vmatprep.subr.bf16.mxu0 %v11205_v49  ;;  %v1449_v49 = vld [vmem:[#allocation6 + $0x858] sm:$0xff] }
 0x511   :  { %v11253_v61 = vcombine.high %v1449_v49, %v1453_v30  ;;  %v1465_v11 = vld [vmem:[#allocation6 + $0x8d8] sm:$0xff] }
 0x512   :  { %7614 = vmatpush1.bf16.msra.mxu1 %v11076_v63  ;;  %v11783_v63 = vld [vmem:[#allocation10 + $0x24] ss:$16 sps:$4 sm:$0xff]  }
 0x513   :  { %7655 = vmatpush1.bf16.msra.mxu0 %v11204_v5  ;;  %7615 = vmatprep.subr.bf16.mxu1 %v11085_v37  ;;  %v1461_v5 = vld [vmem:[#allocation6 + $0x8b8] sm:$0xff]  ;;  %v13021_v37 = vpack.c.bf16 %v7765_v58, %v7765_v58 }
 0x514   :  { %7656 = vmatprep.subr.bf16.mxu0 %v11213_v46  ;;  %v11252_v46 = vcombine.low %v1449_v49, %v1453_v30  ;;  %v11261_v36 = vcombine.high %v1457_v59, %v1461_v5  ;;  %v1477_v15 = vld [vmem:[#allocation6 + $0x938] sm:$0xff] }
 0x515   :  { %v1489_v31 = vld [vmem:[#allocation6 + $0x998] sm:$0xff] }
 0x516   :  { %7616 = vmatpush1.bf16.msra.mxu1 %v11084_v12  ;;  %v1469_v12 = vld [vmem:[#allocation6 + $0x8f8] sm:$0xff] }
 0x517   :  { %7657 = vmatpush1.bf16.msra.mxu0 %v11212_v54  ;;  %7617 = vmatprep.subr.bf16.mxu1 %v11093_v13  ;;  %v11260_v54 = vcombine.low %v1457_v59, %v1461_v5  ;;  %v11789_v13 = vld [vmem:[#allocation10 + $0x64] ss:$16 sps:$4 sm:$0xff]   ;;  %v11268_v0 = vcombine.low %v1465_v11, %v1469_v12 }
 0x518   :  { %7658 = vmatprep.subr.bf16.mxu0 %v11221_v20  ;;  %v1473_v20 = vld [vmem:[#allocation6 + $0x918] sm:$0xff] }
 0x519   :  { %v11277_v62 = vcombine.high %v1473_v20, %v1477_v15  ;;  %v1493_v33 = vld [vmem:[#allocation6 + $0x9b8] sm:$0xff] }
 0x51a   :  { %7618 = vmatpush1.bf16.msra.mxu1 %v11092_v16  ;;  %v11792_v16 = vld [vmem:[#allocation10 + $0x84] ss:$16 sps:$4 sm:$0xff]   ;;  %v11292_v49 = vcombine.low %v1489_v31, %v1493_v33 }
 0x51b   :  { %7659 = vmatpush1.bf16.msra.mxu0 %v11220_v21  ;;  %7619 = vmatprep.subr.bf16.mxu1 %v11101_v22  ;;  %v1481_v21 = vld [vmem:[#allocation6 + $0x958] sm:$0xff]  ;;  %v11276_v22 = vcombine.low %v1473_v20, %v1477_v15 }
 0x51c   :  { %7660 = vmatprep.subr.bf16.mxu0 %v11229_v27  ;;  %v11790_v27 = vld [vmem:[#allocation10 + $0x80] ss:$16 sps:$4 sm:$0xff]   ;;  %v11807_v20 = vld [vmem:[#allocation10 + $0x124] ss:$16 sps:$4 sm:$0xff]  }
 0x51d   :  { %v1497_v52 = vld [vmem:[#allocation6 + $0x9d8] sm:$0xff] }
 0x51e   :  { %7620 = vmatpush1.bf16.msra.mxu1 %v11100_v34  ;;  %v11793_v34 = vld [vmem:[#allocation10 + $0xa0] ss:$16 sps:$4 sm:$0xff]  }
 0x51f   :  { %7661 = vmatpush1.bf16.msra.mxu0 %v11228_v2  ;;  %7621 = vmatprep.subr.bf16.mxu1 %v11109_v43  ;;  %v11293_v2 = vcombine.high %v1489_v31, %v1493_v33  ;;  %v1501_v19 = vld [vmem:[#allocation6 + $0x9f8] sm:$0xff] }
 0x520   :  { %7662 = vmatprep.subr.bf16.mxu0 %v11237_v50  ;;  %v11798_v50 = vld [vmem:[#allocation10 + $0xc4] ss:$16 sps:$4 sm:$0xff]  }
 0x521   :  { %v1505_v5 = vld [vmem:[#allocation6 + $0xa18] sm:$0xff] }
 0x522   :  { %7622 = vmatpush1.bf16.msra.mxu1 %v11108_v3  ;;  %v1521_v15 = vld [vmem:[#allocation6 + $0xa98] sm:$0xff] }
 0x523   :  { %7663 = vmatpush1.bf16.msra.mxu0 %v11236_v6  ;;  %7673 = vmatprep.subr.bf16.mxu1 %v11245_v47  ;;  %v11813_v31 = vld [vmem:[#allocation10 + $0x164] ss:$16 sps:$4 sm:$0xff]  }
 0x524   :  { %9338 = vmatprep.subr.bf16.mxu0 %v11780_v57  ;;  %v1537_v33 = vld [vmem:[#allocation6 + $0xb18] sm:$0xff] }
 0x525   :  { %7624 = vmatmul.mubr.bf16.vlgmr.msra.gmra.mrb[60].mxu1 %v12937_v35  ;;  %v11784_v35 = vld [vmem:[#allocation10 + $0x40] ss:$16 sps:$4 sm:$0xff]  }
 0x526   :  { %7665 = vmatmul.mubr.bf16.vlgmr.msra.gmra.mrb[56].mxu0 %v12962_v45  ;;  %7674 = vmatpush1.bf16.msra.mxu1 %v11244_v44  ;;  %v11269_v45 = vcombine.high %v1465_v11, %v1469_v12  ;;  %v11804_v11 = vld [vmem:[#allocation10 + $0x104] ss:$16 sps:$4 sm:$0xff]  }
 0x527   :  { %9339 = vmatpush1.bf16.msra.mxu0 %v11778_v14  ;;  %9370 = vmatprep.mubr.bf16.mxu0 %v13021_v37  ;;  %v11796_v14 = vld [vmem:[#allocation10 + $0xc0] ss:$16 sps:$4 sm:$0xff]  }
 0x528   :  { %7675 = vmatprep.subr.bf16.mxu1 %v11253_v61  ;;  %9340 = vmatprep.subr.bf16.mxu0 %v11783_v63  ;;  %v11301_v61 = vcombine.high %v1497_v52, %v1501_v19  ;;  %v1513_v12 = vld [vmem:[#allocation6 + $0xa58] sm:$0xff] }
 0x529   :  { %7705 = vmatprep.mubr.bf16.mxu1 %v12945_v1  ;;  %v1485_v1 = vld [vmem:[#allocation6 + $0x978] sm:$0xff] }
 0x52a   :  { %7676 = vmatpush1.bf16.msra.mxu1 %v11252_v46  ;;  %v11285_v28 = vcombine.high %v1481_v21, %v1485_v1  ;;  %v11284_v55 = vcombine.low %v1481_v21, %v1485_v1  ;;  %v1509_v46 = vld [vmem:[#allocation6 + $0xa38] sm:$0xff] }
 0x52b   :  { %9341 = vmatpush1.bf16.msra.mxu0 %v11781_v4  ;;  %7677 = vmatprep.subr.bf16.mxu1 %v11261_v36  ;;  %v11799_v36 = vld [vmem:[#allocation10 + $0xe0] ss:$16 sps:$4 sm:$0xff]   ;;  %v11810_v21 = vld [vmem:[#allocation10 + $0x144] ss:$16 sps:$4 sm:$0xff]  }
 0x52c   :  { %9342 = vmatprep.subr.bf16.mxu0 %v11786_v17  ;;  %v11309_v17 = vcombine.high %v1505_v5, %v1509_v46  ;;  %v1529_v1 = vld [vmem:[#allocation6 + $0xad8] sm:$0xff] }
 0x52e   :  { %7678 = vmatpush1.bf16.msra.mxu1 %v11260_v54  ;;  %v1517_v54 = vld [vmem:[#allocation6 + $0xa78] sm:$0xff] }
 0x52f   :  { %9343 = vmatpush1.bf16.msra.mxu0 %v11784_v35  ;;  %7679 = vmatprep.subr.bf16.mxu1 %v11269_v45  ;;  %v11308_v35 = vcombine.low %v1505_v5, %v1509_v46  ;;  %v11802_v45 = vld [vmem:[#allocation10 + $0x100] ss:$16 sps:$4 sm:$0xff]  }
 0x530   :  { %9344 = vmatprep.subr.bf16.mxu0 %v11789_v13  ;;  %v11317_v13 = vcombine.high %v1513_v12, %v1517_v54  ;;  %v1565_v5 = vld [vmem:[#allocation6 + $0xbf8] sm:$0xff] }
 0x532   :  { %7680 = vmatpush1.bf16.msra.mxu1 %v11268_v0  ;;  %v1525_v0 = vld [vmem:[#allocation6 + $0xab8] sm:$0xff] }
 0x533   :  { %9345 = vmatpush1.bf16.msra.mxu0 %v11787_v42  ;;  %7681 = vmatprep.subr.bf16.mxu1 %v11277_v62  ;;  %v11316_v42 = vcombine.low %v1513_v12, %v1517_v54  ;;  %v11805_v62 = vld [vmem:[#allocation10 + $0x120] ss:$16 sps:$4 sm:$0xff]   ;;  %v11831_v54 = vld [vmem:[#allocation10 + $0xc] ss:$16 sps:$4 sm:$0xff]  }
 0x534   :  { %9346 = vmatprep.subr.bf16.mxu0 %v11792_v16  ;;  %v11325_v16 = vcombine.high %v1521_v15, %v1525_v0  ;;  %v11823_v12 = vld [vmem:[#allocation10 + $0x1e0] ss:$16 sps:$4 sm:$0xff]  }
 0x536   :  { %7682 = vmatpush1.bf16.msra.mxu1 %v11276_v22  ;;  %v1533_v22 = vld [vmem:[#allocation6 + $0xaf8] sm:$0xff] }
 0x537   :  { %9347 = vmatpush1.bf16.msra.mxu0 %v11790_v27  ;;  %7683 = vmatprep.subr.bf16.mxu1 %v11285_v28  ;;  %v11324_v27 = vcombine.low %v1521_v15, %v1525_v0  ;;  %v11808_v28 = vld [vmem:[#allocation10 + $0x140] ss:$16 sps:$4 sm:$0xff]   ;;  %v11837_v0 = vld [vmem:[#allocation10 + $0x2c] ss:$16 sps:$4 sm:$0xff]  }
 0x538   :  { %v7379_v43 = vpop.f32.mrb[48].mxu1  ;;  %9348 = vmatprep.subr.bf16.mxu0 %v11795_v8  ;;  %v11333_v8 = vcombine.high %v1529_v1, %v1533_v22 }
 0x539   :  { %v7380_v25 = vadd.f32 %v7379_v43, %v12922_v51  ;;  %v7381_v3 = vpop.f32.mrb[49].mxu1  ;;  %v7420_v6 = vpop.f32.mrb[44].mxu0  ;;  %v11801_v51 = vld [vmem:[#allocation10 + $0xe4] ss:$16 sps:$4 sm:$0xff]  }
 0x53a   :  { %v7382_v47 = vadd.f32 %v7381_v3, %v12927_v60  ;;  %v7383_v57 = vpop.f32.mrb[50].mxu1  ;;  %7684 = vmatpush1.bf16.msra.mxu1 %v11284_v55  ;;  %v7422_v58 = vpop.f32.mrb[45].mxu0  ;;  %v11300_v60 = vcombine.low %v1497_v52, %v1501_v19  ;;  %v1541_v55 = vld [vmem:[#allocation6 + $0xb38] sm:$0xff] }
 0x53b   :  { %v13029_v30 = vadd.f32 %v7420_v6, %v7380_v25  ;;  %9349 = vmatpush1.bf16.msra.mxu0 %v11793_v34  ;;  %v7384_v44 = vpop.f32.mrb[51].mxu1  ;;  %7685 = vmatprep.subr.bf16.mxu1 %v11293_v2  ;;  %v7424_v63 = vpop.f32.mrb[46].mxu0  ;;  %v11332_v34 = vcombine.low %v1529_v1, %v1533_v22  ;;  %v11811_v2 = vld [vmem:[#allocation10 + $0x160] ss:$16 sps:$4 sm:$0xff]   ;;  %v11341_v43 = vcombine.high %v1537_v33, %v1541_v55  ;;  %v11841_v1 = vld [vmem:[#allocation10 + $0x48] ss:$16 sps:$4 sm:$0xff]  }
 0x53c   :  { %v13031_v59 = vadd.f32 %v7422_v58, %v7382_v47  ;;  %9350 = vmatprep.subr.bf16.mxu0 %v11798_v50  ;;  %v7425_v4 = vpop.f32.mrb[47].mxu0  ;;  %v11816_v50 = vld [vmem:[#allocation10 + $0x184] ss:$16 sps:$4 sm:$0xff]   ;;  %v11340_v25 = vcombine.low %v1537_v33, %v1541_v55  ;;  %v11814_v3 = vld [vmem:[#allocation10 + $0x180] ss:$16 sps:$4 sm:$0xff]  }
 0x53d   :  { %v1545_v52 = vld [vmem:[#allocation6 + $0xb58] sm:$0xff]  ;;  %v11853_v33 = vld [vmem:[#allocation10 + $0x88] ss:$16 sps:$4 sm:$0xff]  }
 0x53e   :  { %7686 = vmatpush1.bf16.msra.mxu1 %v11292_v49  ;;  %v1549_v19 = vld [vmem:[#allocation6 + $0xb78] sm:$0xff] }
 0x53f   :  { %9351 = vmatpush1.bf16.msra.mxu0 %v11796_v14  ;;  %7687 = vmatprep.subr.bf16.mxu1 %v11301_v61  ;;  %v11349_v6 = vcombine.high %v1545_v52, %v1549_v19  ;;  %v11819_v47 = vld [vmem:[#allocation10 + $0x1a4] ss:$16 sps:$4 sm:$0xff]   ;;  %v11348_v49 = vcombine.low %v1545_v52, %v1549_v19  ;;  %v11817_v44 = vld [vmem:[#allocation10 + $0x1a0] ss:$16 sps:$4 sm:$0xff]   ;;  %v7719_v61 = vrot.slane %v13016_v39, %v12796_v24  ;;  %v11867_v52 = vld [vmem:[#allocation10 + $0xcc] ss:$16 sps:$4 sm:$0xff]  }
 0x540   :  { %9352 = vmatprep.subr.bf16.mxu0 %v11801_v51  ;;  %v1553_v57 = vld [vmem:[#allocation6 + $0xb98] sm:$0xff] }
 0x541   :  { %v1557_v58 = vld [vmem:[#allocation6 + $0xbb8] sm:$0xff] }
 0x542   :  { %7688 = vmatpush1.bf16.msra.mxu1 %v11300_v60  ;;  %v11357_v14 = vcombine.high %v1553_v57, %v1557_v58  ;;  %v11822_v63 = vld [vmem:[#allocation10 + $0x1c4] ss:$16 sps:$4 sm:$0xff]   ;;  %v11356_v46 = vcombine.low %v1553_v57, %v1557_v58  ;;  %v11820_v4 = vld [vmem:[#allocation10 + $0x1c0] ss:$16 sps:$4 sm:$0xff]  }
 0x543   :  { %9353 = vmatpush1.bf16.msra.mxu0 %v11799_v36  ;;  %7689 = vmatprep.subr.bf16.mxu1 %v11309_v17  ;;  %v1561_v51 = vld [vmem:[#allocation6 + $0xbd8] sm:$0xff]  ;;  %v7756_v36 = vadd.f32 %v7719_v61, %v13012_v10  ;;  %v11865_v61 = vld [vmem:[#allocation10 + $0xc8] ss:$16 sps:$4 sm:$0xff]  }
 0x544   :  { %9354 = vmatprep.subr.bf16.mxu0 %v11804_v11  ;;  %v11365_v60 = vcombine.high %v1561_v51, %v1565_v5  ;;  %v11825_v17 = vld [vmem:[#allocation10 + $0x1e4] ss:$16 sps:$4 sm:$0xff]   ;;  %v11364_v11 = vcombine.low %v1561_v51, %v1565_v5  ;;  %v11838_v22 = vld [vmem:[#allocation10 + $0x240] ss:$16 sps:$4 sm:$0xff]  }
 0x545   :  { %v11834_v10 = vld [vmem:[#allocation10 + $0x224] ss:$16 sps:$4 sm:$0xff]   ;;  %v11850_v55 = vld [vmem:[#allocation10 + $0x280] ss:$16 sps:$4 sm:$0xff]  }
 0x546   :  { %7690 = vmatpush1.bf16.msra.mxu1 %v11308_v35  ;;  %v7764_v35 = vmax.f32 %v7756_v36, 0.0  ;;  %v11862_v5 = vld [vmem:[#allocation10 + $0x2c0] ss:$16 sps:$4 sm:$0xff]  }
 0x547   :  { %9355 = vmatpush1.bf16.msra.mxu0 %v11802_v45  ;;  %7691 = vmatprep.subr.bf16.mxu1 %v11317_v13  ;;  %v11828_v45 = vld [vmem:[#allocation10 + $0x204] ss:$16 sps:$4 sm:$0xff]   ;;  %v11829_v13 = vld [vmem:[#allocation10 + $0x8] ss:$16 sps:$4 sm:$0xff]  }
 0x548   :  { %9356 = vmatprep.subr.bf16.mxu0 %v11807_v20  ;;  %v11826_v20 = vld [vmem:[#allocation10 + $0x200] ss:$16 sps:$4 sm:$0xff]   ;;  %v13036_v15 = vpack.c.bf16 %v7764_v35, %v7764_v35 }
 0x549   :  { %v11874_v35 = vld [vmem:[#allocation10 + $0x300] ss:$16 sps:$4 sm:$0xff]  }
 0x54a   :  { %7692 = vmatpush1.bf16.msra.mxu1 %v11316_v42  ;;  %v11835_v42 = vld [vmem:[#allocation10 + $0x28] ss:$16 sps:$4 sm:$0xff]  }
 0x54b   :  { %9357 = vmatpush1.bf16.msra.mxu0 %v11805_v62  ;;  %7693 = vmatprep.subr.bf16.mxu1 %v11325_v16  ;;  %v11832_v62 = vld [vmem:[#allocation10 + $0x220] ss:$16 sps:$4 sm:$0xff]   ;;  %v11843_v16 = vld [vmem:[#allocation10 + $0x4c] ss:$16 sps:$4 sm:$0xff]  }
 0x54c   :  { %9358 = vmatprep.subr.bf16.mxu0 %v11810_v21  ;;  %v11840_v21 = vld [vmem:[#allocation10 + $0x244] ss:$16 sps:$4 sm:$0xff]  }
 0x54e   :  { %7694 = vmatpush1.bf16.msra.mxu1 %v11324_v27  ;;  %v11849_v27 = vld [vmem:[#allocation10 + $0x6c] ss:$16 sps:$4 sm:$0xff]  }
 0x54f   :  { %9359 = vmatpush1.bf16.msra.mxu0 %v11808_v28  ;;  %7695 = vmatprep.subr.bf16.mxu1 %v11333_v8  ;;  %v11847_v28 = vld [vmem:[#allocation10 + $0x68] ss:$16 sps:$4 sm:$0xff]   ;;  %v11844_v8 = vld [vmem:[#allocation10 + $0x260] ss:$16 sps:$4 sm:$0xff]  }
 0x550   :  { %9360 = vmatprep.subr.bf16.mxu0 %v11813_v31  ;;  %v11855_v31 = vld [vmem:[#allocation10 + $0x8c] ss:$16 sps:$4 sm:$0xff]  }
 0x552   :  { %7696 = vmatpush1.bf16.msra.mxu1 %v11332_v34  ;;  %v11861_v34 = vld [vmem:[#allocation10 + $0xac] ss:$16 sps:$4 sm:$0xff]  }
 0x553   :  { %9361 = vmatpush1.bf16.msra.mxu0 %v11811_v2  ;;  %7697 = vmatprep.subr.bf16.mxu1 %v11341_v43  ;;  %v11858_v2 = vld [vmem:[#allocation10 + $0x2a4] ss:$16 sps:$4 sm:$0xff]   ;;  %v11859_v43 = vld [vmem:[#allocation10 + $0xa8] ss:$16 sps:$4 sm:$0xff]  }
 0x554   :  { %9362 = vmatprep.subr.bf16.mxu0 %v11816_v50  ;;  %v11856_v50 = vld [vmem:[#allocation10 + $0x2a0] ss:$16 sps:$4 sm:$0xff]  }
 0x556   :  { %7698 = vmatpush1.bf16.msra.mxu1 %v11340_v25  ;;  %v7731_v25 = vrot.slane %v13016_v39, %v12833_v56 }
 0x557   :  { %9363 = vmatpush1.bf16.msra.mxu0 %v11814_v3  ;;  %7699 = vmatprep.subr.bf16.mxu1 %v11349_v6  ;;  %v11864_v3 = vld [vmem:[#allocation10 + $0x2c4] ss:$16 sps:$4 sm:$0xff]  }
 0x558   :  { %9364 = vmatprep.subr.bf16.mxu0 %v11819_v47 }
 0x55a   :  { %7700 = vmatpush1.bf16.msra.mxu1 %v11348_v49 }
 0x55b   :  { %9365 = vmatpush1.bf16.msra.mxu0 %v11817_v44  ;;  %7701 = vmatprep.subr.bf16.mxu1 %v11357_v14 }
 0x55c   :  { %9366 = vmatprep.subr.bf16.mxu0 %v11822_v63 }
 0x55e   :  { %7702 = vmatpush1.bf16.msra.mxu1 %v11356_v46 }
 0x55f   :  { %9367 = vmatpush1.bf16.msra.mxu0 %v11820_v4  ;;  %7703 = vmatprep.subr.bf16.mxu1 %v11365_v60  ;;  %v11870_v60 = vld [vmem:[#allocation10 + $0x2e4] ss:$16 sps:$4 sm:$0xff]  }
 0x560   :  { %9368 = vmatprep.subr.bf16.mxu0 %v11825_v17  ;;  %v11868_v17 = vld [vmem:[#allocation10 + $0x2e0] ss:$16 sps:$4 sm:$0xff]  }
 0x562   :  { %7704 = vmatpush1.bf16.msra.mxu1 %v11364_v11  ;;  %v11879_v11 = vld [vmem:[#allocation10 + $0x10c] ss:$16 sps:$4 sm:$0xff]  }
 0x563   :  { %9369 = vmatpush1.bf16.msra.mxu0 %v11823_v12  ;;  %9502 = vmatprep.subr.bf16.mxu1 %v11831_v54  ;;  %v11877_v54 = vld [vmem:[#allocation10 + $0x108] ss:$16 sps:$4 sm:$0xff]  }
 0x564   :  { %9379 = vmatprep.subr.bf16.mxu0 %v11828_v45  ;;  %v11885_v45 = vld [vmem:[#allocation10 + $0x12c] ss:$16 sps:$4 sm:$0xff]  }
 0x565   :  { %7706 = vmatmul.mubr.bf16.vlgmr.msra.gmra.mrb[64].mxu1 %v12964_v48  ;;  %v11846_v48 = vld [vmem:[#allocation10 + $0x264] ss:$16 sps:$4 sm:$0xff]  }
 0x566   :  { %9371 = vmatmul.mubr.bf16.vlgmr.msra.gmra.mrb[60].mxu0 %v13036_v15  ;;  %9503 = vmatpush1.bf16.msra.mxu1 %v11829_v13  ;;  %v11882_v13 = vld [vmem:[#allocation10 + $0x324] ss:$16 sps:$4 sm:$0xff]  }
 0x567   :  { %9380 = vmatpush1.bf16.msra.mxu0 %v11826_v20  ;;  %9534 = vmatprep.mubr.bf16.mxu1 %v13021_v37  ;;  %v11852_v37 = vld [vmem:[#allocation10 + $0x284] ss:$16 sps:$4 sm:$0xff]   ;;  %v11883_v20 = vld [vmem:[#allocation10 + $0x128] ss:$16 sps:$4 sm:$0xff]  }
 0x568   :  { %9381 = vmatprep.subr.bf16.mxu0 %v11834_v10  ;;  %9504 = vmatprep.subr.bf16.mxu1 %v11837_v0  ;;  %v11880_v10 = vld [vmem:[#allocation10 + $0x320] ss:$16 sps:$4 sm:$0xff]   ;;  %v11891_v0 = vld [vmem:[#allocation10 + $0x14c] ss:$16 sps:$4 sm:$0xff]  }
 0x56a   :  { %9505 = vmatpush1.bf16.msra.mxu1 %v11835_v42  ;;  %v11888_v42 = vld [vmem:[#allocation10 + $0x344] ss:$16 sps:$4 sm:$0xff]  }
 0x56b   :  { %9382 = vmatpush1.bf16.msra.mxu0 %v11832_v62  ;;  %9506 = vmatprep.subr.bf16.mxu1 %v11843_v16  ;;  %v11889_v62 = vld [vmem:[#allocation10 + $0x148] ss:$16 sps:$4 sm:$0xff]   ;;  %v11886_v16 = vld [vmem:[#allocation10 + $0x340] ss:$16 sps:$4 sm:$0xff]  }
 0x56c   :  { %9383 = vmatprep.subr.bf16.mxu0 %v11840_v21  ;;  %v11897_v21 = vld [vmem:[#allocation10 + $0x16c] ss:$16 sps:$4 sm:$0xff]  }
 0x56e   :  { %9507 = vmatpush1.bf16.msra.mxu1 %v11841_v1  ;;  %v11894_v1 = vld [vmem:[#allocation10 + $0x364] ss:$16 sps:$4 sm:$0xff]  }
 0x56f   :  { %9384 = vmatpush1.bf16.msra.mxu0 %v11838_v22  ;;  %9508 = vmatprep.subr.bf16.mxu1 %v11849_v27  ;;  %v11895_v22 = vld [vmem:[#allocation10 + $0x168] ss:$16 sps:$4 sm:$0xff]   ;;  %v11892_v27 = vld [vmem:[#allocation10 + $0x360] ss:$16 sps:$4 sm:$0xff]  }
 0x570   :  { %9385 = vmatprep.subr.bf16.mxu0 %v11846_v48  ;;  %v11903_v48 = vld [vmem:[#allocation10 + $0x18c] ss:$16 sps:$4 sm:$0xff]  }
 0x572   :  { %9509 = vmatpush1.bf16.msra.mxu1 %v11847_v28  ;;  %v11900_v28 = vld [vmem:[#allocation10 + $0x384] ss:$16 sps:$4 sm:$0xff]  }
 0x573   :  { %9386 = vmatpush1.bf16.msra.mxu0 %v11844_v8  ;;  %9510 = vmatprep.subr.bf16.mxu1 %v11855_v31  ;;  %v11901_v8 = vld [vmem:[#allocation10 + $0x188] ss:$16 sps:$4 sm:$0xff]   ;;  %v11898_v31 = vld [vmem:[#allocation10 + $0x380] ss:$16 sps:$4 sm:$0xff]  }
 0x574   :  { %9387 = vmatprep.subr.bf16.mxu0 %v11852_v37  ;;  %v11909_v37 = vld [vmem:[#allocation10 + $0x1ac] ss:$16 sps:$4 sm:$0xff]  }
 0x576   :  { %9511 = vmatpush1.bf16.msra.mxu1 %v11853_v33  ;;  %v11906_v33 = vld [vmem:[#allocation10 + $0x3a4] ss:$16 sps:$4 sm:$0xff]  }
 0x577   :  { %9388 = vmatpush1.bf16.msra.mxu0 %v11850_v55  ;;  %9512 = vmatprep.subr.bf16.mxu1 %v11861_v34  ;;  %v11907_v55 = vld [vmem:[#allocation10 + $0x1a8] ss:$16 sps:$4 sm:$0xff]   ;;  %v11904_v34 = vld [vmem:[#allocation10 + $0x3a0] ss:$16 sps:$4 sm:$0xff]  }
 0x578   :  { %v7461_v19 = vpop.f32.mrb[52].mxu1  ;;  %9389 = vmatprep.subr.bf16.mxu0 %v11858_v2  ;;  %v11915_v2 = vld [vmem:[#allocation10 + $0x1cc] ss:$16 sps:$4 sm:$0xff]  }
 0x579   :  { %v13044_v6 = vadd.f32 %v7461_v19, %v13029_v30  ;;  %v7502_v47 = vpop.f32.mrb[48].mxu0  ;;  %v7463_v57 = vpop.f32.mrb[53].mxu1  ;;  %v11873_v30 = vld [vmem:[#allocation10 + $0xec] ss:$16 sps:$4 sm:$0xff]   ;;  %v11910_v19 = vld [vmem:[#allocation10 + $0x3c0] ss:$16 sps:$4 sm:$0xff]  }
 0x57a   :  { %v13047_v58 = vadd.f32 %v7502_v47, %v12971_v7  ;;  %v7464_v49 = vadd.f32 %v7463_v57, %v13031_v59  ;;  %v7504_v44 = vpop.f32.mrb[49].mxu0  ;;  %v7465_v14 = vpop.f32.mrb[54].mxu1  ;;  %9513 = vmatpush1.bf16.msra.mxu1 %v11859_v43  ;;  %v11871_v59 = vld [vmem:[#allocation10 + $0xe8] ss:$16 sps:$4 sm:$0xff]   ;;  %v7727_v43 = vrot.slane %v13016_v39, %v12830_v53  ;;  %v11918_v47 = vld [vmem:[#allocation10 + $0x3e4] ss:$16 sps:$4 sm:$0xff]  }
 0x57b   :  { %v13051_v63 = vadd.f32 %v7504_v44, %v12976_v9  ;;  %9390 = vmatpush1.bf16.msra.mxu0 %v11856_v50  ;;  %v7466_v51 = vpop.f32.mrb[55].mxu1  ;;  %9514 = vmatprep.subr.bf16.mxu1 %v11867_v52  ;;  %v7506_v46 = vpop.f32.mrb[50].mxu0  ;;  %v11876_v9 = vld [vmem:[#allocation10 + $0x304] ss:$16 sps:$4 sm:$0xff]   ;;  %v11913_v52 = vld [vmem:[#allocation10 + $0x1c8] ss:$16 sps:$4 sm:$0xff]  }
 0x57c   :  { %v7759_v4 = vadd.f32 %v7731_v25, %v7464_v49  ;;  %9391 = vmatprep.subr.bf16.mxu0 %v11864_v3  ;;  %v7507_v7 = vpop.f32.mrb[51].mxu0  ;;  %v11912_v50 = vld [vmem:[#allocation10 + $0x3c4] ss:$16 sps:$4 sm:$0xff]   ;;  %v11921_v25 = vld [vmem:[#allocation10 + $0x1ec] ss:$16 sps:$4 sm:$0xff]   ;;  %v7758_v3 = vadd.f32 %v7727_v43, %v13044_v6 }
 0x57d   :  { %v11919_v57 = vld [vmem:[#allocation10 + $0x1e8] ss:$16 sps:$4 sm:$0xff]   ;;  %v11916_v49 = vld [vmem:[#allocation10 + $0x3e0] ss:$16 sps:$4 sm:$0xff]   ;;  %v11927_v44 = vld [vmem:[#allocation10 + $0x20c] ss:$16 sps:$4 sm:$0xff]  }
 0x57e   :  { %v7767_v36 = vmax.f32 %v7759_v4, 0.0  ;;  %9515 = vmatpush1.bf16.msra.mxu1 %v11865_v61  ;;  %v7766_v14 = vmax.f32 %v7758_v3, 0.0  ;;  %v11924_v61 = vld [vmem:[#allocation10 + $0x404] ss:$16 sps:$4 sm:$0xff]   ;;  %v11925_v51 = vld [vmem:[#allocation10 + $0x208] ss:$16 sps:$4 sm:$0xff]  }
 0x57f   :  { %9392 = vmatpush1.bf16.msra.mxu0 %v11862_v5  ;;  %9516 = vmatprep.subr.bf16.mxu1 %v11873_v30  ;;  %v11922_v5 = vld [vmem:[#allocation10 + $0x400] ss:$16 sps:$4 sm:$0xff]   ;;  %v11930_v6 = vld [vmem:[#allocation10 + $0x424] ss:$16 sps:$4 sm:$0xff]   ;;  %v11933_v46 = vld [vmem:[#allocation10 + $0x22c] ss:$16 sps:$4 sm:$0xff]  }
 0x580   :  { %v13053_v12 = vpack.c.bf16 %v7767_v36, %v7767_v36  ;;  %9393 = vmatprep.subr.bf16.mxu0 %v11870_v60  ;;  %v13059_v30 = vpack.c.bf16 %v7766_v14, %v7766_v14  ;;  %v11931_v4 = vld [vmem:[#allocation10 + $0x228] ss:$16 sps:$4 sm:$0xff]   ;;  %v11928_v60 = vld [vmem:[#allocation10 + $0x420] ss:$16 sps:$4 sm:$0xff]   ;;  %v11939_v7 = vld [vmem:[#allocation10 + $0x24c] ss:$16 sps:$4 sm:$0xff]  }
 0x581   :  { %v11936_v36 = vld [vmem:[#allocation10 + $0x444] ss:$16 sps:$4 sm:$0xff]   ;;  %v11981_v14 = vld [vmem:[#allocation10 + $0x32c] ss:$16 sps:$4 sm:$0xff]  }
 0x582   :  { %9411 = vmatprep.mubr.bf16.mxu0 %v13053_v12  ;;  %9517 = vmatpush1.bf16.msra.mxu1 %v11871_v59  ;;  %v11937_v59 = vld [vmem:[#allocation10 + $0x248] ss:$16 sps:$4 sm:$0xff]  }
 0x583   :  { %9394 = vmatpush1.bf16.msra.mxu0 %v11868_v17  ;;  %9518 = vmatprep.subr.bf16.mxu1 %v11879_v11  ;;  %v11934_v17 = vld [vmem:[#allocation10 + $0x440] ss:$16 sps:$4 sm:$0xff]   ;;  %v11945_v11 = vld [vmem:[#allocation10 + $0x26c] ss:$16 sps:$4 sm:$0xff]  }
 0x584   :  { %9395 = vmatprep.subr.bf16.mxu0 %v11876_v9  ;;  %v11943_v9 = vld [vmem:[#allocation10 + $0x268] ss:$16 sps:$4 sm:$0xff]  }
 0x586   :  { %9519 = vmatpush1.bf16.msra.mxu1 %v11877_v54  ;;  %v11940_v54 = vld [vmem:[#allocation10 + $0x460] ss:$16 sps:$4 sm:$0xff]  }
 0x587   :  { %9396 = vmatpush1.bf16.msra.mxu0 %v11874_v35  ;;  %9520 = vmatprep.subr.bf16.mxu1 %v11885_v45  ;;  %v11951_v35 = vld [vmem:[#allocation10 + $0x28c] ss:$16 sps:$4 sm:$0xff]   ;;  %v11949_v45 = vld [vmem:[#allocation10 + $0x288] ss:$16 sps:$4 sm:$0xff]  }
 0x588   :  { %9397 = vmatprep.subr.bf16.mxu0 %v11882_v13  ;;  %v11946_v13 = vld [vmem:[#allocation10 + $0x480] ss:$16 sps:$4 sm:$0xff]  }
 0x58a   :  { %9521 = vmatpush1.bf16.msra.mxu1 %v11883_v20  ;;  %v11957_v20 = vld [vmem:[#allocation10 + $0x2ac] ss:$16 sps:$4 sm:$0xff]  }
 0x58b   :  { %9398 = vmatpush1.bf16.msra.mxu0 %v11880_v10  ;;  %9522 = vmatprep.subr.bf16.mxu1 %v11891_v0  ;;  %v11954_v10 = vld [vmem:[#allocation10 + $0x4a4] ss:$16 sps:$4 sm:$0xff]   ;;  %v11955_v0 = vld [vmem:[#allocation10 + $0x2a8] ss:$16 sps:$4 sm:$0xff]  }
 0x58c   :  { %9399 = vmatprep.subr.bf16.mxu0 %v11888_v42  ;;  %v11952_v42 = vld [vmem:[#allocation10 + $0x4a0] ss:$16 sps:$4 sm:$0xff]  }
 0x58e   :  { %9523 = vmatpush1.bf16.msra.mxu1 %v11889_v62  ;;  %v11963_v62 = vld [vmem:[#allocation10 + $0x2cc] ss:$16 sps:$4 sm:$0xff]  }
 0x58f   :  { %9400 = vmatpush1.bf16.msra.mxu0 %v11886_v16  ;;  %9524 = vmatprep.subr.bf16.mxu1 %v11897_v21  ;;  %v11960_v21 = vld [vmem:[#allocation10 + $0x4c4] ss:$16 sps:$4 sm:$0xff]  }
 0x590   :  { %9401 = vmatprep.subr.bf16.mxu0 %v11894_v1 }
 0x592   :  { %9525 = vmatpush1.bf16.msra.mxu1 %v11895_v22 }
 0x593   :  { %9402 = vmatpush1.bf16.msra.mxu0 %v11892_v27  ;;  %9526 = vmatprep.subr.bf16.mxu1 %v11903_v48 }
 0x594   :  { %9403 = vmatprep.subr.bf16.mxu0 %v11900_v28 }
 0x596   :  { %9527 = vmatpush1.bf16.msra.mxu1 %v11901_v8 }
 0x597   :  { %9404 = vmatpush1.bf16.msra.mxu0 %v11898_v31  ;;  %9528 = vmatprep.subr.bf16.mxu1 %v11909_v37  ;;  %v7739_v31 = vrot.slane %v13016_v39, %v340_v38  ;;  %v11961_v37 = vld [vmem:[#allocation10 + $0x2c8] ss:$16 sps:$4 sm:$0xff]   ;;  %v11975_v38 = vld [vmem:[#allocation10 + $0x30c] ss:$16 sps:$4 sm:$0xff]  }
 0x598   :  { %9405 = vmatprep.subr.bf16.mxu0 %v11906_v33 }
 0x59a   :  { %9529 = vmatpush1.bf16.msra.mxu1 %v11907_v55 }
 0x59b   :  { %9406 = vmatpush1.bf16.msra.mxu0 %v11904_v34  ;;  %9530 = vmatprep.subr.bf16.mxu1 %v11915_v2  ;;  %v11958_v34 = vld [vmem:[#allocation10 + $0x4c0] ss:$16 sps:$4 sm:$0xff]   ;;  %v11969_v2 = vld [vmem:[#allocation10 + $0x2ec] ss:$16 sps:$4 sm:$0xff]  }
 0x59c   :  { %9407 = vmatprep.subr.bf16.mxu0 %v11912_v50  ;;  %v11966_v50 = vld [vmem:[#allocation10 + $0x4e4] ss:$16 sps:$4 sm:$0xff]  }
 0x59e   :  { %9531 = vmatpush1.bf16.msra.mxu1 %v11913_v52 }
 0x59f   :  { %9408 = vmatpush1.bf16.msra.mxu0 %v11910_v19  ;;  %9532 = vmatprep.subr.bf16.mxu1 %v11921_v25  ;;  %v11967_v19 = vld [vmem:[#allocation10 + $0x2e8] ss:$16 sps:$4 sm:$0xff]   ;;  %v11964_v25 = vld [vmem:[#allocation10 + $0x4e0] ss:$16 sps:$4 sm:$0xff]  }
 0x5a0   :  { %9409 = vmatprep.subr.bf16.mxu0 %v11918_v47  ;;  %v11972_v47 = vld [vmem:[#allocation10 + $0x504] ss:$16 sps:$4 sm:$0xff]  }
 0x5a2   :  { %9533 = vmatpush1.bf16.msra.mxu1 %v11919_v57 }
 0x5a3   :  { %9410 = vmatpush1.bf16.msra.mxu0 %v11916_v49  ;;  %9543 = vmatprep.subr.bf16.mxu1 %v11927_v44  ;;  %v11973_v49 = vld [vmem:[#allocation10 + $0x308] ss:$16 sps:$4 sm:$0xff]   ;;  %v11970_v44 = vld [vmem:[#allocation10 + $0x500] ss:$16 sps:$4 sm:$0xff]  }
 0x5a4   :  { %9420 = vmatprep.subr.bf16.mxu0 %v11924_v61  ;;  %v11978_v61 = vld [vmem:[#allocation10 + $0x524] ss:$16 sps:$4 sm:$0xff]  }
 0x5a5   :  { %9535 = vmatmul.mubr.bf16.vlgmr.msra.gmra.mrb[68].mxu1 %v13036_v15  ;;  %v11942_v15 = vld [vmem:[#allocation10 + $0x464] ss:$16 sps:$4 sm:$0xff]  }
 0x5a6   :  { %9412 = vmatmul.mubr.bf16.vlgmr.msra.gmra.mrb[60].mxu0 %v13059_v30  ;;  %9544 = vmatpush1.bf16.msra.mxu1 %v11925_v51  ;;  %v11979_v51 = vld [vmem:[#allocation10 + $0x328] ss:$16 sps:$4 sm:$0xff]  }
 0x5a7   :  { %9421 = vmatpush1.bf16.msra.mxu0 %v11922_v5  ;;  %9575 = vmatprep.mubr.bf16.mxu1 %v13053_v12  ;;  %v11948_v12 = vld [vmem:[#allocation10 + $0x484] ss:$16 sps:$4 sm:$0xff]   ;;  %v11976_v5 = vld [vmem:[#allocation10 + $0x520] ss:$16 sps:$4 sm:$0xff]  }
 0x5a8   :  { %9422 = vmatprep.subr.bf16.mxu0 %v11930_v6  ;;  %9545 = vmatprep.subr.bf16.mxu1 %v11933_v46  ;;  %v11987_v6 = vld [vmem:[#allocation10 + $0x34c] ss:$16 sps:$4 sm:$0xff]   ;;  %v11984_v46 = vld [vmem:[#allocation10 + $0x544] ss:$16 sps:$4 sm:$0xff]  }
 0x5aa   :  { %9546 = vmatpush1.bf16.msra.mxu1 %v11931_v4  ;;  %v11985_v4 = vld [vmem:[#allocation10 + $0x348] ss:$16 sps:$4 sm:$0xff]  }
 0x5ab   :  { %9423 = vmatpush1.bf16.msra.mxu0 %v11928_v60  ;;  %9547 = vmatprep.subr.bf16.mxu1 %v11939_v7  ;;  %v11982_v60 = vld [vmem:[#allocation10 + $0x540] ss:$16 sps:$4 sm:$0xff]   ;;  %v11993_v7 = vld [vmem:[#allocation10 + $0x36c] ss:$16 sps:$4 sm:$0xff]  }
 0x5ac   :  { %9424 = vmatprep.subr.bf16.mxu0 %v11936_v36  ;;  %v11990_v36 = vld [vmem:[#allocation10 + $0x564] ss:$16 sps:$4 sm:$0xff]  }
 0x5ae   :  { %9548 = vmatpush1.bf16.msra.mxu1 %v11937_v59  ;;  %v11991_v59 = vld [vmem:[#allocation10 + $0x368] ss:$16 sps:$4 sm:$0xff]  }
 0x5af   :  { %9425 = vmatpush1.bf16.msra.mxu0 %v11934_v17  ;;  %9549 = vmatprep.subr.bf16.mxu1 %v11945_v11  ;;  %v11988_v17 = vld [vmem:[#allocation10 + $0x560] ss:$16 sps:$4 sm:$0xff]   ;;  %v11999_v11 = vld [vmem:[#allocation10 + $0x38c] ss:$16 sps:$4 sm:$0xff]  }
 0x5b0   :  { %9426 = vmatprep.subr.bf16.mxu0 %v11942_v15  ;;  %v11996_v15 = vld [vmem:[#allocation10 + $0x584] ss:$16 sps:$4 sm:$0xff]  }
 0x5b2   :  { %9550 = vmatpush1.bf16.msra.mxu1 %v11943_v9  ;;  %v11997_v9 = vld [vmem:[#allocation10 + $0x388] ss:$16 sps:$4 sm:$0xff]  }
 0x5b3   :  { %9427 = vmatpush1.bf16.msra.mxu0 %v11940_v54  ;;  %9551 = vmatprep.subr.bf16.mxu1 %v11951_v35  ;;  %v11994_v54 = vld [vmem:[#allocation10 + $0x580] ss:$16 sps:$4 sm:$0xff]   ;;  %v12005_v35 = vld [vmem:[#allocation10 + $0x3ac] ss:$16 sps:$4 sm:$0xff]  }
 0x5b4   :  { %9428 = vmatprep.subr.bf16.mxu0 %v11948_v12  ;;  %v12002_v12 = vld [vmem:[#allocation10 + $0x5a4] ss:$16 sps:$4 sm:$0xff]  }
 0x5b6   :  { %9552 = vmatpush1.bf16.msra.mxu1 %v11949_v45  ;;  %v12003_v45 = vld [vmem:[#allocation10 + $0x3a8] ss:$16 sps:$4 sm:$0xff]  }
 0x5b7   :  { %9429 = vmatpush1.bf16.msra.mxu0 %v11946_v13  ;;  %9553 = vmatprep.subr.bf16.mxu1 %v11957_v20  ;;  %v12000_v13 = vld [vmem:[#allocation10 + $0x5a0] ss:$16 sps:$4 sm:$0xff]   ;;  %v12011_v20 = vld [vmem:[#allocation10 + $0x3cc] ss:$16 sps:$4 sm:$0xff]  }
 0x5b8   :  { %v7543_v16 = vpop.f32.mrb[56].mxu1  ;;  %9430 = vmatprep.subr.bf16.mxu0 %v11954_v10  ;;  %v7735_v10 = vrot.slane %v13016_v39, %v336_v41  ;;  %v12044_v41 = vld [vmem:[#allocation10 + $0x604] ss:$16 sps:$4 sm:$0xff]   ;;  %v12018_v39 = vld [vmem:[#allocation10 + $0x408] ss:$16 sps:$4 sm:$0xff]  }
 0x5b9   :  { %v7544_v1 = vadd.f32 %v7543_v16, %v13047_v58  ;;  %v7545_v22 = vpop.f32.mrb[57].mxu1  ;;  %v7584_v27 = vpop.f32.mrb[52].mxu0  ;;  %v12017_v16 = vld [vmem:[#allocation10 + $0x3ec] ss:$16 sps:$4 sm:$0xff]  }
 0x5ba   :  { %v7546_v48 = vadd.f32 %v7545_v22, %v13051_v63  ;;  %v7547_v28 = vpop.f32.mrb[58].mxu1  ;;  %9554 = vmatpush1.bf16.msra.mxu1 %v11955_v0  ;;  %v7586_v8 = vpop.f32.mrb[53].mxu0  ;;  %v12008_v0 = vld [vmem:[#allocation10 + $0x5c4] ss:$16 sps:$4 sm:$0xff]   ;;  %v12015_v22 = vld [vmem:[#allocation10 + $0x3e8] ss:$16 sps:$4 sm:$0xff]  }
 0x5bb   :  { %v13069_v33 = vadd.f32 %v7584_v27, %v7544_v1  ;;  %9431 = vmatpush1.bf16.msra.mxu0 %v11952_v42  ;;  %v7548_v55 = vpop.f32.mrb[59].mxu1  ;;  %9555 = vmatprep.subr.bf16.mxu1 %v11963_v62  ;;  %v7588_v58 = vpop.f32.mrb[54].mxu0  ;;  %v12009_v42 = vld [vmem:[#allocation10 + $0x3c8] ss:$16 sps:$4 sm:$0xff]   ;;  %v12006_v62 = vld [vmem:[#allocation10 + $0x5c0] ss:$16 sps:$4 sm:$0xff]  }
 0x5bc   :  { %v7587_v43 = vadd.f32 %v7586_v8, %v7546_v48  ;;  %9432 = vmatprep.subr.bf16.mxu0 %v11960_v21  ;;  %v7589_v63 = vpop.f32.mrb[55].mxu0  ;;  %v12014_v1 = vld [vmem:[#allocation10 + $0x5e4] ss:$16 sps:$4 sm:$0xff]   ;;  %v12012_v27 = vld [vmem:[#allocation10 + $0x5e0] ss:$16 sps:$4 sm:$0xff]  }
 0x5bd   :  { %v7760_v21 = vadd.f32 %v7735_v10, %v13069_v33  ;;  %v12020_v48 = vld [vmem:[#allocation10 + $0x40c] ss:$16 sps:$4 sm:$0xff]   ;;  %v12050_v33 = vld [vmem:[#allocation10 + $0x624] ss:$16 sps:$4 sm:$0xff]   ;;  %v12021_v55 = vld [vmem:[#allocation10 + $0x428] ss:$16 sps:$4 sm:$0xff]  }
 0x5be   :  { %v7761_v52 = vadd.f32 %v7739_v31, %v7587_v43  ;;  %9556 = vmatpush1.bf16.msra.mxu1 %v11961_v37  ;;  %v12023_v8 = vld [vmem:[#allocation10 + $0x42c] ss:$16 sps:$4 sm:$0xff]   ;;  %v12042_v37 = vld [vmem:[#allocation10 + $0x600] ss:$16 sps:$4 sm:$0xff]   ;;  %v12056_v58 = vld [vmem:[#allocation10 + $0x644] ss:$16 sps:$4 sm:$0xff]  }
 0x5bf   :  { %9433 = vmatpush1.bf16.msra.mxu0 %v11958_v34  ;;  %9557 = vmatprep.subr.bf16.mxu1 %v11969_v2  ;;  %v7768_v28 = vmax.f32 %v7760_v21, 0.0  ;;  %v12026_v34 = vld [vmem:[#allocation10 + $0x44c] ss:$16 sps:$4 sm:$0xff]   ;;  %v12048_v2 = vld [vmem:[#allocation10 + $0x620] ss:$16 sps:$4 sm:$0xff]  }
 0x5c0   :  { %v7769_v3 = vmax.f32 %v7761_v52, 0.0  ;;  %9434 = vmatprep.subr.bf16.mxu0 %v11966_v50  ;;  %v12024_v43 = vld [vmem:[#allocation10 + $0x448] ss:$16 sps:$4 sm:$0xff]   ;;  %v12029_v50 = vld [vmem:[#allocation10 + $0x46c] ss:$16 sps:$4 sm:$0xff]  }
 0x5c1   :  { %v13078_v31 = vpack.c.bf16 %v7768_v28, %v7768_v28  ;;  %v12054_v63 = vld [vmem:[#allocation10 + $0x640] ss:$16 sps:$4 sm:$0xff]   ;;  %v12027_v52 = vld [vmem:[#allocation10 + $0x468] ss:$16 sps:$4 sm:$0xff]   ;;  %v12059_v21 = vld [vmem:[#allocation10 + $0x54c] ss:$16 sps:$4 sm:$0xff]  }
 0x5c2   :  { %v13071_v57 = vpack.c.bf16 %v7769_v3, %v7769_v3  ;;  %9558 = vmatpush1.bf16.msra.mxu1 %v11967_v19  ;;  %v12032_v19 = vld [vmem:[#allocation10 + $0x48c] ss:$16 sps:$4 sm:$0xff]   ;;  %v12030_v3 = vld [vmem:[#allocation10 + $0x488] ss:$16 sps:$4 sm:$0xff]   ;;  %v12102_v28 = vld [vmem:[#allocation10 + $0x740] ss:$16 sps:$4 sm:$0xff]  }
 0x5c3   :  { %9435 = vmatpush1.bf16.msra.mxu0 %v11964_v25  ;;  %9559 = vmatprep.subr.bf16.mxu1 %v11975_v38  ;;  %v12060_v25 = vld [vmem:[#allocation10 + $0x660] ss:$16 sps:$4 sm:$0xff]   ;;  %v12068_v38 = vld [vmem:[#allocation10 + $0x684] ss:$16 sps:$4 sm:$0xff]   ;;  %v12045_v10 = vld [vmem:[#allocation10 + $0x508] ss:$16 sps:$4 sm:$0xff]  }
 0x5c4   :  { %9452 = vmatprep.mubr.bf16.mxu0 %v13071_v57  ;;  %9436 = vmatprep.subr.bf16.mxu0 %v11972_v47  ;;  %v12035_v47 = vld [vmem:[#allocation10 + $0x4ac] ss:$16 sps:$4 sm:$0xff]  }
 0x5c6   :  { %9560 = vmatpush1.bf16.msra.mxu1 %v11973_v49  ;;  %v12074_v49 = vld [vmem:[#allocation10 + $0x6a4] ss:$16 sps:$4 sm:$0xff]  }
 0x5c7   :  { %9437 = vmatpush1.bf16.msra.mxu0 %v11970_v44  ;;  %9561 = vmatprep.subr.bf16.mxu1 %v11981_v14  ;;  %v12033_v44 = vld [vmem:[#allocation10 + $0x4a8] ss:$16 sps:$4 sm:$0xff]   ;;  %v12038_v14 = vld [vmem:[#allocation10 + $0x4cc] ss:$16 sps:$4 sm:$0xff]  }
 0x5c8   :  { %9438 = vmatprep.subr.bf16.mxu0 %v11978_v61 }
 0x5ca   :  { %9562 = vmatpush1.bf16.msra.mxu1 %v11979_v51  ;;  %v12072_v51 = vld [vmem:[#allocation10 + $0x6a0] ss:$16 sps:$4 sm:$0xff]  }
 0x5cb   :  { %9439 = vmatpush1.bf16.msra.mxu0 %v11976_v5  ;;  %9563 = vmatprep.subr.bf16.mxu1 %v11987_v6 }
 0x5cc   :  { %9440 = vmatprep.subr.bf16.mxu0 %v11984_v46 }
 0x5ce   :  { %9564 = vmatpush1.bf16.msra.mxu1 %v11985_v4  ;;  %v12080_v4 = vld [vmem:[#allocation10 + $0x6c4] ss:$16 sps:$4 sm:$0xff]  }
 0x5cf   :  { %9441 = vmatpush1.bf16.msra.mxu0 %v11982_v60  ;;  %9565 = vmatprep.subr.bf16.mxu1 %v11993_v7 }
 0x5d0   :  { %9442 = vmatprep.subr.bf16.mxu0 %v11990_v36 }
 0x5d2   :  { %9566 = vmatpush1.bf16.msra.mxu1 %v11991_v59  ;;  %v12036_v59 = vld [vmem:[#allocation10 + $0x4c8] ss:$16 sps:$4 sm:$0xff]  }
 0x5d3   :  { %9443 = vmatpush1.bf16.msra.mxu0 %v11988_v17  ;;  %9567 = vmatprep.subr.bf16.mxu1 %v11999_v11 }
 0x5d4   :  { %9444 = vmatprep.subr.bf16.mxu0 %v11996_v15  ;;  %v12041_v15 = vld [vmem:[#allocation10 + $0x4ec] ss:$16 sps:$4 sm:$0xff]  }
 0x5d6   :  { %9568 = vmatpush1.bf16.msra.mxu1 %v11997_v9 }
 0x5d7   :  { %9445 = vmatpush1.bf16.msra.mxu0 %v11994_v54  ;;  %9569 = vmatprep.subr.bf16.mxu1 %v12005_v35 }
 0x5d8   :  { %9446 = vmatprep.subr.bf16.mxu0 %v12002_v12  ;;  %v12086_v12 = vld [vmem:[#allocation10 + $0x6e4] ss:$16 sps:$4 sm:$0xff]  }
 0x5da   :  { %9570 = vmatpush1.bf16.msra.mxu1 %v12003_v45  ;;  %v12039_v45 = vld [vmem:[#allocation10 + $0x4e8] ss:$16 sps:$4 sm:$0xff]  }
 0x5db   :  { %9447 = vmatpush1.bf16.msra.mxu0 %v12000_v13  ;;  %9571 = vmatprep.subr.bf16.mxu1 %v12011_v20  ;;  %v12084_v13 = vld [vmem:[#allocation10 + $0x6e0] ss:$16 sps:$4 sm:$0xff]   ;;  %v12092_v20 = vld [vmem:[#allocation10 + $0x704] ss:$16 sps:$4 sm:$0xff]  }
 0x5dc   :  { %9448 = vmatprep.subr.bf16.mxu0 %v12008_v0  ;;  %v12053_v0 = vld [vmem:[#allocation10 + $0x52c] ss:$16 sps:$4 sm:$0xff]  }
 0x5de   :  { %9572 = vmatpush1.bf16.msra.mxu1 %v12009_v42  ;;  %v12090_v42 = vld [vmem:[#allocation10 + $0x700] ss:$16 sps:$4 sm:$0xff]  }
 0x5df   :  { %9449 = vmatpush1.bf16.msra.mxu0 %v12006_v62  ;;  %9573 = vmatprep.subr.bf16.mxu1 %v12017_v16  ;;  %v12098_v62 = vld [vmem:[#allocation10 + $0x724] ss:$16 sps:$4 sm:$0xff]   ;;  %v12051_v16 = vld [vmem:[#allocation10 + $0x528] ss:$16 sps:$4 sm:$0xff]  }
 0x5e0   :  { %9450 = vmatprep.subr.bf16.mxu0 %v12014_v1  ;;  %v12096_v1 = vld [vmem:[#allocation10 + $0x720] ss:$16 sps:$4 sm:$0xff]  }
 0x5e2   :  { %9574 = vmatpush1.bf16.msra.mxu1 %v12015_v22  ;;  %v12104_v22 = vld [vmem:[#allocation10 + $0x744] ss:$16 sps:$4 sm:$0xff]  }
 0x5e3   :  { %9451 = vmatpush1.bf16.msra.mxu0 %v12012_v27  ;;  %9584 = vmatprep.subr.bf16.mxu1 %v12020_v48  ;;  %v12057_v27 = vld [vmem:[#allocation10 + $0x548] ss:$16 sps:$4 sm:$0xff]   ;;  %v12065_v48 = vld [vmem:[#allocation10 + $0x56c] ss:$16 sps:$4 sm:$0xff]  }
 0x5e4   :  { %9461 = vmatprep.subr.bf16.mxu0 %v12044_v41  ;;  %v12110_v41 = vld [vmem:[#allocation10 + $0x764] ss:$16 sps:$4 sm:$0xff]  }
 0x5e5   :  { %9576 = vmatmul.mubr.bf16.vlgmr.msra.gmra.mrb[68].mxu1 %v13059_v30  ;;  %v12062_v30 = vld [vmem:[#allocation10 + $0x664] ss:$16 sps:$4 sm:$0xff]  }
 0x5e6   :  { %9453 = vmatmul.mubr.bf16.vlgmr.msra.gmra.mrb[60].mxu0 %v13078_v31  ;;  %9585 = vmatpush1.bf16.msra.mxu1 %v12018_v39  ;;  %v12063_v39 = vld [vmem:[#allocation10 + $0x568] ss:$16 sps:$4 sm:$0xff]  }
 0x5e7   :  { %9616 = vmatprep.mubr.bf16.mxu1 %v13071_v57  ;;  %9586 = vmatprep.subr.bf16.mxu1 %v12023_v8  ;;  %v12066_v57 = vld [vmem:[#allocation10 + $0x680] ss:$16 sps:$4 sm:$0xff]   ;;  %v12071_v8 = vld [vmem:[#allocation10 + $0x58c] ss:$16 sps:$4 sm:$0xff]  }
 0x5e8   :  { %9462 = vmatpush1.bf16.msra.mxu0 %v12042_v37  ;;  %v12108_v37 = vld [vmem:[#allocation10 + $0x760] ss:$16 sps:$4 sm:$0xff]  }
 0x5e9   :  { %9463 = vmatprep.subr.bf16.mxu0 %v12050_v33  ;;  %v12116_v33 = vld [vmem:[#allocation10 + $0x784] ss:$16 sps:$4 sm:$0xff]  }
 0x5ea   :  { %9587 = vmatpush1.bf16.msra.mxu1 %v12021_v55  ;;  %v12069_v55 = vld [vmem:[#allocation10 + $0x588] ss:$16 sps:$4 sm:$0xff]  }
 0x5eb   :  { %9588 = vmatprep.subr.bf16.mxu1 %v12026_v34  ;;  %v12077_v34 = vld [vmem:[#allocation10 + $0x5ac] ss:$16 sps:$4 sm:$0xff]  }
 0x5ec   :  { %9464 = vmatpush1.bf16.msra.mxu0 %v12048_v2  ;;  %v12114_v2 = vld [vmem:[#allocation10 + $0x780] ss:$16 sps:$4 sm:$0xff]  }
 0x5ed   :  { %9465 = vmatprep.subr.bf16.mxu0 %v12056_v58  ;;  %v12122_v58 = vld [vmem:[#allocation10 + $0x7a4] ss:$16 sps:$4 sm:$0xff]  }
 0x5ee   :  { %9589 = vmatpush1.bf16.msra.mxu1 %v12024_v43  ;;  %v12075_v43 = vld [vmem:[#allocation10 + $0x5a8] ss:$16 sps:$4 sm:$0xff]  }
 0x5ef   :  { %9590 = vmatprep.subr.bf16.mxu1 %v12029_v50  ;;  %v12083_v50 = vld [vmem:[#allocation10 + $0x5cc] ss:$16 sps:$4 sm:$0xff]  }
 0x5f0   :  { %9466 = vmatpush1.bf16.msra.mxu0 %v12054_v63  ;;  %v12120_v63 = vld [vmem:[#allocation10 + $0x7a0] ss:$16 sps:$4 sm:$0xff]  }
 0x5f1   :  { %9467 = vmatprep.subr.bf16.mxu0 %v12062_v30  ;;  %v12128_v30 = vld [vmem:[#allocation10 + $0x7c4] ss:$16 sps:$4 sm:$0xff]  }
 0x5f2   :  { %9591 = vmatpush1.bf16.msra.mxu1 %v12027_v52  ;;  %v12081_v52 = vld [vmem:[#allocation10 + $0x5c8] ss:$16 sps:$4 sm:$0xff]  }
 0x5f3   :  { %9592 = vmatprep.subr.bf16.mxu1 %v12032_v19  ;;  %v12089_v19 = vld [vmem:[#allocation10 + $0x5ec] ss:$16 sps:$4 sm:$0xff]  }
 0x5f4   :  { %9468 = vmatpush1.bf16.msra.mxu0 %v12060_v25  ;;  %v12126_v25 = vld [vmem:[#allocation10 + $0x7c0] ss:$16 sps:$4 sm:$0xff]  }
 0x5f5   :  { %9469 = vmatprep.subr.bf16.mxu0 %v12068_v38  ;;  %v12134_v38 = vld [vmem:[#allocation10 + $0x7e4] ss:$16 sps:$4 sm:$0xff]  }
 0x5f6   :  { %9593 = vmatpush1.bf16.msra.mxu1 %v12030_v3  ;;  %v12087_v3 = vld [vmem:[#allocation10 + $0x5e8] ss:$16 sps:$4 sm:$0xff]  }
 0x5f7   :  { %9594 = vmatprep.subr.bf16.mxu1 %v12035_v47  ;;  %v12095_v47 = vld [vmem:[#allocation10 + $0x60c] ss:$16 sps:$4 sm:$0xff]  }
 0x5f8   :  { %v7625_v61 = vpop.f32.mrb[60].mxu1  ;;  %9470 = vmatpush1.bf16.msra.mxu0 %v12066_v57  ;;  %v12132_v57 = vld [vmem:[#allocation10 + $0x7e0] ss:$16 sps:$4 sm:$0xff]  }
 0x5f9   :  { %v7626_v5 = vadd.f32 %v7625_v61, %v12995_v32  ;;  %v7627_v6 = vpop.f32.mrb[61].mxu1  ;;  %v7666_v46 = vpop.f32.mrb[56].mxu0  ;;  %9471 = vmatprep.subr.bf16.mxu0 %v12074_v49  ;;  %v12078_v32 = vld [vmem:[#allocation10 + $0x6c0] ss:$16 sps:$4 sm:$0xff]   ;;  %v12099_v61 = vld [vmem:[#allocation10 + $0x628] ss:$16 sps:$4 sm:$0xff]  }
 0x5fa   :  { %v7628_v60 = vadd.f32 %v7627_v6, %v13001_v40  ;;  %v7629_v7 = vpop.f32.mrb[62].mxu1  ;;  %9595 = vmatpush1.bf16.msra.mxu1 %v12033_v44  ;;  %v7668_v36 = vpop.f32.mrb[57].mxu0  ;;  %v12047_v40 = vld [vmem:[#allocation10 + $0x50c] ss:$16 sps:$4 sm:$0xff]   ;;  %v12164_v49 = vld [vmem:[#allocation13 + $0x4] ss:$8 sps:$4 sm:$0xff]  }
 0x5fb   :  { %v13085_v17 = vadd.f32 %v7666_v46, %v7626_v5  ;;  %v7630_v11 = vpop.f32.mrb[63].mxu1  ;;  %9596 = vmatprep.subr.bf16.mxu1 %v12038_v14  ;;  %v7670_v9 = vpop.f32.mrb[58].mxu0  ;;  %v12093_v44 = vld [vmem:[#allocation10 + $0x608] ss:$16 sps:$4 sm:$0xff]   ;;  %v12101_v14 = vld [vmem:[#allocation10 + $0x62c] ss:$16 sps:$4 sm:$0xff]  }
 0x5fc   :  { %v13087_v54 = vadd.f32 %v7668_v36, %v7628_v60  ;;  %v7671_v35 = vpop.f32.mrb[59].mxu0  ;;  %9472 = vmatpush1.bf16.msra.mxu0 %v12072_v51  ;;  %v12107_v51 = vld [vmem:[#allocation10 + $0x64c] ss:$16 sps:$4 sm:$0xff]   ;;  %v12105_v5 = vld [vmem:[#allocation10 + $0x648] ss:$16 sps:$4 sm:$0xff]  }
 0x5fd   :  { %9473 = vmatprep.subr.bf16.mxu0 %v12080_v4  ;;  %v12113_v6 = vld [vmem:[#allocation10 + $0x66c] ss:$16 sps:$4 sm:$0xff]   ;;  %v12111_v46 = vld [vmem:[#allocation10 + $0x668] ss:$16 sps:$4 sm:$0xff]  }
 0x5fe   :  { %9597 = vmatpush1.bf16.msra.mxu1 %v12036_v59  ;;  %v12119_v4 = vld [vmem:[#allocation10 + $0x68c] ss:$16 sps:$4 sm:$0xff]   ;;  %v12117_v60 = vld [vmem:[#allocation10 + $0x688] ss:$16 sps:$4 sm:$0xff]  }
 0x5ff   :  { %9598 = vmatprep.subr.bf16.mxu1 %v12041_v15  ;;  %v12125_v7 = vld [vmem:[#allocation10 + $0x6ac] ss:$16 sps:$4 sm:$0xff]   ;;  %v12123_v36 = vld [vmem:[#allocation10 + $0x6a8] ss:$16 sps:$4 sm:$0xff]  }
 0x600   :  { %9474 = vmatpush1.bf16.msra.mxu0 %v12078_v32  ;;  %v12131_v11 = vld [vmem:[#allocation10 + $0x6cc] ss:$16 sps:$4 sm:$0xff]  }
 0x601   :  { %9475 = vmatprep.subr.bf16.mxu0 %v12086_v12 }
 0x602   :  { %9599 = vmatpush1.bf16.msra.mxu1 %v12039_v45 }
 0x603   :  { %9600 = vmatprep.subr.bf16.mxu1 %v12047_v40  ;;  %v12129_v40 = vld [vmem:[#allocation10 + $0x6c8] ss:$16 sps:$4 sm:$0xff]  }
 0x604   :  { %9476 = vmatpush1.bf16.msra.mxu0 %v12084_v13 }
 0x605   :  { %9477 = vmatprep.subr.bf16.mxu0 %v12092_v20 }
 0x606   :  { %9601 = vmatpush1.bf16.msra.mxu1 %v12045_v10  ;;  %v12137_v10 = vld [vmem:[#allocation10 + $0x6ec] ss:$16 sps:$4 sm:$0xff]  }
 0x607   :  { %9602 = vmatprep.subr.bf16.mxu1 %v12053_v0 }
 0x608   :  { %9478 = vmatpush1.bf16.msra.mxu0 %v12090_v42 }
 0x609   :  { %9479 = vmatprep.subr.bf16.mxu0 %v12098_v62  ;;  %v12135_v62 = vld [vmem:[#allocation10 + $0x6e8] ss:$16 sps:$4 sm:$0xff]  }
 0x60a   :  { %9603 = vmatpush1.bf16.msra.mxu1 %v12051_v16  ;;  %v12162_v16 = vld [vmem:[#allocation13] ss:$8 sps:$4 sm:$0xff]  }
 0x60b   :  { %9604 = vmatprep.subr.bf16.mxu1 %v12059_v21  ;;  %v12167_v21 = vld [vmem:[#allocation13 + $0x14] ss:$8 sps:$4 sm:$0xff]  }
 0x60c   :  { %9480 = vmatpush1.bf16.msra.mxu0 %v12096_v1  ;;  %v12143_v1 = vld [vmem:[#allocation10 + $0x72c] ss:$16 sps:$4 sm:$0xff]  }
 0x60d   :  { %9481 = vmatprep.subr.bf16.mxu0 %v12104_v22  ;;  %v12165_v22 = vld [vmem:[#allocation13 + $0x10] ss:$8 sps:$4 sm:$0xff]  }
 0x60e   :  { %9605 = vmatpush1.bf16.msra.mxu1 %v12057_v27  ;;  %v12170_v27 = vld [vmem:[#allocation13 + $0x24] ss:$8 sps:$4 sm:$0xff]  }
 0x60f   :  { %9606 = vmatprep.subr.bf16.mxu1 %v12065_v48  ;;  %v12141_v48 = vld [vmem:[#allocation10 + $0x728] ss:$16 sps:$4 sm:$0xff]  }
 0x610   :  { %9482 = vmatpush1.bf16.msra.mxu0 %v12102_v28  ;;  %v12146_v28 = vld [vmem:[#allocation10 + $0x74c] ss:$16 sps:$4 sm:$0xff]  }
 0x611   :  { %9483 = vmatprep.subr.bf16.mxu0 %v12110_v41  ;;  %v12168_v41 = vld [vmem:[#allocation13 + $0x20] ss:$8 sps:$4 sm:$0xff]  }
 0x612   :  { %9607 = vmatpush1.bf16.msra.mxu1 %v12063_v39  ;;  %v12173_v39 = vld [vmem:[#allocation13 + $0x34] ss:$8 sps:$4 sm:$0xff]  }
 0x613   :  { %9608 = vmatprep.subr.bf16.mxu1 %v12071_v8  ;;  %v12144_v8 = vld [vmem:[#allocation10 + $0x748] ss:$16 sps:$4 sm:$0xff]  }
 0x614   :  { %9484 = vmatpush1.bf16.msra.mxu0 %v12108_v37  ;;  %v12149_v37 = vld [vmem:[#allocation10 + $0x76c] ss:$16 sps:$4 sm:$0xff]  }
 0x615   :  { %9485 = vmatprep.subr.bf16.mxu0 %v12116_v33  ;;  %v12171_v33 = vld [vmem:[#allocation13 + $0x30] ss:$8 sps:$4 sm:$0xff]  }
 0x616   :  { %9609 = vmatpush1.bf16.msra.mxu1 %v12069_v55  ;;  %v12176_v55 = vld [vmem:[#allocation13 + $0x44] ss:$8 sps:$4 sm:$0xff]  }
 0x617   :  { %9610 = vmatprep.subr.bf16.mxu1 %v12077_v34  ;;  %v12147_v34 = vld [vmem:[#allocation10 + $0x768] ss:$16 sps:$4 sm:$0xff]  }
 0x618   :  { %9486 = vmatpush1.bf16.msra.mxu0 %v12114_v2  ;;  %v12152_v2 = vld [vmem:[#allocation10 + $0x78c] ss:$16 sps:$4 sm:$0xff]  }
 0x619   :  { %9487 = vmatprep.subr.bf16.mxu0 %v12122_v58  ;;  %v12174_v58 = vld [vmem:[#allocation13 + $0x40] ss:$8 sps:$4 sm:$0xff]  }
 0x61a   :  { %9611 = vmatpush1.bf16.msra.mxu1 %v12075_v43  ;;  %v12179_v43 = vld [vmem:[#allocation13 + $0x54] ss:$8 sps:$4 sm:$0xff]  }
 0x61b   :  { %9612 = vmatprep.subr.bf16.mxu1 %v12083_v50  ;;  %v12150_v50 = vld [vmem:[#allocation10 + $0x788] ss:$16 sps:$4 sm:$0xff]  }
 0x61c   :  { %9488 = vmatpush1.bf16.msra.mxu0 %v12120_v63  ;;  %v12155_v63 = vld [vmem:[#allocation10 + $0x7ac] ss:$16 sps:$4 sm:$0xff]  }
 0x61d   :  { %9489 = vmatprep.subr.bf16.mxu0 %v12128_v30  ;;  %v12177_v30 = vld [vmem:[#allocation13 + $0x50] ss:$8 sps:$4 sm:$0xff]  }
 0x61e   :  { %9613 = vmatpush1.bf16.msra.mxu1 %v12081_v52  ;;  %v12182_v52 = vld [vmem:[#allocation13 + $0x64] ss:$8 sps:$4 sm:$0xff]  }
 0x61f   :  { %9614 = vmatprep.subr.bf16.mxu1 %v12089_v19  ;;  %v12153_v19 = vld [vmem:[#allocation10 + $0x7a8] ss:$16 sps:$4 sm:$0xff]  }
 0x620   :  { %9490 = vmatpush1.bf16.msra.mxu0 %v12126_v25  ;;  %v12158_v25 = vld [vmem:[#allocation10 + $0x7cc] ss:$16 sps:$4 sm:$0xff]  }
 0x621   :  { %9491 = vmatprep.subr.bf16.mxu0 %v12134_v38  ;;  %v12180_v38 = vld [vmem:[#allocation13 + $0x60] ss:$8 sps:$4 sm:$0xff]  }
 0x622   :  { %9615 = vmatpush1.bf16.msra.mxu1 %v12087_v3  ;;  %v12185_v3 = vld [vmem:[#allocation13 + $0x74] ss:$8 sps:$4 sm:$0xff]  }
 0x623   :  { %9625 = vmatprep.subr.bf16.mxu1 %v12095_v47  ;;  %v12156_v47 = vld [vmem:[#allocation10 + $0x7c8] ss:$16 sps:$4 sm:$0xff]  }
 0x624   :  { %9492 = vmatpush1.bf16.msra.mxu0 %v12132_v57  ;;  %v12161_v57 = vld [vmem:[#allocation10 + $0x7ec] ss:$16 sps:$4 sm:$0xff]  }
 0x625   :  { %9617 = vmatmul.mubr.bf16.vlgmr.msra.gmra.mrb[68].mxu1 %v13078_v31  ;;  %10070 = vmatprep.subr.bf16.mxu0 %v12164_v49  ;;  %v12274_v31 = vld [vmem:[#allocation9] sm:$0xff] }
 0x626   :  { %9626 = vmatpush1.bf16.msra.mxu1 %v12093_v44  ;;  %v7743_v59 = vrot.slane %v12274_v31, %v344_v26  ;;  %v7747_v9 = vrot.slane %v12274_v31, %v348_v29  ;;  %v12140_v29 = vld [vmem:[#allocation10 + $0x70c] ss:$16 sps:$4 sm:$0xff]   ;;  %v12188_v44 = vld [vmem:[#allocation13 + $0x84] ss:$8 sps:$4 sm:$0xff]   ;;  %v12203_v31 = vld [vmem:[#allocation13 + $0xd4] ss:$8 sps:$4 sm:$0xff]  }
 0x627   :  { %9627 = vmatprep.subr.bf16.mxu1 %v12101_v14  ;;  %v12183_v49 = vld [vmem:[#allocation13 + $0x70] ss:$8 sps:$4 sm:$0xff]   ;;  %v12159_v14 = vld [vmem:[#allocation10 + $0x7e8] ss:$16 sps:$4 sm:$0xff]  }
 0x62a   :  { %9628 = vmatpush1.bf16.msra.mxu1 %v12099_v61  ;;  %v12186_v61 = vld [vmem:[#allocation13 + $0x80] ss:$8 sps:$4 sm:$0xff]  }
 0x62b   :  { %9629 = vmatprep.subr.bf16.mxu1 %v12107_v51  ;;  %v12191_v51 = vld [vmem:[#allocation13 + $0x94] ss:$8 sps:$4 sm:$0xff]  }
 0x62e   :  { %9630 = vmatpush1.bf16.msra.mxu1 %v12105_v5  ;;  %v12189_v5 = vld [vmem:[#allocation13 + $0x90] ss:$8 sps:$4 sm:$0xff]  }
 0x62f   :  { %9631 = vmatprep.subr.bf16.mxu1 %v12113_v6  ;;  %v12194_v6 = vld [vmem:[#allocation13 + $0xa4] ss:$8 sps:$4 sm:$0xff]  }
 0x632   :  { %9632 = vmatpush1.bf16.msra.mxu1 %v12111_v46  ;;  %v12192_v46 = vld [vmem:[#allocation13 + $0xa0] ss:$8 sps:$4 sm:$0xff]  }
 0x633   :  { %9633 = vmatprep.subr.bf16.mxu1 %v12119_v4  ;;  %v12197_v4 = vld [vmem:[#allocation13 + $0xb4] ss:$8 sps:$4 sm:$0xff]  }
 0x636   :  { %9634 = vmatpush1.bf16.msra.mxu1 %v12117_v60  ;;  %v12195_v60 = vld [vmem:[#allocation13 + $0xb0] ss:$8 sps:$4 sm:$0xff]  }
 0x637   :  { %9635 = vmatprep.subr.bf16.mxu1 %v12125_v7  ;;  %v12200_v7 = vld [vmem:[#allocation13 + $0xc4] ss:$8 sps:$4 sm:$0xff]  }
 0x638   :  { %v7707_v15 = vpop.f32.mrb[64].mxu1 }
 0x639   :  { %v7708_v35 = vadd.f32 %v7707_v15, %v13085_v17  ;;  %v7709_v32 = vpop.f32.mrb[65].mxu1  ;;  %v12204_v15 = vld [vmem:[#allocation13 + $0xe0] ss:$8 sps:$4 sm:$0xff]  }
 0x63a   :  { %v7710_v12 = vadd.f32 %v7709_v32, %v13087_v54  ;;  %v7711_v45 = vpop.f32.mrb[66].mxu1  ;;  %9636 = vmatpush1.bf16.msra.mxu1 %v12123_v36  ;;  %v12138_v54 = vld [vmem:[#allocation10 + $0x708] ss:$16 sps:$4 sm:$0xff]   ;;  %v12198_v36 = vld [vmem:[#allocation13 + $0xc0] ss:$8 sps:$4 sm:$0xff]  }
 0x63b   :  { %v7762_v13 = vadd.f32 %v7743_v59, %v7708_v35  ;;  %v7712_v20 = vpop.f32.mrb[67].mxu1  ;;  %9637 = vmatprep.subr.bf16.mxu1 %v12131_v11  ;;  %v12201_v59 = vld [vmem:[#allocation13 + $0xd0] ss:$8 sps:$4 sm:$0xff]   ;;  %v12206_v11 = vld [vmem:[#allocation13 + $0xe4] ss:$8 sps:$4 sm:$0xff]  }
 0x63c   :  { %v7763_v0 = vadd.f32 %v7747_v9, %v7710_v12  ;;  %v12209_v9 = vld [vmem:[#allocation13 + $0xf4] ss:$8 sps:$4 sm:$0xff]   ;;  %v12207_v35 = vld [vmem:[#allocation13 + $0xf0] ss:$8 sps:$4 sm:$0xff]   ;;  %v12212_v32 = vld [vmem:[#allocation13 + $0x104] ss:$8 sps:$4 sm:$0xff]  }
 0x63d   :  { %v7770_v26 = vmax.f32 %v7762_v13, 0.0  ;;  %v12258_v12 = vld [vmem:[#allocation16 + $0x40] sm:$0xff]   ;;  %v12261_v13 = vld [vmem:[#allocation16 + $0x8] sm:$0xff]   ;;  %v12262_v20 = vld [vmem:[#allocation16 + $0x50] sm:$0xff]  }
 0x63e   :  { %v7771_v42 = vmax.f32 %v7763_v0, 0.0  ;;  %9638 = vmatpush1.bf16.msra.mxu1 %v12129_v40  ;;  %v12259_v45 = vld [vmem:[#allocation16] sm:$0xff]   ;;  %v12260_v40 = vld [vmem:[#allocation16 + $0x48] sm:$0xff]   ;;  %v12264_v0 = vld [vmem:[#allocation16 + $0x58] sm:$0xff]  }
 0x63f   :  { %9639 = vmatprep.subr.bf16.mxu1 %v12137_v10  ;;  %v13096_v17 = vpack.c.bf16 %v7770_v26, %v7770_v26  ;;  %v12263_v10 = vld [vmem:[#allocation16 + $0x10] sm:$0xff]   ;;  %v12265_v26 = vld [vmem:[#allocation16 + $0x18] sm:$0xff]  }
 0x640   :  { %v7779_v23 = vpack.c.bf16 %v7771_v42, %v7771_v42  ;;  %v12266_v42 = vld [vmem:[#allocation16 + $0x60] sm:$0xff]  }
 0x642   :  { %9493 = vmatprep.mubr.bf16.mxu0 %v7779_v23  ;;  %9640 = vmatpush1.bf16.msra.mxu1 %v12135_v62  ;;  %v12267_v62 = vld [vmem:[#allocation16 + $0x20] sm:$0xff]  }
 0x643   :  { %9657 = vmatprep.mubr.bf16.mxu1 %v7779_v23  ;;  %9494 = vmatmul.mubr.bf16.vlgmr.msra.gmra.mrb[60].mxu0 %v13096_v17  ;;  %v12268_v23 = vld [vmem:[#allocation16 + $0x68] sm:$0xff]  }
 0x644   :  { %9641 = vmatprep.subr.bf16.mxu1 %v12140_v29  ;;  %10071 = vmatpush1.bf16.msra.mxu0 %v12162_v16  ;;  %v12269_v29 = vld [vmem:[#allocation16 + $0x28] sm:$0xff]   ;;  %v13100_v16 = vld [vmem:[#allocation12] sm:$0xf] }
 0x645   :  { %10072 = vmatprep.subr.bf16.mxu0 %v12167_v21  ;;  %v8045_v21 = vrot.slane %v13100_v16, %v12801_v18 }
 0x646   :  { %9642 = vmatpush1.bf16.msra.mxu1 %v12138_v54 }
 0x647   :  { %9643 = vmatprep.subr.bf16.mxu1 %v12143_v1 }
 0x648   :  { %10073 = vmatpush1.bf16.msra.mxu0 %v12165_v22 }
 0x649   :  { %10074 = vmatprep.subr.bf16.mxu0 %v12170_v27 }
 0x64a   :  { %9644 = vmatpush1.bf16.msra.mxu1 %v12141_v48 }
 0x64b   :  { %9645 = vmatprep.subr.bf16.mxu1 %v12146_v28 }
 0x64c   :  { %10075 = vmatpush1.bf16.msra.mxu0 %v12168_v41 }
 0x64d   :  { %10076 = vmatprep.subr.bf16.mxu0 %v12173_v39 }
 0x64e   :  { %9646 = vmatpush1.bf16.msra.mxu1 %v12144_v8 }
 0x64f   :  { %9647 = vmatprep.subr.bf16.mxu1 %v12149_v37  ;;  %v12210_v37 = vld [vmem:[#allocation13 + $0x100] ss:$8 sps:$4 sm:$0xff]  }
 0x650   :  { %10077 = vmatpush1.bf16.msra.mxu0 %v12171_v33 }
 0x651   :  { %10078 = vmatprep.subr.bf16.mxu0 %v12176_v55  ;;  %v12215_v55 = vld [vmem:[#allocation13 + $0x114] ss:$8 sps:$4 sm:$0xff]  }
 0x652   :  { %9648 = vmatpush1.bf16.msra.mxu1 %v12147_v34  ;;  %v12213_v34 = vld [vmem:[#allocation13 + $0x110] ss:$8 sps:$4 sm:$0xff]  }
 0x653   :  { %9649 = vmatprep.subr.bf16.mxu1 %v12152_v2  ;;  %v12218_v2 = vld [vmem:[#allocation13 + $0x124] ss:$8 sps:$4 sm:$0xff]  }
 0x654   :  { %10079 = vmatpush1.bf16.msra.mxu0 %v12174_v58  ;;  %v12216_v58 = vld [vmem:[#allocation13 + $0x120] ss:$8 sps:$4 sm:$0xff]  }
 0x655   :  { %10080 = vmatprep.subr.bf16.mxu0 %v12179_v43  ;;  %v12221_v43 = vld [vmem:[#allocation13 + $0x134] ss:$8 sps:$4 sm:$0xff]  }
 0x656   :  { %9650 = vmatpush1.bf16.msra.mxu1 %v12150_v50  ;;  %v12219_v50 = vld [vmem:[#allocation13 + $0x130] ss:$8 sps:$4 sm:$0xff]  }
 0x657   :  { %9651 = vmatprep.subr.bf16.mxu1 %v12155_v63  ;;  %v12224_v63 = vld [vmem:[#allocation13 + $0x144] ss:$8 sps:$4 sm:$0xff]  }
 0x658   :  { %10081 = vmatpush1.bf16.msra.mxu0 %v12177_v30  ;;  %v12222_v30 = vld [vmem:[#allocation13 + $0x140] ss:$8 sps:$4 sm:$0xff]  }
 0x659   :  { %10082 = vmatprep.subr.bf16.mxu0 %v12182_v52  ;;  %v12227_v52 = vld [vmem:[#allocation13 + $0x154] ss:$8 sps:$4 sm:$0xff]  }
 0x65a   :  { %9652 = vmatpush1.bf16.msra.mxu1 %v12153_v19  ;;  %v12225_v19 = vld [vmem:[#allocation13 + $0x150] ss:$8 sps:$4 sm:$0xff]  }
 0x65b   :  { %9653 = vmatprep.subr.bf16.mxu1 %v12158_v25  ;;  %v12230_v25 = vld [vmem:[#allocation13 + $0x164] ss:$8 sps:$4 sm:$0xff]  }
 0x65c   :  { %10083 = vmatpush1.bf16.msra.mxu0 %v12180_v38  ;;  %v12228_v38 = vld [vmem:[#allocation13 + $0x160] ss:$8 sps:$4 sm:$0xff]  }
 0x65d   :  { %10084 = vmatprep.subr.bf16.mxu0 %v12185_v3  ;;  %v12233_v3 = vld [vmem:[#allocation13 + $0x174] ss:$8 sps:$4 sm:$0xff]  }
 0x65e   :  { %9654 = vmatpush1.bf16.msra.mxu1 %v12156_v47  ;;  %v8053_v47 = vrot.slane %v13100_v16, %v12833_v56  ;;  %v12242_v56 = vld [vmem:[#allocation13 + $0x1a4] ss:$8 sps:$4 sm:$0xff]  }
 0x65f   :  { %9655 = vmatprep.subr.bf16.mxu1 %v12161_v57 }
 0x660   :  { %10085 = vmatpush1.bf16.msra.mxu0 %v12183_v49  ;;  %v12231_v49 = vld [vmem:[#allocation13 + $0x170] ss:$8 sps:$4 sm:$0xff]  }
 0x661   :  { %10086 = vmatprep.subr.bf16.mxu0 %v12188_v44 }
 0x662   :  { %9656 = vmatpush1.bf16.msra.mxu1 %v12159_v14  ;;  %v12236_v14 = vld [vmem:[#allocation13 + $0x184] ss:$8 sps:$4 sm:$0xff]  }
 0x663   :  { %11703 = vmatprep.subr.bf16.mxu1 %v12258_v12  ;;  %v12254_v12 = vld [vmem:[#allocation13 + $0x1e4] ss:$8 sps:$4 sm:$0xff]  }
 0x664   :  { %10087 = vmatpush1.bf16.msra.mxu0 %v12186_v61 }
 0x665   :  { %9658 = vmatmul.mubr.bf16.vlgmr.msra.gmra.mrb[68].mxu1 %v13096_v17  ;;  %10088 = vmatprep.subr.bf16.mxu0 %v12191_v51  ;;  %v8041_v17 = vrot.slane %v13100_v16, %v12796_v24 }
 0x666   :  { %11704 = vmatpush3.bf16.msra.mxu1 %v12259_v45  ;;  %v12252_v45 = vld [vmem:[#allocation13 + $0x1e0] ss:$8 sps:$4 sm:$0xff]  }
 0x667   :  { %11705 = vmatprep.subr.bf16.mxu1 %v12260_v40 }
 0x668   :  { %10089 = vmatpush1.bf16.msra.mxu0 %v12189_v5 }
 0x669   :  { %10090 = vmatprep.subr.bf16.mxu0 %v12194_v6 }
 0x66a   :  { %11706 = vmatpush3.bf16.msra.mxu1 %v12261_v13  ;;  %v12257_v13 = vld [vmem:[#allocation13 + $0x1f4] ss:$8 sps:$4 sm:$0xff]  }
 0x66b   :  { %11707 = vmatprep.subr.bf16.mxu1 %v12262_v20  ;;  %v12255_v20 = vld [vmem:[#allocation13 + $0x1f0] ss:$8 sps:$4 sm:$0xff]  }
 0x66c   :  { %10091 = vmatpush1.bf16.msra.mxu0 %v12192_v46  ;;  %v12234_v46 = vld [vmem:[#allocation13 + $0x180] ss:$8 sps:$4 sm:$0xff]  }
 0x66d   :  { %10092 = vmatprep.subr.bf16.mxu0 %v12197_v4  ;;  %v12239_v4 = vld [vmem:[#allocation13 + $0x194] ss:$8 sps:$4 sm:$0xff]  }
 0x66e   :  { %11708 = vmatpush3.bf16.msra.mxu1 %v12263_v10 }
 0x66f   :  { %11709 = vmatprep.subr.bf16.mxu1 %v12264_v0 }
 0x670   :  { %10093 = vmatpush1.bf16.msra.mxu0 %v12195_v60 }
 0x671   :  { %10094 = vmatprep.subr.bf16.mxu0 %v12200_v7  ;;  %v12237_v7 = vld [vmem:[#allocation13 + $0x190] ss:$8 sps:$4 sm:$0xff]  }
 0x672   :  { %11710 = vmatpush3.bf16.msra.mxu1 %v12265_v26  ;;  %v12270_v26 = vld [vmem:[#allocation16 + $0x70] sm:$0xff]  }
 0x673   :  { %11711 = vmatprep.subr.bf16.mxu1 %v12266_v42  ;;  %v12271_v42 = vld [vmem:[#allocation16 + $0x30] sm:$0xff]  }
 0x674   :  { %10095 = vmatpush1.bf16.msra.mxu0 %v12198_v36  ;;  %v12240_v36 = vld [vmem:[#allocation13 + $0x1a0] ss:$8 sps:$4 sm:$0xff]  }
 0x675   :  { %10096 = vmatprep.subr.bf16.mxu0 %v12203_v31  ;;  %v12245_v31 = vld [vmem:[#allocation13 + $0x1b4] ss:$8 sps:$4 sm:$0xff]  }
 0x676   :  { %11712 = vmatpush3.bf16.msra.mxu1 %v12267_v62  ;;  %v12272_v62 = vld [vmem:[#allocation16 + $0x78] sm:$0xff]  }
 0x677   :  { %11713 = vmatprep.subr.bf16.mxu1 %v12268_v23  ;;  %v9738_v23 = vld [vmem:[#allocation15] sm:$0x3] }
 0x678   :  { %10097 = vmatpush1.bf16.msra.mxu0 %v12201_v59  ;;  %v12243_v59 = vld [vmem:[#allocation13 + $0x1b0] ss:$8 sps:$4 sm:$0xff]  }
 0x679   :  { %10098 = vmatprep.subr.bf16.mxu0 %v12206_v11  ;;  %v12248_v11 = vld [vmem:[#allocation13 + $0x1c4] ss:$8 sps:$4 sm:$0xff]  }
 0x67a   :  { %11714 = vmatpush3.bf16.msra.mxu1 %v12269_v29  ;;  %v9743_v29 = vrot.slane %v9738_v23, %v12796_v24 }
 0x67b   :  { %11715 = vmatprep.subr.bf16.mxu1 %v12270_v26 }
 0x67c   :  { %10099 = vmatpush1.bf16.msra.mxu0 %v12204_v15  ;;  %v12246_v15 = vld [vmem:[#allocation13 + $0x1c0] ss:$8 sps:$4 sm:$0xff]  }
 0x67d   :  { %10100 = vmatprep.subr.bf16.mxu0 %v12209_v9  ;;  %v12251_v9 = vld [vmem:[#allocation13 + $0x1d4] ss:$8 sps:$4 sm:$0xff]  }
 0x67e   :  { %11716 = vmatpush3.bf16.msra.mxu1 %v12271_v42 }
 0x67f   :  { %11717 = vmatprep.subr.bf16.mxu1 %v12272_v62 }
 0x680   :  { %10101 = vmatpush1.bf16.msra.mxu0 %v12207_v35  ;;  %v12249_v35 = vld [vmem:[#allocation13 + $0x1d0] ss:$8 sps:$4 sm:$0xff]  }
 0x681   :  { %10111 = vmatprep.subr.bf16.mxu0 %v12212_v32  ;;  %v8049_v32 = vrot.slane %v13100_v16, %v12830_v53  ;;  %v12273_v53 = vld [vmem:[#allocation16 + $0x38] sm:$0xff]   ;;  %v9747_v16 = vrot.slane %v9738_v23, %v12801_v18 }
 0x682   :  { %11718 = vmatpush3.bf16.msra.mxu1 %v12273_v53 }
 0x716   :  { %v9495_v54 = vpop.f32.mrb[60].mxu0 }
 0x717   :  { %v11725_v1 = vadd.f32 %v9495_v54, %v8041_v17  ;;  %v9497_v22 = vpop.f32.mrb[61].mxu0 }
 0x718   :  { %v11726_v27 = vadd.f32 %v9497_v22, %v8045_v21  ;;  %v9499_v48 = vpop.f32.mrb[62].mxu0 }
 0x719   :  { %v9666_v28 = vmax.f32 %v11725_v1, 0.0  ;;  %v9500_v41 = vpop.f32.mrb[63].mxu0 }
 0x71a   :  { %v9667_v39 = vmax.f32 %v11726_v27, 0.0 }
 0x71b   :  { %v9670_v33 = vpack.c.bf16 %v9666_v28, %v9666_v28 }
 0x71c   :  { %v9671_v8 = vpack.c.bf16 %v9667_v39, %v9667_v39 }
 0x71e   :  { %10102 = vmatprep.mubr.bf16.mxu0 %v9671_v8 }
 0x71f   :  { %10103 = vmatmul.mubr.bf16.vlgmr.msra.gmra.mrb[64].mxu0 %v9670_v33 }
 0x720   :  { %10112 = vmatpush1.bf16.msra.mxu0 %v12210_v37  ;;  %v11686_v37 = vld [vmem:[#allocation18] ss:$0 sm:$0xff] }
 0x721   :  { %10113 = vmatprep.subr.bf16.mxu0 %v12215_v55 }
 0x724   :  { %10114 = vmatpush1.bf16.msra.mxu0 %v12213_v34 }
 0x725   :  { %10115 = vmatprep.subr.bf16.mxu0 %v12218_v2 }
 0x728   :  { %10116 = vmatpush1.bf16.msra.mxu0 %v12216_v58 }
 0x729   :  { %10117 = vmatprep.subr.bf16.mxu0 %v12221_v43 }
 0x72c   :  { %10118 = vmatpush1.bf16.msra.mxu0 %v12219_v50 }
 0x72d   :  { %10119 = vmatprep.subr.bf16.mxu0 %v12224_v63 }
 0x730   :  { %10120 = vmatpush1.bf16.msra.mxu0 %v12222_v30 }
 0x731   :  { %10121 = vmatprep.subr.bf16.mxu0 %v12227_v52 }
 0x734   :  { %10122 = vmatpush1.bf16.msra.mxu0 %v12225_v19 }
 0x735   :  { %10123 = vmatprep.subr.bf16.mxu0 %v12230_v25 }
 0x738   :  { %10124 = vmatpush1.bf16.msra.mxu0 %v12228_v38  ;;  %v9659_v57 = vpop.f32.mrb[68].mxu1 }
 0x739   :  { %v9661_v44 = vpop.f32.mrb[69].mxu1  ;;  %10125 = vmatprep.subr.bf16.mxu0 %v12233_v3  ;;  %v11727_v40 = vadd.f32 %v9659_v57, %v8049_v32 }
 0x73a   :  { %v11728_v61 = vadd.f32 %v9661_v44, %v8053_v47  ;;  %v9663_v51 = vpop.f32.mrb[70].mxu1 }
 0x73b   :  { %v9664_v5 = vpop.f32.mrb[71].mxu1  ;;  %v9668_v10 = vmax.f32 %v11727_v40, 0.0 }
 0x73c   :  { %v9669_v6 = vmax.f32 %v11728_v61, 0.0  ;;  %10126 = vmatpush1.bf16.msra.mxu0 %v12231_v49 }
 0x73d   :  { %10127 = vmatprep.subr.bf16.mxu0 %v12236_v14  ;;  %v9672_v0 = vpack.c.bf16 %v9668_v10, %v9668_v10 }
 0x73e   :  { %v9673_v60 = vpack.c.bf16 %v9669_v6, %v9669_v6 }
 0x740   :  { %10128 = vmatpush1.bf16.msra.mxu0 %v12234_v46  ;;  %10143 = vmatprep.mubr.bf16.mxu0 %v9673_v60 }
 0x741   :  { %10129 = vmatprep.subr.bf16.mxu0 %v12239_v4 }
 0x744   :  { %10130 = vmatpush1.bf16.msra.mxu0 %v12237_v7 }
 0x745   :  { %10131 = vmatprep.subr.bf16.mxu0 %v12242_v56 }
 0x748   :  { %10132 = vmatpush1.bf16.msra.mxu0 %v12240_v36 }
 0x749   :  { %10133 = vmatprep.subr.bf16.mxu0 %v12245_v31 }
 0x74c   :  { %10134 = vmatpush1.bf16.msra.mxu0 %v12243_v59 }
 0x74d   :  { %10135 = vmatprep.subr.bf16.mxu0 %v12248_v11 }
 0x750   :  { %10136 = vmatpush1.bf16.msra.mxu0 %v12246_v15 }
 0x751   :  { %10137 = vmatprep.subr.bf16.mxu0 %v12251_v9 }
 0x754   :  { %10138 = vmatpush1.bf16.msra.mxu0 %v12249_v35 }
 0x755   :  { %10139 = vmatprep.subr.bf16.mxu0 %v12254_v12 }
 0x758   :  { %10140 = vmatpush1.bf16.msra.mxu0 %v12252_v45 }
 0x759   :  { %10141 = vmatprep.subr.bf16.mxu0 %v12257_v13 }
 0x75c   :  { %10142 = vmatpush1.bf16.msra.mxu0 %v12255_v20 }
 0x75f   :  { %10144 = vmatmul.mubr.bf16.vlgmr.msra.gmra.mrb[64].mxu0 %v9672_v0 }
 0x832   :  { %v10145_v17 = vpop.f32.mrb[64].mxu0 }
 0x833   :  { %v11729_v21 = vadd.f32 %v10145_v17, %v9743_v29  ;;  %v10147_v54 = vpop.f32.mrb[65].mxu0 }
 0x834   :  { %v11730_v1 = vadd.f32 %v10147_v54, %v9747_v16  ;;  %v10149_v22 = vpop.f32.mrb[66].mxu0 }
 0x835   :  { %v10152_v27 = vmax.f32 %v11729_v21, 0.0  ;;  %v10150_v48 = vpop.f32.mrb[67].mxu0 }
 0x836   :  { %v10153_v28 = vmax.f32 %v11730_v1, 0.0 }
 0x837   :  { %v10154_v39 = vpack.c.bf16 %v10152_v27, %v10152_v27 }
 0x838   :  { %v10155_v41 = vpack.c.bf16 %v10153_v28, %v10153_v28 }
 0x83a   :  { %10323 = vmatprep.mubr.bf16.mxu1 %v10155_v41 }
 0x83b   :  { %10324 = vmatmul.mubr.bf16.vlgmr.msra.gmra.mrb[72].mxu1 %v10154_v39 }
 0x90e   :  { %v11719_v8 = vpop.f32.mrb[72].mxu1 }
 0x90f   :  { %v11720_v33 = vpop.f32.mrb[73].mxu1 }
 0x910   :  { %v11721_v55 = vadd.f32 %v11720_v33, %v11719_v8  ;;  %v11722_v34 = vpop.f32.mrb[74].mxu1 }
 0x911   :  { %v11723_v24 = vpop.f32.mrb[75].mxu1 }
 0x912   :  { %v10326_v2 = vadd.f32 %v11721_v55, %v11686_v37 }
 0x914   :  { %10331 = vst [vmem:[%s13128_s13] sm:$0xff] %v10326_v2 }
 0x915   :  { %10336 = vsyncpa [#allocation3], 1 }
 0x916   :  { %10337 = vsyncpa [#allocation5], 1 }
 0x917   :  { %10338 = vsyncpa [#allocation8], 1 }
 0x918   :  { %10339 = vsyncpa [#allocation11], 1 }
 0x919   :  { %10340 = vsyncpa [#allocation14], 1 }
 0x91a   :  { %10341 = vsyncpa [#allocation17], 1 }

</bundles_post_ra>
